<compile_context>
chip_gen: v7x
topology: tpu7x:2x2x1
jax: 0.10.0
libtpu: 0.0.40
codegen_flags: <defaults>
</compile_context>

<pallas_src>
import functools

import jax
import jax.numpy as jnp
from jax import lax
from jax.experimental import pallas as pl
from jax.experimental.pallas import tpu as pltpu


def _round_up(a, b):
    return ((a + b - 1) // b) * b


@functools.lru_cache(maxsize=None)
def _vmem_limit_bytes():
    """Per-generation VMEM budget with headroom; always legal on v7x (64 MiB / TC)."""
    try:
        cap = int(pltpu.get_tpu_info().vmem_capacity_bytes)
    except Exception:
        cap = 64 * 1024 * 1024
    budget = (cap * 3) // 4
    # Clamp into [32 MiB, 48 MiB]: above the default scoped limit, below any
    # generation's physical per-core VMEM (our tiles are small anyway).
    return max(32 * 1024 * 1024, min(budget, 48 * 1024 * 1024))


# ----------------------------------------------------------------------------
# Fused matmul + folded-BN affine (+ activation) — used for the 1x1 projection
# shortcut.  bf16 MXU operands, f32 accumulator, (M, K) grid tiling.
# ----------------------------------------------------------------------------
def _mm_affine_kernel(x_ref, w_ref, s_ref, b_ref, o_ref, acc_ref, *, act):
    k = pl.program_id(1)

    @pl.when(k == 0)
    def _init():
        acc_ref[...] = jnp.zeros_like(acc_ref)

    acc_ref[...] += jnp.dot(x_ref[...], w_ref[...],
                            preferred_element_type=jnp.float32)

    @pl.when(k == pl.num_programs(1) - 1)
    def _finalize():
        r = acc_ref[...] * s_ref[...] + b_ref[...]
        if act == 'relu':
            r = jnp.maximum(r, 0.0)
        o_ref[...] = r.astype(o_ref.dtype)


def matmul_affine(x, w, scale, bias, *, act='none', out_dtype=jnp.float32,
                  tm=256, tk=512):
    """out = act((x @ w) * scale + bias).  x:(M,K) f32/bf16, w:(K,N)."""
    M, K = x.shape
    Kw, N = w.shape
    assert K == Kw
    # cdiv-based M tiling with a zero-padded tail (never "all of M in one block").
    tm = min(tm, _round_up(M, 8))
    Mp = _round_up(M, tm)
    # K-reduction tiling with an f32 accumulator.
    if K <= tk:
        tk, Kp = K, K
    else:
        Kp = _round_up(K, tk)
    xb = jnp.pad(x.astype(jnp.bfloat16), ((0, Mp - M), (0, Kp - K)))
    wb = jnp.pad(w.astype(jnp.bfloat16), ((0, Kp - K), (0, 0)))

    out = pl.pallas_call(
        functools.partial(_mm_affine_kernel, act=act),
        grid=(Mp // tm, Kp // tk),
        in_specs=[
            pl.BlockSpec((tm, tk), lambda i, k: (i, k)),
            pl.BlockSpec((tk, N), lambda i, k: (k, 0)),
            pl.BlockSpec((1, N), lambda i, k: (0, 0)),
            pl.BlockSpec((1, N), lambda i, k: (0, 0)),
        ],
        out_specs=pl.BlockSpec((tm, N), lambda i, k: (i, 0)),
        out_shape=jax.ShapeDtypeStruct((Mp, N), out_dtype),
        scratch_shapes=[pltpu.VMEM((tm, N), jnp.float32)],
        compiler_params=pltpu.CompilerParams(
            dimension_semantics=("parallel", "arbitrary"),
            vmem_limit_bytes=_vmem_limit_bytes()),
    )(xb, wb,
      scale.reshape(1, N).astype(jnp.float32),
      bias.reshape(1, N).astype(jnp.float32))
    return out[:M]


# ----------------------------------------------------------------------------
# Fused 3x3 conv (stride=1, pad=1) + folded BN [+ residual] [+ ReLU].
# Grid = (batch, dy-tap); the padded image is read once per batch element
# (constant index over the tap axis), the 3 dx taps are unrolled in-kernel and
# all 9 tap matmuls accumulate into one f32 VMEM scratch.  No im2col in HBM.
# ----------------------------------------------------------------------------
def _conv3x3_kernel(x_ref, w_ref, s_ref, b_ref, *rest, H, W, act, has_res):
    # x_ref : (H+2, W+2, Cin)  padded bf16 image for this batch element
    # w_ref : (3, Cin, Cout)   the three dx taps of kernel-row dy
    # s/b   : (1, Cout)        folded BatchNorm scale / bias (f32)
    if has_res:
        res_ref, o_ref, acc_ref = rest
    else:
        o_ref, acc_ref = rest
        res_ref = None

    dy = pl.program_id(1)
    win = x_ref[pl.ds(dy, H), :, :]                       # (H, W+2, Cin)

    contrib = None
    for dx in range(3):                                   # static unroll over dx taps
        xs = win[:, dx:dx + W, :].reshape(H * W, win.shape[-1])
        t = jnp.dot(xs, w_ref[dx], preferred_element_type=jnp.float32)
        contrib = t if contrib is None else contrib + t

    @pl.when(dy == 0)
    def _init():
        acc_ref[...] = contrib

    @pl.when(dy > 0)
    def _accumulate():
        acc_ref[...] += contrib

    @pl.when(dy == pl.num_programs(1) - 1)
    def _finalize():
        r = acc_ref[...] * s_ref[...] + b_ref[...]
        if has_res:
            r = r + res_ref[...].astype(jnp.float32)
        if act == 'relu':
            r = jnp.maximum(r, 0.0)
        o_ref[...] = r.astype(o_ref.dtype)


def _conv3x3_im2col(x_nhwc, w_tap, scale, bias, *, act, residual, out_dtype):
    """Fallback path (im2col + tiled matmul) for widths not divisible by 8."""
    N, H, W, Cin = x_nhwc.shape
    Cout = w_tap.shape[-1]
    xp = jnp.pad(x_nhwc, ((0, 0), (1, 1), (1, 1), (0, 0)))
    cols = [xp[:, dy:dy + H, dx:dx + W, :] for dy in range(3) for dx in range(3)]
    patches = jnp.concatenate(cols, axis=-1).reshape(N * H * W, 9 * Cin)
    out = matmul_affine(patches, w_tap.reshape(9 * Cin, Cout), scale, bias,
                        act='none', out_dtype=jnp.float32).reshape(N, H, W, Cout)
    if residual is not None:
        out = out + residual.astype(jnp.float32)
    if act == 'relu':
        out = jnp.maximum(out, 0.0)
    return out.astype(out_dtype)


def conv3x3_bn(x_nhwc, w_tap, scale, bias, *, act='none', residual=None,
               out_dtype=jnp.float32):
    """3x3 conv (stride=1, pad=1) + folded BN [+ residual] [+ act].  NHWC in/out."""
    N, H, W, Cin = x_nhwc.shape
    Cout = w_tap.shape[-1]
    if W % 8 != 0:
        # TODO(synk): in-kernel (H, W, C)->(H*W, C) collapse needs W % 8 == 0; use the
        # (HBM-heavier) im2col fallback for awkward widths.
        return _conv3x3_im2col(x_nhwc, w_tap, scale, bias, act=act,
                               residual=residual, out_dtype=out_dtype)

    Hp, Wp, M = H + 2, W + 2, H * W
    xp = jnp.pad(x_nhwc.astype(jnp.bfloat16), ((0, 0), (1, 1), (1, 1), (0, 0)))
    args = [xp,
            w_tap.astype(jnp.bfloat16),                   # (3, 3, Cin, Cout)  HWIO
            scale.reshape(1, Cout).astype(jnp.float32),
            bias.reshape(1, Cout).astype(jnp.float32)]
    in_specs = [
        # Whole padded image per batch element; index is constant over the tap axis so
        # it is only DMA'd when `n` changes (no materialized im2col in HBM).
        pl.BlockSpec((None, Hp, Wp, Cin), lambda n, dy: (n, 0, 0, 0)),
        # One kernel row (dy) of taps per reduction step.
        pl.BlockSpec((None, 3, Cin, Cout), lambda n, dy: (dy, 0, 0, 0)),
        pl.BlockSpec((1, Cout), lambda n, dy: (0, 0)),
        pl.BlockSpec((1, Cout), lambda n, dy: (0, 0)),
    ]
    has_res = residual is not None
    if has_res:
        in_specs.append(pl.BlockSpec((None, M, Cout), lambda n, dy: (n, 0, 0)))
        args.append(residual.reshape(N, M, Cout))

    out = pl.pallas_call(
        functools.partial(_conv3x3_kernel, H=H, W=W, act=act, has_res=has_res),
        grid=(N, 3),                                      # (batch, dy-tap reduction)
        in_specs=in_specs,
        out_specs=pl.BlockSpec((None, M, Cout), lambda n, dy: (n, 0, 0)),
        out_shape=jax.ShapeDtypeStruct((N, M, Cout), out_dtype),
        scratch_shapes=[pltpu.VMEM((M, Cout), jnp.float32)],
        compiler_params=pltpu.CompilerParams(
            dimension_semantics=("parallel", "arbitrary"),
            vmem_limit_bytes=_vmem_limit_bytes()),
    )(*args)
    # TODO(synk): very large images would additionally need H-tiling with a halo so the
    # padded image and the (H*W, Cout) accumulator stay within the per-core VMEM budget.
    return out.reshape(N, H, W, Cout)


# ----------------------------------------------------------------------------
# Block (matches the PyTorch module, eval-mode BatchNorm folded to scale/bias)
# ----------------------------------------------------------------------------
def init_block_params(key, in_channel, out_channel, *, res=True, stride=1):
    if stride != 1:
        # TODO(synk): stride>1 conv not implemented (the reference Block's shortcut conv
        # is stride-1, so stride>1 with res=True is shape-inconsistent there as well).
        raise NotImplementedError("stride != 1 not supported")
    ks = jax.random.split(key, 6)

    def conv_w(k, cin, cout, ksz):
        std = (2.0 / (ksz * ksz * cin)) ** 0.5
        return jax.random.normal(k, (ksz, ksz, cin, cout), jnp.float32) * std  # HWIO

    def bn(k, c):
        kg, kb, km, kv = jax.random.split(k, 4)
        gamma = 1.0 + 0.1 * jax.random.normal(kg, (c,), jnp.float32)
        beta = 0.1 * jax.random.normal(kb, (c,), jnp.float32)
        mean = 0.1 * jax.random.normal(km, (c,), jnp.float32)
        var = 1.0 + 0.1 * jnp.abs(jax.random.normal(kv, (c,), jnp.float32))
        s = gamma * lax.rsqrt(var + 1e-5)
        return s, beta - mean * s

    p = {'res': res}
    p['w1'] = conv_w(ks[0], in_channel, out_channel, 3)
    p['s1'], p['b1'] = bn(ks[1], out_channel)
    p['w2'] = conv_w(ks[2], out_channel, out_channel, 3)
    p['s2'], p['b2'] = bn(ks[3], out_channel)
    if stride != 1 or in_channel != out_channel:
        p['w_sc'] = (jax.random.normal(ks[4], (in_channel, out_channel), jnp.float32)
                     * (1.0 / in_channel) ** 0.5)
        p['s_sc'], p['b_sc'] = bn(ks[5], out_channel)
    else:
        p['w_sc'] = None
    return p


def block_forward(params, x_nchw):
    """relu( conv3x3+BN(relu(conv3x3+BN(x))) [+ shortcut(x)] ) — NCHW in/out."""
    x = jnp.transpose(x_nchw, (0, 2, 3, 1)).astype(jnp.float32)   # NCHW -> NHWC
    N, H, W, Cin = x.shape
    Cout = params['w1'].shape[-1]

    # Left branch: conv1 + BN + ReLU (intermediate activation stored bf16).
    h = conv3x3_bn(x, params['w1'], params['s1'], params['b1'],
                   act='relu', out_dtype=jnp.bfloat16)

    residual = None
    if params['res']:
        if params['w_sc'] is not None:
            sc = matmul_affine(x.reshape(N * H * W, Cin), params['w_sc'],
                               params['s_sc'], params['b_sc'],
                               out_dtype=jnp.bfloat16)             # 1x1 conv + BN
            residual = sc.reshape(N, H, W, Cout)
        else:
            residual = x                                           # identity shortcut

    # conv2 + BN, residual add and final ReLU fused into the epilogue; f32 output.
    out = conv3x3_bn(h, params['w2'], params['s2'], params['b2'],
                     act='relu', residual=residual, out_dtype=jnp.float32)
    return jnp.transpose(out, (0, 3, 1, 2))                        # NHWC -> NCHW


def block_ref(params, x_nchw):
    """Pure-JAX reference (validation only)."""
    x = jnp.transpose(x_nchw, (0, 2, 3, 1)).astype(jnp.float32)
    hp = lax.Precision.HIGHEST

    def conv(h, w):
        return lax.conv_general_dilated(
            h, w, window_strides=(1, 1), padding=((1, 1), (1, 1)),
            dimension_numbers=('NHWC', 'HWIO', 'NHWC'), precision=hp)

    h = jnp.maximum(conv(x, params['w1']) * params['s1'] + params['b1'], 0.0)
    out = conv(h, params['w2']) * params['s2'] + params['b2']
    if params['res']:
        if params['w_sc'] is not None:
            sc = jnp.einsum('nhwc,co->nhwo', x, params['w_sc'], precision=hp)
            sc = sc * params['s_sc'] + params['b_sc']
        else:
            sc = x
        out = out + sc
    out = jnp.maximum(out, 0.0)
    return jnp.transpose(out, (0, 3, 1, 2))


# ----------------------------------------------------------------------------
if __name__ == "__main__":
    root = jax.random.PRNGKey(0)
    k_p1, k_p2, k_x = jax.random.split(root, 3)

    B, C_IN, C_OUT, S = 2, 4, 8, 16
    x = jax.random.normal(k_x, (B, C_IN, S, S), jnp.float32)       # NCHW, like PyTorch

    p1 = init_block_params(k_p1, C_IN, C_OUT)       # projection shortcut (1x1 conv + BN)
    p2 = init_block_params(k_p2, C_OUT, C_OUT)      # identity shortcut

    fwd = jax.jit(lambda v: block_forward(p2, block_forward(p1, v)))
    y = jax.block_until_ready(fwd(x))

    # Validate against the pure-JAX reference (bf16 MXU operands -> loose tolerance).
    ref = block_ref(p2, block_ref(p1, x))
    err = float(jnp.max(jnp.abs(y.astype(jnp.float32) - ref)))
    tol = max(1e-1, 5e-2 * float(jnp.max(jnp.abs(ref))))

    assert y.shape == (B, C_OUT, S, S)
    assert bool(jnp.all(jnp.isfinite(y)))
    assert err <= tol, (err, tol)
    print("KERNEL_OK")
</pallas_src>

<mosaic_0001>
module attributes {stable_mosaic.version = 11 : i64} {
  func.func @_mm_affine_kernel(%arg0: i32, %arg1: i32, %arg2: memref<256x4xbf16, #tpu.memory_space<vmem>>, %arg3: memref<4x8xbf16, #tpu.memory_space<vmem>>, %arg4: memref<1x8xf32, #tpu.memory_space<vmem>>, %arg5: memref<1x8xf32, #tpu.memory_space<vmem>>, %arg6: memref<256x8xbf16, #tpu.memory_space<vmem>>, %arg7: memref<256x8xf32, #tpu.memory_space<vmem>>) attributes {dimension_semantics = [#tpu.dimension_semantics<parallel>, #tpu.dimension_semantics<arbitrary>], iteration_bounds = array<i64: 2, 1>, scalar_prefetch = 0 : i64, scratch_operands = 1 : i64, tpu.core_type = #tpu.core_type<tc>, window_params = [{transform_indices = @transform_0, window_bounds = array<i64: 256, 4>}, {transform_indices = @transform_1, window_bounds = array<i64: 4, 8>}, {pipeline_mode = #tpu.pipeline_mode<synchronous>, transform_indices = @transform_2, window_bounds = array<i64: 1, 8>}, {pipeline_mode = #tpu.pipeline_mode<synchronous>, transform_indices = @transform_3, window_bounds = array<i64: 1, 8>}, {transform_indices = @transform_4, window_bounds = array<i64: 256, 8>}]} {
    %c0_i32 = arith.constant 0 : i32
    %0 = arith.cmpi eq, %arg1, %c0_i32 : i32
    %1 = arith.extui %0 : i1 to i32
    %c0_i32_0 = arith.constant 0 : i32
    %2 = arith.cmpi ne, %1, %c0_i32_0 : i32
    scf.if %2 {
      %cst_10 = arith.constant 0.000000e+00 : f32
      %12 = vector.broadcast %cst_10 : f32 to vector<256x8xf32>
      %c0_11 = arith.constant 0 : index
      %c0_12 = arith.constant 0 : index
      %13 = vector.load %arg7[%c0_11, %c0_12] : memref<256x8xf32, #tpu.memory_space<vmem>>, vector<256x8xf32>
      tpu.vector_store %arg7[%c0_11, %c0_12], %12 {strides = array<i32>} : memref<256x8xf32, #tpu.memory_space<vmem>>, vector<256x8xf32>,
    } else {
    }
    %c0 = arith.constant 0 : index
    %c0_1 = arith.constant 0 : index
    %3 = vector.load %arg7[%c0, %c0_1] : memref<256x8xf32, #tpu.memory_space<vmem>>, vector<256x8xf32>
    %c0_2 = arith.constant 0 : index
    %c0_3 = arith.constant 0 : index
    %4 = vector.load %arg2[%c0_2, %c0_3] : memref<256x4xbf16, #tpu.memory_space<vmem>>, vector<256x4xbf16>
    %c0_4 = arith.constant 0 : index
    %c0_5 = arith.constant 0 : index
    %5 = vector.load %arg3[%c0_4, %c0_5] : memref<4x8xbf16, #tpu.memory_space<vmem>>, vector<4x8xbf16>
    %cst = arith.constant dense<0.000000e+00> : vector<256x8xf32>
    %6 = tpu.matmul %4, %5, %cst {dimension_numbers = #tpu.dot_dimension_numbers<[1], [0], [0], [1], [0, 0, 1, 1], [], []>} : vector<256x4xbf16>, vector<4x8xbf16>, vector<256x8xf32> -> vector<256x8xf32>
    %7 = arith.addf %3, %6 : vector<256x8xf32>
    %c0_6 = arith.constant 0 : index
    %c0_7 = arith.constant 0 : index
    %8 = vector.load %arg7[%c0_6, %c0_7] : memref<256x8xf32, #tpu.memory_space<vmem>>, vector<256x8xf32>
    tpu.vector_store %arg7[%c0_6, %c0_7], %7 {strides = array<i32>} : memref<256x8xf32, #tpu.memory_space<vmem>>, vector<256x8xf32>,
    %c0_i32_8 = arith.constant 0 : i32
    %9 = arith.cmpi eq, %arg1, %c0_i32_8 : i32
    %10 = arith.extui %9 : i1 to i32
    %c0_i32_9 = arith.constant 0 : i32
    %11 = arith.cmpi ne, %10, %c0_i32_9 : i32
    scf.if %11 {
      %c0_10 = arith.constant 0 : index
      %c0_11 = arith.constant 0 : index
      %12 = vector.load %arg7[%c0_10, %c0_11] : memref<256x8xf32, #tpu.memory_space<vmem>>, vector<256x8xf32>
      %c0_12 = arith.constant 0 : index
      %c0_13 = arith.constant 0 : index
      %13 = vector.load %arg4[%c0_12, %c0_13] : memref<1x8xf32, #tpu.memory_space<vmem>>, vector<1x8xf32>
      %14 = vector.broadcast %13 : vector<1x8xf32> to vector<256x8xf32>
      %15 = arith.mulf %12, %14 : vector<256x8xf32>
      %c0_14 = arith.constant 0 : index
      %c0_15 = arith.constant 0 : index
      %16 = vector.load %arg5[%c0_14, %c0_15] : memref<1x8xf32, #tpu.memory_space<vmem>>, vector<1x8xf32>
      %17 = vector.broadcast %16 : vector<1x8xf32> to vector<256x8xf32>
      %18 = arith.addf %15, %17 : vector<256x8xf32>
      %19 = arith.truncf %18 : vector<256x8xf32> to vector<256x8xbf16>
      %c0_16 = arith.constant 0 : index
      %c0_17 = arith.constant 0 : index
      %20 = vector.load %arg6[%c0_16, %c0_17] : memref<256x8xbf16, #tpu.memory_space<vmem>>, vector<256x8xbf16>
      tpu.vector_store %arg6[%c0_16, %c0_17], %19 {strides = array<i32>} : memref<256x8xbf16, #tpu.memory_space<vmem>>, vector<256x8xbf16>,
    } else {
    }
    return
  }
  func.func @transform_0(%arg0: i32, %arg1: i32) -> (i32, i32) {
    %c0_i32 = arith.constant 0 : i32
    return %arg0, %arg1 : i32, i32
  }
  func.func @transform_1(%arg0: i32, %arg1: i32) -> (i32, i32) {
    %c0_i32 = arith.constant 0 : i32
    %c0_i32_0 = arith.constant 0 : i32
    return %arg1, %c0_i32 : i32, i32
  }
  func.func @transform_2(%arg0: i32, %arg1: i32) -> (i32, i32) {
    %c0_i32 = arith.constant 0 : i32
    %c0_i32_0 = arith.constant 0 : i32
    %c0_i32_1 = arith.constant 0 : i32
    return %c0_i32, %c0_i32_0 : i32, i32
  }
  func.func @transform_3(%arg0: i32, %arg1: i32) -> (i32, i32) {
    %c0_i32 = arith.constant 0 : i32
    %c0_i32_0 = arith.constant 0 : i32
    %c0_i32_1 = arith.constant 0 : i32
    return %c0_i32, %c0_i32_0 : i32, i32
  }
  func.func @transform_4(%arg0: i32, %arg1: i32) -> (i32, i32) {
    %c0_i32 = arith.constant 0 : i32
    %c0_i32_0 = arith.constant 0 : i32
    return %arg0, %c0_i32 : i32, i32
  }
}

module attributes {stable_mosaic.version = 11 : i64} {
  func.func @_conv3x3_kernel(%arg0: i32, %arg1: i32, %arg2: memref<1x18x18x4xbf16, #tpu.memory_space<vmem>>, %arg3: memref<1x3x4x8xbf16, #tpu.memory_space<vmem>>, %arg4: memref<1x8xf32, #tpu.memory_space<vmem>>, %arg5: memref<1x8xf32, #tpu.memory_space<vmem>>, %arg6: memref<1x256x8xbf16, #tpu.memory_space<vmem>>, %arg7: memref<256x8xf32, #tpu.memory_space<vmem>>) attributes {dimension_semantics = [#tpu.dimension_semantics<parallel>, #tpu.dimension_semantics<arbitrary>], iteration_bounds = array<i64: 2, 3>, scalar_prefetch = 0 : i64, scratch_operands = 1 : i64, tpu.core_type = #tpu.core_type<tc>, window_params = [{transform_indices = @transform_0, window_bounds = array<i64: 1, 18, 18, 4>}, {transform_indices = @transform_1, window_bounds = array<i64: 1, 3, 4, 8>}, {pipeline_mode = #tpu.pipeline_mode<synchronous>, transform_indices = @transform_2, window_bounds = array<i64: 1, 8>}, {pipeline_mode = #tpu.pipeline_mode<synchronous>, transform_indices = @transform_3, window_bounds = array<i64: 1, 8>}, {transform_indices = @transform_4, window_bounds = array<i64: 1, 256, 8>}]} {
    %c0 = arith.constant 0 : index
    %0 = arith.index_cast %arg1 : i32 to index
    %c0_0 = arith.constant 0 : index
    %c0_1 = arith.constant 0 : index
    %1 = vector.load %arg2[%c0, %0, %c0_0, %c0_1] : memref<1x18x18x4xbf16, #tpu.memory_space<vmem>>, vector<1x16x18x4xbf16>
    %2 = vector.shape_cast %1 : vector<1x16x18x4xbf16> to vector<16x18x4xbf16>
    %3 = vector.extract_strided_slice %2 {offsets = [0, 0, 0], sizes = [16, 16, 4], strides = [1, 1, 1]} : vector<16x18x4xbf16> to vector<16x16x4xbf16>
    %4 = vector.shape_cast %3 : vector<16x16x4xbf16> to vector<256x4xbf16>
    %c0_2 = arith.constant 0 : index
    %c0_3 = arith.constant 0 : index
    %c0_4 = arith.constant 0 : index
    %c0_5 = arith.constant 0 : index
    %5 = vector.load %arg3[%c0_2, %c0_3, %c0_4, %c0_5] : memref<1x3x4x8xbf16, #tpu.memory_space<vmem>>, vector<1x1x4x8xbf16>
    %6 = vector.shape_cast %5 : vector<1x1x4x8xbf16> to vector<4x8xbf16>
    %cst = arith.constant dense<0.000000e+00> : vector<256x8xf32>
    %7 = tpu.matmul %4, %6, %cst {dimension_numbers = #tpu.dot_dimension_numbers<[1], [0], [0], [1], [0, 0, 1, 1], [], []>} : vector<256x4xbf16>, vector<4x8xbf16>, vector<256x8xf32> -> vector<256x8xf32>
    %8 = vector.extract_strided_slice %2 {offsets = [0, 1, 0], sizes = [16, 16, 4], strides = [1, 1, 1]} : vector<16x18x4xbf16> to vector<16x16x4xbf16>
    %9 = vector.shape_cast %8 : vector<16x16x4xbf16> to vector<256x4xbf16>
    %c0_6 = arith.constant 0 : index
    %c1 = arith.constant 1 : index
    %c0_7 = arith.constant 0 : index
    %c0_8 = arith.constant 0 : index
    %10 = vector.load %arg3[%c0_6, %c1, %c0_7, %c0_8] : memref<1x3x4x8xbf16, #tpu.memory_space<vmem>>, vector<1x1x4x8xbf16>
    %11 = vector.shape_cast %10 : vector<1x1x4x8xbf16> to vector<4x8xbf16>
    %cst_9 = arith.constant dense<0.000000e+00> : vector<256x8xf32>
    %12 = tpu.matmul %9, %11, %cst_9 {dimension_numbers = #tpu.dot_dimension_numbers<[1], [0], [0], [1], [0, 0, 1, 1], [], []>} : vector<256x4xbf16>, vector<4x8xbf16>, vector<256x8xf32> -> vector<256x8xf32>
    %13 = arith.addf %7, %12 : vector<256x8xf32>
    %14 = vector.extract_strided_slice %2 {offsets = [0, 2, 0], sizes = [16, 16, 4], strides = [1, 1, 1]} : vector<16x18x4xbf16> to vector<16x16x4xbf16>
    %15 = vector.shape_cast %14 : vector<16x16x4xbf16> to vector<256x4xbf16>
    %c0_10 = arith.constant 0 : index
    %c2 = arith.constant 2 : index
    %c0_11 = arith.constant 0 : index
    %c0_12 = arith.constant 0 : index
    %16 = vector.load %arg3[%c0_10, %c2, %c0_11, %c0_12] : memref<1x3x4x8xbf16, #tpu.memory_space<vmem>>, vector<1x1x4x8xbf16>
    %17 = vector.shape_cast %16 : vector<1x1x4x8xbf16> to vector<4x8xbf16>
    %cst_13 = arith.constant dense<0.000000e+00> : vector<256x8xf32>
    %18 = tpu.matmul %15, %17, %cst_13 {dimension_numbers = #tpu.dot_dimension_numbers<[1], [0], [0], [1], [0, 0, 1, 1], [], []>} : vector<256x4xbf16>, vector<4x8xbf16>, vector<256x8xf32> -> vector<256x8xf32>
    %19 = arith.addf %13, %18 : vector<256x8xf32>
    %c0_i32 = arith.constant 0 : i32
    %20 = arith.cmpi eq, %arg1, %c0_i32 : i32
    %21 = arith.extui %20 : i1 to i32
    %c0_i32_14 = arith.constant 0 : i32
    %22 = arith.cmpi ne, %21, %c0_i32_14 : i32
    scf.if %22 {
      %c0_18 = arith.constant 0 : index
      %c0_19 = arith.constant 0 : index
      %29 = vector.load %arg7[%c0_18, %c0_19] : memref<256x8xf32, #tpu.memory_space<vmem>>, vector<256x8xf32>
      tpu.vector_store %arg7[%c0_18, %c0_19], %19 {strides = array<i32>} : memref<256x8xf32, #tpu.memory_space<vmem>>, vector<256x8xf32>,
    } else {
    }
    %c0_i32_15 = arith.constant 0 : i32
    %23 = arith.cmpi sgt, %arg1, %c0_i32_15 : i32
    %24 = arith.extui %23 : i1 to i32
    %c0_i32_16 = arith.constant 0 : i32
    %25 = arith.cmpi ne, %24, %c0_i32_16 : i32
    scf.if %25 {
      %c0_18 = arith.constant 0 : index
      %c0_19 = arith.constant 0 : index
      %29 = vector.load %arg7[%c0_18, %c0_19] : memref<256x8xf32, #tpu.memory_space<vmem>>, vector<256x8xf32>
      %30 = arith.addf %29, %19 : vector<256x8xf32>
      %c0_20 = arith.constant 0 : index
      %c0_21 = arith.constant 0 : index
      %31 = vector.load %arg7[%c0_20, %c0_21] : memref<256x8xf32, #tpu.memory_space<vmem>>, vector<256x8xf32>
      tpu.vector_store %arg7[%c0_20, %c0_21], %30 {strides = array<i32>} : memref<256x8xf32, #tpu.memory_space<vmem>>, vector<256x8xf32>,
    } else {
    }
    %c2_i32 = arith.constant 2 : i32
    %26 = arith.cmpi eq, %arg1, %c2_i32 : i32
    %27 = arith.extui %26 : i1 to i32
    %c0_i32_17 = arith.constant 0 : i32
    %28 = arith.cmpi ne, %27, %c0_i32_17 : i32
    scf.if %28 {
      %c0_18 = arith.constant 0 : index
      %c0_19 = arith.constant 0 : index
      %29 = vector.load %arg7[%c0_18, %c0_19] : memref<256x8xf32, #tpu.memory_space<vmem>>, vector<256x8xf32>
      %c0_20 = arith.constant 0 : index
      %c0_21 = arith.constant 0 : index
      %30 = vector.load %arg4[%c0_20, %c0_21] : memref<1x8xf32, #tpu.memory_space<vmem>>, vector<1x8xf32>
      %31 = vector.broadcast %30 : vector<1x8xf32> to vector<256x8xf32>
      %32 = arith.mulf %29, %31 : vector<256x8xf32>
      %c0_22 = arith.constant 0 : index
      %c0_23 = arith.constant 0 : index
      %33 = vector.load %arg5[%c0_22, %c0_23] : memref<1x8xf32, #tpu.memory_space<vmem>>, vector<1x8xf32>
      %34 = vector.broadcast %33 : vector<1x8xf32> to vector<256x8xf32>
      %35 = arith.addf %32, %34 : vector<256x8xf32>
      %cst_24 = arith.constant 0.000000e+00 : f32
      %36 = vector.broadcast %cst_24 : f32 to vector<256x8xf32>
      %37 = arith.maximumf %35, %36 : vector<256x8xf32>
      %38 = arith.truncf %37 : vector<256x8xf32> to vector<256x8xbf16>
      %c0_25 = arith.constant 0 : index
      %c0_26 = arith.constant 0 : index
      %c0_27 = arith.constant 0 : index
      %39 = vector.load %arg6[%c0_25, %c0_26, %c0_27] : memref<1x256x8xbf16, #tpu.memory_space<vmem>>, vector<1x256x8xbf16>
      %40 = vector.shape_cast %39 : vector<1x256x8xbf16> to vector<256x8xbf16>
      %41 = vector.shape_cast %38 : vector<256x8xbf16> to vector<1x256x8xbf16>
      tpu.vector_store %arg6[%c0_25, %c0_26, %c0_27], %41 {strides = array<i32>} : memref<1x256x8xbf16, #tpu.memory_space<vmem>>, vector<1x256x8xbf16>,
    } else {
    }
    return
  }
  func.func @transform_0(%arg0: i32, %arg1: i32) -> (i32, i32, i32, i32) {
    %c0_i32 = arith.constant 0 : i32
    %c0_i32_0 = arith.constant 0 : i32
    %c0_i32_1 = arith.constant 0 : i32
    %c0_i32_2 = arith.constant 0 : i32
    return %arg0, %c0_i32, %c0_i32_0, %c0_i32_1 : i32, i32, i32, i32
  }
  func.func @transform_1(%arg0: i32, %arg1: i32) -> (i32, i32, i32, i32) {
    %c0_i32 = arith.constant 0 : i32
    %c0_i32_0 = arith.constant 0 : i32
    %c0_i32_1 = arith.constant 0 : i32
    %c0_i32_2 = arith.constant 0 : i32
    return %arg1, %c0_i32, %c0_i32_0, %c0_i32_1 : i32, i32, i32, i32
  }
  func.func @transform_2(%arg0: i32, %arg1: i32) -> (i32, i32) {
    %c0_i32 = arith.constant 0 : i32
    %c0_i32_0 = arith.constant 0 : i32
    %c0_i32_1 = arith.constant 0 : i32
    return %c0_i32, %c0_i32_0 : i32, i32
  }
  func.func @transform_3(%arg0: i32, %arg1: i32) -> (i32, i32) {
    %c0_i32 = arith.constant 0 : i32
    %c0_i32_0 = arith.constant 0 : i32
    %c0_i32_1 = arith.constant 0 : i32
    return %c0_i32, %c0_i32_0 : i32, i32
  }
  func.func @transform_4(%arg0: i32, %arg1: i32) -> (i32, i32, i32) {
    %c0_i32 = arith.constant 0 : i32
    %c0_i32_0 = arith.constant 0 : i32
    %c0_i32_1 = arith.constant 0 : i32
    return %arg0, %c0_i32, %c0_i32_0 : i32, i32, i32
  }
}

module attributes {stable_mosaic.version = 11 : i64} {
  func.func @_conv3x3_kernel(%arg0: i32, %arg1: i32, %arg2: memref<1x18x18x8xbf16, #tpu.memory_space<vmem>>, %arg3: memref<1x3x8x8xbf16, #tpu.memory_space<vmem>>, %arg4: memref<1x8xf32, #tpu.memory_space<vmem>>, %arg5: memref<1x8xf32, #tpu.memory_space<vmem>>, %arg6: memref<1x256x8xbf16, #tpu.memory_space<vmem>>, %arg7: memref<1x256x8xf32, #tpu.memory_space<vmem>>, %arg8: memref<256x8xf32, #tpu.memory_space<vmem>>) attributes {dimension_semantics = [#tpu.dimension_semantics<parallel>, #tpu.dimension_semantics<arbitrary>], iteration_bounds = array<i64: 2, 3>, scalar_prefetch = 0 : i64, scratch_operands = 1 : i64, tpu.core_type = #tpu.core_type<tc>, window_params = [{transform_indices = @transform_0, window_bounds = array<i64: 1, 18, 18, 8>}, {transform_indices = @transform_1, window_bounds = array<i64: 1, 3, 8, 8>}, {pipeline_mode = #tpu.pipeline_mode<synchronous>, transform_indices = @transform_2, window_bounds = array<i64: 1, 8>}, {pipeline_mode = #tpu.pipeline_mode<synchronous>, transform_indices = @transform_3, window_bounds = array<i64: 1, 8>}, {transform_indices = @transform_4, window_bounds = array<i64: 1, 256, 8>}, {transform_indices = @transform_5, window_bounds = array<i64: 1, 256, 8>}]} {
    %c0 = arith.constant 0 : index
    %0 = arith.index_cast %arg1 : i32 to index
    %c0_0 = arith.constant 0 : index
    %c0_1 = arith.constant 0 : index
    %1 = vector.load %arg2[%c0, %0, %c0_0, %c0_1] : memref<1x18x18x8xbf16, #tpu.memory_space<vmem>>, vector<1x16x18x8xbf16>
    %2 = vector.shape_cast %1 : vector<1x16x18x8xbf16> to vector<16x18x8xbf16>
    %3 = vector.extract_strided_slice %2 {offsets = [0, 0, 0], sizes = [16, 16, 8], strides = [1, 1, 1]} : vector<16x18x8xbf16> to vector<16x16x8xbf16>
    %4 = vector.shape_cast %3 : vector<16x16x8xbf16> to vector<256x8xbf16>
    %c0_2 = arith.constant 0 : index
    %c0_3 = arith.constant 0 : index
    %c0_4 = arith.constant 0 : index
    %c0_5 = arith.constant 0 : index
    %5 = vector.load %arg3[%c0_2, %c0_3, %c0_4, %c0_5] : memref<1x3x8x8xbf16, #tpu.memory_space<vmem>>, vector<1x1x8x8xbf16>
    %6 = vector.shape_cast %5 : vector<1x1x8x8xbf16> to vector<8x8xbf16>
    %cst = arith.constant dense<0.000000e+00> : vector<256x8xf32>
    %7 = tpu.matmul %4, %6, %cst {dimension_numbers = #tpu.dot_dimension_numbers<[1], [0], [0], [1], [0, 0, 1, 1], [], []>} : vector<256x8xbf16>, vector<8x8xbf16>, vector<256x8xf32> -> vector<256x8xf32>
    %8 = vector.extract_strided_slice %2 {offsets = [0, 1, 0], sizes = [16, 16, 8], strides = [1, 1, 1]} : vector<16x18x8xbf16> to vector<16x16x8xbf16>
    %9 = vector.shape_cast %8 : vector<16x16x8xbf16> to vector<256x8xbf16>
    %c0_6 = arith.constant 0 : index
    %c1 = arith.constant 1 : index
    %c0_7 = arith.constant 0 : index
    %c0_8 = arith.constant 0 : index
    %10 = vector.load %arg3[%c0_6, %c1, %c0_7, %c0_8] : memref<1x3x8x8xbf16, #tpu.memory_space<vmem>>, vector<1x1x8x8xbf16>
    %11 = vector.shape_cast %10 : vector<1x1x8x8xbf16> to vector<8x8xbf16>
    %cst_9 = arith.constant dense<0.000000e+00> : vector<256x8xf32>
    %12 = tpu.matmul %9, %11, %cst_9 {dimension_numbers = #tpu.dot_dimension_numbers<[1], [0], [0], [1], [0, 0, 1, 1], [], []>} : vector<256x8xbf16>, vector<8x8xbf16>, vector<256x8xf32> -> vector<256x8xf32>
    %13 = arith.addf %7, %12 : vector<256x8xf32>
    %14 = vector.extract_strided_slice %2 {offsets = [0, 2, 0], sizes = [16, 16, 8], strides = [1, 1, 1]} : vector<16x18x8xbf16> to vector<16x16x8xbf16>
    %15 = vector.shape_cast %14 : vector<16x16x8xbf16> to vector<256x8xbf16>
    %c0_10 = arith.constant 0 : index
    %c2 = arith.constant 2 : index
    %c0_11 = arith.constant 0 : index
    %c0_12 = arith.constant 0 : index
    %16 = vector.load %arg3[%c0_10, %c2, %c0_11, %c0_12] : memref<1x3x8x8xbf16, #tpu.memory_space<vmem>>, vector<1x1x8x8xbf16>
    %17 = vector.shape_cast %16 : vector<1x1x8x8xbf16> to vector<8x8xbf16>
    %cst_13 = arith.constant dense<0.000000e+00> : vector<256x8xf32>
    %18 = tpu.matmul %15, %17, %cst_13 {dimension_numbers = #tpu.dot_dimension_numbers<[1], [0], [0], [1], [0, 0, 1, 1], [], []>} : vector<256x8xbf16>, vector<8x8xbf16>, vector<256x8xf32> -> vector<256x8xf32>
    %19 = arith.addf %13, %18 : vector<256x8xf32>
    %c0_i32 = arith.constant 0 : i32
    %20 = arith.cmpi eq, %arg1, %c0_i32 : i32
    %21 = arith.extui %20 : i1 to i32
    %c0_i32_14 = arith.constant 0 : i32
    %22 = arith.cmpi ne, %21, %c0_i32_14 : i32
    scf.if %22 {
      %c0_18 = arith.constant 0 : index
      %c0_19 = arith.constant 0 : index
      %29 = vector.load %arg8[%c0_18, %c0_19] : memref<256x8xf32, #tpu.memory_space<vmem>>, vector<256x8xf32>
      tpu.vector_store %arg8[%c0_18, %c0_19], %19 {strides = array<i32>} : memref<256x8xf32, #tpu.memory_space<vmem>>, vector<256x8xf32>,
    } else {
    }
    %c0_i32_15 = arith.constant 0 : i32
    %23 = arith.cmpi sgt, %arg1, %c0_i32_15 : i32
    %24 = arith.extui %23 : i1 to i32
    %c0_i32_16 = arith.constant 0 : i32
    %25 = arith.cmpi ne, %24, %c0_i32_16 : i32
    scf.if %25 {
      %c0_18 = arith.constant 0 : index
      %c0_19 = arith.constant 0 : index
      %29 = vector.load %arg8[%c0_18, %c0_19] : memref<256x8xf32, #tpu.memory_space<vmem>>, vector<256x8xf32>
      %30 = arith.addf %29, %19 : vector<256x8xf32>
      %c0_20 = arith.constant 0 : index
      %c0_21 = arith.constant 0 : index
      %31 = vector.load %arg8[%c0_20, %c0_21] : memref<256x8xf32, #tpu.memory_space<vmem>>, vector<256x8xf32>
      tpu.vector_store %arg8[%c0_20, %c0_21], %30 {strides = array<i32>} : memref<256x8xf32, #tpu.memory_space<vmem>>, vector<256x8xf32>,
    } else {
    }
    %c2_i32 = arith.constant 2 : i32
    %26 = arith.cmpi eq, %arg1, %c2_i32 : i32
    %27 = arith.extui %26 : i1 to i32
    %c0_i32_17 = arith.constant 0 : i32
    %28 = arith.cmpi ne, %27, %c0_i32_17 : i32
    scf.if %28 {
      %c0_18 = arith.constant 0 : index
      %c0_19 = arith.constant 0 : index
      %29 = vector.load %arg8[%c0_18, %c0_19] : memref<256x8xf32, #tpu.memory_space<vmem>>, vector<256x8xf32>
      %c0_20 = arith.constant 0 : index
      %c0_21 = arith.constant 0 : index
      %30 = vector.load %arg4[%c0_20, %c0_21] : memref<1x8xf32, #tpu.memory_space<vmem>>, vector<1x8xf32>
      %31 = vector.broadcast %30 : vector<1x8xf32> to vector<256x8xf32>
      %32 = arith.mulf %29, %31 : vector<256x8xf32>
      %c0_22 = arith.constant 0 : index
      %c0_23 = arith.constant 0 : index
      %33 = vector.load %arg5[%c0_22, %c0_23] : memref<1x8xf32, #tpu.memory_space<vmem>>, vector<1x8xf32>
      %34 = vector.broadcast %33 : vector<1x8xf32> to vector<256x8xf32>
      %35 = arith.addf %32, %34 : vector<256x8xf32>
      %c0_24 = arith.constant 0 : index
      %c0_25 = arith.constant 0 : index
      %c0_26 = arith.constant 0 : index
      %36 = vector.load %arg6[%c0_24, %c0_25, %c0_26] : memref<1x256x8xbf16, #tpu.memory_space<vmem>>, vector<1x256x8xbf16>
      %37 = vector.shape_cast %36 : vector<1x256x8xbf16> to vector<256x8xbf16>
      %38 = arith.extf %37 : vector<256x8xbf16> to vector<256x8xf32>
      %39 = arith.addf %35, %38 : vector<256x8xf32>
      %cst_27 = arith.constant 0.000000e+00 : f32
      %40 = vector.broadcast %cst_27 : f32 to vector<256x8xf32>
      %41 = arith.maximumf %39, %40 : vector<256x8xf32>
      %c0_28 = arith.constant 0 : index
      %c0_29 = arith.constant 0 : index
      %c0_30 = arith.constant 0 : index
      %42 = vector.load %arg7[%c0_28, %c0_29, %c0_30] : memref<1x256x8xf32, #tpu.memory_space<vmem>>, vector<1x256x8xf32>
      %43 = vector.shape_cast %42 : vector<1x256x8xf32> to vector<256x8xf32>
      %44 = vector.shape_cast %41 : vector<256x8xf32> to vector<1x256x8xf32>
      tpu.vector_store %arg7[%c0_28, %c0_29, %c0_30], %44 {strides = array<i32>} : memref<1x256x8xf32, #tpu.memory_space<vmem>>, vector<1x256x8xf32>,
    } else {
    }
    return
  }
  func.func @transform_0(%arg0: i32, %arg1: i32) -> (i32, i32, i32, i32) {
    %c0_i32 = arith.constant 0 : i32
    %c0_i32_0 = arith.constant 0 : i32
    %c0_i32_1 = arith.constant 0 : i32
    %c0_i32_2 = arith.constant 0 : i32
    return %arg0, %c0_i32, %c0_i32_0, %c0_i32_1 : i32, i32, i32, i32
  }
  func.func @transform_1(%arg0: i32, %arg1: i32) -> (i32, i32, i32, i32) {
    %c0_i32 = arith.constant 0 : i32
    %c0_i32_0 = arith.constant 0 : i32
    %c0_i32_1 = arith.constant 0 : i32
    %c0_i32_2 = arith.constant 0 : i32
    return %arg1, %c0_i32, %c0_i32_0, %c0_i32_1 : i32, i32, i32, i32
  }
  func.func @transform_2(%arg0: i32, %arg1: i32) -> (i32, i32) {
    %c0_i32 = arith.constant 0 : i32
    %c0_i32_0 = arith.constant 0 : i32
    %c0_i32_1 = arith.constant 0 : i32
    return %c0_i32, %c0_i32_0 : i32, i32
  }
  func.func @transform_3(%arg0: i32, %arg1: i32) -> (i32, i32) {
    %c0_i32 = arith.constant 0 : i32
    %c0_i32_0 = arith.constant 0 : i32
    %c0_i32_1 = arith.constant 0 : i32
    return %c0_i32, %c0_i32_0 : i32, i32
  }
  func.func @transform_4(%arg0: i32, %arg1: i32) -> (i32, i32, i32) {
    %c0_i32 = arith.constant 0 : i32
    %c0_i32_0 = arith.constant 0 : i32
    %c0_i32_1 = arith.constant 0 : i32
    return %arg0, %c0_i32, %c0_i32_0 : i32, i32, i32
  }
  func.func @transform_5(%arg0: i32, %arg1: i32) -> (i32, i32, i32) {
    %c0_i32 = arith.constant 0 : i32
    %c0_i32_0 = arith.constant 0 : i32
    %c0_i32_1 = arith.constant 0 : i32
    return %arg0, %c0_i32, %c0_i32_0 : i32, i32, i32
  }
}

module attributes {stable_mosaic.version = 11 : i64} {
  func.func @_conv3x3_kernel(%arg0: i32, %arg1: i32, %arg2: memref<1x18x18x8xbf16, #tpu.memory_space<vmem>>, %arg3: memref<1x3x8x8xbf16, #tpu.memory_space<vmem>>, %arg4: memref<1x8xf32, #tpu.memory_space<vmem>>, %arg5: memref<1x8xf32, #tpu.memory_space<vmem>>, %arg6: memref<1x256x8xbf16, #tpu.memory_space<vmem>>, %arg7: memref<256x8xf32, #tpu.memory_space<vmem>>) attributes {dimension_semantics = [#tpu.dimension_semantics<parallel>, #tpu.dimension_semantics<arbitrary>], iteration_bounds = array<i64: 2, 3>, scalar_prefetch = 0 : i64, scratch_operands = 1 : i64, tpu.core_type = #tpu.core_type<tc>, window_params = [{transform_indices = @transform_0, window_bounds = array<i64: 1, 18, 18, 8>}, {transform_indices = @transform_1, window_bounds = array<i64: 1, 3, 8, 8>}, {pipeline_mode = #tpu.pipeline_mode<synchronous>, transform_indices = @transform_2, window_bounds = array<i64: 1, 8>}, {pipeline_mode = #tpu.pipeline_mode<synchronous>, transform_indices = @transform_3, window_bounds = array<i64: 1, 8>}, {transform_indices = @transform_4, window_bounds = array<i64: 1, 256, 8>}]} {
    %c0 = arith.constant 0 : index
    %0 = arith.index_cast %arg1 : i32 to index
    %c0_0 = arith.constant 0 : index
    %c0_1 = arith.constant 0 : index
    %1 = vector.load %arg2[%c0, %0, %c0_0, %c0_1] : memref<1x18x18x8xbf16, #tpu.memory_space<vmem>>, vector<1x16x18x8xbf16>
    %2 = vector.shape_cast %1 : vector<1x16x18x8xbf16> to vector<16x18x8xbf16>
    %3 = vector.extract_strided_slice %2 {offsets = [0, 0, 0], sizes = [16, 16, 8], strides = [1, 1, 1]} : vector<16x18x8xbf16> to vector<16x16x8xbf16>
    %4 = vector.shape_cast %3 : vector<16x16x8xbf16> to vector<256x8xbf16>
    %c0_2 = arith.constant 0 : index
    %c0_3 = arith.constant 0 : index
    %c0_4 = arith.constant 0 : index
    %c0_5 = arith.constant 0 : index
    %5 = vector.load %arg3[%c0_2, %c0_3, %c0_4, %c0_5] : memref<1x3x8x8xbf16, #tpu.memory_space<vmem>>, vector<1x1x8x8xbf16>
    %6 = vector.shape_cast %5 : vector<1x1x8x8xbf16> to vector<8x8xbf16>
    %cst = arith.constant dense<0.000000e+00> : vector<256x8xf32>
    %7 = tpu.matmul %4, %6, %cst {dimension_numbers = #tpu.dot_dimension_numbers<[1], [0], [0], [1], [0, 0, 1, 1], [], []>} : vector<256x8xbf16>, vector<8x8xbf16>, vector<256x8xf32> -> vector<256x8xf32>
    %8 = vector.extract_strided_slice %2 {offsets = [0, 1, 0], sizes = [16, 16, 8], strides = [1, 1, 1]} : vector<16x18x8xbf16> to vector<16x16x8xbf16>
    %9 = vector.shape_cast %8 : vector<16x16x8xbf16> to vector<256x8xbf16>
    %c0_6 = arith.constant 0 : index
    %c1 = arith.constant 1 : index
    %c0_7 = arith.constant 0 : index
    %c0_8 = arith.constant 0 : index
    %10 = vector.load %arg3[%c0_6, %c1, %c0_7, %c0_8] : memref<1x3x8x8xbf16, #tpu.memory_space<vmem>>, vector<1x1x8x8xbf16>
    %11 = vector.shape_cast %10 : vector<1x1x8x8xbf16> to vector<8x8xbf16>
    %cst_9 = arith.constant dense<0.000000e+00> : vector<256x8xf32>
    %12 = tpu.matmul %9, %11, %cst_9 {dimension_numbers = #tpu.dot_dimension_numbers<[1], [0], [0], [1], [0, 0, 1, 1], [], []>} : vector<256x8xbf16>, vector<8x8xbf16>, vector<256x8xf32> -> vector<256x8xf32>
    %13 = arith.addf %7, %12 : vector<256x8xf32>
    %14 = vector.extract_strided_slice %2 {offsets = [0, 2, 0], sizes = [16, 16, 8], strides = [1, 1, 1]} : vector<16x18x8xbf16> to vector<16x16x8xbf16>
    %15 = vector.shape_cast %14 : vector<16x16x8xbf16> to vector<256x8xbf16>
    %c0_10 = arith.constant 0 : index
    %c2 = arith.constant 2 : index
    %c0_11 = arith.constant 0 : index
    %c0_12 = arith.constant 0 : index
    %16 = vector.load %arg3[%c0_10, %c2, %c0_11, %c0_12] : memref<1x3x8x8xbf16, #tpu.memory_space<vmem>>, vector<1x1x8x8xbf16>
    %17 = vector.shape_cast %16 : vector<1x1x8x8xbf16> to vector<8x8xbf16>
    %cst_13 = arith.constant dense<0.000000e+00> : vector<256x8xf32>
    %18 = tpu.matmul %15, %17, %cst_13 {dimension_numbers = #tpu.dot_dimension_numbers<[1], [0], [0], [1], [0, 0, 1, 1], [], []>} : vector<256x8xbf16>, vector<8x8xbf16>, vector<256x8xf32> -> vector<256x8xf32>
    %19 = arith.addf %13, %18 : vector<256x8xf32>
    %c0_i32 = arith.constant 0 : i32
    %20 = arith.cmpi eq, %arg1, %c0_i32 : i32
    %21 = arith.extui %20 : i1 to i32
    %c0_i32_14 = arith.constant 0 : i32
    %22 = arith.cmpi ne, %21, %c0_i32_14 : i32
    scf.if %22 {
      %c0_18 = arith.constant 0 : index
      %c0_19 = arith.constant 0 : index
      %29 = vector.load %arg7[%c0_18, %c0_19] : memref<256x8xf32, #tpu.memory_space<vmem>>, vector<256x8xf32>
      tpu.vector_store %arg7[%c0_18, %c0_19], %19 {strides = array<i32>} : memref<256x8xf32, #tpu.memory_space<vmem>>, vector<256x8xf32>,
    } else {
    }
    %c0_i32_15 = arith.constant 0 : i32
    %23 = arith.cmpi sgt, %arg1, %c0_i32_15 : i32
    %24 = arith.extui %23 : i1 to i32
    %c0_i32_16 = arith.constant 0 : i32
    %25 = arith.cmpi ne, %24, %c0_i32_16 : i32
    scf.if %25 {
      %c0_18 = arith.constant 0 : index
      %c0_19 = arith.constant 0 : index
      %29 = vector.load %arg7[%c0_18, %c0_19] : memref<256x8xf32, #tpu.memory_space<vmem>>, vector<256x8xf32>
      %30 = arith.addf %29, %19 : vector<256x8xf32>
      %c0_20 = arith.constant 0 : index
      %c0_21 = arith.constant 0 : index
      %31 = vector.load %arg7[%c0_20, %c0_21] : memref<256x8xf32, #tpu.memory_space<vmem>>, vector<256x8xf32>
      tpu.vector_store %arg7[%c0_20, %c0_21], %30 {strides = array<i32>} : memref<256x8xf32, #tpu.memory_space<vmem>>, vector<256x8xf32>,
    } else {
    }
    %c2_i32 = arith.constant 2 : i32
    %26 = arith.cmpi eq, %arg1, %c2_i32 : i32
    %27 = arith.extui %26 : i1 to i32
    %c0_i32_17 = arith.constant 0 : i32
    %28 = arith.cmpi ne, %27, %c0_i32_17 : i32
    scf.if %28 {
      %c0_18 = arith.constant 0 : index
      %c0_19 = arith.constant 0 : index
      %29 = vector.load %arg7[%c0_18, %c0_19] : memref<256x8xf32, #tpu.memory_space<vmem>>, vector<256x8xf32>
      %c0_20 = arith.constant 0 : index
      %c0_21 = arith.constant 0 : index
      %30 = vector.load %arg4[%c0_20, %c0_21] : memref<1x8xf32, #tpu.memory_space<vmem>>, vector<1x8xf32>
      %31 = vector.broadcast %30 : vector<1x8xf32> to vector<256x8xf32>
      %32 = arith.mulf %29, %31 : vector<256x8xf32>
      %c0_22 = arith.constant 0 : index
      %c0_23 = arith.constant 0 : index
      %33 = vector.load %arg5[%c0_22, %c0_23] : memref<1x8xf32, #tpu.memory_space<vmem>>, vector<1x8xf32>
      %34 = vector.broadcast %33 : vector<1x8xf32> to vector<256x8xf32>
      %35 = arith.addf %32, %34 : vector<256x8xf32>
      %cst_24 = arith.constant 0.000000e+00 : f32
      %36 = vector.broadcast %cst_24 : f32 to vector<256x8xf32>
      %37 = arith.maximumf %35, %36 : vector<256x8xf32>
      %38 = arith.truncf %37 : vector<256x8xf32> to vector<256x8xbf16>
      %c0_25 = arith.constant 0 : index
      %c0_26 = arith.constant 0 : index
      %c0_27 = arith.constant 0 : index
      %39 = vector.load %arg6[%c0_25, %c0_26, %c0_27] : memref<1x256x8xbf16, #tpu.memory_space<vmem>>, vector<1x256x8xbf16>
      %40 = vector.shape_cast %39 : vector<1x256x8xbf16> to vector<256x8xbf16>
      %41 = vector.shape_cast %38 : vector<256x8xbf16> to vector<1x256x8xbf16>
      tpu.vector_store %arg6[%c0_25, %c0_26, %c0_27], %41 {strides = array<i32>} : memref<1x256x8xbf16, #tpu.memory_space<vmem>>, vector<1x256x8xbf16>,
    } else {
    }
    return
  }
  func.func @transform_0(%arg0: i32, %arg1: i32) -> (i32, i32, i32, i32) {
    %c0_i32 = arith.constant 0 : i32
    %c0_i32_0 = arith.constant 0 : i32
    %c0_i32_1 = arith.constant 0 : i32
    %c0_i32_2 = arith.constant 0 : i32
    return %arg0, %c0_i32, %c0_i32_0, %c0_i32_1 : i32, i32, i32, i32
  }
  func.func @transform_1(%arg0: i32, %arg1: i32) -> (i32, i32, i32, i32) {
    %c0_i32 = arith.constant 0 : i32
    %c0_i32_0 = arith.constant 0 : i32
    %c0_i32_1 = arith.constant 0 : i32
    %c0_i32_2 = arith.constant 0 : i32
    return %arg1, %c0_i32, %c0_i32_0, %c0_i32_1 : i32, i32, i32, i32
  }
  func.func @transform_2(%arg0: i32, %arg1: i32) -> (i32, i32) {
    %c0_i32 = arith.constant 0 : i32
    %c0_i32_0 = arith.constant 0 : i32
    %c0_i32_1 = arith.constant 0 : i32
    return %c0_i32, %c0_i32_0 : i32, i32
  }
  func.func @transform_3(%arg0: i32, %arg1: i32) -> (i32, i32) {
    %c0_i32 = arith.constant 0 : i32
    %c0_i32_0 = arith.constant 0 : i32
    %c0_i32_1 = arith.constant 0 : i32
    return %c0_i32, %c0_i32_0 : i32, i32
  }
  func.func @transform_4(%arg0: i32, %arg1: i32) -> (i32, i32, i32) {
    %c0_i32 = arith.constant 0 : i32
    %c0_i32_0 = arith.constant 0 : i32
    %c0_i32_1 = arith.constant 0 : i32
    return %arg0, %c0_i32, %c0_i32_0 : i32, i32, i32
  }
}

module attributes {stable_mosaic.version = 11 : i64} {
  func.func @_conv3x3_kernel(%arg0: i32, %arg1: i32, %arg2: memref<1x18x18x8xbf16, #tpu.memory_space<vmem>>, %arg3: memref<1x3x8x8xbf16, #tpu.memory_space<vmem>>, %arg4: memref<1x8xf32, #tpu.memory_space<vmem>>, %arg5: memref<1x8xf32, #tpu.memory_space<vmem>>, %arg6: memref<1x256x8xf32, #tpu.memory_space<vmem>>, %arg7: memref<1x256x8xf32, #tpu.memory_space<vmem>>, %arg8: memref<256x8xf32, #tpu.memory_space<vmem>>) attributes {dimension_semantics = [#tpu.dimension_semantics<parallel>, #tpu.dimension_semantics<arbitrary>], iteration_bounds = array<i64: 2, 3>, scalar_prefetch = 0 : i64, scratch_operands = 1 : i64, tpu.core_type = #tpu.core_type<tc>, window_params = [{transform_indices = @transform_0, window_bounds = array<i64: 1, 18, 18, 8>}, {transform_indices = @transform_1, window_bounds = array<i64: 1, 3, 8, 8>}, {pipeline_mode = #tpu.pipeline_mode<synchronous>, transform_indices = @transform_2, window_bounds = array<i64: 1, 8>}, {pipeline_mode = #tpu.pipeline_mode<synchronous>, transform_indices = @transform_3, window_bounds = array<i64: 1, 8>}, {transform_indices = @transform_4, window_bounds = array<i64: 1, 256, 8>}, {transform_indices = @transform_5, window_bounds = array<i64: 1, 256, 8>}]} {
    %c0 = arith.constant 0 : index
    %0 = arith.index_cast %arg1 : i32 to index
    %c0_0 = arith.constant 0 : index
    %c0_1 = arith.constant 0 : index
    %1 = vector.load %arg2[%c0, %0, %c0_0, %c0_1] : memref<1x18x18x8xbf16, #tpu.memory_space<vmem>>, vector<1x16x18x8xbf16>
    %2 = vector.shape_cast %1 : vector<1x16x18x8xbf16> to vector<16x18x8xbf16>
    %3 = vector.extract_strided_slice %2 {offsets = [0, 0, 0], sizes = [16, 16, 8], strides = [1, 1, 1]} : vector<16x18x8xbf16> to vector<16x16x8xbf16>
    %4 = vector.shape_cast %3 : vector<16x16x8xbf16> to vector<256x8xbf16>
    %c0_2 = arith.constant 0 : index
    %c0_3 = arith.constant 0 : index
    %c0_4 = arith.constant 0 : index
    %c0_5 = arith.constant 0 : index
    %5 = vector.load %arg3[%c0_2, %c0_3, %c0_4, %c0_5] : memref<1x3x8x8xbf16, #tpu.memory_space<vmem>>, vector<1x1x8x8xbf16>
    %6 = vector.shape_cast %5 : vector<1x1x8x8xbf16> to vector<8x8xbf16>
    %cst = arith.constant dense<0.000000e+00> : vector<256x8xf32>
    %7 = tpu.matmul %4, %6, %cst {dimension_numbers = #tpu.dot_dimension_numbers<[1], [0], [0], [1], [0, 0, 1, 1], [], []>} : vector<256x8xbf16>, vector<8x8xbf16>, vector<256x8xf32> -> vector<256x8xf32>
    %8 = vector.extract_strided_slice %2 {offsets = [0, 1, 0], sizes = [16, 16, 8], strides = [1, 1, 1]} : vector<16x18x8xbf16> to vector<16x16x8xbf16>
    %9 = vector.shape_cast %8 : vector<16x16x8xbf16> to vector<256x8xbf16>
    %c0_6 = arith.constant 0 : index
    %c1 = arith.constant 1 : index
    %c0_7 = arith.constant 0 : index
    %c0_8 = arith.constant 0 : index
    %10 = vector.load %arg3[%c0_6, %c1, %c0_7, %c0_8] : memref<1x3x8x8xbf16, #tpu.memory_space<vmem>>, vector<1x1x8x8xbf16>
    %11 = vector.shape_cast %10 : vector<1x1x8x8xbf16> to vector<8x8xbf16>
    %cst_9 = arith.constant dense<0.000000e+00> : vector<256x8xf32>
    %12 = tpu.matmul %9, %11, %cst_9 {dimension_numbers = #tpu.dot_dimension_numbers<[1], [0], [0], [1], [0, 0, 1, 1], [], []>} : vector<256x8xbf16>, vector<8x8xbf16>, vector<256x8xf32> -> vector<256x8xf32>
    %13 = arith.addf %7, %12 : vector<256x8xf32>
    %14 = vector.extract_strided_slice %2 {offsets = [0, 2, 0], sizes = [16, 16, 8], strides = [1, 1, 1]} : vector<16x18x8xbf16> to vector<16x16x8xbf16>
    %15 = vector.shape_cast %14 : vector<16x16x8xbf16> to vector<256x8xbf16>
    %c0_10 = arith.constant 0 : index
    %c2 = arith.constant 2 : index
    %c0_11 = arith.constant 0 : index
    %c0_12 = arith.constant 0 : index
    %16 = vector.load %arg3[%c0_10, %c2, %c0_11, %c0_12] : memref<1x3x8x8xbf16, #tpu.memory_space<vmem>>, vector<1x1x8x8xbf16>
    %17 = vector.shape_cast %16 : vector<1x1x8x8xbf16> to vector<8x8xbf16>
    %cst_13 = arith.constant dense<0.000000e+00> : vector<256x8xf32>
    %18 = tpu.matmul %15, %17, %cst_13 {dimension_numbers = #tpu.dot_dimension_numbers<[1], [0], [0], [1], [0, 0, 1, 1], [], []>} : vector<256x8xbf16>, vector<8x8xbf16>, vector<256x8xf32> -> vector<256x8xf32>
    %19 = arith.addf %13, %18 : vector<256x8xf32>
    %c0_i32 = arith.constant 0 : i32
    %20 = arith.cmpi eq, %arg1, %c0_i32 : i32
    %21 = arith.extui %20 : i1 to i32
    %c0_i32_14 = arith.constant 0 : i32
    %22 = arith.cmpi ne, %21, %c0_i32_14 : i32
    scf.if %22 {
      %c0_18 = arith.constant 0 : index
      %c0_19 = arith.constant 0 : index
      %29 = vector.load %arg8[%c0_18, %c0_19] : memref<256x8xf32, #tpu.memory_space<vmem>>, vector<256x8xf32>
      tpu.vector_store %arg8[%c0_18, %c0_19], %19 {strides = array<i32>} : memref<256x8xf32, #tpu.memory_space<vmem>>, vector<256x8xf32>,
    } else {
    }
    %c0_i32_15 = arith.constant 0 : i32
    %23 = arith.cmpi sgt, %arg1, %c0_i32_15 : i32
    %24 = arith.extui %23 : i1 to i32
    %c0_i32_16 = arith.constant 0 : i32
    %25 = arith.cmpi ne, %24, %c0_i32_16 : i32
    scf.if %25 {
      %c0_18 = arith.constant 0 : index
      %c0_19 = arith.constant 0 : index
      %29 = vector.load %arg8[%c0_18, %c0_19] : memref<256x8xf32, #tpu.memory_space<vmem>>, vector<256x8xf32>
      %30 = arith.addf %29, %19 : vector<256x8xf32>
      %c0_20 = arith.constant 0 : index
      %c0_21 = arith.constant 0 : index
      %31 = vector.load %arg8[%c0_20, %c0_21] : memref<256x8xf32, #tpu.memory_space<vmem>>, vector<256x8xf32>
      tpu.vector_store %arg8[%c0_20, %c0_21], %30 {strides = array<i32>} : memref<256x8xf32, #tpu.memory_space<vmem>>, vector<256x8xf32>,
    } else {
    }
    %c2_i32 = arith.constant 2 : i32
    %26 = arith.cmpi eq, %arg1, %c2_i32 : i32
    %27 = arith.extui %26 : i1 to i32
    %c0_i32_17 = arith.constant 0 : i32
    %28 = arith.cmpi ne, %27, %c0_i32_17 : i32
    scf.if %28 {
      %c0_18 = arith.constant 0 : index
      %c0_19 = arith.constant 0 : index
      %29 = vector.load %arg8[%c0_18, %c0_19] : memref<256x8xf32, #tpu.memory_space<vmem>>, vector<256x8xf32>
      %c0_20 = arith.constant 0 : index
      %c0_21 = arith.constant 0 : index
      %30 = vector.load %arg4[%c0_20, %c0_21] : memref<1x8xf32, #tpu.memory_space<vmem>>, vector<1x8xf32>
      %31 = vector.broadcast %30 : vector<1x8xf32> to vector<256x8xf32>
      %32 = arith.mulf %29, %31 : vector<256x8xf32>
      %c0_22 = arith.constant 0 : index
      %c0_23 = arith.constant 0 : index
      %33 = vector.load %arg5[%c0_22, %c0_23] : memref<1x8xf32, #tpu.memory_space<vmem>>, vector<1x8xf32>
      %34 = vector.broadcast %33 : vector<1x8xf32> to vector<256x8xf32>
      %35 = arith.addf %32, %34 : vector<256x8xf32>
      %c0_24 = arith.constant 0 : index
      %c0_25 = arith.constant 0 : index
      %c0_26 = arith.constant 0 : index
      %36 = vector.load %arg6[%c0_24, %c0_25, %c0_26] : memref<1x256x8xf32, #tpu.memory_space<vmem>>, vector<1x256x8xf32>
      %37 = vector.shape_cast %36 : vector<1x256x8xf32> to vector<256x8xf32>
      %38 = arith.addf %35, %37 : vector<256x8xf32>
      %cst_27 = arith.constant 0.000000e+00 : f32
      %39 = vector.broadcast %cst_27 : f32 to vector<256x8xf32>
      %40 = arith.maximumf %38, %39 : vector<256x8xf32>
      %c0_28 = arith.constant 0 : index
      %c0_29 = arith.constant 0 : index
      %c0_30 = arith.constant 0 : index
      %41 = vector.load %arg7[%c0_28, %c0_29, %c0_30] : memref<1x256x8xf32, #tpu.memory_space<vmem>>, vector<1x256x8xf32>
      %42 = vector.shape_cast %41 : vector<1x256x8xf32> to vector<256x8xf32>
      %43 = vector.shape_cast %40 : vector<256x8xf32> to vector<1x256x8xf32>
      tpu.vector_store %arg7[%c0_28, %c0_29, %c0_30], %43 {strides = array<i32>} : memref<1x256x8xf32, #tpu.memory_space<vmem>>, vector<1x256x8xf32>,
    } else {
    }
    return
  }
  func.func @transform_0(%arg0: i32, %arg1: i32) -> (i32, i32, i32, i32) {
    %c0_i32 = arith.constant 0 : i32
    %c0_i32_0 = arith.constant 0 : i32
    %c0_i32_1 = arith.constant 0 : i32
    %c0_i32_2 = arith.constant 0 : i32
    return %arg0, %c0_i32, %c0_i32_0, %c0_i32_1 : i32, i32, i32, i32
  }
  func.func @transform_1(%arg0: i32, %arg1: i32) -> (i32, i32, i32, i32) {
    %c0_i32 = arith.constant 0 : i32
    %c0_i32_0 = arith.constant 0 : i32
    %c0_i32_1 = arith.constant 0 : i32
    %c0_i32_2 = arith.constant 0 : i32
    return %arg1, %c0_i32, %c0_i32_0, %c0_i32_1 : i32, i32, i32, i32
  }
  func.func @transform_2(%arg0: i32, %arg1: i32) -> (i32, i32) {
    %c0_i32 = arith.constant 0 : i32
    %c0_i32_0 = arith.constant 0 : i32
    %c0_i32_1 = arith.constant 0 : i32
    return %c0_i32, %c0_i32_0 : i32, i32
  }
  func.func @transform_3(%arg0: i32, %arg1: i32) -> (i32, i32) {
    %c0_i32 = arith.constant 0 : i32
    %c0_i32_0 = arith.constant 0 : i32
    %c0_i32_1 = arith.constant 0 : i32
    return %c0_i32, %c0_i32_0 : i32, i32
  }
  func.func @transform_4(%arg0: i32, %arg1: i32) -> (i32, i32, i32) {
    %c0_i32 = arith.constant 0 : i32
    %c0_i32_0 = arith.constant 0 : i32
    %c0_i32_1 = arith.constant 0 : i32
    return %arg0, %c0_i32, %c0_i32_0 : i32, i32, i32
  }
  func.func @transform_5(%arg0: i32, %arg1: i32) -> (i32, i32, i32) {
    %c0_i32 = arith.constant 0 : i32
    %c0_i32_0 = arith.constant 0 : i32
    %c0_i32_1 = arith.constant 0 : i32
    return %arg0, %c0_i32, %c0_i32_0 : i32, i32, i32
  }
}

</mosaic_0001>

<bundles_post_ra>
// kernel: _lambda_.6
= control target key start
LH: loop header
LB: loop body
LE: loop exit
PB: predicated region body
PF: predicated region fallthrough
CT: control target
= control target key end

     0   :  { %s1316_s15 = smov 0   ;;  %s1318_s16 = smov 0   ;;  %s1610_s0 = inlined_call_operand.vmem [shape: bf16[512,4], index: 0, kind: input, shape index: {}]   ;;  %s1611_s1 = inlined_call_operand.vmem [shape: bf16[4,8], index: 1, kind: input, shape index: {}]   ;;  %s1612_s2 = inlined_call_operand.vmem [shape: f32[1,8], index: 2, kind: input, shape index: {}]   ;;  %s1613_s3 = inlined_call_operand.vmem [shape: f32[1,8], index: 3, kind: input, shape index: {}]   ;;  %s1614_s4 = inlined_call_operand.vmem [shape: bf16[512,8], index: 4, kind: output, shape index: {}]  }
   0x1   :  { %s1320_s17 = smov 0  }
   0x2 LB: > { %s26_s18 = sadd.s32 1, %s1284_s16  ;;  %p1065_p0 = scmp.ge.s32.totalorder %s1288_s17, 1  ;;  %s1288_s17 = sphi %s1320_s17, %s14_s17   ;;  %s1284_s16 = sphi %s1318_s16, %s1617_s16   ;;  %s1280_s15 = sphi %s1316_s15, %s1616_s15  }
   0x3   : > { %p28_p1 = scmp.ge.s32.totalorder %s26_s18, 2  ;;  %p189_p2 = scmp.lt.s32.totalorder %s1288_s17, 3 }
   0x5   : > { %s1619_s18 = smov (%p28_p1, %s26_s18), 0  ;;  %p190_p3 = pnand %p1065_p0, %p189_p2 }
   0x6   : > { %v343_v0 = vld [vmem:[%s1611_s1] sm:$0x3] (!%p190_p3)  ;;  %vm473_vm0 = vcmask (!%p190_p3), 1041408   ;;  %s1066_s21 = sshll.u32 (!%p190_p3), %s1280_s15, 5  ;;  %vm246_vm1 = vcmask (!%p190_p3), 64512   ;;  %v1290_v2 = vmov (!%p190_p3), 0.0  }
   0x7   : > { %193 = sbr.rel (%p190_p3) target bundleno = 281 (0x119), region = 36  ;;  %1223 = vmatprep.subr.msk.bf16.mxu0 (!%p190_p3), %vm473_vm0, %v343_v0  ;;  %1224 = vmatprep.subr.msk.bf16.mxu1 (!%p190_p3), %vm473_vm0, %v343_v0  ;;  %v475_v1 = vsel (!%p190_p3), %vm473_vm0, %v343_v0, 0  ;;  %p1342_p4 = scmp.lt.s32.totalorder (!%p190_p3), %s1066_s21, 63  ;;  %249 = vst.msk [vmem:[#allocation2 + $0x10] sm:$0xff] (!%p190_p3), %vm246_vm1, %v1290_v2  ;;  %247 = vst.msk [vmem:[#allocation2] sm:$0xff] (!%p190_p3), %vm246_vm1, %v1290_v2  ;;  %vm424_vm2 = vcmask (!%p190_p3), 31744  }
   0x8   : > { %1188 = vmatpush3.bf16.msra.mxu0 (!%p190_p3), %v475_v1  ;;  %1222 = vmatpush3.bf16.msra.mxu1 (!%p190_p3), %v475_v1  ;;  %248 = vst.msk [vmem:[#allocation2 + $0x8] sm:$0xff] (!%p190_p3), %vm246_vm1, %v1290_v2  ;;  %250 = vst.msk [vmem:[#allocation2 + $0x18] sm:$0xff] (!%p190_p3), %vm246_vm1, %v1290_v2  ;;  %v1435_v46 = vld [vmem:[%s1612_s2] ss:$0 sm:$0xff] (!%p190_p3)  ;;  %vm944_vm3 = vcmask (!%p190_p3), 60416  }
   0x9   : > { %251 = vst.msk [vmem:[#allocation2 + $0x20] sm:$0xff] (!%p190_p3), %vm246_vm1, %v1290_v2  ;;  %252 = vst.msk [vmem:[#allocation2 + $0x28] sm:$0xff] (!%p190_p3), %vm246_vm1, %v1290_v2  ;;  %v1440_v56 = vld [vmem:[%s1613_s3] ss:$0 sm:$0xff] (!%p190_p3) }
   0xa   : > { %253 = vst.msk [vmem:[#allocation2 + $0x30] sm:$0xff] (!%p190_p3), %vm246_vm1, %v1290_v2  ;;  %254 = vst.msk [vmem:[#allocation2 + $0x38] sm:$0xff] (!%p190_p3), %vm246_vm1, %v1290_v2 }
   0xb   : > { %255 = vst.msk [vmem:[#allocation2 + $0x40] sm:$0xff] (!%p190_p3), %vm246_vm1, %v1290_v2  ;;  %256 = vst.msk [vmem:[#allocation2 + $0x48] sm:$0xff] (!%p190_p3), %vm246_vm1, %v1290_v2 }
   0xc   : > { %257 = vst.msk [vmem:[#allocation2 + $0x50] sm:$0xff] (!%p190_p3), %vm246_vm1, %v1290_v2  ;;  %258 = vst.msk [vmem:[#allocation2 + $0x58] sm:$0xff] (!%p190_p3), %vm246_vm1, %v1290_v2 }
   0xd   : > { %259 = vst.msk [vmem:[#allocation2 + $0x60] sm:$0xff] (!%p190_p3), %vm246_vm1, %v1290_v2  ;;  %260 = vst.msk [vmem:[#allocation2 + $0x68] sm:$0xff] (!%p190_p3), %vm246_vm1, %v1290_v2 }
   0xe   : > { %261 = vst.msk [vmem:[#allocation2 + $0x70] sm:$0xff] %vm246_vm1, %v1290_v2  ;;  %262 = vst.msk [vmem:[#allocation2 + $0x78] sm:$0xff] %vm246_vm1, %v1290_v2  ;;  %s1621_s21 = smov (!%p1342_p4, %s1066_s21), 63  ;;  %v281_v19 = vld [vmem:[#allocation2 + $0x10] sm:$0xff]  ;;  %v279_v21 = vld [vmem:[#allocation2] sm:$0xff] }
   0xf   : > { %263 = vst.msk [vmem:[#allocation2 + $0x80] sm:$0xff] %vm246_vm1, %v1290_v2  ;;  %264 = vst.msk [vmem:[#allocation2 + $0x88] sm:$0xff] %vm246_vm1, %v1290_v2  ;;  %s1067_s23 = sshll.u32 %s1621_s21, 2  ;;  %v282_v24 = vld [vmem:[#allocation2 + $0x18] sm:$0xff]  ;;  %v280_v29 = vld [vmem:[#allocation2 + $0x8] sm:$0xff] }
  0x10   : > { %265 = vst.msk [vmem:[#allocation2 + $0x90] sm:$0xff] %vm246_vm1, %v1290_v2  ;;  %266 = vst.msk [vmem:[#allocation2 + $0x98] sm:$0xff] %vm246_vm1, %v1290_v2  ;;  %s1390_s26 = scalar_lea.vmem %s1610_s0, %s1067_s23  ;;  %v283_v45 = vld [vmem:[#allocation2 + $0x20] sm:$0xff]  ;;  %v284_v54 = vld [vmem:[#allocation2 + $0x28] sm:$0xff]  ;;  %s1458_s7 = scalar_lea.vmem %s1614_s4, %s1067_s23 }
  0x11   : > { %267 = vst.msk [vmem:[#allocation2 + $0xa0] sm:$0xff] %vm246_vm1, %v1290_v2  ;;  %268 = vst.msk [vmem:[#allocation2 + $0xa8] sm:$0xff] %vm246_vm1, %v1290_v2  ;;  %v1250_v3 = vld [vmem:[%s1390_s26] sm:$0xff]   ;;  %v1252_v5 = vld [vmem:[%s1390_s26 + $0x8] sm:$0xff]  }
  0x12   : > { %269 = vst.msk [vmem:[#allocation2 + $0xb0] sm:$0xff] %vm246_vm1, %v1290_v2  ;;  %270 = vst.msk [vmem:[#allocation2 + $0xb8] sm:$0xff] %vm246_vm1, %v1290_v2  ;;  %v1251_v4 = vld [vmem:[%s1390_s26 + $0x40] sm:$0xff]   ;;  %1189 = vmatprep.mubr.msk.bf16.mxu0 %vm424_vm2, %v1250_v3  ;;  %v1253_v6 = vld [vmem:[%s1390_s26 + $0x48] sm:$0xff]  }
  0x13   : > { %271 = vst.msk [vmem:[#allocation2 + $0xc0] sm:$0xff] %vm246_vm1, %v1290_v2  ;;  %272 = vst.msk [vmem:[#allocation2 + $0xc8] sm:$0xff] %vm246_vm1, %v1290_v2  ;;  %1205 = vmatprep.mubr.msk.bf16.mxu1 %vm424_vm2, %v1251_v4  ;;  %1190 = vmatmul.mubr.msk.bf16.vlgmr.msra.gmra.mrb[0].mxu0 %vm424_vm2, %v1252_v5  ;;  %v1254_v7 = vld [vmem:[%s1390_s26 + $0x10] sm:$0xff]   ;;  %v1256_v9 = vld [vmem:[%s1390_s26 + $0x18] sm:$0xff]  }
  0x14   : > { %273 = vst.msk [vmem:[#allocation2 + $0xd0] sm:$0xff] %vm246_vm1, %v1290_v2  ;;  %274 = vst.msk [vmem:[#allocation2 + $0xd8] sm:$0xff] %vm246_vm1, %v1290_v2  ;;  %1206 = vmatmul.mubr.msk.bf16.vlgmr.msra.gmra.mrb[0].mxu1 %vm424_vm2, %v1253_v6  ;;  %v1255_v8 = vld [vmem:[%s1390_s26 + $0x50] sm:$0xff]   ;;  %1193 = vmatprep.mubr.msk.bf16.mxu0 %vm424_vm2, %v1254_v7  ;;  %v1257_v10 = vld [vmem:[%s1390_s26 + $0x58] sm:$0xff]  }
  0x15   : > { %275 = vst.msk [vmem:[#allocation2 + $0xe0] sm:$0xff] %vm246_vm1, %v1290_v2  ;;  %276 = vst.msk [vmem:[#allocation2 + $0xe8] sm:$0xff] %vm246_vm1, %v1290_v2  ;;  %1209 = vmatprep.mubr.msk.bf16.mxu1 %vm424_vm2, %v1255_v8  ;;  %v1258_v11 = vld [vmem:[%s1390_s26 + $0x20] sm:$0xff]   ;;  %v1260_v13 = vld [vmem:[%s1390_s26 + $0x28] sm:$0xff]  }
  0x16   : > { %277 = vst.msk [vmem:[#allocation2 + $0xf0] sm:$0xff] %vm246_vm1, %v1290_v2  ;;  %278 = vst.msk [vmem:[#allocation2 + $0xf8] sm:$0xff] %vm246_vm1, %v1290_v2  ;;  %v1259_v12 = vld [vmem:[%s1390_s26 + $0x60] sm:$0xff]   ;;  %v1261_v14 = vld [vmem:[%s1390_s26 + $0x68] sm:$0xff]  }
  0x17   : > { %v1262_v15 = vld [vmem:[%s1390_s26 + $0x30] sm:$0xff]   ;;  %v1264_v17 = vld [vmem:[%s1390_s26 + $0x38] sm:$0xff]   ;;  %v295_v23 = vld [vmem:[#allocation2 + $0x80] sm:$0xff] }
  0x18   : > { %v1263_v16 = vld [vmem:[%s1390_s26 + $0x70] sm:$0xff]   ;;  %v1265_v18 = vld [vmem:[%s1390_s26 + $0x78] sm:$0xff]   ;;  %v296_v34 = vld [vmem:[#allocation2 + $0x88] sm:$0xff] }
  0x19   : > { %v297_v20 = vld [vmem:[#allocation2 + $0x90] sm:$0xff]  ;;  %v298_v28 = vld [vmem:[#allocation2 + $0x98] sm:$0xff]  ;;  %v299_v48 = vld [vmem:[#allocation2 + $0xa0] sm:$0xff] }
  0x1a   : > { %v285_v43 = vld [vmem:[#allocation2 + $0x30] sm:$0xff]  ;;  %v286_v49 = vld [vmem:[#allocation2 + $0x38] sm:$0xff]  ;;  %v300_v61 = vld [vmem:[#allocation2 + $0xa8] sm:$0xff] }
  0x1b   : > { %1194 = vmatmul.mubr.msk.bf16.gmra.mrb[4].mxu0 %vm424_vm2, %v1256_v9  ;;  %v301_v44 = vld [vmem:[#allocation2 + $0xb0] sm:$0xff]  ;;  %v302_v53 = vld [vmem:[#allocation2 + $0xb8] sm:$0xff] }
  0x1c   : > { %1210 = vmatmul.mubr.msk.bf16.gmra.mrb[4].mxu1 %vm424_vm2, %v1257_v10  ;;  %1197 = vmatprep.mubr.msk.bf16.mxu0 %vm424_vm2, %v1258_v11 }
  0x1d   : > { %1213 = vmatprep.mubr.msk.bf16.mxu1 %vm424_vm2, %v1259_v12 }
  0x23   : > { %1198 = vmatmul.mubr.msk.bf16.gmra.mrb[8].mxu0 %vm424_vm2, %v1260_v13 }
  0x24   : > { %1214 = vmatmul.mubr.msk.bf16.gmra.mrb[8].mxu1 %vm424_vm2, %v1261_v14  ;;  %1201 = vmatprep.mubr.msk.bf16.mxu0 %vm424_vm2, %v1262_v15 }
  0x25   : > { %1217 = vmatprep.mubr.msk.bf16.mxu1 %vm424_vm2, %v1263_v16 }
  0x2b   : > { %1202 = vmatmul.mubr.msk.bf16.gmra.mrb[12].mxu0 %vm424_vm2, %v1264_v17 }
  0x2c   : > { %1218 = vmatmul.mubr.msk.bf16.gmra.mrb[12].mxu1 %vm424_vm2, %v1265_v18 }
  0xe6   : > { %v1191_v22 = vpop.f32.mrb[0].mxu0 }
  0xe7   : > { %v640_v25 = vadd.f32 %v1191_v22, %v281_v19  ;;  %v1207_v26 = vpop.f32.mrb[0].mxu1  ;;  %v511_v27 = vpop.f32.mrb[1].mxu0 }
  0xe8   : > { %v656_v30 = vadd.f32 %v1207_v26, %v297_v20  ;;  %v638_v31 = vadd.f32 %v511_v27, %v279_v21  ;;  %v575_v32 = vpop.f32.mrb[1].mxu1  ;;  %v1192_v33 = vpop.f32.mrb[2].mxu0 }
  0xe9   : > { %673 = vst.msk [vmem:[#allocation2 + $0x10] sm:$0xff] %vm246_vm1, %v640_v25  ;;  %v654_v35 = vadd.f32 %v575_v32, %v295_v23  ;;  %v641_v36 = vadd.f32 %v1192_v33, %v282_v24  ;;  %v1208_v37 = vpop.f32.mrb[2].mxu1  ;;  %v514_v38 = vpop.f32.mrb[3].mxu0  ;;  %v289_v23 = vld [vmem:[#allocation2 + $0x50] sm:$0xff] }
  0xea   : > { %689 = vst.msk [vmem:[#allocation2 + $0x90] sm:$0xff] %vm246_vm1, %v656_v30  ;;  %671 = vst.msk [vmem:[#allocation2] sm:$0xff] %vm246_vm1, %v638_v31  ;;  %v657_v39 = vadd.f32 %v1208_v37, %v298_v28  ;;  %v639_v40 = vadd.f32 %v514_v38, %v280_v29  ;;  %v578_v41 = vpop.f32.mrb[3].mxu1  ;;  %v305_v28 = vld [vmem:[#allocation2 + $0xd0] sm:$0xff]  ;;  %v287_v29 = vld [vmem:[#allocation2 + $0x40] sm:$0xff] }
  0xeb   : > { %687 = vst.msk [vmem:[#allocation2 + $0x80] sm:$0xff] %vm246_vm1, %v654_v35  ;;  %674 = vst.msk [vmem:[#allocation2 + $0x18] sm:$0xff] %vm246_vm1, %v641_v36  ;;  %v655_v42 = vadd.f32 %v578_v41, %v296_v34  ;;  %v303_v35 = vld [vmem:[#allocation2 + $0xc0] sm:$0xff]  ;;  %v290_v36 = vld [vmem:[#allocation2 + $0x58] sm:$0xff] }
  0xec   : > { %690 = vst.msk [vmem:[#allocation2 + $0x98] sm:$0xff] %vm246_vm1, %v657_v39  ;;  %672 = vst.msk [vmem:[#allocation2 + $0x8] sm:$0xff] %vm246_vm1, %v639_v40 }
  0xed   : > { %688 = vst.msk [vmem:[#allocation2 + $0x88] sm:$0xff] %vm246_vm1, %v655_v42 }
  0xee   : > { %v1195_v47 = vpop.f32.mrb[4].mxu0 }
  0xef   : > { %v644_v50 = vadd.f32 %v1195_v47, %v285_v43  ;;  %v1211_v51 = vpop.f32.mrb[4].mxu1  ;;  %v527_v52 = vpop.f32.mrb[5].mxu0  ;;  %v306_v43 = vld [vmem:[#allocation2 + $0xd8] sm:$0xff] }
  0xf0   : > { %v708_v55 = vld [vmem:[#allocation2 + $0x10] sm:$0xff]  ;;  %v660_v57 = vadd.f32 %v1211_v51, %v301_v44  ;;  %v642_v58 = vadd.f32 %v527_v52, %v283_v45  ;;  %v591_v59 = vpop.f32.mrb[5].mxu1  ;;  %v1196_v60 = vpop.f32.mrb[6].mxu0  ;;  %v288_v44 = vld [vmem:[#allocation2 + $0x48] sm:$0xff] }
  0xf1   : > { %v747_v62 = vmul.f32 %v1435_v46, %v708_v55  ;;  %v724_v63 = vld [vmem:[#allocation2 + $0x90] sm:$0xff]  ;;  %v706_v0 = vld [vmem:[#allocation2] sm:$0xff]  ;;  %677 = vst.msk [vmem:[#allocation2 + $0x30] sm:$0xff] %vm246_vm1, %v644_v50  ;;  %v658_v1 = vadd.f32 %v591_v59, %v299_v48  ;;  %v645_v2 = vadd.f32 %v1196_v60, %v286_v49  ;;  %v1212_v3 = vpop.f32.mrb[6].mxu1  ;;  %v530_v4 = vpop.f32.mrb[7].mxu0 }
  0xf2   : > { %v763_v5 = vmul.f32 %v1435_v46, %v724_v63  ;;  %v745_v6 = vmul.f32 %v1435_v46, %v706_v0  ;;  %v722_v7 = vld [vmem:[#allocation2 + $0x80] sm:$0xff]  ;;  %v709_v8 = vld [vmem:[#allocation2 + $0x18] sm:$0xff]  ;;  %693 = vst.msk [vmem:[#allocation2 + $0xb0] sm:$0xff] %vm246_vm1, %v660_v57  ;;  %675 = vst.msk [vmem:[#allocation2 + $0x20] sm:$0xff] %vm246_vm1, %v642_v58  ;;  %v661_v9 = vadd.f32 %v1212_v3, %v302_v53  ;;  %v594_v11 = vpop.f32.mrb[7].mxu1 }
  0xf3   : > { %v643_v10 = vadd.f32 %v530_v4, %v284_v54  ;;  %v786_v12 = vadd.f32 %v1440_v56, %v747_v62  ;;  %v761_v13 = vmul.f32 %v1435_v46, %v722_v7  ;;  %v748_v14 = vmul.f32 %v1435_v46, %v709_v8  ;;  %v725_v15 = vld [vmem:[#allocation2 + $0x98] sm:$0xff]  ;;  %v707_v16 = vld [vmem:[#allocation2 + $0x8] sm:$0xff]  ;;  %691 = vst.msk [vmem:[#allocation2 + $0xa0] sm:$0xff] %vm246_vm1, %v658_v1 }
  0xf4   : > { %678 = vst.msk [vmem:[#allocation2 + $0x38] sm:$0xff] %vm246_vm1, %v645_v2  ;;  %v659_v17 = vadd.f32 %v594_v11, %v300_v61  ;;  %v802_v18 = vadd.f32 %v1440_v56, %v763_v5  ;;  %v784_v19 = vadd.f32 %v1440_v56, %v745_v6  ;;  %v764_v20 = vmul.f32 %v1435_v46, %v725_v15  ;;  %v723_v22 = vld [vmem:[#allocation2 + $0x88] sm:$0xff] }
  0xf5   : > { %v746_v21 = vmul.f32 %v1435_v46, %v707_v16  ;;  %694 = vst.msk [vmem:[#allocation2 + $0xb8] sm:$0xff] %vm246_vm1, %v661_v9  ;;  %676 = vst.msk [vmem:[#allocation2 + $0x28] sm:$0xff] %vm246_vm1, %v643_v10  ;;  %v1140_v24 = vpack.c.bf16 %v786_v12, %v786_v12  ;;  %v800_v25 = vadd.f32 %v1440_v56, %v761_v13  ;;  %v304_v53 = vld [vmem:[#allocation2 + $0xc8] sm:$0xff] }
  0xf6   : > { %v787_v26 = vadd.f32 %v1440_v56, %v748_v14  ;;  %v762_v27 = vmul.f32 %v1435_v46, %v723_v22  ;;  %692 = vst.msk [vmem:[#allocation2 + $0xa8] sm:$0xff] %vm246_vm1, %v659_v17  ;;  %v1156_v30 = vpack.c.bf16 %v802_v18, %v802_v18  ;;  %v1138_v31 = vpack.c.bf16 %v784_v19, %v784_v19  ;;  %v1199_v34 = vpop.f32.mrb[8].mxu0  ;;  %v293_v17 = vld [vmem:[#allocation2 + $0x70] sm:$0xff] }
  0xf7   : > { %v803_v32 = vadd.f32 %v1440_v56, %v764_v20  ;;  %v785_v33 = vadd.f32 %v1440_v56, %v746_v21  ;;  %947 = vst.msk [vmem:[%s1458_s7 + $0x8] sm:$0xf] %vm944_vm3, %v1140_v24  ;;  %v1154_v37 = vpack.c.bf16 %v800_v25, %v800_v25  ;;  %v648_v40 = vadd.f32 %v1199_v34, %v289_v23  ;;  %v1215_v41 = vpop.f32.mrb[8].mxu1  ;;  %v543_v42 = vpop.f32.mrb[9].mxu0  ;;  %v309_v22 = vld [vmem:[#allocation2 + $0xf0] sm:$0xff]  ;;  %v291_v23 = vld [vmem:[#allocation2 + $0x60] sm:$0xff] }
  0xf8   : > { %v1141_v38 = vpack.c.bf16 %v787_v26, %v787_v26  ;;  %v801_v39 = vadd.f32 %v1440_v56, %v762_v27  ;;  %963 = vst.msk [vmem:[%s1458_s7 + $0x48] sm:$0xf] %vm944_vm3, %v1156_v30  ;;  %945 = vst.msk [vmem:[%s1458_s7] sm:$0xf] %vm944_vm3, %v1138_v31  ;;  %v712_v48 = vld [vmem:[#allocation2 + $0x30] sm:$0xff]  ;;  %v664_v49 = vadd.f32 %v1215_v41, %v305_v28  ;;  %v607_v51 = vpop.f32.mrb[9].mxu1 }
  0xf9   : > { %v1157_v45 = vpack.c.bf16 %v803_v32, %v803_v32  ;;  %v1139_v47 = vpack.c.bf16 %v785_v33, %v785_v33  ;;  %v646_v50 = vadd.f32 %v543_v42, %v287_v29  ;;  %v1200_v52 = vpop.f32.mrb[10].mxu0  ;;  %961 = vst.msk [vmem:[%s1458_s7 + $0x40] sm:$0xf] %vm944_vm3, %v1154_v37  ;;  %v751_v55 = vmul.f32 %v1435_v46, %v712_v48  ;;  %v728_v57 = vld [vmem:[#allocation2 + $0xb0] sm:$0xff]  ;;  %v710_v58 = vld [vmem:[#allocation2 + $0x20] sm:$0xff]  ;;  %v1216_v61 = vpop.f32.mrb[10].mxu1 }
  0xfa   : > { %948 = vst.msk [vmem:[%s1458_s7 + $0xc] sm:$0xf] %vm944_vm3, %v1141_v38  ;;  %v1155_v54 = vpack.c.bf16 %v801_v39, %v801_v39  ;;  %v662_v59 = vadd.f32 %v607_v51, %v303_v35  ;;  %v649_v60 = vadd.f32 %v1200_v52, %v290_v36  ;;  %v546_v62 = vpop.f32.mrb[11].mxu0  ;;  %v767_v63 = vmul.f32 %v1435_v46, %v728_v57  ;;  %v726_v1 = vld [vmem:[#allocation2 + $0xa0] sm:$0xff]  ;;  %v610_v5 = vpop.f32.mrb[11].mxu1  ;;  %v294_v30 = vld [vmem:[#allocation2 + $0x78] sm:$0xff] }
  0xfb   : > { %681 = vst.msk [vmem:[#allocation2 + $0x50] sm:$0xff] %vm246_vm1, %v648_v40  ;;  %v749_v0 = vmul.f32 %v1435_v46, %v710_v58  ;;  %v713_v2 = vld [vmem:[#allocation2 + $0x38] sm:$0xff]  ;;  %697 = vst.msk [vmem:[#allocation2 + $0xd0] sm:$0xff] %vm246_vm1, %v664_v49  ;;  %v665_v3 = vadd.f32 %v1216_v61, %v306_v43  ;;  %v647_v4 = vadd.f32 %v546_v62, %v288_v44  ;;  %v307_v29 = vld [vmem:[#allocation2 + $0xe0] sm:$0xff] }
  0xfc   : > { %964 = vst.msk [vmem:[%s1458_s7 + $0x4c] sm:$0xf] %vm944_vm3, %v1157_v45  ;;  %946 = vst.msk [vmem:[%s1458_s7 + $0x4] sm:$0xf] %vm944_vm3, %v1139_v47  ;;  %v790_v6 = vadd.f32 %v1440_v56, %v751_v55  ;;  %v765_v7 = vmul.f32 %v1435_v46, %v726_v1  ;;  %v752_v8 = vmul.f32 %v1435_v46, %v713_v2  ;;  %v729_v9 = vld [vmem:[#allocation2 + $0xb8] sm:$0xff]  ;;  %v711_v10 = vld [vmem:[#allocation2 + $0x28] sm:$0xff] }
  0xfd   : > { %679 = vst.msk [vmem:[#allocation2 + $0x40] sm:$0xff] %vm246_vm1, %v646_v50  ;;  %695 = vst.msk [vmem:[#allocation2 + $0xc0] sm:$0xff] %vm246_vm1, %v662_v59  ;;  %v663_v11 = vadd.f32 %v610_v5, %v304_v53  ;;  %v806_v12 = vadd.f32 %v1440_v56, %v767_v63  ;;  %v788_v13 = vadd.f32 %v1440_v56, %v749_v0  ;;  %v727_v16 = vld [vmem:[#allocation2 + $0xa8] sm:$0xff]  ;;  %v310_v37 = vld [vmem:[#allocation2 + $0xf8] sm:$0xff] }
  0xfe   : > { %962 = vst.msk [vmem:[%s1458_s7 + $0x44] sm:$0xf] %vm944_vm3, %v1155_v54  ;;  %v768_v14 = vmul.f32 %v1435_v46, %v729_v9  ;;  %v750_v15 = vmul.f32 %v1435_v46, %v711_v10  ;;  %v1144_v18 = vpack.c.bf16 %v790_v6, %v790_v6  ;;  %v804_v19 = vadd.f32 %v1440_v56, %v765_v7  ;;  %v1203_v28 = vpop.f32.mrb[12].mxu0  ;;  %v292_v38 = vld [vmem:[#allocation2 + $0x68] sm:$0xff] }
  0xff   : > { %682 = vst.msk [vmem:[#allocation2 + $0x58] sm:$0xff] %vm246_vm1, %v649_v60  ;;  %698 = vst.msk [vmem:[#allocation2 + $0xd8] sm:$0xff] %vm246_vm1, %v665_v3  ;;  %v791_v20 = vadd.f32 %v1440_v56, %v752_v8  ;;  %v766_v21 = vmul.f32 %v1435_v46, %v727_v16  ;;  %v1160_v24 = vpack.c.bf16 %v806_v12, %v806_v12  ;;  %v1219_v35 = vpop.f32.mrb[12].mxu1  ;;  %v559_v36 = vpop.f32.mrb[13].mxu0  ;;  %v308_v47 = vld [vmem:[#allocation2 + $0xe8] sm:$0xff] }
 0x100   : > { %680 = vst.msk [vmem:[#allocation2 + $0x48] sm:$0xff] %vm246_vm1, %v647_v4  ;;  %696 = vst.msk [vmem:[#allocation2 + $0xc8] sm:$0xff] %vm246_vm1, %v663_v11  ;;  %v1142_v25 = vpack.c.bf16 %v788_v13, %v788_v13  ;;  %v807_v26 = vadd.f32 %v1440_v56, %v768_v14  ;;  %v789_v27 = vadd.f32 %v1440_v56, %v750_v15  ;;  %v623_v44 = vpop.f32.mrb[13].mxu1  ;;  %v1204_v45 = vpop.f32.mrb[14].mxu0 }
 0x101   : > { %951 = vst.msk [vmem:[%s1458_s7 + $0x18] sm:$0xf] %vm944_vm3, %v1144_v18  ;;  %v1158_v31 = vpack.c.bf16 %v804_v19, %v804_v19  ;;  %v1145_v32 = vpack.c.bf16 %v791_v20, %v791_v20  ;;  %v805_v33 = vadd.f32 %v1440_v56, %v766_v21  ;;  %v652_v34 = vadd.f32 %v1203_v28, %v293_v17  ;;  %v1220_v54 = vpop.f32.mrb[14].mxu1  ;;  %v562_v55 = vpop.f32.mrb[15].mxu0 }
 0x102   : > { %967 = vst.msk [vmem:[%s1458_s7 + $0x58] sm:$0xf] %vm944_vm3, %v1160_v24  ;;  %949 = vst.msk [vmem:[%s1458_s7 + $0x10] sm:$0xf] %vm944_vm3, %v1142_v25  ;;  %v1161_v39 = vpack.c.bf16 %v807_v26, %v807_v26  ;;  %v1143_v40 = vpack.c.bf16 %v789_v27, %v789_v27  ;;  %v716_v41 = vld [vmem:[#allocation2 + $0x50] sm:$0xff]  ;;  %v668_v42 = vadd.f32 %v1219_v35, %v309_v22  ;;  %v626_v63 = vpop.f32.mrb[15].mxu1 }
 0x103   : > { %v650_v43 = vadd.f32 %v559_v36, %v291_v23  ;;  %965 = vst.msk [vmem:[%s1458_s7 + $0x50] sm:$0xf] %vm944_vm3, %v1158_v31  ;;  %952 = vst.msk [vmem:[%s1458_s7 + $0x1c] sm:$0xf] %vm944_vm3, %v1145_v32  ;;  %v1159_v48 = vpack.c.bf16 %v805_v33, %v805_v33  ;;  %v755_v49 = vmul.f32 %v1435_v46, %v716_v41  ;;  %v732_v50 = vld [vmem:[#allocation2 + $0xd0] sm:$0xff] }
 0x104   : > { %v714_v51 = vld [vmem:[#allocation2 + $0x40] sm:$0xff]  ;;  %685 = vst.msk [vmem:[#allocation2 + $0x70] sm:$0xff] %vm246_vm1, %v652_v34  ;;  %v666_v52 = vadd.f32 %v623_v44, %v307_v29  ;;  %v653_v53 = vadd.f32 %v1204_v45, %v294_v30  ;;  %v771_v57 = vmul.f32 %v1435_v46, %v732_v50  ;;  %701 = vst.msk [vmem:[#allocation2 + $0xf0] sm:$0xff] %vm246_vm1, %v668_v42 }
 0x105   : > { %968 = vst.msk [vmem:[%s1458_s7 + $0x5c] sm:$0xf] %vm944_vm3, %v1161_v39  ;;  %950 = vst.msk [vmem:[%s1458_s7 + $0x14] sm:$0xf] %vm944_vm3, %v1143_v40  ;;  %v753_v58 = vmul.f32 %v1435_v46, %v714_v51  ;;  %v730_v59 = vld [vmem:[#allocation2 + $0xc0] sm:$0xff]  ;;  %v669_v61 = vadd.f32 %v1220_v54, %v310_v37  ;;  %v651_v62 = vadd.f32 %v562_v55, %v292_v38 }
 0x106   : > { %v717_v60 = vld [vmem:[#allocation2 + $0x58] sm:$0xff]  ;;  %683 = vst.msk [vmem:[#allocation2 + $0x60] sm:$0xff] %vm246_vm1, %v650_v43  ;;  %v794_v0 = vadd.f32 %v1440_v56, %v755_v49  ;;  %v769_v1 = vmul.f32 %v1435_v46, %v730_v59  ;;  %699 = vst.msk [vmem:[#allocation2 + $0xe0] sm:$0xff] %vm246_vm1, %v666_v52  ;;  %v667_v5 = vadd.f32 %v626_v63, %v308_v47 }
 0x107   : > { %966 = vst.msk [vmem:[%s1458_s7 + $0x54] sm:$0xf] %vm944_vm3, %v1159_v48  ;;  %v756_v2 = vmul.f32 %v1435_v46, %v717_v60  ;;  %v733_v3 = vld [vmem:[#allocation2 + $0xd8] sm:$0xff]  ;;  %v715_v4 = vld [vmem:[#allocation2 + $0x48] sm:$0xff]  ;;  %v810_v6 = vadd.f32 %v1440_v56, %v771_v57  ;;  %v792_v7 = vadd.f32 %v1440_v56, %v753_v58 }
 0x108   : > { %686 = vst.msk [vmem:[#allocation2 + $0x78] sm:$0xff] %vm246_vm1, %v653_v53  ;;  %v772_v8 = vmul.f32 %v1435_v46, %v733_v3  ;;  %v754_v9 = vmul.f32 %v1435_v46, %v715_v4  ;;  %v731_v10 = vld [vmem:[#allocation2 + $0xc8] sm:$0xff]  ;;  %702 = vst.msk [vmem:[#allocation2 + $0xf8] sm:$0xff] %vm246_vm1, %v669_v61  ;;  %v1148_v11 = vpack.c.bf16 %v794_v0, %v794_v0 }
 0x109   : > { %684 = vst.msk [vmem:[#allocation2 + $0x68] sm:$0xff] %vm246_vm1, %v651_v62  ;;  %v808_v12 = vadd.f32 %v1440_v56, %v769_v1  ;;  %v795_v13 = vadd.f32 %v1440_v56, %v756_v2  ;;  %v770_v14 = vmul.f32 %v1435_v46, %v731_v10  ;;  %700 = vst.msk [vmem:[#allocation2 + $0xe8] sm:$0xff] %vm246_vm1, %v667_v5 }
 0x10a   : > { %v1164_v15 = vpack.c.bf16 %v810_v6, %v810_v6  ;;  %v1146_v16 = vpack.c.bf16 %v792_v7, %v792_v7  ;;  %v811_v17 = vadd.f32 %v1440_v56, %v772_v8  ;;  %v793_v18 = vadd.f32 %v1440_v56, %v754_v9  ;;  %955 = vst.msk [vmem:[%s1458_s7 + $0x28] sm:$0xf] %vm944_vm3, %v1148_v11 }
 0x10b   : > { %v1162_v19 = vpack.c.bf16 %v808_v12, %v808_v12  ;;  %v1149_v20 = vpack.c.bf16 %v795_v13, %v795_v13  ;;  %v809_v21 = vadd.f32 %v1440_v56, %v770_v14  ;;  %v720_v24 = vld [vmem:[#allocation2 + $0x70] sm:$0xff] }
 0x10c   : > { %971 = vst.msk [vmem:[%s1458_s7 + $0x68] sm:$0xf] %vm944_vm3, %v1164_v15  ;;  %953 = vst.msk [vmem:[%s1458_s7 + $0x20] sm:$0xf] %vm944_vm3, %v1146_v16  ;;  %v1165_v22 = vpack.c.bf16 %v811_v17, %v811_v17  ;;  %v1147_v23 = vpack.c.bf16 %v793_v18, %v793_v18  ;;  %v759_v26 = vmul.f32 %v1435_v46, %v720_v24  ;;  %v736_v27 = vld [vmem:[#allocation2 + $0xf0] sm:$0xff] }
 0x10d   : > { %969 = vst.msk [vmem:[%s1458_s7 + $0x60] sm:$0xf] %vm944_vm3, %v1162_v19  ;;  %956 = vst.msk [vmem:[%s1458_s7 + $0x2c] sm:$0xf] %vm944_vm3, %v1149_v20  ;;  %v1163_v25 = vpack.c.bf16 %v809_v21, %v809_v21  ;;  %v718_v28 = vld [vmem:[#allocation2 + $0x60] sm:$0xff]  ;;  %v775_v29 = vmul.f32 %v1435_v46, %v736_v27 }
 0x10e   : > { %972 = vst.msk [vmem:[%s1458_s7 + $0x6c] sm:$0xf] %vm944_vm3, %v1165_v22  ;;  %954 = vst.msk [vmem:[%s1458_s7 + $0x24] sm:$0xf] %vm944_vm3, %v1147_v23  ;;  %v757_v30 = vmul.f32 %v1435_v46, %v718_v28  ;;  %v734_v31 = vld [vmem:[#allocation2 + $0xe0] sm:$0xff]  ;;  %v798_v33 = vadd.f32 %v1440_v56, %v759_v26 }
 0x10f   : > { %v721_v32 = vld [vmem:[#allocation2 + $0x78] sm:$0xff]  ;;  %970 = vst.msk [vmem:[%s1458_s7 + $0x64] sm:$0xf] %vm944_vm3, %v1163_v25  ;;  %v773_v34 = vmul.f32 %v1435_v46, %v734_v31  ;;  %v814_v38 = vadd.f32 %v1440_v56, %v775_v29 }
 0x110   : > { %v760_v35 = vmul.f32 %v1435_v46, %v721_v32  ;;  %v737_v36 = vld [vmem:[#allocation2 + $0xf8] sm:$0xff]  ;;  %v719_v37 = vld [vmem:[#allocation2 + $0x68] sm:$0xff]  ;;  %v796_v39 = vadd.f32 %v1440_v56, %v757_v30  ;;  %v1152_v43 = vpack.c.bf16 %v798_v33, %v798_v33 }
 0x111   : > { %v776_v40 = vmul.f32 %v1435_v46, %v737_v36  ;;  %v758_v41 = vmul.f32 %v1435_v46, %v719_v37  ;;  %v735_v42 = vld [vmem:[#allocation2 + $0xe8] sm:$0xff]  ;;  %v812_v44 = vadd.f32 %v1440_v56, %v773_v34  ;;  %v1168_v48 = vpack.c.bf16 %v814_v38, %v814_v38 }
 0x112   : > { %v799_v45 = vadd.f32 %v1440_v56, %v760_v35  ;;  %v774_v47 = vmul.f32 %v1435_v46, %v735_v42  ;;  %v1150_v49 = vpack.c.bf16 %v796_v39, %v796_v39  ;;  %959 = vst.msk [vmem:[%s1458_s7 + $0x38] sm:$0xf] %vm944_vm3, %v1152_v43 }
 0x113   : > { %v815_v50 = vadd.f32 %v1440_v56, %v776_v40  ;;  %v797_v51 = vadd.f32 %v1440_v56, %v758_v41  ;;  %v1166_v52 = vpack.c.bf16 %v812_v44, %v812_v44  ;;  %975 = vst.msk [vmem:[%s1458_s7 + $0x78] sm:$0xf] %vm944_vm3, %v1168_v48 }
 0x114   : > { %v1153_v53 = vpack.c.bf16 %v799_v45, %v799_v45  ;;  %v813_v54 = vadd.f32 %v1440_v56, %v774_v47  ;;  %957 = vst.msk [vmem:[%s1458_s7 + $0x30] sm:$0xf] %vm944_vm3, %v1150_v49 }
 0x115   : > { %v1169_v46 = vpack.c.bf16 %v815_v50, %v815_v50  ;;  %v1151_v55 = vpack.c.bf16 %v797_v51, %v797_v51  ;;  %973 = vst.msk [vmem:[%s1458_s7 + $0x70] sm:$0xf] %vm944_vm3, %v1166_v52 }
 0x116   : > { %960 = vst.msk [vmem:[%s1458_s7 + $0x3c] sm:$0xf] %vm944_vm3, %v1153_v53  ;;  %v1167_v57 = vpack.c.bf16 %v813_v54, %v813_v54 }
 0x117   : > { %976 = vst.msk [vmem:[%s1458_s7 + $0x7c] sm:$0xf] %vm944_vm3, %v1169_v46  ;;  %958 = vst.msk [vmem:[%s1458_s7 + $0x34] sm:$0xf] %vm944_vm3, %v1151_v55 }
 0x118   : > { %974 = vst.msk [vmem:[%s1458_s7 + $0x74] sm:$0xf] %vm944_vm3, %v1167_v57 }
 0x119 PF: > { %s14_s17 = sadd.s32 1, %s1288_s17   ;;  %s1616_s15 = smov %s1284_s16 }
 0x11a   : > { %p11_p5 = scmp.ge.s32.totalorder %s14_s17, 4   ;;  %s1617_s16 = smov %s1619_s18 }
 0x11c   :  { %13 = sbr.rel (!%p11_p5) target bundleno = 2 (0x2), region = 77 }

// kernel: _lambda_.5
= control target key start
LH: loop header
LB: loop body
LE: loop exit
PB: predicated region body
PF: predicated region fallthrough
CT: control target
= control target key end

     0   :  { %s2719_s15 = smov 0   ;;  %s2721_s16 = smov 0   ;;  %s3642_s0 = inlined_call_operand.vmem [shape: bf16[2,18,18,4], index: 0, kind: input, shape index: {}]   ;;  %s3643_s1 = inlined_call_operand.vmem [shape: bf16[3,3,4,8], index: 1, kind: input, shape index: {}]   ;;  %s3644_s2 = inlined_call_operand.vmem [shape: f32[1,8], index: 2, kind: input, shape index: {}]   ;;  %s3645_s3 = inlined_call_operand.vmem [shape: f32[1,8], index: 3, kind: input, shape index: {}]   ;;  %s3646_s4 = inlined_call_operand.vmem [shape: bf16[2,256,8], index: 4, kind: output, shape index: {}]  }
   0x1   :  { %s2723_s17 = smov 0   ;;  %s2725_s18 = smov 0  }
   0x2   :  { %s2727_s19 = smov 0  }
   0x3 LB: > { %s23_s20 = sadd.s32 1, %s2684_s17  ;;  %s26_s21 = sadd.s32 1, %s2688_s18  ;;  %s2692_s19 = sphi %s2727_s19, %s14_s19   ;;  %s2688_s18 = sphi %s2725_s18, %s3654_s18   ;;  %s2684_s17 = sphi %s2723_s17, %s3653_s17   ;;  %s2680_s16 = sphi %s2721_s16, %s3652_s16   ;;  %s2676_s15 = sphi %s2719_s15, %s3651_s15  }
   0x4   : > { %p24_p0 = scmp.ge.s32.totalorder %s23_s20, 3  ;;  %p2180_p1 = scmp.ge.s32.totalorder %s2692_s19, 1 }
   0x5   : > { %p184_p2 = scmp.lt.s32.totalorder %s2692_s19, 7 }
   0x6   : > { %s3656_s20 = smov (%p24_p0, %s23_s20), 0  ;;  %s3658_s21 = smov (!%p24_p0, %s26_s21), %s2688_s18 }
   0x7   : > { %p185_p3 = pnand %p2180_p1, %p184_p2  ;;  %p28_p4 = scmp.ge.s32.totalorder %s3658_s21, 2 }
   0x8   : > { %p220_p5 = scmp.lt.s32.totalorder (!%p185_p3), %s2676_s15, 2  ;;  %p215_p6 = scmp.lt.s32.totalorder (!%p185_p3), %s2680_s16, 1  ;;  %vm769_vm0 = vcmask (!%p185_p3), 1041408   ;;  %vm720_vm1 = vcmask (!%p185_p3), 31744   ;;  %vm283_vm2 = vsmask.f32 (!%p185_p3), 3328 }
   0x9   : > { %s3660_s21 = smov (%p28_p4, %s3658_s21), 0  ;;  %188 = sbr.rel (%p185_p3) target bundleno = 425 (0x1a9), region = 36 }
   0xa   : > { %s2340_s22 = smul.u32 (!%p185_p3), 12, %s2676_s15  ;;  %vm284_vm3 = vsmask.f32 (!%p185_p3), 7440  ;;  %vm1242_vm5 = vcmask (!%p185_p3), 1042432   ;;  %vm1243_vm6 = vcmask (!%p185_p3), 1046532   ;;  %p2300_p7 = scmp.ne.s32.totalorder (!%p185_p3), %s2676_s15, 0 }
   0xb   : > { %vm2845_vm4 = vmor (!%p185_p3), %vm283_vm2, %vm284_vm3 }
   0xc   : > { %vm2942_vm7 = vmor (!%p185_p3), %vm1242_vm5, %vm1243_vm6 }
  0x10   : > { %s221_s23 = scalar_select %p220_p5, %s2676_s15, 2 }
  0x11   : > { %s3662_s16 = smov (!%p215_p6, %s2680_s16), 1  ;;  %vm1655_vm8 = vcmask (!%p2300_p7), 64512  }
  0x12   : > { %s2597_s24 = smul.u32 6, %s221_s23  ;;  %s2339_s26 = sshll.u32 %s3662_s16, 7 }
  0x13   : > { %s2596_s25 = smul.u32 216, %s3662_s16  ;;  %s2760_s6 = scalar_lea.vmem %s3646_s4, %s2339_s26 }
  0x14   : > { %s224_s29 = scalar_lea.vmem %s3643_s1, %s2597_s24 }
  0x15   : > { %v282_v0 = vld [vmem:[%s224_s29] sm:$0x3]  ;;  %s219_s9 = scalar_lea.vmem %s3642_s0, %s2596_s25  ;;  %v2186_v1 = vld [vmem:[%s224_s29 + $0x2] sm:$0x3]  ;;  %v2267_v2 = vld [vmem:[%s224_s29 + $0x4] sm:$0x3] }
  0x16   : > { %2593 = vmatprep.subr.msk.bf16.mxu0 %vm769_vm0, %v282_v0  ;;  %v2767_v3 = vsel %vm769_vm0, %v282_v0, 0  ;;  %s2769_s10 = scalar_lea.vmem %s219_s9, %s2340_s22  ;;  %2592 = vmatprep.subr.msk.bf16.mxu1 %vm769_vm0, %v2186_v1  ;;  %v771_v4 = vsel %vm769_vm0, %v2186_v1, 0  ;;  %v1456_v5 = vsel %vm769_vm0, %v2267_v2, 0 }
  0x17   : > { %2459 = vmatpush3.bf16.msra.mxu0 %v2767_v3  ;;  %v2776_v6 = vld [vmem:[%s2769_s10] sm:$0xf]  ;;  %v2779_v7 = vld [vmem:[%s2769_s10 + $0x4] sm:$0xf]  ;;  %v2782_v8 = vld [vmem:[%s2769_s10 + $0xc] sm:$0xf]  ;;  %2425 = vmatpush3.bf16.msra.mxu1 %v771_v4 }
  0x18   : > { %v287_v9 = vshrl.u32 %v2776_v6, 16  ;;  %v290_v10 = vshll.u32 %v2776_v6, 16  ;;  %v300_v11 = vshrl.u32 %v2779_v7, 16  ;;  %v2219_v12 = vcombine.low %v2776_v6, %v2779_v7  ;;  %v2790_v13 = vld [vmem:[%s2769_s10 + $0x10] sm:$0xf]  ;;  %2594 = vmatprep.subr.msk.bf16.mxu1 %vm769_vm0, %v282_v0  ;;  %2595 = vmatprep.subr.msk.bf16.mxu0 %vm769_vm0, %v2267_v2 }
  0x19   : > { %v2251_v14 = vrot.slane %v2776_v6, 9  ;;  %v1247_v15 = vrot.slane %v2779_v7, 5  ;;  %v311_v16 = vshrl.u32 %v2782_v8, 16  ;;  %v314_v17 = vshll.u32 %v2782_v8, 16  ;;  %v2799_v18 = vld [vmem:[%s2769_s10 + $0x18] sm:$0xf] }
  0x1a   : > { %2460 = vmatprep.mubr.msk.bf16.mxu0 %vm720_vm1, %v2219_v12  ;;  %v324_v19 = vshrl.u32 %v2790_v13, 16  ;;  %v2220_v20 = vcombine.low %v2782_v8, %v2790_v13  ;;  %v2252_v21 = vrot.slane %v2782_v8, 9  ;;  %v1254_v22 = vrot.slane %v2790_v13, 5  ;;  %v2808_v23 = vld [vmem:[%s2769_s10 + $0x1c] sm:$0xf] }
  0x1b   : > { %v2812_v24 = vrot.slane %v1247_v15, 4  ;;  %v335_v25 = vshrl.u32 %v2799_v18, 16  ;;  %v338_v26 = vshll.u32 %v2799_v18, 16  ;;  %v348_v27 = vshrl.u32 %v2808_v23, 16  ;;  %v2818_v28 = vld [vmem:[%s2769_s10 + $0x8] sm:$0x1] }
  0x1c   : > { %2461 = vmatmul.mubr.msk.bf16.vlgmr.msra.gmra.mrb[0].mxu0 %vm720_vm1, %v2220_v20  ;;  %v2823_v29 = vrot.slane %v1254_v22, 4  ;;  %v2221_v30 = vcombine.low %v2799_v18, %v2808_v23  ;;  %v289_v31 = vrot.slane %v287_v9, 4  ;;  %v292_v32 = vrot.slane %v290_v10, 5  ;;  %v2828_v33 = vld [vmem:[%s2769_s10 + $0x24] sm:$0xf] }
  0x1d   : > { %v296_v34 = vshll.u32 %v2779_v7, 16  ;;  %v302_v35 = vrot.slane %v300_v11, 4  ;;  %v306_v36 = vshll.u32 %v2818_v28, 16  ;;  %v1250_v37 = vrot.slane %v2818_v28, 5  ;;  %v2834_v38 = vld [vmem:[%s2769_s10 + $0x28] sm:$0xf]  ;;  %2493 = vmatpush3.bf16.msra.mxu0 %v1456_v5 }
  0x1e   : > { %2464 = vmatprep.mubr.msk.bf16.mxu0 %vm720_vm1, %v2221_v30  ;;  %v293_v39 = vor.u32 %v292_v32, %v289_v31  ;;  %v359_v40 = vshrl.u32 %v2828_v33, 16  ;;  %v362_v41 = vshll.u32 %v2828_v33, 16  ;;  %v372_v42 = vshrl.u32 %v2834_v38, 16  ;;  %v2841_v43 = vld [vmem:[%s2769_s10 + $0x14] sm:$0x1] }
  0x1f   : > { %v298_v45 = vrot.slane %v296_v34, 5  ;;  %v308_v46 = vrot.slane %v306_v36, 5  ;;  %v2222_v47 = vcombine.low %v2828_v33, %v2834_v38  ;;  %v313_v48 = vrot.slane %v311_v16, 4  ;;  %v2852_v49 = vld [vmem:[%s2769_s10 + $0x30] sm:$0xf] }
  0x20   : > { %v294_v50 = vrot.slane %v293_v39, 4  ;;  %v316_v51 = vrot.slane %v314_v17, 5  ;;  %v320_v52 = vshll.u32 %v2790_v13, 16  ;;  %v326_v53 = vrot.slane %v324_v19, 4  ;;  %v2856_v54 = vld [vmem:[%s2769_s10 + $0x34] sm:$0xf] }
  0x21   : > { %v303_v55 = vor.u32 %v302_v35, %v298_v45  ;;  %v330_v56 = vshll.u32 %v2841_v43, 16  ;;  %v1257_v57 = vrot.slane %v2841_v43, 5  ;;  %v383_v58 = vshrl.u32 %v2852_v49, 16  ;;  %v2865_v63 = vld [vmem:[%s2769_s10 + $0x20] sm:$0x1] }
  0x22   : > { %v299_v59 = vsel %vm2845_vm4, %v294_v50, %v298_v45  ;;  %v317_v60 = vor.u32 %v316_v51, %v313_v48  ;;  %v322_v61 = vrot.slane %v320_v52, 5  ;;  %v386_v62 = vshll.u32 %v2852_v49, 16  ;;  %v2872_v12 = vld [vmem:[%s2769_s10 + $0x3c] sm:$0xf]  ;;  %v2880_v30 = vld [vmem:[%s2769_s10 + $0x40] sm:$0xf] }
  0x23   : > { %v304_v0 = vrot.slane %v303_v55, 4  ;;  %v332_v1 = vrot.slane %v330_v56, 5  ;;  %v396_v2 = vshrl.u32 %v2856_v54, 16  ;;  %v2223_v4 = vcombine.low %v2852_v49, %v2856_v54  ;;  %v2887_v39 = vld [vmem:[%s2769_s10 + $0x2c] sm:$0x1] }
  0x24   : > { %2465 = vmatmul.mubr.msk.bf16.gmra.mrb[4].mxu0 %vm720_vm1, %v2222_v47  ;;  %v318_v5 = vrot.slane %v317_v60, 4  ;;  %v327_v9 = vor.u32 %v326_v53, %v322_v61  ;;  %v337_v10 = vrot.slane %v335_v25, 4  ;;  %v340_v11 = vrot.slane %v338_v26, 5  ;;  %v2896_v50 = vld [vmem:[%s2769_s10 + $0x48] sm:$0xf] }
  0x25   : > { %v309_v16 = vsel %vm2845_vm4, %v304_v0, %v308_v46  ;;  %2468 = vmatprep.mubr.msk.bf16.mxu0 %vm720_vm1, %v2223_v4  ;;  %v344_v17 = vshll.u32 %v2808_v23, 16  ;;  %v350_v19 = vrot.slane %v348_v27, 4  ;;  %v354_v20 = vshll.u32 %v2865_v63, 16  ;;  %v2899_v56 = vld [vmem:[%s2769_s10 + $0x4c] sm:$0xf] }
  0x26   : > { %v2187_v31 = vcombine.low %v299_v59, %v309_v16  ;;  %v323_v25 = vsel %vm2845_vm4, %v318_v5, %v322_v61  ;;  %v328_v26 = vrot.slane %v327_v9, 4  ;;  %v341_v32 = vor.u32 %v340_v11, %v337_v10  ;;  %v2917_v16 = vld [vmem:[%s2769_s10 + $0x54] sm:$0xf] }
  0x27   : > { %v346_v34 = vrot.slane %v344_v17, 5  ;;  %v356_v35 = vrot.slane %v354_v20, 5  ;;  %v407_v36 = vshrl.u32 %v2872_v12, 16  ;;  %v410_v27 = vshll.u32 %v2872_v12, 16 }
  0x28   : > { %2426 = vmatprep.mubr.msk.bf16.mxu1 %vm720_vm1, %v2187_v31  ;;  %v333_v45 = vsel %vm2845_vm4, %v328_v26, %v332_v1  ;;  %v342_v46 = vrot.slane %v341_v32, 4  ;;  %v420_v47 = vshrl.u32 %v2880_v30, 16  ;;  %v2224_v48 = vcombine.low %v2872_v12, %v2880_v30 }
  0x29   : > { %v2188_v51 = vcombine.low %v323_v25, %v333_v45  ;;  %v351_v52 = vor.u32 %v350_v19, %v346_v34  ;;  %v361_v53 = vrot.slane %v359_v40, 4  ;;  %v364_v55 = vrot.slane %v362_v41, 5  ;;  %v2909_v41 = vld [vmem:[%s2769_s10 + $0x38] sm:$0x1] }
  0x2a   : > { %v347_v59 = vsel %vm2845_vm4, %v342_v46, %v346_v34  ;;  %v368_v60 = vshll.u32 %v2834_v38, 16  ;;  %v374_v61 = vrot.slane %v372_v42, 4  ;;  %v378_v0 = vshll.u32 %v2887_v39, 16 }
  0x2b   : > { %2427 = vmatmul.mubr.msk.bf16.vlgmr.msra.gmra.mrb[0].mxu1 %vm720_vm1, %v2188_v51  ;;  %v352_v1 = vrot.slane %v351_v52, 4  ;;  %v365_v4 = vor.u32 %v364_v55, %v361_v53  ;;  %v431_v5 = vshrl.u32 %v2896_v50, 16  ;;  %v434_v40 = vshll.u32 %v2896_v50, 16  ;;  %v2936_v53 = vld [vmem:[%s2769_s10 + $0x44] sm:$0x1] }
  0x2c   : > { %2527 = vmatpush3.bf16.msra.mxu1 %v2767_v3  ;;  %2469 = vmatmul.mubr.msk.bf16.gmra.mrb[8].mxu0 %vm720_vm1, %v2224_v48  ;;  %v370_v9 = vrot.slane %v368_v60, 5  ;;  %v380_v10 = vrot.slane %v378_v0, 5  ;;  %v444_v42 = vshrl.u32 %v2899_v56, 16  ;;  %v2225_v11 = vcombine.low %v2896_v50, %v2899_v56  ;;  %v2924_v3 = vld [vmem:[%s2769_s10 + $0x58] sm:$0xf] }
  0x2d   : > { %v357_v17 = vsel %vm2845_vm4, %v352_v1, %v356_v35  ;;  %v366_v19 = vrot.slane %v365_v4, 4  ;;  %v385_v20 = vrot.slane %v383_v58, 4  ;;  %v388_v31 = vrot.slane %v386_v62, 5 }
  0x2e   : > { %v2189_v25 = vcombine.low %v347_v59, %v357_v17  ;;  %v375_v26 = vor.u32 %v374_v61, %v370_v9  ;;  %2472 = vmatprep.mubr.msk.bf16.mxu0 %vm720_vm1, %v2225_v11  ;;  %v392_v32 = vshll.u32 %v2856_v54, 16  ;;  %v398_v34 = vrot.slane %v396_v2, 4 }
  0x2f   : > { %v371_v45 = vsel %vm2845_vm4, %v366_v19, %v370_v9  ;;  %v389_v46 = vor.u32 %v388_v31, %v385_v20  ;;  %v402_v35 = vshll.u32 %v2909_v41, 16  ;;  %v455_v48 = vshrl.u32 %v2917_v16, 16 }
  0x30   : > { %2430 = vmatprep.mubr.msk.bf16.mxu1 %vm720_vm1, %v2189_v25  ;;  %v376_v58 = vrot.slane %v375_v26, 4  ;;  %v394_v62 = vrot.slane %v392_v32, 5  ;;  %v458_v51 = vshll.u32 %v2917_v16, 16  ;;  %v468_v52 = vshrl.u32 %v2924_v3, 16  ;;  %v2966_v26 = vld [vmem:[%s2769_s10 + $0x50] sm:$0x1] }
  0x31   : > { %v390_v55 = vrot.slane %v389_v46, 4  ;;  %v404_v2 = vrot.slane %v402_v35, 5  ;;  %v2226_v59 = vcombine.low %v2917_v16, %v2924_v3  ;;  %v409_v60 = vrot.slane %v407_v36, 4 }
  0x32   : > { %v381_v0 = vsel %vm2845_vm4, %v376_v58, %v380_v10  ;;  %v399_v1 = vor.u32 %v398_v34, %v394_v62  ;;  %v412_v4 = vrot.slane %v410_v27, 5  ;;  %v416_v9 = vshll.u32 %v2880_v30, 16 }
  0x33   : > { %v2190_v11 = vcombine.low %v371_v45, %v381_v0  ;;  %v395_v17 = vsel %vm2845_vm4, %v390_v55, %v394_v62  ;;  %v422_v19 = vrot.slane %v420_v47, 4  ;;  %v426_v36 = vshll.u32 %v2936_v53, 16  ;;  %v2988_v55 = vld [vmem:[%s2769_s10 + $0x5c] sm:$0x1] }
  0x34   : > { %v400_v20 = vrot.slane %v399_v1, 4  ;;  %2473 = vmatmul.mubr.msk.bf16.gmra.mrb[12].mxu0 %vm720_vm1, %v2226_v59  ;;  %v413_v31 = vor.u32 %v412_v4, %v409_v60  ;;  %v418_v25 = vrot.slane %v416_v9, 5  ;;  %v1248_v27 = vsel %vm2942_vm7, %v2251_v14, %v1247_v15  ;;  %v2996_v1 = vld [vmem:[%s2769_s10 + $0x60] sm:$0xf] }
  0x35   : > { %2431 = vmatmul.mubr.msk.bf16.gmra.mrb[4].mxu1 %vm720_vm1, %v2190_v11  ;;  %v428_v10 = vrot.slane %v426_v36, 5  ;;  %v1251_v47 = vsel %vm2942_vm7, %v2812_v24, %v1250_v37  ;;  %v433_v32 = vrot.slane %v431_v5, 4  ;;  %v436_v34 = vrot.slane %v434_v40, 5 }
  0x36   : > { %v405_v7 = vsel %vm2845_vm4, %v400_v20, %v404_v2  ;;  %v414_v6 = vrot.slane %v413_v31, 4  ;;  %v423_v45 = vor.u32 %v422_v19, %v418_v25  ;;  %v2268_v14 = vcombine.low %v1248_v27, %v1251_v47  ;;  %v3005_v20 = vld [vmem:[%s2769_s10 + $0x64] sm:$0xf] }
  0x37   : > { %v2191_v15 = vcombine.low %v395_v17, %v405_v7  ;;  %v437_v46 = vor.u32 %v436_v34, %v433_v32  ;;  %v440_v35 = vshll.u32 %v2899_v56, 16  ;;  %v446_v28 = vrot.slane %v444_v42, 4 }
  0x38   : > { %v419_v58 = vsel %vm2845_vm4, %v414_v6, %v418_v25  ;;  %v424_v24 = vrot.slane %v423_v45, 4  ;;  %2494 = vmatprep.mubr.msk.bf16.mxu0 %vm720_vm1, %v2268_v14  ;;  %v450_v37 = vshll.u32 %v2966_v26, 16  ;;  %v1255_v5 = vsel %vm2942_vm7, %v2252_v21, %v1254_v22 }
  0x39   : > { %2434 = vmatprep.mubr.msk.bf16.mxu1 %vm720_vm1, %v2191_v15  ;;  %v438_v40 = vrot.slane %v437_v46, 4  ;;  %v442_v42 = vrot.slane %v440_v35, 5  ;;  %v1258_v62 = vsel %vm2942_vm7, %v2823_v29, %v1257_v57  ;;  %v457_v2 = vrot.slane %v455_v48, 4 }
  0x3a   : > { %v429_v8 = vsel %vm2845_vm4, %v424_v24, %v428_v10  ;;  %v452_v13 = vrot.slane %v450_v37, 5  ;;  %v2269_v59 = vcombine.low %v1255_v5, %v1258_v62  ;;  %v460_v60 = vrot.slane %v458_v51, 5 }
  0x3b   : > { %v2192_v21 = vcombine.low %v419_v58, %v429_v8  ;;  %v443_v22 = vsel %vm2845_vm4, %v438_v40, %v442_v42  ;;  %v447_v0 = vor.u32 %v446_v28, %v442_v42  ;;  %v464_v43 = vshll.u32 %v2924_v3, 16  ;;  %v3026_v58 = vld [vmem:[%s2769_s10 + $0x6c] sm:$0xf]  ;;  %v3032_v42 = vld [vmem:[%s2769_s10 + $0x70] sm:$0xf] }
  0x3c   : > { %2495 = vmatmul.mubr.msk.bf16.vlgmr.msra.gmra.mrb[0].mxu0 %vm720_vm1, %v2269_v59  ;;  %v461_v29 = vor.u32 %v460_v60, %v457_v2  ;;  %v470_v57 = vrot.slane %v468_v52, 4  ;;  %v474_v48 = vshll.u32 %v2988_v55, 16  ;;  %v2253_v4 = vrot.slane %v2799_v18, 9  ;;  %v3037_v59 = vld [vmem:[%s2769_s10 + $0x74] sm:$0x1] }
  0x3d   : > { %2435 = vmatmul.mubr.msk.bf16.gmra.mrb[8].mxu1 %vm720_vm1, %v2192_v21  ;;  %v448_v51 = vrot.slane %v447_v0, 4  ;;  %v466_v9 = vrot.slane %v464_v43, 5  ;;  %v1261_v11 = vrot.slane %v2808_v23, 5  ;;  %v1264_v17 = vrot.slane %v2865_v63, 5  ;;  %v3014_v23 = vld [vmem:[%s2769_s10 + $0x68] sm:$0x1] }
  0x3e   : > { %v462_v19 = vrot.slane %v461_v29, 4  ;;  %v476_v36 = vrot.slane %v474_v48, 5  ;;  %v479_v31 = vshrl.u32 %v2996_v1, 16  ;;  %v482_v52 = vshll.u32 %v2996_v1, 16 }
  0x3f   : > { %v453_v25 = vsel %vm2845_vm4, %v448_v51, %v452_v13  ;;  %v471_v18 = vor.u32 %v470_v57, %v466_v9  ;;  %v1262_v27 = vsel %vm2942_vm7, %v2253_v4, %v1261_v11  ;;  %v1263_v10 = vrot.slane %v1261_v11, 4 }
  0x40   : > { %v2193_v63 = vcombine.low %v443_v22, %v453_v25  ;;  %v467_v47 = vsel %vm2845_vm4, %v462_v19, %v466_v9  ;;  %v481_v32 = vrot.slane %v479_v31, 4  ;;  %v484_v34 = vrot.slane %v482_v52, 5  ;;  %v3052_v19 = vld [vmem:[%s2769_s10 + $0x78] sm:$0xf] }
  0x41   : > { %v472_v7 = vrot.slane %v471_v18, 4  ;;  %v1265_v6 = vsel %vm2942_vm7, %v1263_v10, %v1264_v17  ;;  %v488_v45 = vshll.u32 %v3005_v20, 16  ;;  %v492_v14 = vshrl.u32 %v3005_v20, 16  ;;  %v3059_v18 = vld [vmem:[%s2769_s10 + $0x7c] sm:$0xf] }
  0x42   : > { %2438 = vmatprep.mubr.msk.bf16.mxu1 %vm720_vm1, %v2193_v63  ;;  %v2270_v15 = vcombine.low %v1262_v27, %v1265_v6  ;;  %v485_v46 = vor.u32 %v484_v34, %v481_v32  ;;  %v498_v35 = vshll.u32 %v3014_v23, 16  ;;  %v2254_v28 = vrot.slane %v2828_v33, 9  ;;  %v3064_v32 = vld [vmem:[%s2769_s10 + $0x80] sm:$0x1] }
  0x43   : > { %v477_v24 = vsel %vm2845_vm4, %v472_v7, %v476_v36  ;;  %v490_v37 = vrot.slane %v488_v45, 5  ;;  %v494_v5 = vrot.slane %v492_v14, 4  ;;  %v1268_v40 = vrot.slane %v2834_v38, 5 }
  0x44   : > { %v2194_v62 = vcombine.low %v467_v47, %v477_v24  ;;  %2498 = vmatprep.mubr.msk.bf16.mxu0 %vm720_vm1, %v2270_v15  ;;  %v486_v2 = vrot.slane %v485_v46, 4  ;;  %v500_v8 = vrot.slane %v498_v35, 5  ;;  %v1271_v13 = vrot.slane %v2887_v39, 5  ;;  %v3077_v24 = vld [vmem:[%s2769_s10 + $0x84] sm:$0xf] }
  0x45   : > { %v495_v33 = vor.u32 %v494_v5, %v490_v37  ;;  %v1269_v60 = vsel %vm2942_vm7, %v2254_v28, %v1268_v40  ;;  %v1270_v21 = vrot.slane %v1268_v40, 4  ;;  %v503_v22 = vshrl.u32 %v3026_v58, 16 }
  0x46   : > { %2439 = vmatmul.mubr.msk.bf16.gmra.mrb[12].mxu1 %vm720_vm1, %v2194_v62  ;;  %v491_v38 = vsel %vm2845_vm4, %v486_v2, %v490_v37  ;;  %v506_v0 = vshll.u32 %v3026_v58, 16  ;;  %v512_v39 = vshll.u32 %v3032_v42, 16  ;;  %v516_v43 = vshrl.u32 %v3032_v42, 16  ;;  %v3084_v2 = vld [vmem:[%s2769_s10 + $0x88] sm:$0xf] }
  0x47   : > { %v496_v29 = vrot.slane %v495_v33, 4  ;;  %v1272_v57 = vsel %vm2942_vm7, %v1270_v21, %v1271_v13  ;;  %v505_v48 = vrot.slane %v503_v22, 4  ;;  %v522_v4 = vshll.u32 %v3037_v59, 16 }
  0x48   : > { %v2271_v51 = vcombine.low %v1269_v60, %v1272_v57  ;;  %v508_v9 = vrot.slane %v506_v0, 5  ;;  %v514_v11 = vrot.slane %v512_v39, 5  ;;  %v518_v17 = vrot.slane %v516_v43, 4 }
  0x49   : > { %v501_v36 = vsel %vm2845_vm4, %v496_v29, %v500_v8  ;;  %v524_v31 = vrot.slane %v522_v4, 5  ;;  %v2255_v52 = vrot.slane %v2852_v49, 9  ;;  %v1275_v25 = vrot.slane %v2856_v54, 5  ;;  %v3093_v29 = vld [vmem:[%s2769_s10 + $0x8c] sm:$0x1] }
  0x4a   : > { %v2195_v27 = vcombine.low %v491_v38, %v501_v36  ;;  %2499 = vmatmul.mubr.msk.bf16.gmra.mrb[4].mxu0 %vm720_vm1, %v2271_v51  ;;  %v509_v10 = vor.u32 %v508_v9, %v505_v48  ;;  %v519_v63 = vor.u32 %v518_v17, %v514_v11  ;;  %v1278_v47 = vrot.slane %v2909_v41, 5 }
  0x4b   : > { %v1276_v34 = vsel %vm2942_vm7, %v2255_v52, %v1275_v25  ;;  %v1277_v7 = vrot.slane %v1275_v25, 4  ;;  %v527_v49 = vshrl.u32 %v3052_v19, 16  ;;  %v530_v54 = vshll.u32 %v3052_v19, 16 }
  0x4c   : > { %2442 = vmatprep.mubr.msk.bf16.mxu1 %vm720_vm1, %v2195_v27  ;;  %v510_v6 = vrot.slane %v509_v10, 4  ;;  %v520_v45 = vrot.slane %v519_v63, 4  ;;  %v536_v14 = vshll.u32 %v3059_v18, 16  ;;  %v540_v15 = vshrl.u32 %v3059_v18, 16  ;;  %v3107_v27 = vld [vmem:[%s2769_s10 + $0x90] sm:$0xf] }
  0x4d   : > { %v1279_v41 = vsel %vm2942_vm7, %v1277_v7, %v1278_v47  ;;  %v529_v46 = vrot.slane %v527_v49, 4  ;;  %v532_v35 = vrot.slane %v530_v54, 5  ;;  %v546_v28 = vshll.u32 %v3064_v32, 16  ;;  %v3113_v7 = vld [vmem:[%s2769_s10 + $0x94] sm:$0xf] }
  0x4e   : > { %v515_v37 = vsel %vm2845_vm4, %v510_v6, %v514_v11  ;;  %v525_v5 = vsel %vm2845_vm4, %v520_v45, %v524_v31  ;;  %v2272_v40 = vcombine.low %v1276_v34, %v1279_v41  ;;  %v538_v62 = vrot.slane %v536_v14, 5  ;;  %v3117_v14 = vld [vmem:[%s2769_s10 + $0x98] sm:$0x1] }
  0x4f   : > { %v2196_v8 = vcombine.low %v515_v37, %v525_v5  ;;  %v533_v13 = vor.u32 %v532_v35, %v529_v46  ;;  %v542_v33 = vrot.slane %v540_v15, 4  ;;  %v548_v60 = vrot.slane %v546_v28, 5 }
  0x50   : > { %2502 = vmatprep.mubr.msk.bf16.mxu0 %vm720_vm1, %v2272_v40  ;;  %v2256_v21 = vrot.slane %v2872_v12, 9  ;;  %v1282_v22 = vrot.slane %v2880_v30, 5  ;;  %v1285_v38 = vrot.slane %v2936_v53, 5  ;;  %v551_v0 = vshrl.u32 %v3077_v24, 16 }
  0x51   : > { %2443 = vmatmul.mubr.msk.bf16.gmra.mrb[16].mxu1 %vm720_vm1, %v2196_v8  ;;  %v534_v39 = vrot.slane %v533_v13, 4  ;;  %v543_v43 = vor.u32 %v542_v33, %v538_v62  ;;  %v554_v57 = vshll.u32 %v3077_v24, 16  ;;  %v560_v48 = vshll.u32 %v3084_v2, 16  ;;  %v3133_v8 = vld [vmem:[%s2769_s10 + $0x9c] sm:$0xf] }
  0x52   : > { %v1283_v12 = vsel %vm2942_vm7, %v2256_v21, %v1282_v22  ;;  %v1284_v4 = vrot.slane %v1282_v22, 4  ;;  %v553_v30 = vrot.slane %v551_v0, 4  ;;  %v564_v53 = vshrl.u32 %v3084_v2, 16  ;;  %v3138_v22 = vld [vmem:[%s2769_s10 + $0xa0] sm:$0xf] }
  0x53   : > { %v539_v51 = vsel %vm2845_vm4, %v534_v39, %v538_v62  ;;  %v544_v9 = vrot.slane %v543_v43, 4  ;;  %v556_v11 = vrot.slane %v554_v57, 5  ;;  %v562_v17 = vrot.slane %v560_v48, 5 }
  0x54   : > { %v1286_v36 = vsel %vm2942_vm7, %v1284_v4, %v1285_v38  ;;  %v566_v31 = vrot.slane %v564_v53, 4  ;;  %v570_v52 = vshll.u32 %v3093_v29, 16  ;;  %v2257_v25 = vrot.slane %v2896_v50, 9  ;;  %v3145_v4 = vld [vmem:[%s2769_s10 + $0xa4] sm:$0x1] }
  0x55   : > { %v549_v10 = vsel %vm2845_vm4, %v544_v9, %v548_v60  ;;  %v2273_v63 = vcombine.low %v1283_v12, %v1286_v36  ;;  %v557_v47 = vor.u32 %v556_v11, %v553_v30  ;;  %v1289_v34 = vrot.slane %v2899_v56, 5  ;;  %v3153_v11 = vld [vmem:[%s2769_s10 + $0xa8] sm:$0xf] }
  0x56   : > { %v2197_v49 = vcombine.low %v539_v51, %v549_v10  ;;  %v567_v54 = vor.u32 %v566_v31, %v562_v17  ;;  %v572_v6 = vrot.slane %v570_v52, 5  ;;  %v1292_v45 = vrot.slane %v2966_v26, 5 }
  0x57   : > { %2503 = vmatmul.mubr.msk.bf16.gmra.mrb[8].mxu0 %vm720_vm1, %v2273_v63  ;;  %v558_v50 = vrot.slane %v557_v47, 4  ;;  %v1290_v15 = vsel %vm2942_vm7, %v2257_v25, %v1289_v34  ;;  %v1291_v41 = vrot.slane %v1289_v34, 4  ;;  %v575_v56 = vshrl.u32 %v3107_v27, 16 }
  0x58   : > { %2446 = vmatprep.mubr.msk.bf16.mxu1 %vm720_vm1, %v2197_v49  ;;  %v568_v46 = vrot.slane %v567_v54, 4  ;;  %v578_v35 = vshll.u32 %v3107_v27, 16  ;;  %v584_v26 = vshll.u32 %v3113_v7, 16  ;;  %v588_v28 = vshrl.u32 %v3113_v7, 16  ;;  %v3163_v49 = vld [vmem:[%s2769_s10 + $0xac] sm:$0xf] }
  0x59   : > { %v563_v37 = vsel %vm2845_vm4, %v558_v50, %v562_v17  ;;  %v1293_v5 = vsel %vm2942_vm7, %v1291_v41, %v1292_v45  ;;  %v577_v40 = vrot.slane %v575_v56, 4  ;;  %v594_v62 = vshll.u32 %v3117_v14, 16  ;;  %v3169_v41 = vld [vmem:[%s2769_s10 + $0xb0] sm:$0x1]  ;;  %v3172_v56 = vld [vmem:[%s2769_s10 + $0xb4] sm:$0xf] }
  0x5a   : > { %v573_v13 = vsel %vm2845_vm4, %v568_v46, %v572_v6  ;;  %v2274_v33 = vcombine.low %v1290_v15, %v1293_v5  ;;  %v580_v60 = vrot.slane %v578_v35, 5  ;;  %v586_v21 = vrot.slane %v584_v26, 5 }
  0x5b   : > { %v2198_v38 = vcombine.low %v563_v37, %v573_v13  ;;  %v590_v0 = vrot.slane %v588_v28, 4  ;;  %v596_v39 = vrot.slane %v594_v62, 5  ;;  %v2258_v43 = vrot.slane %v2917_v16, 9 }
  0x5c   : > { %2506 = vmatprep.mubr.msk.bf16.mxu0 %vm720_vm1, %v2274_v33  ;;  %v581_v57 = vor.u32 %v580_v60, %v577_v40  ;;  %v1296_v48 = vrot.slane %v2924_v3, 5  ;;  %v1299_v12 = vrot.slane %v2988_v55, 5  ;;  %v599_v30 = vshrl.u32 %v3133_v8, 16  ;;  %v3181_v60 = vld [vmem:[%s2769_s10 + $0xb8] sm:$0xf] }
  0x5d   : > { %2447 = vmatmul.mubr.msk.bf16.gmra.mrb[20].mxu1 %vm720_vm1, %v2198_v38  ;;  %v591_v53 = vor.u32 %v590_v0, %v586_v21  ;;  %v602_v51 = vshll.u32 %v3133_v8, 16  ;;  %v608_v9 = vshll.u32 %v3138_v22, 16  ;;  %v612_v16 = vshrl.u32 %v3138_v22, 16 }
  0x5e   : > { %v582_v17 = vrot.slane %v581_v57, 4  ;;  %v1297_v3 = vsel %vm2942_vm7, %v2258_v43, %v1296_v48  ;;  %v1298_v55 = vrot.slane %v1296_v48, 4  ;;  %v601_v36 = vrot.slane %v599_v30, 4  ;;  %v3190_v48 = vld [vmem:[%s2769_s10 + $0xbc] sm:$0x1] }
  0x5f   : > { %v592_v31 = vrot.slane %v591_v53, 4  ;;  %v604_v52 = vrot.slane %v602_v51, 5  ;;  %v610_v25 = vrot.slane %v608_v9, 5  ;;  %v614_v10 = vrot.slane %v612_v16, 4 }
  0x60   : > { %v587_v63 = vsel %vm2845_vm4, %v582_v17, %v586_v21  ;;  %v1300_v47 = vsel %vm2942_vm7, %v1298_v55, %v1299_v12  ;;  %v618_v34 = vshll.u32 %v3145_v4, 16  ;;  %v623_v54 = vshrl.u32 %v3153_v11, 16 }
  0x61   : > { %v597_v6 = vsel %vm2845_vm4, %v592_v31, %v596_v39  ;;  %v2275_v45 = vcombine.low %v1297_v3, %v1300_v47  ;;  %v605_v50 = vor.u32 %v604_v52, %v601_v36  ;;  %v615_v15 = vor.u32 %v614_v10, %v610_v25 }
  0x62   : > { %v2199_v46 = vcombine.low %v587_v63, %v597_v6  ;;  %v620_v35 = vrot.slane %v618_v34, 5  ;;  %v625_v26 = vrot.slane %v623_v54, 4  ;;  %v626_v28 = vshll.u32 %v3153_v11, 16 }
  0x63   : > { %2507 = vmatmul.mubr.msk.bf16.gmra.mrb[12].mxu0 %vm720_vm1, %v2275_v45  ;;  %v606_v37 = vrot.slane %v605_v50, 4  ;;  %v616_v5 = vrot.slane %v615_v15, 4  ;;  %v632_v40 = vshll.u32 %v3163_v49, 16  ;;  %v636_v62 = vshrl.u32 %v3163_v49, 16 }
  0x64   : > { %2450 = vmatprep.mubr.msk.bf16.mxu1 %vm720_vm1, %v2199_v46  ;;  %v628_v13 = vrot.slane %v626_v28, 5  ;;  %v642_v33 = vshll.u32 %v3169_v41, 16  ;;  %v647_v21 = vshrl.u32 %v3172_v56, 16  ;;  %v650_v38 = vshll.u32 %v3172_v56, 16 }
  0x65   : > { %v611_v0 = vsel %vm2845_vm4, %v606_v37, %v610_v25  ;;  %v621_v39 = vsel %vm2845_vm4, %v616_v5, %v620_v35  ;;  %v634_v43 = vrot.slane %v632_v40, 5  ;;  %v638_v57 = vrot.slane %v636_v62, 4 }
  0x66   : > { %v2200_v12 = vcombine.low %v611_v0, %v621_v39  ;;  %v629_v30 = vor.u32 %v628_v13, %v625_v26  ;;  %v644_v53 = vrot.slane %v642_v33, 5  ;;  %v649_v51 = vrot.slane %v647_v21, 4 }
  0x67   : > { %v639_v9 = vor.u32 %v638_v57, %v634_v43  ;;  %v652_v16 = vrot.slane %v650_v38, 5  ;;  %v656_v17 = vshll.u32 %v3181_v60, 16  ;;  %v660_v3 = vshrl.u32 %v3181_v60, 16 }
  0x68   : > { %2451 = vmatmul.mubr.msk.bf16.gmra.mrb[24].mxu1 %vm720_vm1, %v2200_v12  ;;  %v630_v55 = vrot.slane %v629_v30, 4  ;;  %v666_v36 = vshll.u32 %v3190_v48, 16  ;;  %v2259_v31 = vrot.slane %v2996_v1, 9  ;;  %v1303_v52 = vrot.slane %v3005_v20, 5 }
  0x69   : > { %v640_v25 = vrot.slane %v639_v9, 4  ;;  %v653_v10 = vor.u32 %v652_v16, %v649_v51  ;;  %v658_v63 = vrot.slane %v656_v17, 5  ;;  %v662_v47 = vrot.slane %v660_v3, 4 }
  0x6a   : > { %v635_v34 = vsel %vm2845_vm4, %v630_v55, %v634_v43  ;;  %v668_v54 = vrot.slane %v666_v36, 5  ;;  %v1304_v6 = vsel %vm2942_vm7, %v2259_v31, %v1303_v52  ;;  %v1305_v45 = vrot.slane %v1303_v52, 4 }
  0x6b   : > { %v645_v50 = vsel %vm2845_vm4, %v640_v25, %v644_v53  ;;  %v654_v15 = vrot.slane %v653_v10, 4  ;;  %v663_v46 = vor.u32 %v662_v47, %v658_v63  ;;  %v1306_v35 = vrot.slane %v3014_v23, 5 }
  0x6c   : > { %v2201_v26 = vcombine.low %v635_v34, %v645_v50  ;;  %v2260_v28 = vrot.slane %v3026_v58, 9  ;;  %v1310_v37 = vrot.slane %v3032_v42, 5  ;;  %v1313_v5 = vrot.slane %v3037_v59, 5 }
  0x6d   : > { %v659_v40 = vsel %vm2845_vm4, %v654_v15, %v658_v63  ;;  %v664_v62 = vrot.slane %v663_v46, 4  ;;  %v1307_v13 = vsel %vm2942_vm7, %v1305_v45, %v1306_v35  ;;  %v2227_v38 = vcombine.low %v2996_v1, %v3005_v20 }
  0x6e   : > { %2454 = vmatprep.mubr.msk.bf16.mxu1 %vm720_vm1, %v2201_v26  ;;  %v2276_v33 = vcombine.low %v1304_v6, %v1307_v13  ;;  %v1311_v23 = vsel %vm2942_vm7, %v2260_v28, %v1310_v37  ;;  %v1312_v21 = vrot.slane %v1310_v37, 4  ;;  %v2261_v0 = vrot.slane %v3052_v19, 9 }
  0x6f   : > { %v669_v59 = vsel %vm2845_vm4, %v664_v62, %v668_v54  ;;  %v1317_v39 = vrot.slane %v3059_v18, 5  ;;  %v1320_v43 = vrot.slane %v3064_v32, 5  ;;  %v2262_v30 = vrot.slane %v3077_v24, 9 }
  0x70   : > { %v2202_v57 = vcombine.low %v659_v40, %v669_v59  ;;  %2510 = vmatprep.mubr.msk.bf16.mxu0 %vm720_vm1, %v2276_v33  ;;  %v1314_v12 = vsel %vm2942_vm7, %v1312_v21, %v1313_v5  ;;  %v1324_v53 = vrot.slane %v3084_v2, 5  ;;  %v1327_v51 = vrot.slane %v3093_v29, 5 }
  0x71   : > { %v2277_v1 = vcombine.low %v1311_v23, %v1314_v12  ;;  %v1318_v44 = vsel %vm2942_vm7, %v2261_v0, %v1317_v39  ;;  %v1319_v20 = vrot.slane %v1317_v39, 4  ;;  %v2263_v16 = vrot.slane %v3107_v27, 9 }
  0x72   : > { %2455 = vmatmul.mubr.msk.bf16.gmra.mrb[28].mxu1 %vm720_vm1, %v2202_v57  ;;  %v1326_v32 = vrot.slane %v1324_v53, 4  ;;  %v1331_v17 = vrot.slane %v3113_v7, 5  ;;  %v1334_v3 = vrot.slane %v3117_v14, 5  ;;  %v1325_v29 = vsel %vm2942_vm7, %v2262_v30, %v1324_v53 }
  0x73   : > { %2511 = vmatmul.mubr.msk.bf16.gmra.mrb[16].mxu0 %vm720_vm1, %v2277_v1  ;;  %2476 = vmatprep.mubr.msk.bf16.mxu1 %vm720_vm1, %v2227_v38  ;;  %v1321_v9 = vsel %vm2942_vm7, %v1319_v20, %v1320_v43  ;;  %v1338_v31 = vrot.slane %v3138_v22, 5  ;;  %v2228_v10 = vcombine.low %v3026_v58, %v3032_v42  ;;  %v2229_v14 = vcombine.low %v3052_v19, %v3059_v18 }
  0x74   : > { %v2278_v55 = vcombine.low %v1318_v44, %v1321_v9  ;;  %v1328_v36 = vsel %vm2942_vm7, %v1326_v32, %v1327_v51  ;;  %v1332_v52 = vsel %vm2942_vm7, %v2263_v16, %v1331_v17  ;;  %v1333_v25 = vrot.slane %v1331_v17, 4 }
  0x75   : > { %v2279_v63 = vcombine.low %v1325_v29, %v1328_v36  ;;  %v1345_v34 = vrot.slane %v3163_v49, 5  ;;  %v2264_v6 = vrot.slane %v3133_v8, 9  ;;  %v1340_v45 = vrot.slane %v1338_v31, 4 }
  0x76   : > { %2514 = vmatprep.mubr.msk.bf16.mxu0 %vm720_vm1, %v2278_v55  ;;  %v1335_v47 = vsel %vm2942_vm7, %v1333_v25, %v1334_v3  ;;  %v1341_v50 = vrot.slane %v3145_v4, 5  ;;  %v2265_v15 = vrot.slane %v3153_v11, 9  ;;  %v1348_v42 = vrot.slane %v3169_v41, 5 }
  0x77   : > { %v2280_v54 = vcombine.low %v1332_v52, %v1335_v47  ;;  %v1347_v58 = vrot.slane %v1345_v34, 4  ;;  %v1339_v19 = vsel %vm2942_vm7, %v2264_v6, %v1338_v31  ;;  %v1352_v4 = vrot.slane %v3181_v60, 5 }
  0x78   : > { %v1342_v18 = vsel %vm2942_vm7, %v1340_v45, %v1341_v50  ;;  %v1346_v46 = vsel %vm2942_vm7, %v2265_v15, %v1345_v34  ;;  %v2230_v35 = vcombine.low %v3077_v24, %v3084_v2  ;;  %v2231_v28 = vcombine.low %v3107_v27, %v3113_v7 }
  0x79   : > { %v1349_v41 = vsel %vm2942_vm7, %v1347_v58, %v1348_v42  ;;  %v2281_v26 = vcombine.low %v1339_v19, %v1342_v18  ;;  %v2266_v5 = vrot.slane %v3172_v56, 9  ;;  %v1354_v40 = vrot.slane %v1352_v4, 4 }
  0x7a   : > { %2477 = vmatmul.mubr.msk.bf16.vlgmr.msra.gmra.mrb[16].mxu1 %vm720_vm1, %v2228_v10  ;;  %v2282_v37 = vcombine.low %v1346_v46, %v1349_v41  ;;  %v1355_v62 = vrot.slane %v3190_v48, 5  ;;  %v2232_v27 = vcombine.low %v3133_v8, %v3138_v22  ;;  %v2233_v48 = vcombine.low %v3153_v11, %v3163_v49 }
  0x7b   : > { %2515 = vmatmul.mubr.msk.bf16.gmra.mrb[20].mxu0 %vm720_vm1, %v2279_v63  ;;  %2480 = vmatprep.mubr.msk.bf16.mxu1 %vm720_vm1, %v2229_v14  ;;  %v1353_v24 = vsel %vm2942_vm7, %v2266_v5, %v1352_v4  ;;  %v2234_v13 = vcombine.low %v3172_v56, %v3181_v60 }
  0x7c   : > { %2518 = vmatprep.mubr.msk.bf16.mxu0 %vm720_vm1, %v2280_v54  ;;  %v1356_v2 = vsel %vm2942_vm7, %v1354_v40, %v1355_v62 }
  0x7d   : > { %v2283_v7 = vcombine.low %v1353_v24, %v1356_v2 }
  0x82   : > { %2481 = vmatmul.mubr.msk.bf16.gmra.mrb[20].mxu1 %vm720_vm1, %v2230_v35 }
  0x83   : > { %2519 = vmatmul.mubr.msk.bf16.gmra.mrb[24].mxu0 %vm720_vm1, %v2281_v26  ;;  %2484 = vmatprep.mubr.msk.bf16.mxu1 %vm720_vm1, %v2231_v28 }
  0x84   : > { %2522 = vmatprep.mubr.msk.bf16.mxu0 %vm720_vm1, %v2282_v37 }
  0x8a   : > { %2485 = vmatmul.mubr.msk.bf16.gmra.mrb[24].mxu1 %vm720_vm1, %v2232_v27 }
  0x8b   : > { %2523 = vmatmul.mubr.msk.bf16.gmra.mrb[28].mxu0 %vm720_vm1, %v2283_v7  ;;  %2488 = vmatprep.mubr.msk.bf16.mxu1 %vm720_vm1, %v2233_v48 }
  0x92   : > { %2489 = vmatmul.mubr.msk.bf16.gmra.mrb[28].mxu1 %vm720_vm1, %v2234_v13 }
  0xfe   : > { %v2428_v61 = vpop.f32.mrb[0].mxu1 }
  0xff   : > { %v807_v33 = vpop.f32.mrb[1].mxu1 }
 0x100   : > { %v2429_v23 = vpop.f32.mrb[2].mxu1 }
 0x101   : > { %v810_v21 = vpop.f32.mrb[3].mxu1 }
 0x108   : > { %v2432_v8 = vpop.f32.mrb[4].mxu1 }
 0x109   : > { %v823_v22 = vpop.f32.mrb[5].mxu1 }
 0x10a   : > { %v2433_v38 = vpop.f32.mrb[6].mxu1 }
 0x10b   : > { %v826_v59 = vpop.f32.mrb[7].mxu1 }
 0x10f   : > { %v2496_v11 = vpop.f32.mrb[0].mxu0 }
 0x110   : > { %v2436_v49 = vpop.f32.mrb[8].mxu1  ;;  %v3294_v0 = vadd.f32 %v2496_v11, %v2428_v61  ;;  %v1492_v39 = vpop.f32.mrb[1].mxu0 }
 0x111   : > { %v839_v43 = vpop.f32.mrb[9].mxu1  ;;  %v3296_v57 = vadd.f32 %v1492_v39, %v807_v33  ;;  %v2497_v12 = vpop.f32.mrb[2].mxu0 }
 0x112   : > { %v2437_v56 = vpop.f32.mrb[10].mxu1  ;;  %v3298_v60 = vadd.f32 %v2497_v12, %v2429_v23  ;;  %v1495_v30 = vpop.f32.mrb[3].mxu0  ;;  %1658 = vst.msk [vmem:[#allocation2 + $0x10] sm:$0xff] (!%p2300_p7), %vm1655_vm8, %v3294_v0 }
 0x113   : > { %v842_v53 = vpop.f32.mrb[11].mxu1  ;;  %v3300_v1 = vadd.f32 %v1495_v30, %v810_v21  ;;  %1656 = vst.msk [vmem:[#allocation2] sm:$0xff] (!%p2300_p7), %vm1655_vm8, %v3296_v57 }
 0x114   : > { %1659 = vst.msk [vmem:[#allocation2 + $0x18] sm:$0xff] (!%p2300_p7), %vm1655_vm8, %v3298_v60 }
 0x115   : > { %1657 = vst.msk [vmem:[#allocation2 + $0x8] sm:$0xff] (!%p2300_p7), %vm1655_vm8, %v3300_v1 }
 0x119   : > { %v2440_v44 = vpop.f32.mrb[12].mxu1 }
 0x11a   : > { %v855_v20 = vpop.f32.mrb[13].mxu1 }
 0x11b   : > { %v2441_v51 = vpop.f32.mrb[14].mxu1 }
 0x11c   : > { %v858_v32 = vpop.f32.mrb[15].mxu1 }
 0x11d   : > { %v2500_v9 = vpop.f32.mrb[4].mxu0 }
 0x11e   : > { %v3302_v16 = vadd.f32 %v2500_v9, %v2432_v8  ;;  %v1508_v17 = vpop.f32.mrb[5].mxu0 }
 0x11f   : > { %v3304_v3 = vadd.f32 %v1508_v17, %v823_v22  ;;  %v2501_v55 = vpop.f32.mrb[6].mxu0 }
 0x120   : > { %v3306_v29 = vadd.f32 %v2501_v55, %v2433_v38  ;;  %v1511_v36 = vpop.f32.mrb[7].mxu0  ;;  %1662 = vst.msk [vmem:[#allocation2 + $0x30] sm:$0xff] (!%p2300_p7), %vm1655_vm8, %v3302_v16 }
 0x121   : > { %v3308_v31 = vadd.f32 %v1511_v36, %v826_v59  ;;  %1660 = vst.msk [vmem:[#allocation2 + $0x20] sm:$0xff] (!%p2300_p7), %vm1655_vm8, %v3304_v3 }
 0x122   : > { %1663 = vst.msk [vmem:[#allocation2 + $0x38] sm:$0xff] (!%p2300_p7), %vm1655_vm8, %v3306_v29 }
 0x123   : > { %1661 = vst.msk [vmem:[#allocation2 + $0x28] sm:$0xff] (!%p2300_p7), %vm1655_vm8, %v3308_v31 }
 0x12a   : > { %v2504_v52 = vpop.f32.mrb[8].mxu0 }
 0x12b   : > { %v3310_v25 = vadd.f32 %v2504_v52, %v2436_v49  ;;  %v1524_v10 = vpop.f32.mrb[9].mxu0 }
 0x12c   : > { %v3312_v63 = vadd.f32 %v1524_v10, %v839_v43  ;;  %v2505_v14 = vpop.f32.mrb[10].mxu0 }
 0x12d   : > { %v3314_v47 = vadd.f32 %v2505_v14, %v2437_v56  ;;  %v1527_v34 = vpop.f32.mrb[11].mxu0  ;;  %1666 = vst.msk [vmem:[#allocation2 + $0x50] sm:$0xff] (!%p2300_p7), %vm1655_vm8, %v3310_v25 }
 0x12e   : > { %v3316_v54 = vadd.f32 %v1527_v34, %v842_v53  ;;  %1664 = vst.msk [vmem:[#allocation2 + $0x40] sm:$0xff] (!%p2300_p7), %vm1655_vm8, %v3312_v63 }
 0x12f   : > { %1667 = vst.msk [vmem:[#allocation2 + $0x58] sm:$0xff] (!%p2300_p7), %vm1655_vm8, %v3314_v47 }
 0x130   : > { %1665 = vst.msk [vmem:[#allocation2 + $0x48] sm:$0xff] (!%p2300_p7), %vm1655_vm8, %v3316_v54 }
 0x136   : > { %v2508_v6 = vpop.f32.mrb[12].mxu0 }
 0x137   : > { %v3318_v45 = vadd.f32 %v2508_v6, %v2440_v44  ;;  %v1540_v50 = vpop.f32.mrb[13].mxu0 }
 0x138   : > { %v3320_v15 = vadd.f32 %v1540_v50, %v855_v20  ;;  %v2509_v58 = vpop.f32.mrb[14].mxu0 }
 0x139   : > { %v3322_v42 = vadd.f32 %v2509_v58, %v2441_v51  ;;  %v1543_v19 = vpop.f32.mrb[15].mxu0  ;;  %1670 = vst.msk [vmem:[#allocation2 + $0x70] sm:$0xff] (!%p2300_p7), %vm1655_vm8, %v3318_v45 }
 0x13a   : > { %v3324_v18 = vadd.f32 %v1543_v19, %v858_v32  ;;  %1668 = vst.msk [vmem:[#allocation2 + $0x60] sm:$0xff] (!%p2300_p7), %vm1655_vm8, %v3320_v15 }
 0x13b   : > { %1671 = vst.msk [vmem:[#allocation2 + $0x78] sm:$0xff] (!%p2300_p7), %vm1655_vm8, %v3322_v42 }
 0x13c   : > { %1669 = vst.msk [vmem:[#allocation2 + $0x68] sm:$0xff] (!%p2300_p7), %vm1655_vm8, %v3324_v18 }
 0x146   : > { %v2512_v4 = vpop.f32.mrb[16].mxu0 }
 0x147   : > { %v1556_v46 = vpop.f32.mrb[17].mxu0 }
 0x148   : > { %v2513_v41 = vpop.f32.mrb[18].mxu0 }
 0x149   : > { %v1559_v35 = vpop.f32.mrb[19].mxu0 }
 0x14d   : > { %v2478_v26 = vpop.f32.mrb[16].mxu1 }
 0x14e   : > { %v3326_v28 = vadd.f32 %v2512_v4, %v2478_v26  ;;  %v1163_v37 = vpop.f32.mrb[17].mxu1  ;;  %v2516_v5 = vpop.f32.mrb[20].mxu0 }
 0x14f   : > { %v3328_v40 = vadd.f32 %v1556_v46, %v1163_v37  ;;  %v2479_v62 = vpop.f32.mrb[18].mxu1  ;;  %v1572_v24 = vpop.f32.mrb[21].mxu0 }
 0x150   : > { %v3330_v2 = vadd.f32 %v2513_v41, %v2479_v62  ;;  %v1166_v27 = vpop.f32.mrb[19].mxu1  ;;  %v2517_v7 = vpop.f32.mrb[22].mxu0  ;;  %1674 = vst.msk [vmem:[#allocation2 + $0x90] sm:$0xff] (!%p2300_p7), %vm1655_vm8, %v3326_v28 }
 0x151   : > { %v3332_v48 = vadd.f32 %v1559_v35, %v1166_v27  ;;  %v1575_v13 = vpop.f32.mrb[23].mxu0  ;;  %1672 = vst.msk [vmem:[#allocation2 + $0x80] sm:$0xff] (!%p2300_p7), %vm1655_vm8, %v3328_v40 }
 0x152   : > { %1675 = vst.msk [vmem:[#allocation2 + $0x98] sm:$0xff] (!%p2300_p7), %vm1655_vm8, %v3330_v2 }
 0x153   : > { %1673 = vst.msk [vmem:[#allocation2 + $0x88] sm:$0xff] (!%p2300_p7), %vm1655_vm8, %v3332_v48 }
 0x155   : > { %v2482_v61 = vpop.f32.mrb[20].mxu1 }
 0x156   : > { %v3334_v33 = vadd.f32 %v2516_v5, %v2482_v61  ;;  %v1179_v23 = vpop.f32.mrb[21].mxu1  ;;  %v2520_v21 = vpop.f32.mrb[24].mxu0 }
 0x157   : > { %v3336_v8 = vadd.f32 %v1572_v24, %v1179_v23  ;;  %v2483_v22 = vpop.f32.mrb[22].mxu1  ;;  %v1588_v38 = vpop.f32.mrb[25].mxu0 }
 0x158   : > { %v3338_v59 = vadd.f32 %v2517_v7, %v2483_v22  ;;  %v1182_v11 = vpop.f32.mrb[23].mxu1  ;;  %v2521_v49 = vpop.f32.mrb[26].mxu0  ;;  %1678 = vst.msk [vmem:[#allocation2 + $0xb0] sm:$0xff] (!%p2300_p7), %vm1655_vm8, %v3334_v33 }
 0x159   : > { %v3340_v39 = vadd.f32 %v1575_v13, %v1182_v11  ;;  %v1591_v43 = vpop.f32.mrb[27].mxu0  ;;  %1676 = vst.msk [vmem:[#allocation2 + $0xa0] sm:$0xff] (!%p2300_p7), %vm1655_vm8, %v3336_v8 }
 0x15a   : > { %1679 = vst.msk [vmem:[#allocation2 + $0xb8] sm:$0xff] (!%p2300_p7), %vm1655_vm8, %v3338_v59 }
 0x15b   : > { %1677 = vst.msk [vmem:[#allocation2 + $0xa8] sm:$0xff] (!%p2300_p7), %vm1655_vm8, %v3340_v39 }
 0x15d   : > { %v2486_v12 = vpop.f32.mrb[24].mxu1 }
 0x15e   : > { %v3342_v56 = vadd.f32 %v2520_v21, %v2486_v12  ;;  %v1195_v30 = vpop.f32.mrb[25].mxu1  ;;  %v2524_v53 = vpop.f32.mrb[28].mxu0 }
 0x15f   : > { %v3344_v44 = vadd.f32 %v1588_v38, %v1195_v30  ;;  %v2487_v20 = vpop.f32.mrb[26].mxu1  ;;  %v1604_v51 = vpop.f32.mrb[29].mxu0 }
 0x160   : > { %v3346_v32 = vadd.f32 %v2521_v49, %v2487_v20  ;;  %v1198_v9 = vpop.f32.mrb[27].mxu1  ;;  %v2525_v17 = vpop.f32.mrb[30].mxu0  ;;  %1682 = vst.msk [vmem:[#allocation2 + $0xd0] sm:$0xff] (!%p2300_p7), %vm1655_vm8, %v3342_v56 }
 0x161   : > { %v3348_v55 = vadd.f32 %v1591_v43, %v1198_v9  ;;  %v1607_v36 = vpop.f32.mrb[31].mxu0  ;;  %1680 = vst.msk [vmem:[#allocation2 + $0xc0] sm:$0xff] (!%p2300_p7), %vm1655_vm8, %v3344_v44 }
 0x162   : > { %1683 = vst.msk [vmem:[#allocation2 + $0xd8] sm:$0xff] (!%p2300_p7), %vm1655_vm8, %v3346_v32 }
 0x163   : > { %1654 = sbr.rel (%p2300_p7) target bundleno = 364 (0x16c), region = 40  ;;  %1681 = vst.msk [vmem:[#allocation2 + $0xc8] sm:$0xff] (!%p2300_p7), %vm1655_vm8, %v3348_v55 }
 0x165   : > { %v2490_v52 = vpop.f32.mrb[28].mxu1 }
 0x166   : > { %v3350_v10 = vadd.f32 %v2524_v53, %v2490_v52  ;;  %v1211_v14 = vpop.f32.mrb[29].mxu1 }
 0x167   : > { %v3352_v34 = vadd.f32 %v1604_v51, %v1211_v14  ;;  %v2491_v6 = vpop.f32.mrb[30].mxu1 }
 0x168   : > { %v3354_v50 = vadd.f32 %v2525_v17, %v2491_v6  ;;  %v1214_v58 = vpop.f32.mrb[31].mxu1  ;;  %1686 = vst.msk [vmem:[#allocation2 + $0xf0] sm:$0xff] (!%p2300_p7), %vm1655_vm8, %v3350_v10 }
 0x169   : > { %v3356_v19 = vadd.f32 %v1607_v36, %v1214_v58  ;;  %1684 = vst.msk [vmem:[#allocation2 + $0xe0] sm:$0xff] (!%p2300_p7), %vm1655_vm8, %v3352_v34 }
 0x16a   : > { %1687 = vst.msk [vmem:[#allocation2 + $0xf8] sm:$0xff] %vm1655_vm8, %v3354_v50 }
 0x16b   : > { %1685 = vst.msk [vmem:[#allocation2 + $0xe8] sm:$0xff] %vm1655_vm8, %v3356_v19 }
 0x16c PF: > { %p2301_p8 = scmp.le.s32.totalorder %s2676_s15, 0 }
 0x16d   : > { %v1692_v4 = vld [vmem:[#allocation2] sm:$0xff] (!%p2301_p8)  ;;  %vm1756_vm9 = vcmask (!%p2301_p8), 64512   ;;  %v1693_v46 = vld [vmem:[#allocation2 + $0x8] sm:$0xff] (!%p2301_p8)  ;;  %v1694_v41 = vld [vmem:[#allocation2 + $0x10] sm:$0xff] (!%p2301_p8) }
 0x16e   : > { %1691 = sbr.rel (%p2301_p8) target bundleno = 384 (0x180), region = 44  ;;  %v1724_v35 = vadd.f32 (!%p2301_p8), %v3296_v57, %v1692_v4  ;;  %v1725_v26 = vadd.f32 (!%p2301_p8), %v3300_v1, %v1693_v46  ;;  %v1726_v37 = vadd.f32 (!%p2301_p8), %v3294_v0, %v1694_v41  ;;  %v1695_v5 = vld [vmem:[#allocation2 + $0x18] sm:$0xff] (!%p2301_p8)  ;;  %v1696_v62 = vld [vmem:[#allocation2 + $0x20] sm:$0xff] (!%p2301_p8)  ;;  %v1697_v24 = vld [vmem:[#allocation2 + $0x28] sm:$0xff] (!%p2301_p8) }
 0x16f   : > { %v1727_v27 = vadd.f32 (!%p2301_p8), %v3298_v60, %v1695_v5  ;;  %v1728_v7 = vadd.f32 (!%p2301_p8), %v3304_v3, %v1696_v62  ;;  %v1729_v13 = vadd.f32 (!%p2301_p8), %v3308_v31, %v1697_v24  ;;  %v1698_v61 = vld [vmem:[#allocation2 + $0x30] sm:$0xff] (!%p2301_p8)  ;;  %v1699_v23 = vld [vmem:[#allocation2 + $0x38] sm:$0xff] (!%p2301_p8)  ;;  %v1700_v21 = vld [vmem:[#allocation2 + $0x40] sm:$0xff] (!%p2301_p8) }
 0x170   : > { %1757 = vst.msk [vmem:[#allocation2] sm:$0xff] (!%p2301_p8), %vm1756_vm9, %v1724_v35  ;;  %1758 = vst.msk [vmem:[#allocation2 + $0x8] sm:$0xff] (!%p2301_p8), %vm1756_vm9, %v1725_v26  ;;  %v1730_v0 = vadd.f32 (!%p2301_p8), %v3302_v16, %v1698_v61  ;;  %v1731_v57 = vadd.f32 (!%p2301_p8), %v3306_v29, %v1699_v23  ;;  %v1732_v1 = vadd.f32 (!%p2301_p8), %v3312_v63, %v1700_v21  ;;  %v1701_v60 = vld [vmem:[#allocation2 + $0x48] sm:$0xff] (!%p2301_p8)  ;;  %v1702_v22 = vld [vmem:[#allocation2 + $0x50] sm:$0xff] (!%p2301_p8) }
 0x171   : > { %1759 = vst.msk [vmem:[#allocation2 + $0x10] sm:$0xff] (!%p2301_p8), %vm1756_vm9, %v1726_v37  ;;  %v1703_v3 = vld [vmem:[#allocation2 + $0x58] sm:$0xff] (!%p2301_p8)  ;;  %1760 = vst.msk [vmem:[#allocation2 + $0x18] sm:$0xff] (!%p2301_p8), %vm1756_vm9, %v1727_v27  ;;  %v1733_v31 = vadd.f32 (!%p2301_p8), %v3316_v54, %v1701_v60  ;;  %v1734_v38 = vadd.f32 (!%p2301_p8), %v3310_v25, %v1702_v22  ;;  %v1704_v16 = vld [vmem:[#allocation2 + $0x60] sm:$0xff] (!%p2301_p8) }
 0x172   : > { %1761 = vst.msk [vmem:[#allocation2 + $0x20] sm:$0xff] (!%p2301_p8), %vm1756_vm9, %v1728_v7  ;;  %1762 = vst.msk [vmem:[#allocation2 + $0x28] sm:$0xff] (!%p2301_p8), %vm1756_vm9, %v1729_v13  ;;  %v1735_v11 = vadd.f32 (!%p2301_p8), %v3314_v47, %v1703_v3  ;;  %v1705_v49 = vld [vmem:[#allocation2 + $0x68] sm:$0xff] (!%p2301_p8)  ;;  %v1706_v29 = vld [vmem:[#allocation2 + $0x70] sm:$0xff] (!%p2301_p8)  ;;  %v1736_v63 = vadd.f32 (!%p2301_p8), %v3320_v15, %v1704_v16 }
 0x173   : > { %1763 = vst.msk [vmem:[#allocation2 + $0x30] sm:$0xff] (!%p2301_p8), %vm1756_vm9, %v1730_v0  ;;  %1764 = vst.msk [vmem:[#allocation2 + $0x38] sm:$0xff] (!%p2301_p8), %vm1756_vm9, %v1731_v57  ;;  %v1737_v43 = vadd.f32 (!%p2301_p8), %v3324_v18, %v1705_v49  ;;  %v1738_v12 = vadd.f32 (!%p2301_p8), %v3318_v45, %v1706_v29  ;;  %v1707_v54 = vld [vmem:[#allocation2 + $0x78] sm:$0xff] (!%p2301_p8)  ;;  %v1708_v30 = vld [vmem:[#allocation2 + $0x80] sm:$0xff] (!%p2301_p8) }
 0x174   : > { %1765 = vst.msk [vmem:[#allocation2 + $0x40] sm:$0xff] (!%p2301_p8), %vm1756_vm9, %v1732_v1  ;;  %v1709_v25 = vld [vmem:[#allocation2 + $0x88] sm:$0xff] (!%p2301_p8)  ;;  %1766 = vst.msk [vmem:[#allocation2 + $0x48] sm:$0xff] (!%p2301_p8), %vm1756_vm9, %v1733_v31  ;;  %v1739_v47 = vadd.f32 (!%p2301_p8), %v3322_v42, %v1707_v54  ;;  %v1740_v53 = vadd.f32 (!%p2301_p8), %v3328_v40, %v1708_v30  ;;  %v1710_v15 = vld [vmem:[#allocation2 + $0x90] sm:$0xff] (!%p2301_p8) }
 0x175   : > { %1767 = vst.msk [vmem:[#allocation2 + $0x50] sm:$0xff] %vm1756_vm9, %v1734_v38  ;;  %1768 = vst.msk [vmem:[#allocation2 + $0x58] sm:$0xff] %vm1756_vm9, %v1735_v11  ;;  %v1741_v20 = vadd.f32 %v3332_v48, %v1709_v25  ;;  %v1711_v51 = vld [vmem:[#allocation2 + $0x98] sm:$0xff]  ;;  %v1712_v18 = vld [vmem:[#allocation2 + $0xa0] sm:$0xff]  ;;  %v1742_v45 = vadd.f32 %v3326_v28, %v1710_v15 }
 0x176   : > { %1769 = vst.msk [vmem:[#allocation2 + $0x60] sm:$0xff] %vm1756_vm9, %v1736_v63  ;;  %1770 = vst.msk [vmem:[#allocation2 + $0x68] sm:$0xff] %vm1756_vm9, %v1737_v43  ;;  %v1743_v9 = vadd.f32 %v3330_v2, %v1711_v51  ;;  %v1744_v17 = vadd.f32 %v3336_v8, %v1712_v18  ;;  %v1713_v42 = vld [vmem:[#allocation2 + $0xa8] sm:$0xff]  ;;  %v1714_v36 = vld [vmem:[#allocation2 + $0xb0] sm:$0xff] }
 0x177   : > { %1771 = vst.msk [vmem:[#allocation2 + $0x70] sm:$0xff] %vm1756_vm9, %v1738_v12  ;;  %v1715_v40 = vld [vmem:[#allocation2 + $0xb8] sm:$0xff]  ;;  %1772 = vst.msk [vmem:[#allocation2 + $0x78] sm:$0xff] %vm1756_vm9, %v1739_v47  ;;  %v1745_v48 = vadd.f32 %v3340_v39, %v1713_v42  ;;  %v1746_v52 = vadd.f32 %v3334_v33, %v1714_v36  ;;  %v1716_v28 = vld [vmem:[#allocation2 + $0xc0] sm:$0xff] }
 0x178   : > { %1773 = vst.msk [vmem:[#allocation2 + $0x80] sm:$0xff] %vm1756_vm9, %v1740_v53  ;;  %1774 = vst.msk [vmem:[#allocation2 + $0x88] sm:$0xff] %vm1756_vm9, %v1741_v20  ;;  %v1747_v14 = vadd.f32 %v3338_v59, %v1715_v40  ;;  %v1717_v6 = vld [vmem:[#allocation2 + $0xc8] sm:$0xff]  ;;  %v1718_v2 = vld [vmem:[#allocation2 + $0xd0] sm:$0xff]  ;;  %v1748_v8 = vadd.f32 %v3344_v44, %v1716_v28 }
 0x179   : > { %1775 = vst.msk [vmem:[#allocation2 + $0x90] sm:$0xff] %vm1756_vm9, %v1742_v45  ;;  %1776 = vst.msk [vmem:[#allocation2 + $0x98] sm:$0xff] %vm1756_vm9, %v1743_v9  ;;  %v1749_v58 = vadd.f32 %v3348_v55, %v1717_v6  ;;  %v1750_v4 = vadd.f32 %v3342_v56, %v1718_v2  ;;  %v1719_v39 = vld [vmem:[#allocation2 + $0xd8] sm:$0xff]  ;;  %v1720_v46 = vld [vmem:[#allocation2 + $0xe0] sm:$0xff] }
 0x17a   : > { %1777 = vst.msk [vmem:[#allocation2 + $0xa0] sm:$0xff] %vm1756_vm9, %v1744_v17  ;;  %v1721_v33 = vld [vmem:[#allocation2 + $0xe8] sm:$0xff]  ;;  %1778 = vst.msk [vmem:[#allocation2 + $0xa8] sm:$0xff] %vm1756_vm9, %v1745_v48  ;;  %v1751_v59 = vadd.f32 %v3346_v32, %v1719_v39  ;;  %v1752_v41 = vadd.f32 %v3352_v34, %v1720_v46  ;;  %v1722_v44 = vld [vmem:[#allocation2 + $0xf0] sm:$0xff] }
 0x17b   : > { %1779 = vst.msk [vmem:[#allocation2 + $0xb0] sm:$0xff] %vm1756_vm9, %v1746_v52  ;;  %1780 = vst.msk [vmem:[#allocation2 + $0xb8] sm:$0xff] %vm1756_vm9, %v1747_v14  ;;  %v1753_v35 = vadd.f32 %v3356_v19, %v1721_v33  ;;  %v1723_v26 = vld [vmem:[#allocation2 + $0xf8] sm:$0xff]  ;;  %v1754_v56 = vadd.f32 %v3350_v10, %v1722_v44 }
 0x17c   : > { %1781 = vst.msk [vmem:[#allocation2 + $0xc0] sm:$0xff] %vm1756_vm9, %v1748_v8  ;;  %1782 = vst.msk [vmem:[#allocation2 + $0xc8] sm:$0xff] %vm1756_vm9, %v1749_v58  ;;  %v1755_v55 = vadd.f32 %v3354_v50, %v1723_v26 }
 0x17d   : > { %1783 = vst.msk [vmem:[#allocation2 + $0xd0] sm:$0xff] %vm1756_vm9, %v1750_v4  ;;  %1784 = vst.msk [vmem:[#allocation2 + $0xd8] sm:$0xff] %vm1756_vm9, %v1751_v59 }
 0x17e   : > { %1785 = vst.msk [vmem:[#allocation2 + $0xe0] sm:$0xff] %vm1756_vm9, %v1752_v41  ;;  %1786 = vst.msk [vmem:[#allocation2 + $0xe8] sm:$0xff] %vm1756_vm9, %v1753_v35 }
 0x17f   : > { %1787 = vst.msk [vmem:[#allocation2 + $0xf0] sm:$0xff] %vm1756_vm9, %v1754_v56  ;;  %1788 = vst.msk [vmem:[#allocation2 + $0xf8] sm:$0xff] %vm1756_vm9, %v1755_v55 }
 0x180 PF: > { %p2302_p9 = scmp.ne.s32.totalorder %s2676_s15, 2 }
 0x181   : > { %v3492_v10 = vld [vmem:[%s3644_s2] ss:$0 sm:$0xff] (!%p2302_p9)  ;;  %vm2063_vm10 = vcmask (!%p2302_p9), 60416   ;;  %v1806_v36 = vld [vmem:[#allocation2 + $0x68] sm:$0xff] (!%p2302_p9)  ;;  %v1807_v40 = vld [vmem:[#allocation2 + $0x70] sm:$0xff] (!%p2302_p9) }
 0x182   : > { %1792 = sbr.rel (%p2302_p9) target bundleno = 425 (0x1a9), region = 48  ;;  %v1793_v32 = vld [vmem:[#allocation2] sm:$0xff] (!%p2302_p9)  ;;  %v1794_v19 = vld [vmem:[#allocation2 + $0x8] sm:$0xff] (!%p2302_p9)  ;;  %v1808_v6 = vld [vmem:[#allocation2 + $0x78] sm:$0xff] (!%p2302_p9)  ;;  %v1845_v33 = vmul.f32 (!%p2302_p9), %v3492_v10, %v1806_v36  ;;  %v1846_v59 = vmul.f32 (!%p2302_p9), %v3492_v10, %v1807_v40 }
 0x183   : > { %v3497_v34 = vld [vmem:[%s3645_s3] ss:$0 sm:$0xff] (!%p2302_p9)  ;;  %v1832_v50 = vmul.f32 (!%p2302_p9), %v3492_v10, %v1793_v32  ;;  %v1795_v37 = vld [vmem:[#allocation2 + $0x10] sm:$0xff] (!%p2302_p9)  ;;  %v1796_v5 = vld [vmem:[#allocation2 + $0x18] sm:$0xff] (!%p2302_p9)  ;;  %v1833_v62 = vmul.f32 (!%p2302_p9), %v3492_v10, %v1794_v19  ;;  %v1847_v26 = vmul.f32 (!%p2302_p9), %v3492_v10, %v1808_v6 }
 0x184   : > { %v1834_v24 = vmul.f32 (!%p2302_p9), %v3492_v10, %v1795_v37  ;;  %v1835_v27 = vmul.f32 (!%p2302_p9), %v3492_v10, %v1796_v5  ;;  %v1797_v7 = vld [vmem:[#allocation2 + $0x20] sm:$0xff] (!%p2302_p9)  ;;  %v1798_v13 = vld [vmem:[#allocation2 + $0x28] sm:$0xff] (!%p2302_p9)  ;;  %v1884_v32 = vadd.f32 (!%p2302_p9), %v3497_v34, %v1845_v33 }
 0x185   : > { %v1799_v61 = vld [vmem:[#allocation2 + $0x30] sm:$0xff] (!%p2302_p9)  ;;  %v1871_v23 = vadd.f32 (!%p2302_p9), %v3497_v34, %v1832_v50  ;;  %v1836_v21 = vmul.f32 (!%p2302_p9), %v3492_v10, %v1797_v7  ;;  %v1837_v0 = vmul.f32 (!%p2302_p9), %v3492_v10, %v1798_v13  ;;  %v1800_v1 = vld [vmem:[#allocation2 + $0x38] sm:$0xff] (!%p2302_p9)  ;;  %v1872_v60 = vadd.f32 (!%p2302_p9), %v3497_v34, %v1833_v62  ;;  %v1805_v42 = vld [vmem:[#allocation2 + $0x60] sm:$0xff] (!%p2302_p9) }
 0x186   : > { %v1838_v57 = vmul.f32 (!%p2302_p9), %v3492_v10, %v1799_v61  ;;  %v1873_v22 = vadd.f32 (!%p2302_p9), %v3497_v34, %v1834_v24  ;;  %v1874_v3 = vadd.f32 (!%p2302_p9), %v3497_v34, %v1835_v27  ;;  %v1839_v31 = vmul.f32 (!%p2302_p9), %v3492_v10, %v1800_v1  ;;  %v1801_v54 = vld [vmem:[#allocation2 + $0x40] sm:$0xff] (!%p2302_p9)  ;;  %v1802_v20 = vld [vmem:[#allocation2 + $0x48] sm:$0xff] (!%p2302_p9) }
 0x187   : > { %v1903_v38 = vmax.f32 (!%p2302_p9), %v1871_v23, 0.0  ;;  %v1875_v11 = vadd.f32 (!%p2302_p9), %v3497_v34, %v1836_v21  ;;  %v1876_v16 = vadd.f32 (!%p2302_p9), %v3497_v34, %v1837_v0  ;;  %v1904_v29 = vmax.f32 (!%p2302_p9), %v1872_v60, 0.0  ;;  %v1803_v15 = vld [vmem:[#allocation2 + $0x50] sm:$0xff] (!%p2302_p9)  ;;  %v1804_v51 = vld [vmem:[#allocation2 + $0x58] sm:$0xff] (!%p2302_p9)  ;;  %v1809_v24 = vld [vmem:[#allocation2 + $0x80] sm:$0xff] (!%p2302_p9) }
 0x188   : > { %v1877_v49 = vadd.f32 (!%p2302_p9), %v3497_v34, %v1838_v57  ;;  %v1905_v63 = vmax.f32 (!%p2302_p9), %v1873_v22, 0.0  ;;  %v1906_v43 = vmax.f32 (!%p2302_p9), %v1874_v3, 0.0  ;;  %v1878_v12 = vadd.f32 (!%p2302_p9), %v3497_v34, %v1839_v31  ;;  %v1810_v23 = vld [vmem:[#allocation2 + $0x88] sm:$0xff] (!%p2302_p9)  ;;  %v1811_v21 = vld [vmem:[#allocation2 + $0x90] sm:$0xff] (!%p2302_p9)  ;;  %v1812_v0 = vld [vmem:[#allocation2 + $0x98] sm:$0xff] (!%p2302_p9) }
 0x189   : > { %v2341_v30 = vpack.c.bf16 %v1903_v38, %v1903_v38  ;;  %v1907_v25 = vmax.f32 %v1875_v11, 0.0  ;;  %v1908_v47 = vmax.f32 %v1876_v16, 0.0  ;;  %v2342_v18 = vpack.c.bf16 %v1904_v29, %v1904_v29  ;;  %v1813_v3 = vld [vmem:[#allocation2 + $0xa0] sm:$0xff]  ;;  %v1814_v31 = vld [vmem:[#allocation2 + $0xa8] sm:$0xff]  ;;  %v1815_v38 = vld [vmem:[#allocation2 + $0xb0] sm:$0xff] }
 0x18a   : > { %v1909_v53 = vmax.f32 %v1877_v49, 0.0  ;;  %v2343_v45 = vpack.c.bf16 %v1905_v63, %v1905_v63  ;;  %v2344_v9 = vpack.c.bf16 %v1906_v43, %v1906_v43  ;;  %v1910_v17 = vmax.f32 %v1878_v12, 0.0  ;;  %v1816_v63 = vld [vmem:[#allocation2 + $0xb8] sm:$0xff] }
 0x18b   : > { %2064 = vst.msk [vmem:[%s2760_s6] sm:$0xf] %vm2063_vm10, %v2341_v30  ;;  %v2345_v48 = vpack.c.bf16 %v1907_v25, %v1907_v25  ;;  %v2346_v52 = vpack.c.bf16 %v1908_v47, %v1908_v47  ;;  %v1840_v28 = vmul.f32 %v3492_v10, %v1801_v54  ;;  %2065 = vst.msk [vmem:[%s2760_s6 + $0x4] sm:$0xf] %vm2063_vm10, %v2342_v18  ;;  %v1916_v13 = vmax.f32 %v1884_v32, 0.0 }
 0x18c   : > { %v2347_v14 = vpack.c.bf16 %v1909_v53, %v1909_v53  ;;  %2066 = vst.msk [vmem:[%s2760_s6 + $0x8] sm:$0xf] %vm2063_vm10, %v2343_v45  ;;  %2067 = vst.msk [vmem:[%s2760_s6 + $0xc] sm:$0xf] %vm2063_vm10, %v2344_v9  ;;  %v2348_v2 = vpack.c.bf16 %v1910_v17, %v1910_v17  ;;  %v1841_v8 = vmul.f32 %v3492_v10, %v1802_v20 }
 0x18d   : > { %v1842_v58 = vmul.f32 %v3492_v10, %v1803_v15  ;;  %v1843_v4 = vmul.f32 %v3492_v10, %v1804_v51  ;;  %2068 = vst.msk [vmem:[%s2760_s6 + $0x10] sm:$0xf] %vm2063_vm10, %v2345_v48  ;;  %2069 = vst.msk [vmem:[%s2760_s6 + $0x14] sm:$0xf] %vm2063_vm10, %v2346_v52  ;;  %v1879_v39 = vadd.f32 %v3497_v34, %v1840_v28  ;;  %v1817_v28 = vld [vmem:[#allocation2 + $0xc0] sm:$0xff] }
 0x18e   : > { %2070 = vst.msk [vmem:[%s2760_s6 + $0x18] sm:$0xf] %vm2063_vm10, %v2347_v14  ;;  %v1844_v46 = vmul.f32 %v3492_v10, %v1805_v42  ;;  %2071 = vst.msk [vmem:[%s2760_s6 + $0x1c] sm:$0xf] %vm2063_vm10, %v2348_v2  ;;  %v1880_v41 = vadd.f32 %v3497_v34, %v1841_v8  ;;  %v1885_v50 = vadd.f32 %v3497_v34, %v1846_v59 }
 0x18f   : > { %v1881_v35 = vadd.f32 %v3497_v34, %v1842_v58  ;;  %v1882_v44 = vadd.f32 %v3497_v34, %v1843_v4  ;;  %v1911_v56 = vmax.f32 %v1879_v39, 0.0  ;;  %v1886_v62 = vadd.f32 %v3497_v34, %v1847_v26  ;;  %v1818_v4 = vld [vmem:[#allocation2 + $0xc8] sm:$0xff]  ;;  %v1819_v39 = vld [vmem:[#allocation2 + $0xd0] sm:$0xff] }
 0x190   : > { %v1883_v55 = vadd.f32 %v3497_v34, %v1844_v46  ;;  %v1912_v19 = vmax.f32 %v1880_v41, 0.0  ;;  %v1917_v61 = vmax.f32 %v1885_v50, 0.0  ;;  %v2354_v16 = vpack.c.bf16 %v1916_v13, %v1916_v13  ;;  %v1820_v46 = vld [vmem:[#allocation2 + $0xd8] sm:$0xff]  ;;  %v1822_v26 = vld [vmem:[#allocation2 + $0xe8] sm:$0xff] }
 0x191   : > { %v1913_v37 = vmax.f32 %v1881_v35, 0.0  ;;  %v1914_v5 = vmax.f32 %v1882_v44, 0.0  ;;  %v2349_v27 = vpack.c.bf16 %v1911_v56, %v1911_v56  ;;  %v1918_v22 = vmax.f32 %v1886_v62, 0.0  ;;  %v1821_v44 = vld [vmem:[#allocation2 + $0xe0] sm:$0xff]  ;;  %v1823_v56 = vld [vmem:[#allocation2 + $0xf0] sm:$0xff] }
 0x192   : > { %v1915_v7 = vmax.f32 %v1883_v55, 0.0  ;;  %v2350_v57 = vpack.c.bf16 %v1912_v19, %v1912_v19  ;;  %v2355_v49 = vpack.c.bf16 %v1917_v61, %v1917_v61  ;;  %v1848_v29 = vmul.f32 %v3492_v10, %v1809_v24  ;;  %2077 = vst.msk [vmem:[%s2760_s6 + $0x34] sm:$0xf] %vm2063_vm10, %v2354_v16 }
 0x193   : > { %v2351_v1 = vpack.c.bf16 %v1913_v37, %v1913_v37  ;;  %v2352_v60 = vpack.c.bf16 %v1914_v5, %v1914_v5  ;;  %2072 = vst.msk [vmem:[%s2760_s6 + $0x20] sm:$0xf] %vm2063_vm10, %v2349_v27  ;;  %v2356_v43 = vpack.c.bf16 %v1918_v22, %v1918_v22  ;;  %v1849_v12 = vmul.f32 %v3492_v10, %v1810_v23  ;;  %v1824_v37 = vld [vmem:[#allocation2 + $0xf8] sm:$0xff] }
 0x194   : > { %v2353_v11 = vpack.c.bf16 %v1915_v7, %v1915_v7  ;;  %2073 = vst.msk [vmem:[%s2760_s6 + $0x24] sm:$0xf] %vm2063_vm10, %v2350_v57  ;;  %v1850_v54 = vmul.f32 %v3492_v10, %v1811_v21  ;;  %v1851_v30 = vmul.f32 %v3492_v10, %v1812_v0  ;;  %2078 = vst.msk [vmem:[%s2760_s6 + $0x38] sm:$0xf] %vm2063_vm10, %v2355_v49 }
 0x195   : > { %2074 = vst.msk [vmem:[%s2760_s6 + $0x28] sm:$0xf] %vm2063_vm10, %v2351_v1  ;;  %2075 = vst.msk [vmem:[%s2760_s6 + $0x2c] sm:$0xf] %vm2063_vm10, %v2352_v60  ;;  %v1887_v25 = vadd.f32 %v3497_v34, %v1848_v29  ;;  %v1852_v47 = vmul.f32 %v3492_v10, %v1813_v3  ;;  %v1853_v53 = vmul.f32 %v3492_v10, %v1814_v31 }
 0x196   : > { %2076 = vst.msk [vmem:[%s2760_s6 + $0x30] sm:$0xf] %vm2063_vm10, %v2353_v11  ;;  %v1854_v20 = vmul.f32 %v3492_v10, %v1815_v38  ;;  %2079 = vst.msk [vmem:[%s2760_s6 + $0x3c] sm:$0xf] %vm2063_vm10, %v2356_v43  ;;  %v1888_v15 = vadd.f32 %v3497_v34, %v1849_v12  ;;  %v1889_v51 = vadd.f32 %v3497_v34, %v1850_v54 }
 0x197   : > { %v1890_v18 = vadd.f32 %v3497_v34, %v1851_v30  ;;  %v1855_v45 = vmul.f32 %v3492_v10, %v1816_v63  ;;  %v1919_v9 = vmax.f32 %v1887_v25, 0.0  ;;  %v1891_v17 = vadd.f32 %v3497_v34, %v1852_v47 }
 0x198   : > { %v1892_v42 = vadd.f32 %v3497_v34, %v1853_v53  ;;  %v1893_v36 = vadd.f32 %v3497_v34, %v1854_v20  ;;  %v1920_v40 = vmax.f32 %v1888_v15, 0.0  ;;  %v1921_v48 = vmax.f32 %v1889_v51, 0.0 }
 0x199   : > { %v1922_v52 = vmax.f32 %v1890_v18, 0.0  ;;  %v1894_v14 = vadd.f32 %v3497_v34, %v1855_v45  ;;  %v2357_v6 = vpack.c.bf16 %v1919_v9, %v1919_v9  ;;  %v1923_v2 = vmax.f32 %v1891_v17, 0.0 }
 0x19a   : > { %v1924_v8 = vmax.f32 %v1892_v42, 0.0  ;;  %v1925_v58 = vmax.f32 %v1893_v36, 0.0  ;;  %v2358_v33 = vpack.c.bf16 %v1920_v40, %v1920_v40  ;;  %v2359_v59 = vpack.c.bf16 %v1921_v48, %v1921_v48 }
 0x19b   : > { %v2360_v41 = vpack.c.bf16 %v1922_v52, %v1922_v52  ;;  %v1926_v35 = vmax.f32 %v1894_v14, 0.0  ;;  %2080 = vst.msk [vmem:[%s2760_s6 + $0x40] sm:$0xf] %vm2063_vm10, %v2357_v6  ;;  %v2361_v55 = vpack.c.bf16 %v1923_v2, %v1923_v2  ;;  %v1856_v19 = vmul.f32 %v3492_v10, %v1817_v28 }
 0x19c   : > { %v2362_v32 = vpack.c.bf16 %v1924_v8, %v1924_v8  ;;  %v2363_v50 = vpack.c.bf16 %v1925_v58, %v1925_v58  ;;  %2081 = vst.msk [vmem:[%s2760_s6 + $0x44] sm:$0xf] %vm2063_vm10, %v2358_v33  ;;  %2082 = vst.msk [vmem:[%s2760_s6 + $0x48] sm:$0xf] %vm2063_vm10, %v2359_v59  ;;  %v1857_v62 = vmul.f32 %v3492_v10, %v1818_v4 }
 0x19d   : > { %2083 = vst.msk [vmem:[%s2760_s6 + $0x4c] sm:$0xf] %vm2063_vm10, %v2360_v41  ;;  %v2364_v5 = vpack.c.bf16 %v1926_v35, %v1926_v35  ;;  %v1858_v24 = vmul.f32 %v3492_v10, %v1819_v39  ;;  %v1859_v27 = vmul.f32 %v3492_v10, %v1820_v46  ;;  %2084 = vst.msk [vmem:[%s2760_s6 + $0x50] sm:$0xf] %vm2063_vm10, %v2361_v55 }
 0x19e   : > { %2085 = vst.msk [vmem:[%s2760_s6 + $0x54] sm:$0xf] %vm2063_vm10, %v2362_v32  ;;  %2086 = vst.msk [vmem:[%s2760_s6 + $0x58] sm:$0xf] %vm2063_vm10, %v2363_v50  ;;  %v1895_v7 = vadd.f32 %v3497_v34, %v1856_v19  ;;  %v1860_v13 = vmul.f32 %v3492_v10, %v1821_v44  ;;  %v1861_v61 = vmul.f32 %v3492_v10, %v1822_v26 }
 0x19f   : > { %v1862_v23 = vmul.f32 %v3492_v10, %v1823_v56  ;;  %2087 = vst.msk [vmem:[%s2760_s6 + $0x5c] sm:$0xf] %vm2063_vm10, %v2364_v5  ;;  %v1896_v21 = vadd.f32 %v3497_v34, %v1857_v62  ;;  %v1897_v0 = vadd.f32 %v3497_v34, %v1858_v24  ;;  %v1898_v57 = vadd.f32 %v3497_v34, %v1859_v27 }
 0x1a0   : > { %v1863_v1 = vmul.f32 %v3492_v10, %v1824_v37  ;;  %v1927_v60 = vmax.f32 %v1895_v7, 0.0  ;;  %v1899_v22 = vadd.f32 %v3497_v34, %v1860_v13  ;;  %v1900_v3 = vadd.f32 %v3497_v34, %v1861_v61 }
 0x1a1   : > { %v1901_v31 = vadd.f32 %v3497_v34, %v1862_v23  ;;  %v1928_v38 = vmax.f32 %v1896_v21, 0.0  ;;  %v1929_v11 = vmax.f32 %v1897_v0, 0.0  ;;  %v1930_v16 = vmax.f32 %v1898_v57, 0.0 }
 0x1a2   : > { %v1902_v49 = vadd.f32 %v3497_v34, %v1863_v1  ;;  %v2365_v29 = vpack.c.bf16 %v1927_v60, %v1927_v60  ;;  %v1931_v63 = vmax.f32 %v1899_v22, 0.0  ;;  %v1932_v10 = vmax.f32 %v1900_v3, 0.0 }
 0x1a3   : > { %v1933_v43 = vmax.f32 %v1901_v31, 0.0  ;;  %v2366_v12 = vpack.c.bf16 %v1928_v38, %v1928_v38  ;;  %v2367_v54 = vpack.c.bf16 %v1929_v11, %v1929_v11  ;;  %v2368_v30 = vpack.c.bf16 %v1930_v16, %v1930_v16 }
 0x1a4   : > { %v1934_v25 = vmax.f32 %v1902_v49, 0.0  ;;  %2088 = vst.msk [vmem:[%s2760_s6 + $0x60] sm:$0xf] %vm2063_vm10, %v2365_v29  ;;  %v2369_v47 = vpack.c.bf16 %v1931_v63, %v1931_v63  ;;  %v2370_v53 = vpack.c.bf16 %v1932_v10, %v1932_v10 }
 0x1a5   : > { %v2371_v20 = vpack.c.bf16 %v1933_v43, %v1933_v43  ;;  %2089 = vst.msk [vmem:[%s2760_s6 + $0x64] sm:$0xf] %vm2063_vm10, %v2366_v12  ;;  %2090 = vst.msk [vmem:[%s2760_s6 + $0x68] sm:$0xf] %vm2063_vm10, %v2367_v54 }
 0x1a6   : > { %2091 = vst.msk [vmem:[%s2760_s6 + $0x6c] sm:$0xf] %vm2063_vm10, %v2368_v30  ;;  %v2372_v34 = vpack.c.bf16 %v1934_v25, %v1934_v25  ;;  %2092 = vst.msk [vmem:[%s2760_s6 + $0x70] sm:$0xf] %vm2063_vm10, %v2369_v47 }
 0x1a7   : > { %2093 = vst.msk [vmem:[%s2760_s6 + $0x74] sm:$0xf] %vm2063_vm10, %v2370_v53  ;;  %2094 = vst.msk [vmem:[%s2760_s6 + $0x78] sm:$0xf] %vm2063_vm10, %v2371_v20 }
 0x1a8   : > { %2095 = vst.msk [vmem:[%s2760_s6 + $0x7c] sm:$0xf] %vm2063_vm10, %v2372_v34 }
 0x1a9 PF: > { %s14_s19 = sadd.s32 1, %s2692_s19   ;;  %s3651_s15 = smov %s2684_s17 }
 0x1aa   : > { %p11_p10 = scmp.ge.s32.totalorder %s14_s19, 8   ;;  %s3652_s16 = smov %s2688_s18 }
 0x1ab   : > { %s3653_s17 = smov %s3656_s20  ;;  %s3654_s18 = smov %s3660_s21 }
 0x1ac   :  { %13 = sbr.rel (!%p11_p10) target bundleno = 3 (0x3), region = 84 }

// kernel: _lambda_.7
= control target key start
LH: loop header
LB: loop body
LE: loop exit
PB: predicated region body
PF: predicated region fallthrough
CT: control target
= control target key end

     0   :  { %s2766_s18 = smov 0   ;;  %s2768_s19 = smov 0   ;;  %s3710_s0 = inlined_call_operand.vmem [shape: bf16[2,18,18,8], index: 0, kind: input, shape index: {}]   ;;  %s3711_s1 = inlined_call_operand.vmem [shape: bf16[3,3,8,8], index: 1, kind: input, shape index: {}]   ;;  %s3712_s2 = inlined_call_operand.vmem [shape: f32[1,8], index: 2, kind: input, shape index: {}]   ;;  %s3713_s3 = inlined_call_operand.vmem [shape: f32[1,8], index: 3, kind: input, shape index: {}]   ;;  %s3714_s4 = inlined_call_operand.vmem [shape: bf16[2,256,8], index: 4, kind: input, shape index: {}]   ;;  %s3715_s5 = inlined_call_operand.vmem [shape: f32[2,256,8], index: 5, kind: output, shape index: {}]  }
   0x1   :  { %s2770_s20 = smov 0   ;;  %s2772_s21 = smov 0  }
   0x2   :  { %s2774_s22 = smov 0  }
   0x3 LB: > { %s24_s23 = sadd.s32 1, %s2726_s20  ;;  %s27_s24 = sadd.s32 1, %s2730_s21  ;;  %s2734_s22 = sphi %s2774_s22, %s15_s22   ;;  %s2730_s21 = sphi %s2772_s21, %s3723_s21   ;;  %s2726_s20 = sphi %s2770_s20, %s3722_s20   ;;  %s2722_s19 = sphi %s2768_s19, %s3721_s19   ;;  %s2718_s18 = sphi %s2766_s18, %s3720_s18  }
   0x4   : > { %p25_p0 = scmp.ge.s32.totalorder %s24_s23, 3  ;;  %p2204_p1 = scmp.ge.s32.totalorder %s2734_s22, 1 }
   0x5   : > { %p219_p2 = scmp.lt.s32.totalorder %s2734_s22, 7 }
   0x6   : > { %s3725_s23 = smov (%p25_p0, %s24_s23), 0  ;;  %s3727_s24 = smov (!%p25_p0, %s27_s24), %s2730_s21 }
   0x7   : > { %p220_p3 = pnand %p2204_p1, %p219_p2  ;;  %p29_p4 = scmp.ge.s32.totalorder %s3727_s24, 2 }
   0x8   : > { %p262_p5 = scmp.lt.s32.totalorder (!%p220_p3), %s2718_s18, 2  ;;  %p257_p6 = scmp.lt.s32.totalorder (!%p220_p3), %s2722_s19, 1  ;;  %vm816_vm0 = vcmask (!%p220_p3), 1043456   ;;  %vm330_vm1 = vsmask.f32 (!%p220_p3), 3328  ;;  %vm767_vm2 = vcmask (!%p220_p3), 64512  }
   0x9   : > { %s3729_s24 = smov (%p29_p4, %s3727_s24), 0  ;;  %223 = sbr.rel (%p220_p3) target bundleno = 432 (0x1b0), region = 40 }
   0xa   : > { %s2335_s25 = smul.u32 (!%p220_p3), 12, %s2718_s18  ;;  %vm331_vm3 = vsmask.f32 (!%p220_p3), 7440  ;;  %vm1289_vm5 = vcmask (!%p220_p3), 1042432   ;;  %vm1290_vm6 = vcmask (!%p220_p3), 1046532   ;;  %p2326_p7 = scmp.ne.s32.totalorder (!%p220_p3), %s2718_s18, 0 }
   0xb   : > { %vm2896_vm4 = vmor (!%p220_p3), %vm330_vm1, %vm331_vm3 }
   0xc   : > { %vm2994_vm7 = vmor (!%p220_p3), %vm1289_vm5, %vm1290_vm6 }
  0x10   : > { %s263_s26 = scalar_select %p262_p5, %s2718_s18, 2 }
  0x11   : > { %s3731_s19 = smov (!%p257_p6, %s2722_s19), 1 }
  0x12   : > { %s2639_s27 = smul.u32 12, %s263_s26  ;;  %s2333_s29 = sshll.u32 %s3731_s19, 7 }
  0x13   : > { %s2638_s28 = smul.u32 216, %s3731_s19  ;;  %s2807_s10 = scalar_lea.vmem %s3714_s4, %s2333_s29 }
  0x14   : > { %s266_s7 = scalar_lea.vmem %s3711_s1, %s2639_s27  ;;  %s2334_s14 = sshll.u32 %s3731_s19, 8 }
  0x15   : > { %v329_v0 = vld [vmem:[%s266_s7] sm:$0xf]  ;;  %s261_s13 = scalar_lea.vmem %s3710_s0, %s2638_s28  ;;  %v2212_v1 = vld [vmem:[%s266_s7 + $0x4] sm:$0xf]  ;;  %s2819_s17 = scalar_lea.vmem %s3715_s5, %s2334_s14  ;;  %v2293_v4 = vld [vmem:[%s266_s7 + $0x8] sm:$0xf] }
  0x16   : > { %2635 = vmatprep.subr.msk.bf16.mxu0 %vm816_vm0, %v329_v0  ;;  %v2814_v2 = vsel %vm816_vm0, %v329_v0, 0  ;;  %s2821_s26 = scalar_lea.vmem %s261_s13, %s2335_s25  ;;  %2634 = vmatprep.subr.msk.bf16.mxu1 %vm816_vm0, %v2212_v1  ;;  %v818_v3 = vsel %vm816_vm0, %v2212_v1, 0  ;;  %v1503_v57 = vsel %vm816_vm0, %v2293_v4, 0 }
  0x17   : > { %2501 = vmatpush3.bf16.msra.mxu0 %v2814_v2  ;;  %v2827_v5 = vld [vmem:[%s2821_s26] sm:$0xf]  ;;  %v2830_v6 = vld [vmem:[%s2821_s26 + $0x4] sm:$0xf]  ;;  %v2833_v7 = vld [vmem:[%s2821_s26 + $0xc] sm:$0xf]  ;;  %2467 = vmatpush3.bf16.msra.mxu1 %v818_v3 }
  0x18   : > { %v334_v8 = vshrl.u32 %v2827_v5, 16  ;;  %v337_v9 = vshll.u32 %v2827_v5, 16  ;;  %v347_v10 = vshrl.u32 %v2830_v6, 16  ;;  %v2245_v11 = vcombine.low %v2827_v5, %v2830_v6  ;;  %v2841_v12 = vld [vmem:[%s2821_s26 + $0x10] sm:$0xf]  ;;  %2636 = vmatprep.subr.msk.bf16.mxu1 %vm816_vm0, %v329_v0  ;;  %2637 = vmatprep.subr.msk.bf16.mxu0 %vm816_vm0, %v2293_v4 }
  0x19   : > { %v2277_v13 = vrot.slane %v2827_v5, 9  ;;  %v1294_v14 = vrot.slane %v2830_v6, 5  ;;  %v358_v15 = vshrl.u32 %v2833_v7, 16  ;;  %v361_v16 = vshll.u32 %v2833_v7, 16  ;;  %v2850_v17 = vld [vmem:[%s2821_s26 + $0x18] sm:$0xf] }
  0x1a   : > { %2502 = vmatprep.mubr.msk.bf16.mxu0 %vm767_vm2, %v2245_v11  ;;  %v371_v18 = vshrl.u32 %v2841_v12, 16  ;;  %v2246_v19 = vcombine.low %v2833_v7, %v2841_v12  ;;  %v2278_v20 = vrot.slane %v2833_v7, 9  ;;  %v1301_v21 = vrot.slane %v2841_v12, 5  ;;  %v2859_v22 = vld [vmem:[%s2821_s26 + $0x1c] sm:$0xf] }
  0x1b   : > { %v2863_v23 = vrot.slane %v1294_v14, 4  ;;  %v382_v24 = vshrl.u32 %v2850_v17, 16  ;;  %v385_v25 = vshll.u32 %v2850_v17, 16  ;;  %v395_v26 = vshrl.u32 %v2859_v22, 16  ;;  %v2869_v27 = vld [vmem:[%s2821_s26 + $0x8] sm:$0x1] }
  0x1c   : > { %2503 = vmatmul.mubr.msk.bf16.vlgmr.msra.gmra.mrb[0].mxu0 %vm767_vm2, %v2246_v19  ;;  %v2874_v28 = vrot.slane %v1301_v21, 4  ;;  %v2247_v29 = vcombine.low %v2850_v17, %v2859_v22  ;;  %v336_v30 = vrot.slane %v334_v8, 4  ;;  %v339_v31 = vrot.slane %v337_v9, 5  ;;  %v2879_v32 = vld [vmem:[%s2821_s26 + $0x24] sm:$0xf] }
  0x1d   : > { %v343_v33 = vshll.u32 %v2830_v6, 16  ;;  %v349_v34 = vrot.slane %v347_v10, 4  ;;  %v353_v35 = vshll.u32 %v2869_v27, 16  ;;  %v1297_v36 = vrot.slane %v2869_v27, 5  ;;  %v2885_v37 = vld [vmem:[%s2821_s26 + $0x28] sm:$0xf]  ;;  %2535 = vmatpush3.bf16.msra.mxu0 %v1503_v57 }
  0x1e   : > { %2506 = vmatprep.mubr.msk.bf16.mxu0 %vm767_vm2, %v2247_v29  ;;  %v340_v38 = vor.u32 %v339_v31, %v336_v30  ;;  %v406_v39 = vshrl.u32 %v2879_v32, 16  ;;  %v409_v40 = vshll.u32 %v2879_v32, 16  ;;  %v419_v41 = vshrl.u32 %v2885_v37, 16  ;;  %v2892_v42 = vld [vmem:[%s2821_s26 + $0x14] sm:$0x1] }
  0x1f   : > { %v345_v44 = vrot.slane %v343_v33, 5  ;;  %v355_v45 = vrot.slane %v353_v35, 5  ;;  %v2248_v46 = vcombine.low %v2879_v32, %v2885_v37  ;;  %v360_v47 = vrot.slane %v358_v15, 4  ;;  %v2903_v48 = vld [vmem:[%s2821_s26 + $0x30] sm:$0xf] }
  0x20   : > { %v341_v49 = vrot.slane %v340_v38, 4  ;;  %v363_v50 = vrot.slane %v361_v16, 5  ;;  %v367_v51 = vshll.u32 %v2841_v12, 16  ;;  %v373_v52 = vrot.slane %v371_v18, 4  ;;  %v2907_v53 = vld [vmem:[%s2821_s26 + $0x34] sm:$0xf] }
  0x21   : > { %v350_v54 = vor.u32 %v349_v34, %v345_v44  ;;  %v377_v55 = vshll.u32 %v2892_v42, 16  ;;  %v1304_v56 = vrot.slane %v2892_v42, 5  ;;  %v430_v61 = vshrl.u32 %v2903_v48, 16  ;;  %v2918_v3 = vld [vmem:[%s2821_s26 + $0x20] sm:$0x1] }
  0x22   : > { %v346_v58 = vsel %vm2896_vm4, %v341_v49, %v345_v44  ;;  %v364_v59 = vor.u32 %v363_v50, %v360_v47  ;;  %v369_v60 = vrot.slane %v367_v51, 5  ;;  %v433_v0 = vshll.u32 %v2903_v48, 16  ;;  %v2924_v11 = vld [vmem:[%s2821_s26 + $0x3c] sm:$0xf]  ;;  %v2930_v29 = vld [vmem:[%s2821_s26 + $0x40] sm:$0xf] }
  0x23   : > { %v351_v62 = vrot.slane %v350_v54, 4  ;;  %v379_v63 = vrot.slane %v377_v55, 5  ;;  %v443_v1 = vshrl.u32 %v2907_v53, 16  ;;  %v2249_v9 = vcombine.low %v2903_v48, %v2907_v53  ;;  %v2939_v38 = vld [vmem:[%s2821_s26 + $0x2c] sm:$0x1] }
  0x24   : > { %2507 = vmatmul.mubr.msk.bf16.gmra.mrb[4].mxu0 %vm767_vm2, %v2248_v46  ;;  %v365_v4 = vrot.slane %v364_v59, 4  ;;  %v374_v8 = vor.u32 %v373_v52, %v369_v60  ;;  %v384_v10 = vrot.slane %v382_v24, 4  ;;  %v387_v16 = vrot.slane %v385_v25, 5  ;;  %v2948_v49 = vld [vmem:[%s2821_s26 + $0x48] sm:$0xf] }
  0x25   : > { %v356_v15 = vsel %vm2896_vm4, %v351_v62, %v355_v45  ;;  %v391_v18 = vshll.u32 %v2859_v22, 16  ;;  %v397_v19 = vrot.slane %v395_v26, 4  ;;  %2510 = vmatprep.mubr.msk.bf16.mxu0 %vm767_vm2, %v2249_v9  ;;  %v401_v24 = vshll.u32 %v2918_v3, 16  ;;  %v2951_v55 = vld [vmem:[%s2821_s26 + $0x4c] sm:$0xf] }
  0x26   : > { %v2213_v30 = vcombine.low %v346_v58, %v356_v15  ;;  %v370_v31 = vsel %vm2896_vm4, %v365_v4, %v369_v60  ;;  %v375_v33 = vrot.slane %v374_v8, 4  ;;  %v388_v34 = vor.u32 %v387_v16, %v384_v10  ;;  %v2967_v15 = vld [vmem:[%s2821_s26 + $0x54] sm:$0xf] }
  0x27   : > { %v393_v25 = vrot.slane %v391_v18, 5  ;;  %v454_v35 = vshrl.u32 %v2924_v11, 16  ;;  %v457_v26 = vshll.u32 %v2924_v11, 16  ;;  %v403_v45 = vrot.slane %v401_v24, 5 }
  0x28   : > { %2468 = vmatprep.mubr.msk.bf16.mxu1 %vm767_vm2, %v2213_v30  ;;  %v380_v44 = vsel %vm2896_vm4, %v375_v33, %v379_v63  ;;  %v467_v46 = vshrl.u32 %v2930_v29, 16  ;;  %v2250_v47 = vcombine.low %v2924_v11, %v2930_v29  ;;  %v389_v51 = vrot.slane %v388_v34, 4  ;;  %v2975_v34 = vld [vmem:[%s2821_s26 + $0x58] sm:$0xf] }
  0x29   : > { %v2214_v50 = vcombine.low %v370_v31, %v380_v44  ;;  %v398_v52 = vor.u32 %v397_v19, %v393_v25  ;;  %v408_v54 = vrot.slane %v406_v39, 4  ;;  %v411_v57 = vrot.slane %v409_v40, 5  ;;  %v2961_v39 = vld [vmem:[%s2821_s26 + $0x38] sm:$0x1] }
  0x2a   : > { %v415_v58 = vshll.u32 %v2885_v37, 16  ;;  %v421_v59 = vrot.slane %v419_v41, 4  ;;  %v425_v60 = vshll.u32 %v2939_v38, 16  ;;  %v394_v62 = vsel %vm2896_vm4, %v389_v51, %v393_v25 }
  0x2b   : > { %2469 = vmatmul.mubr.msk.bf16.vlgmr.msra.gmra.mrb[0].mxu1 %vm767_vm2, %v2214_v50  ;;  %v399_v63 = vrot.slane %v398_v52, 4  ;;  %v478_v4 = vshrl.u32 %v2948_v49, 16  ;;  %v481_v8 = vshll.u32 %v2948_v49, 16  ;;  %v412_v40 = vor.u32 %v411_v57, %v408_v54 }
  0x2c   : > { %2569 = vmatpush3.bf16.msra.mxu1 %v2814_v2  ;;  %2511 = vmatmul.mubr.msk.bf16.gmra.mrb[8].mxu0 %vm767_vm2, %v2250_v47  ;;  %v417_v41 = vrot.slane %v415_v58, 5  ;;  %v427_v9 = vrot.slane %v425_v60, 5  ;;  %v491_v10 = vshrl.u32 %v2951_v55, 16  ;;  %v2251_v18 = vcombine.low %v2948_v49, %v2951_v55  ;;  %v2990_v58 = vld [vmem:[%s2821_s26 + $0x44] sm:$0x1] }
  0x2d   : > { %v404_v16 = vsel %vm2896_vm4, %v399_v63, %v403_v45  ;;  %v432_v19 = vrot.slane %v430_v61, 4  ;;  %v435_v30 = vrot.slane %v433_v0, 5  ;;  %v413_v33 = vrot.slane %v412_v40, 4 }
  0x2e   : > { %v2215_v31 = vcombine.low %v394_v62, %v404_v16  ;;  %v422_v2 = vor.u32 %v421_v59, %v417_v41  ;;  %v439_v24 = vshll.u32 %v2907_v53, 16  ;;  %2514 = vmatprep.mubr.msk.bf16.mxu0 %vm767_vm2, %v2251_v18  ;;  %v445_v44 = vrot.slane %v443_v1, 4 }
  0x2f   : > { %v436_v25 = vor.u32 %v435_v30, %v432_v19  ;;  %v449_v45 = vshll.u32 %v2961_v39, 16  ;;  %v502_v47 = vshrl.u32 %v2967_v15, 16  ;;  %v418_v61 = vsel %vm2896_vm4, %v413_v33, %v417_v41 }
  0x30   : > { %2472 = vmatprep.mubr.msk.bf16.mxu1 %vm767_vm2, %v2215_v31  ;;  %v423_v0 = vrot.slane %v422_v2, 4  ;;  %v441_v50 = vrot.slane %v439_v24, 5  ;;  %v505_v51 = vshll.u32 %v2967_v15, 16  ;;  %v515_v57 = vshrl.u32 %v2975_v34, 16 }
  0x31   : > { %v437_v52 = vrot.slane %v436_v25, 4  ;;  %v451_v54 = vrot.slane %v449_v45, 5  ;;  %v2252_v1 = vcombine.low %v2967_v15, %v2975_v34  ;;  %v456_v63 = vrot.slane %v454_v35, 4 }
  0x32   : > { %v428_v60 = vsel %vm2896_vm4, %v423_v0, %v427_v9  ;;  %v446_v62 = vor.u32 %v445_v44, %v441_v50  ;;  %v459_v40 = vrot.slane %v457_v26, 5  ;;  %v463_v18 = vshll.u32 %v2930_v29, 16  ;;  %v3018_v9 = vld [vmem:[%s2821_s26 + $0x50] sm:$0x1] }
  0x33   : > { %v2216_v41 = vcombine.low %v418_v61, %v428_v60  ;;  %v442_v16 = vsel %vm2896_vm4, %v437_v52, %v441_v50  ;;  %v469_v19 = vrot.slane %v467_v46, 4  ;;  %v473_v33 = vshll.u32 %v2990_v58, 16  ;;  %v3040_v52 = vld [vmem:[%s2821_s26 + $0x5c] sm:$0x1] }
  0x34   : > { %v447_v30 = vrot.slane %v446_v62, 4  ;;  %2515 = vmatmul.mubr.msk.bf16.gmra.mrb[12].mxu0 %vm767_vm2, %v2252_v1  ;;  %v460_v31 = vor.u32 %v459_v40, %v456_v63  ;;  %v1295_v35 = vsel %vm2994_vm7, %v2277_v13, %v1294_v14  ;;  %v465_v26 = vrot.slane %v463_v18, 5  ;;  %v3048_v62 = vld [vmem:[%s2821_s26 + $0x60] sm:$0xf] }
  0x35   : > { %2473 = vmatmul.mubr.msk.bf16.gmra.mrb[4].mxu1 %vm767_vm2, %v2216_v41  ;;  %v1298_v46 = vsel %vm2994_vm7, %v2863_v23, %v1297_v36  ;;  %v480_v2 = vrot.slane %v478_v4, 4  ;;  %v483_v24 = vrot.slane %v481_v8, 5  ;;  %v475_v25 = vrot.slane %v473_v33, 5 }
  0x36   : > { %v452_v6 = vsel %vm2896_vm4, %v447_v30, %v451_v54  ;;  %v461_v5 = vrot.slane %v460_v31, 4  ;;  %v2294_v13 = vcombine.low %v1295_v35, %v1298_v46  ;;  %v470_v44 = vor.u32 %v469_v19, %v465_v26  ;;  %v3057_v31 = vld [vmem:[%s2821_s26 + $0x64] sm:$0xf] }
  0x37   : > { %v2217_v14 = vcombine.low %v442_v16, %v452_v6  ;;  %v484_v45 = vor.u32 %v483_v24, %v480_v2  ;;  %v487_v27 = vshll.u32 %v2951_v55, 16  ;;  %v493_v23 = vrot.slane %v491_v10, 4 }
  0x38   : > { %v466_v61 = vsel %vm2896_vm4, %v461_v5, %v465_v26  ;;  %2536 = vmatprep.mubr.msk.bf16.mxu0 %vm767_vm2, %v2294_v13  ;;  %v497_v36 = vshll.u32 %v3018_v9, 16  ;;  %v1302_v4 = vsel %vm2994_vm7, %v2278_v20, %v1301_v21  ;;  %v471_v8 = vrot.slane %v470_v44, 4 }
  0x39   : > { %2476 = vmatprep.mubr.msk.bf16.mxu1 %vm767_vm2, %v2217_v14  ;;  %v485_v0 = vrot.slane %v484_v45, 4  ;;  %v489_v50 = vrot.slane %v487_v27, 5  ;;  %v1305_v10 = vsel %vm2994_vm7, %v2874_v28, %v1304_v56  ;;  %v504_v7 = vrot.slane %v502_v47, 4 }
  0x3a   : > { %v499_v12 = vrot.slane %v497_v36, 5  ;;  %v2295_v54 = vcombine.low %v1302_v4, %v1305_v10  ;;  %v507_v1 = vrot.slane %v505_v51, 5  ;;  %v476_v20 = vsel %vm2896_vm4, %v471_v8, %v475_v25 }
  0x3b   : > { %v490_v21 = vsel %vm2896_vm4, %v485_v0, %v489_v50  ;;  %v494_v60 = vor.u32 %v493_v23, %v489_v50  ;;  %v511_v42 = vshll.u32 %v2975_v34, 16  ;;  %v2218_v63 = vcombine.low %v466_v61, %v476_v20  ;;  %v3078_v61 = vld [vmem:[%s2821_s26 + $0x6c] sm:$0xf]  ;;  %v3084_v0 = vld [vmem:[%s2821_s26 + $0x70] sm:$0xf] }
  0x3c   : > { %2537 = vmatmul.mubr.msk.bf16.vlgmr.msra.gmra.mrb[0].mxu0 %vm767_vm2, %v2295_v54  ;;  %v508_v28 = vor.u32 %v507_v1, %v504_v7  ;;  %v517_v56 = vrot.slane %v515_v57, 4  ;;  %v521_v47 = vshll.u32 %v3040_v52, 16  ;;  %v2279_v41 = vrot.slane %v2850_v17, 9  ;;  %v3089_v7 = vld [vmem:[%s2821_s26 + $0x74] sm:$0x1] }
  0x3d   : > { %v495_v51 = vrot.slane %v494_v60, 4  ;;  %v513_v40 = vrot.slane %v511_v42, 5  ;;  %v1308_v16 = vrot.slane %v2859_v22, 5  ;;  %2477 = vmatmul.mubr.msk.bf16.gmra.mrb[8].mxu1 %vm767_vm2, %v2218_v63  ;;  %v1311_v30 = vrot.slane %v2918_v3, 5  ;;  %v3065_v22 = vld [vmem:[%s2821_s26 + $0x68] sm:$0x1] }
  0x3e   : > { %v509_v18 = vrot.slane %v508_v28, 4  ;;  %v523_v19 = vrot.slane %v521_v47, 5  ;;  %v526_v33 = vshrl.u32 %v3048_v62, 16  ;;  %v529_v24 = vshll.u32 %v3048_v62, 16 }
  0x3f   : > { %v500_v57 = vsel %vm2896_vm4, %v495_v51, %v499_v12  ;;  %v518_v35 = vor.u32 %v517_v56, %v513_v40  ;;  %v1309_v26 = vsel %vm2994_vm7, %v2279_v41, %v1308_v16  ;;  %v1310_v17 = vrot.slane %v1308_v16, 4 }
  0x40   : > { %v2219_v46 = vcombine.low %v490_v21, %v500_v57  ;;  %v514_v2 = vsel %vm2896_vm4, %v509_v18, %v513_v40  ;;  %v528_v3 = vrot.slane %v526_v33, 4  ;;  %v535_v25 = vshll.u32 %v3057_v31, 16  ;;  %v3104_v18 = vld [vmem:[%s2821_s26 + $0x78] sm:$0xf] }
  0x41   : > { %v519_v6 = vrot.slane %v518_v35, 4  ;;  %v1312_v5 = vsel %vm2994_vm7, %v1310_v17, %v1311_v30  ;;  %v539_v13 = vshrl.u32 %v3057_v31, 16  ;;  %v531_v44 = vrot.slane %v529_v24, 5  ;;  %v3116_v24 = vld [vmem:[%s2821_s26 + $0x80] sm:$0x1] }
  0x42   : > { %2480 = vmatprep.mubr.msk.bf16.mxu1 %vm767_vm2, %v2219_v46  ;;  %v2296_v14 = vcombine.low %v1309_v26, %v1312_v5  ;;  %v545_v45 = vshll.u32 %v3065_v22, 16  ;;  %v2280_v27 = vrot.slane %v2879_v32, 9  ;;  %v537_v36 = vrot.slane %v535_v25, 5 }
  0x43   : > { %v524_v23 = vsel %vm2896_vm4, %v519_v6, %v523_v19  ;;  %v541_v4 = vrot.slane %v539_v13, 4  ;;  %v1315_v8 = vrot.slane %v2885_v37, 5  ;;  %v532_v10 = vor.u32 %v531_v44, %v528_v3  ;;  %v3107_v19 = vld [vmem:[%s2821_s26 + $0x7c] sm:$0xf] }
  0x44   : > { %v2220_v50 = vcombine.low %v514_v2, %v524_v23  ;;  %2540 = vmatprep.mubr.msk.bf16.mxu0 %vm767_vm2, %v2296_v14  ;;  %v547_v12 = vrot.slane %v545_v45, 5  ;;  %v1318_v54 = vrot.slane %v2939_v38, 5  ;;  %v550_v37 = vshrl.u32 %v3078_v61, 16 }
  0x45   : > { %v542_v32 = vor.u32 %v541_v4, %v537_v36  ;;  %v1316_v1 = vsel %vm2994_vm7, %v2280_v27, %v1315_v8  ;;  %v1317_v20 = vrot.slane %v1315_v8, 4  ;;  %v533_v21 = vrot.slane %v532_v10, 4 }
  0x46   : > { %2481 = vmatmul.mubr.msk.bf16.gmra.mrb[12].mxu1 %vm767_vm2, %v2220_v50  ;;  %v553_v60 = vshll.u32 %v3078_v61, 16  ;;  %v559_v42 = vshll.u32 %v3084_v0, 16  ;;  %v563_v38 = vshrl.u32 %v3084_v0, 16  ;;  %v552_v56 = vrot.slane %v550_v37, 4  ;;  %v3131_v50 = vld [vmem:[%s2821_s26 + $0x84] sm:$0xf] }
  0x47   : > { %v543_v63 = vrot.slane %v542_v32, 4  ;;  %v1319_v28 = vsel %vm2994_vm7, %v1317_v20, %v1318_v54  ;;  %v569_v47 = vshll.u32 %v3089_v7, 16  ;;  %v538_v51 = vsel %vm2896_vm4, %v533_v21, %v537_v36 }
  0x48   : > { %v2297_v40 = vcombine.low %v1316_v1, %v1319_v28  ;;  %v555_v41 = vrot.slane %v553_v60, 5  ;;  %v561_v16 = vrot.slane %v559_v42, 5  ;;  %v565_v33 = vrot.slane %v563_v38, 4  ;;  %v3137_v1 = vld [vmem:[%s2821_s26 + $0x88] sm:$0xf] }
  0x49   : > { %v548_v30 = vsel %vm2896_vm4, %v543_v63, %v547_v12  ;;  %v571_v57 = vrot.slane %v569_v47, 5  ;;  %v2281_v35 = vrot.slane %v2903_v48, 9  ;;  %v1322_v46 = vrot.slane %v2907_v53, 5  ;;  %v3143_v63 = vld [vmem:[%s2821_s26 + $0x8c] sm:$0x1] }
  0x4a   : > { %v2221_v26 = vcombine.low %v538_v51, %v548_v30  ;;  %2541 = vmatmul.mubr.msk.bf16.gmra.mrb[4].mxu0 %vm767_vm2, %v2297_v40  ;;  %v556_v17 = vor.u32 %v555_v41, %v552_v56  ;;  %v1325_v2 = vrot.slane %v2961_v39, 5  ;;  %v566_v3 = vor.u32 %v565_v33, %v561_v16 }
  0x4b   : > { %v574_v6 = vshrl.u32 %v3104_v18, 16  ;;  %v577_v5 = vshll.u32 %v3104_v18, 16  ;;  %v583_v25 = vshll.u32 %v3107_v19, 16  ;;  %v1323_v13 = vsel %vm2994_vm7, %v2281_v35, %v1322_v46 }
  0x4c   : > { %2484 = vmatprep.mubr.msk.bf16.mxu1 %vm767_vm2, %v2221_v26  ;;  %v557_v48 = vrot.slane %v556_v17, 4  ;;  %v1324_v53 = vrot.slane %v1322_v46, 4  ;;  %v587_v39 = vshrl.u32 %v3107_v19, 16  ;;  %v567_v14 = vrot.slane %v566_v3, 4  ;;  %v3160_v26 = vld [vmem:[%s2821_s26 + $0x90] sm:$0xf] }
  0x4d   : > { %v576_v44 = vrot.slane %v574_v6, 4  ;;  %v579_v45 = vrot.slane %v577_v5, 5  ;;  %v585_v27 = vrot.slane %v583_v25, 5  ;;  %v593_v8 = vshll.u32 %v3116_v24, 16  ;;  %v3163_v6 = vld [vmem:[%s2821_s26 + $0x94] sm:$0xf] }
  0x4e   : > { %v562_v23 = vsel %vm2896_vm4, %v557_v48, %v561_v16  ;;  %v1326_v36 = vsel %vm2994_vm7, %v1324_v53, %v1325_v2  ;;  %v589_v4 = vrot.slane %v587_v39, 4  ;;  %v572_v10 = vsel %vm2896_vm4, %v567_v14, %v571_v57  ;;  %v3171_v14 = vld [vmem:[%s2821_s26 + $0x98] sm:$0x1] }
  0x4f   : > { %v2298_v12 = vcombine.low %v1323_v13, %v1326_v36  ;;  %v580_v54 = vor.u32 %v579_v45, %v576_v44  ;;  %v2282_v32 = vrot.slane %v2924_v11, 9  ;;  %v2222_v20 = vcombine.low %v562_v23, %v572_v10 }
  0x50   : > { %v590_v37 = vor.u32 %v589_v4, %v585_v27  ;;  %v595_v21 = vrot.slane %v593_v8, 5  ;;  %v1329_v60 = vrot.slane %v2930_v29, 5  ;;  %v1332_v38 = vrot.slane %v2990_v58, 5 }
  0x51   : > { %2544 = vmatprep.mubr.msk.bf16.mxu0 %vm767_vm2, %v2298_v12  ;;  %v581_v42 = vrot.slane %v580_v54, 4  ;;  %v598_v28 = vshrl.u32 %v3131_v50, 16  ;;  %v601_v56 = vshll.u32 %v3131_v50, 16  ;;  %2485 = vmatmul.mubr.msk.bf16.gmra.mrb[16].mxu1 %vm767_vm2, %v2222_v20  ;;  %v607_v51 = vshll.u32 %v3137_v1, 16  ;;  %v3185_v20 = vld [vmem:[%s2821_s26 + $0x9c] sm:$0xf] }
  0x52   : > { %v591_v11 = vrot.slane %v590_v37, 4  ;;  %v1330_v47 = vsel %vm2994_vm7, %v2282_v32, %v1329_v60  ;;  %v1331_v29 = vrot.slane %v1329_v60, 4  ;;  %v611_v16 = vshrl.u32 %v3137_v1, 16 }
  0x53   : > { %v586_v58 = vsel %vm2896_vm4, %v581_v42, %v585_v27  ;;  %v600_v40 = vrot.slane %v598_v28, 4  ;;  %v603_v41 = vrot.slane %v601_v56, 5  ;;  %v609_v57 = vrot.slane %v607_v51, 5 }
  0x54   : > { %v596_v30 = vsel %vm2896_vm4, %v591_v11, %v595_v21  ;;  %v1333_v33 = vsel %vm2994_vm7, %v1331_v29, %v1332_v38  ;;  %v617_v35 = vshll.u32 %v3143_v63, 16  ;;  %v613_v3 = vrot.slane %v611_v16, 4  ;;  %v3191_v38 = vld [vmem:[%s2821_s26 + $0xa0] sm:$0xf] }
  0x55   : > { %v2223_v17 = vcombine.low %v586_v58, %v596_v30  ;;  %v2299_v46 = vcombine.low %v1330_v47, %v1333_v33  ;;  %v604_v2 = vor.u32 %v603_v41, %v600_v40  ;;  %v2283_v25 = vrot.slane %v2948_v49, 9  ;;  %v3197_v58 = vld [vmem:[%s2821_s26 + $0xa4] sm:$0x1]  ;;  %v3206_v33 = vld [vmem:[%s2821_s26 + $0xa8] sm:$0xf] }
  0x56   : > { %v619_v5 = vrot.slane %v617_v35, 5  ;;  %v1336_v48 = vrot.slane %v2951_v55, 5  ;;  %v1339_v13 = vrot.slane %v3018_v9, 5  ;;  %v614_v39 = vor.u32 %v613_v3, %v609_v57 }
  0x57   : > { %2488 = vmatprep.mubr.msk.bf16.mxu1 %vm767_vm2, %v2223_v17  ;;  %2545 = vmatmul.mubr.msk.bf16.gmra.mrb[8].mxu0 %vm767_vm2, %v2299_v46  ;;  %v605_v53 = vrot.slane %v604_v2, 4  ;;  %v622_v44 = vshrl.u32 %v3160_v26, 16  ;;  %v625_v45 = vshll.u32 %v3160_v26, 16  ;;  %v631_v55 = vshll.u32 %v3163_v6, 16  ;;  %v3212_v46 = vld [vmem:[%s2821_s26 + $0xac] sm:$0xf] }
  0x58   : > { %v1337_v49 = vsel %vm2994_vm7, %v2283_v25, %v1336_v48  ;;  %v1338_v27 = vrot.slane %v1336_v48, 4  ;;  %v635_v9 = vshrl.u32 %v3163_v6, 16  ;;  %v615_v36 = vrot.slane %v614_v39, 4  ;;  %v3220_v48 = vld [vmem:[%s2821_s26 + $0xb0] sm:$0x1] }
  0x59   : > { %v610_v23 = vsel %vm2896_vm4, %v605_v53, %v609_v57  ;;  %v624_v4 = vrot.slane %v622_v44, 4  ;;  %v627_v8 = vrot.slane %v625_v45, 5  ;;  %v633_v12 = vrot.slane %v631_v55, 5  ;;  %v3223_v45 = vld [vmem:[%s2821_s26 + $0xb4] sm:$0xf] }
  0x5a   : > { %v1340_v10 = vsel %vm2994_vm7, %v1338_v27, %v1339_v13  ;;  %v637_v54 = vrot.slane %v635_v9, 4  ;;  %v641_v32 = vshll.u32 %v3171_v14, 16  ;;  %v620_v37 = vsel %vm2896_vm4, %v615_v36, %v619_v5 }
  0x5b   : > { %v2300_v21 = vcombine.low %v1337_v49, %v1340_v10  ;;  %v628_v60 = vor.u32 %v627_v8, %v624_v4  ;;  %v2284_v42 = vrot.slane %v2967_v15, 9  ;;  %v2224_v28 = vcombine.low %v610_v23, %v620_v37  ;;  %v3233_v10 = vld [vmem:[%s2821_s26 + $0xb8] sm:$0xf]  ;;  %v3236_v37 = vld [vmem:[%s2821_s26 + $0xbc] sm:$0x1] }
  0x5c   : > { %v638_v56 = vor.u32 %v637_v54, %v633_v12  ;;  %v643_v11 = vrot.slane %v641_v32, 5  ;;  %v1343_v47 = vrot.slane %v2975_v34, 5  ;;  %v1346_v51 = vrot.slane %v3040_v52, 5 }
  0x5d   : > { %2548 = vmatprep.mubr.msk.bf16.mxu0 %vm767_vm2, %v2300_v21  ;;  %v629_v29 = vrot.slane %v628_v60, 4  ;;  %v646_v40 = vshrl.u32 %v3185_v20, 16  ;;  %v649_v15 = vshll.u32 %v3185_v20, 16  ;;  %2489 = vmatmul.mubr.msk.bf16.gmra.mrb[20].mxu1 %vm767_vm2, %v2224_v28  ;;  %v655_v30 = vshll.u32 %v3191_v38, 16 }
  0x5e   : > { %v639_v41 = vrot.slane %v638_v56, 4  ;;  %v1344_v16 = vsel %vm2994_vm7, %v2284_v42, %v1343_v47  ;;  %v1345_v34 = vrot.slane %v1343_v47, 4  ;;  %v659_v17 = vshrl.u32 %v3191_v38, 16 }
  0x5f   : > { %v634_v52 = vsel %vm2896_vm4, %v629_v29, %v633_v12  ;;  %v648_v57 = vrot.slane %v646_v40, 4  ;;  %v651_v35 = vrot.slane %v649_v15, 5  ;;  %v657_v5 = vrot.slane %v655_v30, 5 }
  0x60   : > { %v644_v2 = vsel %vm2896_vm4, %v639_v41, %v643_v11  ;;  %v1347_v3 = vsel %vm2994_vm7, %v1345_v34, %v1346_v51  ;;  %v665_v25 = vshll.u32 %v3197_v58, 16  ;;  %v661_v44 = vrot.slane %v659_v17, 4 }
  0x61   : > { %v2225_v13 = vcombine.low %v634_v52, %v644_v2  ;;  %v2301_v53 = vcombine.low %v1344_v16, %v1347_v3  ;;  %v652_v39 = vor.u32 %v651_v35, %v648_v57  ;;  %v670_v27 = vshrl.u32 %v3206_v33, 16 }
  0x62   : > { %v667_v49 = vrot.slane %v665_v25, 5  ;;  %v673_v55 = vshll.u32 %v3206_v33, 16  ;;  %v679_v9 = vshll.u32 %v3212_v46, 16  ;;  %v662_v36 = vor.u32 %v661_v44, %v657_v5 }
  0x63   : > { %2492 = vmatprep.mubr.msk.bf16.mxu1 %vm767_vm2, %v2225_v13  ;;  %2549 = vmatmul.mubr.msk.bf16.gmra.mrb[12].mxu0 %vm767_vm2, %v2301_v53  ;;  %v653_v23 = vrot.slane %v652_v39, 4  ;;  %v683_v4 = vshrl.u32 %v3212_v46, 16  ;;  %v689_v8 = vshll.u32 %v3220_v48, 16  ;;  %v672_v12 = vrot.slane %v670_v27, 4 }
  0x64   : > { %v675_v54 = vrot.slane %v673_v55, 5  ;;  %v681_v32 = vrot.slane %v679_v9, 5  ;;  %v694_v21 = vshrl.u32 %v3223_v45, 16  ;;  %v663_v42 = vrot.slane %v662_v36, 4 }
  0x65   : > { %v658_v60 = vsel %vm2896_vm4, %v653_v23, %v657_v5  ;;  %v685_v28 = vrot.slane %v683_v4, 4  ;;  %v691_v56 = vrot.slane %v689_v8, 5  ;;  %v697_v29 = vshll.u32 %v3223_v45, 16 }
  0x66   : > { %v676_v11 = vor.u32 %v675_v54, %v672_v12  ;;  %v696_v47 = vrot.slane %v694_v21, 4  ;;  %v703_v51 = vshll.u32 %v3233_v10, 16  ;;  %v668_v40 = vsel %vm2896_vm4, %v663_v42, %v667_v49 }
  0x67   : > { %v686_v15 = vor.u32 %v685_v28, %v681_v32  ;;  %v707_v41 = vshrl.u32 %v3233_v10, 16  ;;  %v713_v16 = vshll.u32 %v3236_v37, 16  ;;  %v2226_v34 = vcombine.low %v658_v60, %v668_v40 }
  0x68   : > { %v677_v30 = vrot.slane %v676_v11, 4  ;;  %v699_v52 = vrot.slane %v697_v29, 5  ;;  %v705_v57 = vrot.slane %v703_v51, 5  ;;  %v2285_v3 = vrot.slane %v3048_v62, 9 }
  0x69   : > { %v687_v35 = vrot.slane %v686_v15, 4  ;;  %v709_v17 = vrot.slane %v707_v41, 4  ;;  %v715_v2 = vrot.slane %v713_v16, 5  ;;  %2493 = vmatmul.mubr.msk.bf16.gmra.mrb[24].mxu1 %vm767_vm2, %v2226_v34  ;;  %v1350_v13 = vrot.slane %v3057_v31, 5 }
  0x6a   : > { %v682_v5 = vsel %vm2896_vm4, %v677_v30, %v681_v32  ;;  %v700_v25 = vor.u32 %v699_v52, %v696_v47  ;;  %v1353_v53 = vrot.slane %v3065_v22, 5  ;;  %v2286_v49 = vrot.slane %v3078_v61, 9 }
  0x6b   : > { %v692_v39 = vsel %vm2896_vm4, %v687_v35, %v691_v56  ;;  %v710_v44 = vor.u32 %v709_v17, %v705_v57  ;;  %v1357_v27 = vrot.slane %v3084_v0, 5  ;;  %v1351_v23 = vsel %vm2994_vm7, %v2285_v3, %v1350_v13 }
  0x6c   : > { %v2227_v55 = vcombine.low %v682_v5, %v692_v39  ;;  %v701_v9 = vrot.slane %v700_v25, 4  ;;  %v1352_v36 = vrot.slane %v1350_v13, 4  ;;  %v1360_v22 = vrot.slane %v3089_v7, 5 }
  0x6d   : > { %v711_v4 = vrot.slane %v710_v44, 4  ;;  %v1358_v8 = vsel %vm2994_vm7, %v2286_v49, %v1357_v27  ;;  %v1359_v12 = vrot.slane %v1357_v27, 4  ;;  %v2253_v21 = vcombine.low %v3048_v62, %v3057_v31 }
  0x6e   : > { %2496 = vmatprep.mubr.msk.bf16.mxu1 %vm767_vm2, %v2227_v55  ;;  %v706_v54 = vsel %vm2896_vm4, %v701_v9, %v705_v57  ;;  %v1354_v32 = vsel %vm2994_vm7, %v1352_v36, %v1353_v53  ;;  %v2287_v7 = vrot.slane %v3104_v18, 9  ;;  %v1364_v47 = vrot.slane %v3107_v19, 5 }
  0x6f   : > { %v716_v60 = vsel %vm2896_vm4, %v711_v4, %v715_v2  ;;  %v2302_v42 = vcombine.low %v1351_v23, %v1354_v32  ;;  %v1361_v28 = vsel %vm2994_vm7, %v1359_v12, %v1360_v22  ;;  %v1367_v29 = vrot.slane %v3116_v24, 5 }
  0x70   : > { %v2228_v56 = vcombine.low %v706_v54, %v716_v60  ;;  %v2303_v11 = vcombine.low %v1358_v8, %v1361_v28  ;;  %v2288_v51 = vrot.slane %v3131_v50, 9  ;;  %v1371_v62 = vrot.slane %v3137_v1, 5 }
  0x71   : > { %2552 = vmatprep.mubr.msk.bf16.mxu0 %vm767_vm2, %v2302_v42  ;;  %v1374_v43 = vrot.slane %v3143_v63, 5  ;;  %v1365_v31 = vsel %vm2994_vm7, %v2287_v7, %v1364_v47  ;;  %v1366_v40 = vrot.slane %v1364_v47, 4  ;;  %v2289_v15 = vrot.slane %v3160_v26, 9 }
  0x72   : > { %2497 = vmatmul.mubr.msk.bf16.gmra.mrb[28].mxu1 %vm767_vm2, %v2228_v56  ;;  %2553 = vmatmul.mubr.msk.bf16.gmra.mrb[16].mxu0 %vm767_vm2, %v2303_v11  ;;  %v1372_v24 = vsel %vm2994_vm7, %v2288_v51, %v1371_v62  ;;  %v1373_v41 = vrot.slane %v1371_v62, 4  ;;  %v1378_v16 = vrot.slane %v3163_v6, 5  ;;  %v1381_v63 = vrot.slane %v3171_v14, 5 }
  0x73   : > { %2518 = vmatprep.mubr.msk.bf16.mxu1 %vm767_vm2, %v2253_v21  ;;  %v1368_v34 = vsel %vm2994_vm7, %v1366_v40, %v1367_v29  ;;  %v1385_v30 = vrot.slane %v3191_v38, 5  ;;  %v2254_v2 = vcombine.low %v3078_v61, %v3084_v0  ;;  %v2255_v14 = vcombine.low %v3104_v18, %v3107_v19 }
  0x74   : > { %v2304_v52 = vcombine.low %v1365_v31, %v1368_v34  ;;  %v1375_v57 = vsel %vm2994_vm7, %v1373_v41, %v1374_v43  ;;  %v1379_v35 = vsel %vm2994_vm7, %v2289_v15, %v1378_v16  ;;  %v1380_v17 = vrot.slane %v1378_v16, 4 }
  0x75   : > { %v2305_v3 = vcombine.low %v1372_v24, %v1375_v57  ;;  %v2290_v5 = vrot.slane %v3185_v20, 9  ;;  %v1387_v13 = vrot.slane %v1385_v30, 4  ;;  %v1388_v53 = vrot.slane %v3197_v58, 5 }
  0x76   : > { %2556 = vmatprep.mubr.msk.bf16.mxu0 %vm767_vm2, %v2304_v52  ;;  %v1382_v25 = vsel %vm2994_vm7, %v1380_v17, %v1381_v63  ;;  %v1392_v39 = vrot.slane %v3212_v46, 5  ;;  %v2291_v49 = vrot.slane %v3206_v33, 9  ;;  %v1395_v61 = vrot.slane %v3220_v48, 5 }
  0x77   : > { %v2306_v44 = vcombine.low %v1379_v35, %v1382_v25  ;;  %v1386_v18 = vsel %vm2994_vm7, %v2290_v5, %v1385_v30  ;;  %v1389_v19 = vsel %vm2994_vm7, %v1387_v13, %v1388_v53  ;;  %v1399_v58 = vrot.slane %v3233_v10, 5 }
  0x78   : > { %v1394_v0 = vrot.slane %v1392_v39, 4  ;;  %v1393_v48 = vsel %vm2994_vm7, %v2291_v49, %v1392_v39  ;;  %v2256_v55 = vcombine.low %v3131_v50, %v3137_v1  ;;  %v2307_v9 = vcombine.low %v1386_v18, %v1389_v19 }
  0x79   : > { %v2257_v23 = vcombine.low %v3160_v26, %v3163_v6  ;;  %v2292_v4 = vrot.slane %v3223_v45, 9  ;;  %v1401_v8 = vrot.slane %v1399_v58, 4  ;;  %v1402_v12 = vrot.slane %v3236_v37, 5 }
  0x7a   : > { %2519 = vmatmul.mubr.msk.bf16.vlgmr.msra.gmra.mrb[16].mxu1 %vm767_vm2, %v2254_v2  ;;  %2557 = vmatmul.mubr.msk.bf16.gmra.mrb[20].mxu0 %vm767_vm2, %v2305_v3  ;;  %v1396_v27 = vsel %vm2994_vm7, %v1394_v0, %v1395_v61  ;;  %v2258_v26 = vcombine.low %v3185_v20, %v3191_v38  ;;  %v2259_v37 = vcombine.low %v3206_v33, %v3212_v46 }
  0x7b   : > { %2522 = vmatprep.mubr.msk.bf16.mxu1 %vm767_vm2, %v2255_v14  ;;  %2560 = vmatprep.mubr.msk.bf16.mxu0 %vm767_vm2, %v2306_v44  ;;  %v2308_v36 = vcombine.low %v1393_v48, %v1396_v27  ;;  %v1400_v50 = vsel %vm2994_vm7, %v2292_v4, %v1399_v58  ;;  %v1403_v1 = vsel %vm2994_vm7, %v1401_v8, %v1402_v12 }
  0x7c   : > { %v2309_v6 = vcombine.low %v1400_v50, %v1403_v1  ;;  %v2260_v22 = vcombine.low %v3223_v45, %v3233_v10 }
  0x82   : > { %2523 = vmatmul.mubr.msk.bf16.gmra.mrb[20].mxu1 %vm767_vm2, %v2256_v55  ;;  %2561 = vmatmul.mubr.msk.bf16.gmra.mrb[24].mxu0 %vm767_vm2, %v2307_v9 }
  0x83   : > { %2526 = vmatprep.mubr.msk.bf16.mxu1 %vm767_vm2, %v2257_v23  ;;  %2564 = vmatprep.mubr.msk.bf16.mxu0 %vm767_vm2, %v2308_v36 }
  0x8a   : > { %2527 = vmatmul.mubr.msk.bf16.gmra.mrb[24].mxu1 %vm767_vm2, %v2258_v26  ;;  %2565 = vmatmul.mubr.msk.bf16.gmra.mrb[28].mxu0 %vm767_vm2, %v2309_v6 }
  0x8b   : > { %2530 = vmatprep.mubr.msk.bf16.mxu1 %vm767_vm2, %v2259_v37 }
  0x92   : > { %2531 = vmatmul.mubr.msk.bf16.gmra.mrb[28].mxu1 %vm767_vm2, %v2260_v22 }
  0xfe   : > { %v2470_v59 = vpop.f32.mrb[0].mxu1 }
  0xff   : > { %v854_v54 = vpop.f32.mrb[1].mxu1 }
 0x100   : > { %v2471_v32 = vpop.f32.mrb[2].mxu1 }
 0x101   : > { %v857_v21 = vpop.f32.mrb[3].mxu1 }
 0x108   : > { %v2474_v20 = vpop.f32.mrb[4].mxu1 }
 0x109   : > { %v870_v38 = vpop.f32.mrb[5].mxu1 }
 0x10a   : > { %v2475_v60 = vpop.f32.mrb[6].mxu1 }
 0x10b   : > { %v873_v42 = vpop.f32.mrb[7].mxu1 }
 0x10f   : > { %v2538_v33 = vpop.f32.mrb[0].mxu0 }
 0x110   : > { %v3346_v46 = vadd.f32 %v2538_v33, %v2470_v59  ;;  %v1539_v28 = vpop.f32.mrb[1].mxu0  ;;  %v2478_v7 = vpop.f32.mrb[8].mxu1 }
 0x111   : > { %v3348_v56 = vadd.f32 %v1539_v28, %v854_v54  ;;  %v2539_v11 = vpop.f32.mrb[2].mxu0  ;;  %v886_v47 = vpop.f32.mrb[9].mxu1 }
 0x112   : > { %v3350_v45 = vadd.f32 %v2539_v11, %v2471_v32  ;;  %v1542_v10 = vpop.f32.mrb[3].mxu0  ;;  %v2479_v29 = vpop.f32.mrb[10].mxu1  ;;  %1704 = vst.msk [vmem:[#allocation2 + $0x10] sm:$0xff] (!%p2326_p7), %vm767_vm2, %v3346_v46 }
 0x113   : > { %v3352_v51 = vadd.f32 %v1542_v10, %v857_v21  ;;  %v889_v62 = vpop.f32.mrb[11].mxu1  ;;  %1702 = vst.msk [vmem:[#allocation2] sm:$0xff] (!%p2326_p7), %vm767_vm2, %v3348_v56 }
 0x114   : > { %1705 = vst.msk [vmem:[#allocation2 + $0x18] sm:$0xff] (!%p2326_p7), %vm767_vm2, %v3350_v45 }
 0x115   : > { %1703 = vst.msk [vmem:[#allocation2 + $0x8] sm:$0xff] (!%p2326_p7), %vm767_vm2, %v3352_v51 }
 0x119   : > { %v2482_v43 = vpop.f32.mrb[12].mxu1 }
 0x11a   : > { %v902_v31 = vpop.f32.mrb[13].mxu1 }
 0x11b   : > { %v2483_v40 = vpop.f32.mrb[14].mxu1 }
 0x11c   : > { %v905_v15 = vpop.f32.mrb[15].mxu1 }
 0x11d   : > { %v2542_v24 = vpop.f32.mrb[4].mxu0 }
 0x11e   : > { %v3354_v41 = vadd.f32 %v2542_v24, %v2474_v20  ;;  %v1555_v16 = vpop.f32.mrb[5].mxu0 }
 0x11f   : > { %v3356_v63 = vadd.f32 %v1555_v16, %v870_v38  ;;  %v2543_v34 = vpop.f32.mrb[6].mxu0 }
 0x120   : > { %v3358_v30 = vadd.f32 %v2543_v34, %v2475_v60  ;;  %v1558_v52 = vpop.f32.mrb[7].mxu0  ;;  %1708 = vst.msk [vmem:[#allocation2 + $0x30] sm:$0xff] (!%p2326_p7), %vm767_vm2, %v3354_v41 }
 0x121   : > { %v3360_v57 = vadd.f32 %v1558_v52, %v873_v42  ;;  %1706 = vst.msk [vmem:[#allocation2 + $0x20] sm:$0xff] (!%p2326_p7), %vm767_vm2, %v3356_v63 }
 0x122   : > { %1709 = vst.msk [vmem:[#allocation2 + $0x38] sm:$0xff] (!%p2326_p7), %vm767_vm2, %v3358_v30 }
 0x123   : > { %1707 = vst.msk [vmem:[#allocation2 + $0x28] sm:$0xff] (!%p2326_p7), %vm767_vm2, %v3360_v57 }
 0x12a   : > { %v2546_v35 = vpop.f32.mrb[8].mxu0 }
 0x12b   : > { %v3362_v17 = vadd.f32 %v2546_v35, %v2478_v7  ;;  %v1571_v2 = vpop.f32.mrb[9].mxu0 }
 0x12c   : > { %v3364_v3 = vadd.f32 %v1571_v2, %v886_v47  ;;  %v2547_v14 = vpop.f32.mrb[10].mxu0 }
 0x12d   : > { %v3366_v5 = vadd.f32 %v2547_v14, %v2479_v29  ;;  %v1574_v25 = vpop.f32.mrb[11].mxu0  ;;  %1712 = vst.msk [vmem:[#allocation2 + $0x50] sm:$0xff] (!%p2326_p7), %vm767_vm2, %v3362_v17 }
 0x12e   : > { %v3368_v13 = vadd.f32 %v1574_v25, %v889_v62  ;;  %1710 = vst.msk [vmem:[#allocation2 + $0x40] sm:$0xff] (!%p2326_p7), %vm767_vm2, %v3364_v3 }
 0x12f   : > { %1713 = vst.msk [vmem:[#allocation2 + $0x58] sm:$0xff] (!%p2326_p7), %vm767_vm2, %v3366_v5 }
 0x130   : > { %1711 = vst.msk [vmem:[#allocation2 + $0x48] sm:$0xff] (!%p2326_p7), %vm767_vm2, %v3368_v13 }
 0x136   : > { %v2550_v53 = vpop.f32.mrb[12].mxu0 }
 0x137   : > { %v3370_v39 = vadd.f32 %v2550_v53, %v2482_v43  ;;  %v1587_v44 = vpop.f32.mrb[13].mxu0 }
 0x138   : > { %v3372_v49 = vadd.f32 %v1587_v44, %v902_v31  ;;  %v2551_v61 = vpop.f32.mrb[14].mxu0 }
 0x139   : > { %v3374_v0 = vadd.f32 %v2551_v61, %v2483_v40  ;;  %v1590_v18 = vpop.f32.mrb[15].mxu0  ;;  %1716 = vst.msk [vmem:[#allocation2 + $0x70] sm:$0xff] (!%p2326_p7), %vm767_vm2, %v3370_v39 }
 0x13a   : > { %v3376_v19 = vadd.f32 %v1590_v18, %v905_v15  ;;  %1714 = vst.msk [vmem:[#allocation2 + $0x60] sm:$0xff] (!%p2326_p7), %vm767_vm2, %v3372_v49 }
 0x13b   : > { %1717 = vst.msk [vmem:[#allocation2 + $0x78] sm:$0xff] (!%p2326_p7), %vm767_vm2, %v3374_v0 }
 0x13c   : > { %1715 = vst.msk [vmem:[#allocation2 + $0x68] sm:$0xff] (!%p2326_p7), %vm767_vm2, %v3376_v19 }
 0x145   : > { %v2554_v58 = vpop.f32.mrb[16].mxu0 }
 0x146   : > { %v1603_v48 = vpop.f32.mrb[17].mxu0 }
 0x147   : > { %v2555_v27 = vpop.f32.mrb[18].mxu0 }
 0x148   : > { %v1606_v55 = vpop.f32.mrb[19].mxu0 }
 0x14d   : > { %v2520_v9 = vpop.f32.mrb[16].mxu1  ;;  %v2558_v23 = vpop.f32.mrb[20].mxu0 }
 0x14e   : > { %v3378_v36 = vadd.f32 %v2554_v58, %v2520_v9  ;;  %v1210_v4 = vpop.f32.mrb[17].mxu1  ;;  %v1619_v8 = vpop.f32.mrb[21].mxu0 }
 0x14f   : > { %v3380_v12 = vadd.f32 %v1603_v48, %v1210_v4  ;;  %v2521_v50 = vpop.f32.mrb[18].mxu1  ;;  %v2559_v1 = vpop.f32.mrb[22].mxu0 }
 0x150   : > { %v3382_v26 = vadd.f32 %v2555_v27, %v2521_v50  ;;  %v1213_v6 = vpop.f32.mrb[19].mxu1  ;;  %v1622_v37 = vpop.f32.mrb[23].mxu0  ;;  %1720 = vst.msk [vmem:[#allocation2 + $0x90] sm:$0xff] (!%p2326_p7), %vm767_vm2, %v3378_v36 }
 0x151   : > { %v3384_v22 = vadd.f32 %v1606_v55, %v1213_v6  ;;  %1718 = vst.msk [vmem:[#allocation2 + $0x80] sm:$0xff] (!%p2326_p7), %vm767_vm2, %v3380_v12 }
 0x152   : > { %1721 = vst.msk [vmem:[#allocation2 + $0x98] sm:$0xff] (!%p2326_p7), %vm767_vm2, %v3382_v26 }
 0x153   : > { %1719 = vst.msk [vmem:[#allocation2 + $0x88] sm:$0xff] (!%p2326_p7), %vm767_vm2, %v3384_v22 }
 0x155   : > { %v2524_v59 = vpop.f32.mrb[20].mxu1  ;;  %v2562_v54 = vpop.f32.mrb[24].mxu0 }
 0x156   : > { %v3386_v32 = vadd.f32 %v2558_v23, %v2524_v59  ;;  %v1226_v21 = vpop.f32.mrb[21].mxu1  ;;  %v1635_v20 = vpop.f32.mrb[25].mxu0 }
 0x157   : > { %v3388_v38 = vadd.f32 %v1619_v8, %v1226_v21  ;;  %v2525_v60 = vpop.f32.mrb[22].mxu1  ;;  %v2563_v42 = vpop.f32.mrb[26].mxu0 }
 0x158   : > { %v3390_v33 = vadd.f32 %v2559_v1, %v2525_v60  ;;  %v1229_v28 = vpop.f32.mrb[23].mxu1  ;;  %v1638_v7 = vpop.f32.mrb[27].mxu0  ;;  %1724 = vst.msk [vmem:[#allocation2 + $0xb0] sm:$0xff] (!%p2326_p7), %vm767_vm2, %v3386_v32 }
 0x159   : > { %v3392_v11 = vadd.f32 %v1622_v37, %v1229_v28  ;;  %1722 = vst.msk [vmem:[#allocation2 + $0xa0] sm:$0xff] (!%p2326_p7), %vm767_vm2, %v3388_v38 }
 0x15a   : > { %1725 = vst.msk [vmem:[#allocation2 + $0xb8] sm:$0xff] (!%p2326_p7), %vm767_vm2, %v3390_v33 }
 0x15b   : > { %1723 = vst.msk [vmem:[#allocation2 + $0xa8] sm:$0xff] (!%p2326_p7), %vm767_vm2, %v3392_v11 }
 0x15d   : > { %v2528_v47 = vpop.f32.mrb[24].mxu1  ;;  %v2566_v10 = vpop.f32.mrb[28].mxu0 }
 0x15e   : > { %v3394_v29 = vadd.f32 %v2562_v54, %v2528_v47  ;;  %v1242_v62 = vpop.f32.mrb[25].mxu1  ;;  %v1651_v43 = vpop.f32.mrb[29].mxu0 }
 0x15f   : > { %v3396_v31 = vadd.f32 %v1635_v20, %v1242_v62  ;;  %v2529_v40 = vpop.f32.mrb[26].mxu1  ;;  %v2567_v15 = vpop.f32.mrb[30].mxu0 }
 0x160   : > { %v3398_v24 = vadd.f32 %v2563_v42, %v2529_v40  ;;  %v1245_v16 = vpop.f32.mrb[27].mxu1  ;;  %v1654_v34 = vpop.f32.mrb[31].mxu0  ;;  %1728 = vst.msk [vmem:[#allocation2 + $0xd0] sm:$0xff] (!%p2326_p7), %vm767_vm2, %v3394_v29 }
 0x161   : > { %v3400_v52 = vadd.f32 %v1638_v7, %v1245_v16  ;;  %1726 = vst.msk [vmem:[#allocation2 + $0xc0] sm:$0xff] (!%p2326_p7), %vm767_vm2, %v3396_v31 }
 0x162   : > { %1729 = vst.msk [vmem:[#allocation2 + $0xd8] sm:$0xff] (!%p2326_p7), %vm767_vm2, %v3398_v24 }
 0x163   : > { %1701 = sbr.rel (%p2326_p7) target bundleno = 364 (0x16c), region = 44  ;;  %1727 = vst.msk [vmem:[#allocation2 + $0xc8] sm:$0xff] (!%p2326_p7), %vm767_vm2, %v3400_v52 }
 0x165   : > { %v2532_v35 = vpop.f32.mrb[28].mxu1 }
 0x166   : > { %v3402_v2 = vadd.f32 %v2566_v10, %v2532_v35  ;;  %v1258_v14 = vpop.f32.mrb[29].mxu1 }
 0x167   : > { %v3404_v25 = vadd.f32 %v1651_v43, %v1258_v14  ;;  %v2533_v53 = vpop.f32.mrb[30].mxu1 }
 0x168   : > { %v3406_v44 = vadd.f32 %v2567_v15, %v2533_v53  ;;  %v1261_v61 = vpop.f32.mrb[31].mxu1  ;;  %1732 = vst.msk [vmem:[#allocation2 + $0xf0] sm:$0xff] (!%p2326_p7), %vm767_vm2, %v3402_v2 }
 0x169   : > { %v3408_v18 = vadd.f32 %v1654_v34, %v1261_v61  ;;  %1730 = vst.msk [vmem:[#allocation2 + $0xe0] sm:$0xff] (!%p2326_p7), %vm767_vm2, %v3404_v25 }
 0x16a   : > { %1733 = vst.msk [vmem:[#allocation2 + $0xf8] sm:$0xff] %vm767_vm2, %v3406_v44 }
 0x16b   : > { %1731 = vst.msk [vmem:[#allocation2 + $0xe8] sm:$0xff] %vm767_vm2, %v3408_v18 }
 0x16c PF: > { %p2327_p8 = scmp.le.s32.totalorder %s2718_s18, 0 }
 0x16d   : > { %v1738_v58 = vld [vmem:[#allocation2] sm:$0xff] (!%p2327_p8)  ;;  %v1739_v48 = vld [vmem:[#allocation2 + $0x8] sm:$0xff] (!%p2327_p8)  ;;  %v1740_v27 = vld [vmem:[#allocation2 + $0x10] sm:$0xff] (!%p2327_p8) }
 0x16e   : > { %1737 = sbr.rel (%p2327_p8) target bundleno = 384 (0x180), region = 48  ;;  %v1770_v55 = vadd.f32 (!%p2327_p8), %v3348_v56, %v1738_v58  ;;  %v1771_v9 = vadd.f32 (!%p2327_p8), %v3352_v51, %v1739_v48  ;;  %v1772_v23 = vadd.f32 (!%p2327_p8), %v3346_v46, %v1740_v27  ;;  %v1741_v4 = vld [vmem:[#allocation2 + $0x18] sm:$0xff] (!%p2327_p8)  ;;  %v1742_v8 = vld [vmem:[#allocation2 + $0x20] sm:$0xff] (!%p2327_p8)  ;;  %v1743_v50 = vld [vmem:[#allocation2 + $0x28] sm:$0xff] (!%p2327_p8) }
 0x16f   : > { %v1773_v1 = vadd.f32 (!%p2327_p8), %v3350_v45, %v1741_v4  ;;  %v1774_v6 = vadd.f32 (!%p2327_p8), %v3356_v63, %v1742_v8  ;;  %v1775_v37 = vadd.f32 (!%p2327_p8), %v3360_v57, %v1743_v50  ;;  %v1744_v59 = vld [vmem:[#allocation2 + $0x30] sm:$0xff] (!%p2327_p8)  ;;  %v1745_v54 = vld [vmem:[#allocation2 + $0x38] sm:$0xff] (!%p2327_p8)  ;;  %v1746_v21 = vld [vmem:[#allocation2 + $0x40] sm:$0xff] (!%p2327_p8) }
 0x170   : > { %1802 = vst.msk [vmem:[#allocation2] sm:$0xff] (!%p2327_p8), %vm767_vm2, %v1770_v55  ;;  %1803 = vst.msk [vmem:[#allocation2 + $0x8] sm:$0xff] (!%p2327_p8), %vm767_vm2, %v1771_v9  ;;  %v1776_v46 = vadd.f32 (!%p2327_p8), %v3354_v41, %v1744_v59  ;;  %v1777_v56 = vadd.f32 (!%p2327_p8), %v3358_v30, %v1745_v54  ;;  %v1778_v51 = vadd.f32 (!%p2327_p8), %v3364_v3, %v1746_v21  ;;  %v1747_v45 = vld [vmem:[#allocation2 + $0x48] sm:$0xff] (!%p2327_p8)  ;;  %v1748_v20 = vld [vmem:[#allocation2 + $0x50] sm:$0xff] (!%p2327_p8) }
 0x171   : > { %1804 = vst.msk [vmem:[#allocation2 + $0x10] sm:$0xff] (!%p2327_p8), %vm767_vm2, %v1772_v23  ;;  %v1749_v63 = vld [vmem:[#allocation2 + $0x58] sm:$0xff] (!%p2327_p8)  ;;  %1805 = vst.msk [vmem:[#allocation2 + $0x18] sm:$0xff] (!%p2327_p8), %vm767_vm2, %v1773_v1  ;;  %v1779_v57 = vadd.f32 (!%p2327_p8), %v3368_v13, %v1747_v45  ;;  %v1780_v60 = vadd.f32 (!%p2327_p8), %v3362_v17, %v1748_v20  ;;  %v1750_v41 = vld [vmem:[#allocation2 + $0x60] sm:$0xff] (!%p2327_p8) }
 0x172   : > { %1806 = vst.msk [vmem:[#allocation2 + $0x20] sm:$0xff] (!%p2327_p8), %vm767_vm2, %v1774_v6  ;;  %1807 = vst.msk [vmem:[#allocation2 + $0x28] sm:$0xff] (!%p2327_p8), %vm767_vm2, %v1775_v37  ;;  %v1781_v42 = vadd.f32 (!%p2327_p8), %v3366_v5, %v1749_v63  ;;  %v1751_v28 = vld [vmem:[#allocation2 + $0x68] sm:$0xff] (!%p2327_p8)  ;;  %v1752_v30 = vld [vmem:[#allocation2 + $0x70] sm:$0xff] (!%p2327_p8)  ;;  %v1782_v3 = vadd.f32 (!%p2327_p8), %v3372_v49, %v1750_v41 }
 0x173   : > { %1808 = vst.msk [vmem:[#allocation2 + $0x30] sm:$0xff] (!%p2327_p8), %vm767_vm2, %v1776_v46  ;;  %1809 = vst.msk [vmem:[#allocation2 + $0x38] sm:$0xff] (!%p2327_p8), %vm767_vm2, %v1777_v56  ;;  %v1783_v7 = vadd.f32 (!%p2327_p8), %v3376_v19, %v1751_v28  ;;  %v1784_v47 = vadd.f32 (!%p2327_p8), %v3370_v39, %v1752_v30  ;;  %v1753_v13 = vld [vmem:[#allocation2 + $0x78] sm:$0xff] (!%p2327_p8)  ;;  %v1754_v10 = vld [vmem:[#allocation2 + $0x80] sm:$0xff] (!%p2327_p8) }
 0x174   : > { %1810 = vst.msk [vmem:[#allocation2 + $0x40] sm:$0xff] (!%p2327_p8), %vm767_vm2, %v1778_v51  ;;  %v1755_v17 = vld [vmem:[#allocation2 + $0x88] sm:$0xff] (!%p2327_p8)  ;;  %1811 = vst.msk [vmem:[#allocation2 + $0x48] sm:$0xff] (!%p2327_p8), %vm767_vm2, %v1779_v57  ;;  %v1785_v5 = vadd.f32 (!%p2327_p8), %v3374_v0, %v1753_v13  ;;  %v1786_v62 = vadd.f32 (!%p2327_p8), %v3380_v12, %v1754_v10  ;;  %v1756_v49 = vld [vmem:[#allocation2 + $0x90] sm:$0xff] (!%p2327_p8) }
 0x175   : > { %1812 = vst.msk [vmem:[#allocation2 + $0x50] sm:$0xff] %vm767_vm2, %v1780_v60  ;;  %1813 = vst.msk [vmem:[#allocation2 + $0x58] sm:$0xff] %vm767_vm2, %v1781_v42  ;;  %v1787_v43 = vadd.f32 %v3384_v22, %v1755_v17  ;;  %v1757_v40 = vld [vmem:[#allocation2 + $0x98] sm:$0xff]  ;;  %v1758_v19 = vld [vmem:[#allocation2 + $0xa0] sm:$0xff]  ;;  %v1788_v39 = vadd.f32 %v3378_v36, %v1756_v49 }
 0x176   : > { %1814 = vst.msk [vmem:[#allocation2 + $0x60] sm:$0xff] %vm767_vm2, %v1782_v3  ;;  %1815 = vst.msk [vmem:[#allocation2 + $0x68] sm:$0xff] %vm767_vm2, %v1783_v7  ;;  %v1789_v15 = vadd.f32 %v3382_v26, %v1757_v40  ;;  %v1790_v16 = vadd.f32 %v3388_v38, %v1758_v19  ;;  %v1759_v0 = vld [vmem:[#allocation2 + $0xa8] sm:$0xff]  ;;  %v1760_v34 = vld [vmem:[#allocation2 + $0xb0] sm:$0xff] }
 0x177   : > { %1816 = vst.msk [vmem:[#allocation2 + $0x70] sm:$0xff] %vm767_vm2, %v1784_v47  ;;  %v1761_v12 = vld [vmem:[#allocation2 + $0xb8] sm:$0xff]  ;;  %1817 = vst.msk [vmem:[#allocation2 + $0x78] sm:$0xff] %vm767_vm2, %v1785_v5  ;;  %v1791_v22 = vadd.f32 %v3392_v11, %v1759_v0  ;;  %v1792_v35 = vadd.f32 %v3386_v32, %v1760_v34  ;;  %v1762_v36 = vld [vmem:[#allocation2 + $0xc0] sm:$0xff] }
 0x178   : > { %1818 = vst.msk [vmem:[#allocation2 + $0x80] sm:$0xff] %vm767_vm2, %v1786_v62  ;;  %1819 = vst.msk [vmem:[#allocation2 + $0x88] sm:$0xff] %vm767_vm2, %v1787_v43  ;;  %v1793_v14 = vadd.f32 %v3390_v33, %v1761_v12  ;;  %v1763_v53 = vld [vmem:[#allocation2 + $0xc8] sm:$0xff]  ;;  %v1764_v26 = vld [vmem:[#allocation2 + $0xd0] sm:$0xff]  ;;  %v1794_v38 = vadd.f32 %v3396_v31, %v1762_v36 }
 0x179   : > { %1820 = vst.msk [vmem:[#allocation2 + $0x90] sm:$0xff] %vm767_vm2, %v1788_v39  ;;  %1821 = vst.msk [vmem:[#allocation2 + $0x98] sm:$0xff] %vm767_vm2, %v1789_v15  ;;  %v1795_v61 = vadd.f32 %v3400_v52, %v1763_v53  ;;  %v1796_v58 = vadd.f32 %v3394_v29, %v1764_v26  ;;  %v1765_v11 = vld [vmem:[#allocation2 + $0xd8] sm:$0xff]  ;;  %v1766_v48 = vld [vmem:[#allocation2 + $0xe0] sm:$0xff] }
 0x17a   : > { %1822 = vst.msk [vmem:[#allocation2 + $0xa0] sm:$0xff] %vm767_vm2, %v1790_v16  ;;  %v1767_v32 = vld [vmem:[#allocation2 + $0xe8] sm:$0xff]  ;;  %1823 = vst.msk [vmem:[#allocation2 + $0xa8] sm:$0xff] %vm767_vm2, %v1791_v22  ;;  %v1797_v33 = vadd.f32 %v3398_v24, %v1765_v11  ;;  %v1798_v27 = vadd.f32 %v3404_v25, %v1766_v48  ;;  %v1768_v31 = vld [vmem:[#allocation2 + $0xf0] sm:$0xff] }
 0x17b   : > { %1824 = vst.msk [vmem:[#allocation2 + $0xb0] sm:$0xff] %vm767_vm2, %v1792_v35  ;;  %1825 = vst.msk [vmem:[#allocation2 + $0xb8] sm:$0xff] %vm767_vm2, %v1793_v14  ;;  %v1799_v55 = vadd.f32 %v3408_v18, %v1767_v32  ;;  %v1769_v9 = vld [vmem:[#allocation2 + $0xf8] sm:$0xff]  ;;  %v1800_v29 = vadd.f32 %v3402_v2, %v1768_v31 }
 0x17c   : > { %1826 = vst.msk [vmem:[#allocation2 + $0xc0] sm:$0xff] %vm767_vm2, %v1794_v38  ;;  %1827 = vst.msk [vmem:[#allocation2 + $0xc8] sm:$0xff] %vm767_vm2, %v1795_v61  ;;  %v1801_v52 = vadd.f32 %v3406_v44, %v1769_v9 }
 0x17d   : > { %1828 = vst.msk [vmem:[#allocation2 + $0xd0] sm:$0xff] %vm767_vm2, %v1796_v58  ;;  %1829 = vst.msk [vmem:[#allocation2 + $0xd8] sm:$0xff] %vm767_vm2, %v1797_v33 }
 0x17e   : > { %1830 = vst.msk [vmem:[#allocation2 + $0xe0] sm:$0xff] %vm767_vm2, %v1798_v27  ;;  %1831 = vst.msk [vmem:[#allocation2 + $0xe8] sm:$0xff] %vm767_vm2, %v1799_v55 }
 0x17f   : > { %1832 = vst.msk [vmem:[#allocation2 + $0xf0] sm:$0xff] %vm767_vm2, %v1800_v29  ;;  %1833 = vst.msk [vmem:[#allocation2 + $0xf8] sm:$0xff] %vm767_vm2, %v1801_v52 }
 0x180 PF: > { %p2328_p9 = scmp.ne.s32.totalorder %s2718_s18, 2 }
 0x181   : > { %v3544_v2 = vld [vmem:[%s3712_s2] ss:$0 sm:$0xff] (!%p2328_p9)  ;;  %v2400_v37 = vld [vmem:[%s2807_s10 + $0x8] sm:$0xff] (!%p2328_p9)   ;;  %v2401_v45 = vld [vmem:[%s2807_s10 + $0x10] sm:$0xff] (!%p2328_p9)  }
 0x182   : > { %1837 = sbr.rel (%p2328_p9) target bundleno = 432 (0x1b0), region = 52  ;;  %v1838_v24 = vld [vmem:[#allocation2] sm:$0xff] (!%p2328_p9)  ;;  %v1839_v23 = vld [vmem:[#allocation2 + $0x8] sm:$0xff] (!%p2328_p9)  ;;  %v2342_v46 = vunpack.c.l.bf16 (!%p2328_p9), %v2400_v37  ;;  %v2343_v51 = vunpack.c.h.bf16 (!%p2328_p9), %v2400_v37  ;;  %v2346_v41 = vunpack.c.l.bf16 (!%p2328_p9), %v2401_v45  ;;  %v2402_v28 = vld [vmem:[%s2807_s10 + $0x18] sm:$0xff] (!%p2328_p9)   ;;  %v2347_v47 = vunpack.c.h.bf16 (!%p2328_p9), %v2401_v45 }
 0x183   : > { %v3549_v25 = vld [vmem:[%s3713_s3] ss:$0 sm:$0xff] (!%p2328_p9)  ;;  %v1877_v44 = vmul.f32 (!%p2328_p9), %v3544_v2, %v1838_v24  ;;  %v1840_v4 = vld [vmem:[#allocation2 + $0x10] sm:$0xff] (!%p2328_p9)  ;;  %v1878_v50 = vmul.f32 (!%p2328_p9), %v3544_v2, %v1839_v23  ;;  %v1841_v59 = vld [vmem:[#allocation2 + $0x18] sm:$0xff] (!%p2328_p9)  ;;  %v2350_v19 = vunpack.c.l.bf16 (!%p2328_p9), %v2402_v28  ;;  %v2351_v53 = vunpack.c.h.bf16 (!%p2328_p9), %v2402_v28 }
 0x184   : > { %v2337_v18 = vld [vmem:[%s2807_s10] sm:$0xff] (!%p2328_p9)   ;;  %v1879_v6 = vmul.f32 (!%p2328_p9), %v3544_v2, %v1840_v4  ;;  %v1880_v56 = vmul.f32 (!%p2328_p9), %v3544_v2, %v1841_v59  ;;  %v1843_v20 = vld [vmem:[#allocation2 + $0x28] sm:$0xff] (!%p2328_p9)  ;;  %v2405_v29 = vld [vmem:[%s2807_s10 + $0x30] sm:$0xff] (!%p2328_p9)  }
 0x185   : > { %v2338_v8 = vunpack.c.l.bf16 (!%p2328_p9), %v2337_v18  ;;  %v2339_v1 = vunpack.c.h.bf16 (!%p2328_p9), %v2337_v18  ;;  %v1842_v54 = vld [vmem:[#allocation2 + $0x20] sm:$0xff] (!%p2328_p9)  ;;  %v1916_v21 = vadd.f32 (!%p2328_p9), %v3549_v25, %v1877_v44  ;;  %v1844_v63 = vld [vmem:[#allocation2 + $0x30] sm:$0xff] (!%p2328_p9)  ;;  %v1917_v57 = vadd.f32 (!%p2328_p9), %v3549_v25, %v1878_v50  ;;  %v1845_v62 = vld [vmem:[#allocation2 + $0x38] sm:$0xff] (!%p2328_p9) }
 0x186   : > { %v1918_v60 = vadd.f32 (!%p2328_p9), %v3549_v25, %v1879_v6  ;;  %v1881_v42 = vmul.f32 (!%p2328_p9), %v3544_v2, %v1842_v54  ;;  %v1919_v3 = vadd.f32 (!%p2328_p9), %v3549_v25, %v1880_v56  ;;  %v1882_v7 = vmul.f32 (!%p2328_p9), %v3544_v2, %v1843_v20  ;;  %v1846_v39 = vld [vmem:[#allocation2 + $0x40] sm:$0xff] (!%p2328_p9)  ;;  %v1847_v22 = vld [vmem:[#allocation2 + $0x48] sm:$0xff] (!%p2328_p9)  ;;  %v2406_v20 = vld [vmem:[%s2807_s10 + $0x38] sm:$0xff] (!%p2328_p9)  }
 0x187   : > { %v2012_v30 = vadd.f32 (!%p2328_p9), %v2338_v8, %v1916_v21  ;;  %v2013_v13 = vadd.f32 (!%p2328_p9), %v2339_v1, %v1917_v57  ;;  %v1883_v5 = vmul.f32 (!%p2328_p9), %v3544_v2, %v1844_v63  ;;  %v2403_v15 = vld [vmem:[%s2807_s10 + $0x20] sm:$0xff] (!%p2328_p9)   ;;  %v1884_v36 = vmul.f32 (!%p2328_p9), %v3544_v2, %v1845_v62  ;;  %v1848_v26 = vld [vmem:[#allocation2 + $0x50] sm:$0xff] (!%p2328_p9)  ;;  %v2404_v38 = vld [vmem:[%s2807_s10 + $0x28] sm:$0xff] (!%p2328_p9)  }
 0x188   : > { %v2014_v10 = vadd.f32 (!%p2328_p9), %v2342_v46, %v1918_v60  ;;  %v1920_v17 = vadd.f32 (!%p2328_p9), %v3549_v25, %v1881_v42  ;;  %v2015_v49 = vadd.f32 (!%p2328_p9), %v2343_v51, %v1919_v3  ;;  %v1921_v40 = vadd.f32 (!%p2328_p9), %v3549_v25, %v1882_v7  ;;  %v1849_v32 = vld [vmem:[#allocation2 + $0x58] sm:$0xff] (!%p2328_p9)  ;;  %v1850_v9 = vld [vmem:[#allocation2 + $0x60] sm:$0xff] (!%p2328_p9)  ;;  %v1851_v23 = vld [vmem:[#allocation2 + $0x68] sm:$0xff] (!%p2328_p9) }
 0x189   : > { %v2044_v43 = vmax.f32 %v2012_v30, 0.0  ;;  %v2045_v16 = vmax.f32 %v2013_v13, 0.0  ;;  %v1922_v12 = vadd.f32 %v3549_v25, %v1883_v5  ;;  %v1885_v11 = vmul.f32 %v3544_v2, %v1846_v39  ;;  %v1852_v21 = vld [vmem:[#allocation2 + $0x70] sm:$0xff]  ;;  %v1853_v63 = vld [vmem:[#allocation2 + $0x78] sm:$0xff]  ;;  %v2407_v13 = vld [vmem:[%s2807_s10 + $0x40] sm:$0xff]  }
 0x18a   : > { %v2046_v0 = vmax.f32 %v2014_v10, 0.0  ;;  %v2016_v34 = vadd.f32 %v2346_v41, %v1920_v17  ;;  %v2047_v35 = vmax.f32 %v2015_v49, 0.0  ;;  %v2017_v14 = vadd.f32 %v2347_v47, %v1921_v40  ;;  %v1854_v47 = vld [vmem:[#allocation2 + $0x80] sm:$0xff] }
 0x18b   : > { %2076 = vst.msk [vmem:[%s2819_s17] sm:$0xff] %vm767_vm2, %v2044_v43  ;;  %2077 = vst.msk [vmem:[%s2819_s17 + $0x8] sm:$0xff] %vm767_vm2, %v2045_v16  ;;  %v2018_v58 = vadd.f32 %v2350_v19, %v1922_v12  ;;  %v2354_v48 = vunpack.c.l.bf16 %v2403_v15  ;;  %v1923_v27 = vadd.f32 %v3549_v25, %v1884_v36  ;;  %v1886_v55 = vmul.f32 %v3544_v2, %v1847_v22  ;;  %v1855_v43 = vld [vmem:[#allocation2 + $0x88] sm:$0xff] }
 0x18c   : > { %2078 = vst.msk [vmem:[%s2819_s17 + $0x10] sm:$0xff] %vm767_vm2, %v2046_v0  ;;  %v2048_v61 = vmax.f32 %v2016_v34, 0.0  ;;  %2079 = vst.msk [vmem:[%s2819_s17 + $0x18] sm:$0xff] %vm767_vm2, %v2047_v35  ;;  %v2049_v33 = vmax.f32 %v2017_v14, 0.0  ;;  %v2355_v31 = vunpack.c.h.bf16 %v2403_v15  ;;  %v1924_v24 = vadd.f32 %v3549_v25, %v1885_v11  ;;  %v1856_v15 = vld [vmem:[#allocation2 + $0x90] sm:$0xff]  ;;  %v2408_v16 = vld [vmem:[%s2807_s10 + $0x48] sm:$0xff]  }
 0x18d   : > { %v2050_v52 = vmax.f32 %v2018_v58, 0.0  ;;  %v1887_v44 = vmul.f32 %v3544_v2, %v1848_v26  ;;  %v2358_v18 = vunpack.c.l.bf16 %v2404_v38  ;;  %v2019_v4 = vadd.f32 %v2351_v53, %v1923_v27  ;;  %v1857_v35 = vld [vmem:[#allocation2 + $0x98] sm:$0xff] }
 0x18e   : > { %2080 = vst.msk [vmem:[%s2819_s17 + $0x20] sm:$0xff] %vm767_vm2, %v2048_v61  ;;  %2081 = vst.msk [vmem:[%s2819_s17 + $0x28] sm:$0xff] %vm767_vm2, %v2049_v33  ;;  %v1925_v8 = vadd.f32 %v3549_v25, %v1886_v55  ;;  %v1888_v50 = vmul.f32 %v3544_v2, %v1849_v32  ;;  %v2359_v1 = vunpack.c.h.bf16 %v2404_v38  ;;  %v2020_v6 = vadd.f32 %v2354_v48, %v1924_v24  ;;  %v1858_v38 = vld [vmem:[#allocation2 + $0xa0] sm:$0xff]  ;;  %v2409_v32 = vld [vmem:[%s2807_s10 + $0x50] sm:$0xff]  }
 0x18f   : > { %2082 = vst.msk [vmem:[%s2819_s17 + $0x30] sm:$0xff] %vm767_vm2, %v2050_v52  ;;  %v1926_v37 = vadd.f32 %v3549_v25, %v1887_v44  ;;  %v1889_v59 = vmul.f32 %v3544_v2, %v1850_v9  ;;  %v2362_v54 = vunpack.c.l.bf16 %v2405_v29  ;;  %v2051_v46 = vmax.f32 %v2019_v4, 0.0  ;;  %v1859_v33 = vld [vmem:[#allocation2 + $0xa8] sm:$0xff] }
 0x190   : > { %v2021_v56 = vadd.f32 %v2355_v31, %v1925_v8  ;;  %v1927_v51 = vadd.f32 %v3549_v25, %v1888_v50  ;;  %v1890_v45 = vmul.f32 %v3544_v2, %v1851_v23  ;;  %v2052_v57 = vmax.f32 %v2020_v6, 0.0  ;;  %v1861_v6 = vld [vmem:[#allocation2 + $0xb8] sm:$0xff] }
 0x191   : > { %v2022_v60 = vadd.f32 %v2358_v18, %v1926_v37  ;;  %v1928_v42 = vadd.f32 %v3549_v25, %v1889_v59  ;;  %v2363_v41 = vunpack.c.h.bf16 %v2405_v29  ;;  %2083 = vst.msk [vmem:[%s2819_s17 + $0x38] sm:$0xff] %vm767_vm2, %v2051_v46  ;;  %v1891_v7 = vmul.f32 %v3544_v2, %v1852_v21  ;;  %v1860_v18 = vld [vmem:[#allocation2 + $0xb0] sm:$0xff] }
 0x192   : > { %v2053_v28 = vmax.f32 %v2021_v56, 0.0  ;;  %v2023_v30 = vadd.f32 %v2359_v1, %v1927_v51  ;;  %v1929_v3 = vadd.f32 %v3549_v25, %v1890_v45  ;;  %2084 = vst.msk [vmem:[%s2819_s17 + $0x40] sm:$0xff] %vm767_vm2, %v2052_v57  ;;  %v2366_v5 = vunpack.c.l.bf16 %v2406_v20  ;;  %v2410_v1 = vld [vmem:[%s2807_s10 + $0x58] sm:$0xff]  }
 0x193   : > { %v2054_v10 = vmax.f32 %v2022_v60, 0.0  ;;  %v2024_v17 = vadd.f32 %v2362_v54, %v1928_v42  ;;  %v1892_v62 = vmul.f32 %v3544_v2, %v1853_v63  ;;  %v1930_v19 = vadd.f32 %v3549_v25, %v1891_v7  ;;  %v2411_v63 = vld [vmem:[%s2807_s10 + $0x60] sm:$0xff]  }
 0x194   : > { %2085 = vst.msk [vmem:[%s2819_s17 + $0x48] sm:$0xff] %vm767_vm2, %v2053_v28  ;;  %v2055_v49 = vmax.f32 %v2023_v30, 0.0  ;;  %v2025_v40 = vadd.f32 %v2363_v41, %v1929_v3  ;;  %v2367_v39 = vunpack.c.h.bf16 %v2406_v20  ;;  %v1893_v12 = vmul.f32 %v3544_v2, %v1854_v47  ;;  %v1862_v20 = vld [vmem:[#allocation2 + $0xc0] sm:$0xff]  ;;  %v1863_v28 = vld [vmem:[#allocation2 + $0xc8] sm:$0xff] }
 0x195   : > { %2086 = vst.msk [vmem:[%s2819_s17 + $0x50] sm:$0xff] %vm767_vm2, %v2054_v10  ;;  %v2056_v0 = vmax.f32 %v2024_v17, 0.0  ;;  %v1931_v34 = vadd.f32 %v3549_v25, %v1892_v62  ;;  %v2370_v22 = vunpack.c.l.bf16 %v2407_v13  ;;  %v2026_v36 = vadd.f32 %v2366_v5, %v1930_v19  ;;  %v2412_v10 = vld [vmem:[%s2807_s10 + $0x68] sm:$0xff]  }
 0x196   : > { %2087 = vst.msk [vmem:[%s2819_s17 + $0x58] sm:$0xff] %vm767_vm2, %v2055_v49  ;;  %v2057_v14 = vmax.f32 %v2025_v40, 0.0  ;;  %v1894_v53 = vmul.f32 %v3544_v2, %v1855_v43  ;;  %v2371_v26 = vunpack.c.h.bf16 %v2407_v13  ;;  %v1932_v58 = vadd.f32 %v3549_v25, %v1893_v12  ;;  %v1864_v13 = vld [vmem:[#allocation2 + $0xd0] sm:$0xff]  ;;  %v1865_v49 = vld [vmem:[#allocation2 + $0xd8] sm:$0xff] }
 0x197   : > { %2088 = vst.msk [vmem:[%s2819_s17 + $0x60] sm:$0xff] %vm767_vm2, %v2056_v0  ;;  %v2027_v61 = vadd.f32 %v2367_v39, %v1931_v34  ;;  %v1895_v11 = vmul.f32 %v3544_v2, %v1856_v15  ;;  %v2374_v48 = vunpack.c.l.bf16 %v2408_v16  ;;  %v2058_v27 = vmax.f32 %v2026_v36, 0.0 }
 0x198   : > { %2089 = vst.msk [vmem:[%s2819_s17 + $0x68] sm:$0xff] %vm767_vm2, %v2057_v14  ;;  %v1933_v55 = vadd.f32 %v3549_v25, %v1894_v53  ;;  %v1896_v31 = vmul.f32 %v3544_v2, %v1857_v35  ;;  %v2375_v9 = vunpack.c.h.bf16 %v2408_v16  ;;  %v2028_v52 = vadd.f32 %v2370_v22, %v1932_v58  ;;  %v1866_v16 = vld [vmem:[#allocation2 + $0xe0] sm:$0xff]  ;;  %v2413_v35 = vld [vmem:[%s2807_s10 + $0x70] sm:$0xff]   ;;  %v1867_v14 = vld [vmem:[#allocation2 + $0xe8] sm:$0xff] }
 0x199   : > { %v2059_v29 = vmax.f32 %v2027_v61, 0.0  ;;  %v1934_v24 = vadd.f32 %v3549_v25, %v1895_v11  ;;  %v1897_v44 = vmul.f32 %v3544_v2, %v1858_v38  ;;  %2090 = vst.msk [vmem:[%s2819_s17 + $0x70] sm:$0xff] %vm767_vm2, %v2058_v27  ;;  %v2378_v8 = vunpack.c.l.bf16 %v2409_v32 }
 0x19a   : > { %v2029_v23 = vadd.f32 %v2371_v26, %v1933_v55  ;;  %v1935_v4 = vadd.f32 %v3549_v25, %v1896_v31  ;;  %v1898_v50 = vmul.f32 %v3544_v2, %v1859_v33  ;;  %v2060_v37 = vmax.f32 %v2028_v52, 0.0 }
 0x19b   : > { %2091 = vst.msk [vmem:[%s2819_s17 + $0x78] sm:$0xff] %vm767_vm2, %v2059_v29  ;;  %v2030_v59 = vadd.f32 %v2374_v48, %v1934_v24  ;;  %v1936_v54 = vadd.f32 %v3549_v25, %v1897_v44  ;;  %v2379_v21 = vunpack.c.h.bf16 %v2409_v32  ;;  %v1899_v45 = vmul.f32 %v3544_v2, %v1860_v18  ;;  %v1868_v32 = vld [vmem:[#allocation2 + $0xf0] sm:$0xff]  ;;  %v1869_v29 = vld [vmem:[#allocation2 + $0xf8] sm:$0xff] }
 0x19c   : > { %v2061_v46 = vmax.f32 %v2029_v23, 0.0  ;;  %v2031_v56 = vadd.f32 %v2375_v9, %v1935_v4  ;;  %v1937_v51 = vadd.f32 %v3549_v25, %v1898_v50  ;;  %2092 = vst.msk [vmem:[%s2819_s17 + $0x80] sm:$0xff] %vm767_vm2, %v2060_v37  ;;  %v2382_v42 = vunpack.c.l.bf16 %v2410_v1  ;;  %v2414_v9 = vld [vmem:[%s2807_s10 + $0x78] sm:$0xff]  }
 0x19d   : > { %v2062_v57 = vmax.f32 %v2030_v59, 0.0  ;;  %v2032_v60 = vadd.f32 %v2378_v8, %v1936_v54  ;;  %v1900_v41 = vmul.f32 %v3544_v2, %v1861_v6  ;;  %v1938_v7 = vadd.f32 %v3549_v25, %v1899_v45 }
 0x19e   : > { %2093 = vst.msk [vmem:[%s2819_s17 + $0x88] sm:$0xff] %vm767_vm2, %v2061_v46  ;;  %v2063_v30 = vmax.f32 %v2031_v56, 0.0  ;;  %v2033_v3 = vadd.f32 %v2379_v21, %v1937_v51  ;;  %v2383_v47 = vunpack.c.h.bf16 %v2410_v1  ;;  %v1901_v62 = vmul.f32 %v3544_v2, %v1862_v20 }
 0x19f   : > { %2094 = vst.msk [vmem:[%s2819_s17 + $0x90] sm:$0xff] %vm767_vm2, %v2062_v57  ;;  %v2064_v17 = vmax.f32 %v2032_v60, 0.0  ;;  %v1939_v5 = vadd.f32 %v3549_v25, %v1900_v41  ;;  %v2386_v43 = vunpack.c.l.bf16 %v2411_v63  ;;  %v2034_v19 = vadd.f32 %v2382_v42, %v1938_v7 }
 0x1a0   : > { %2095 = vst.msk [vmem:[%s2819_s17 + $0x98] sm:$0xff] %vm767_vm2, %v2063_v30  ;;  %v2065_v40 = vmax.f32 %v2033_v3, 0.0  ;;  %v1902_v39 = vmul.f32 %v3544_v2, %v1863_v28  ;;  %v2387_v15 = vunpack.c.h.bf16 %v2411_v63  ;;  %v1940_v34 = vadd.f32 %v3549_v25, %v1901_v62 }
 0x1a1   : > { %2096 = vst.msk [vmem:[%s2819_s17 + $0xa0] sm:$0xff] %vm767_vm2, %v2064_v17  ;;  %v2035_v0 = vadd.f32 %v2383_v47, %v1939_v5  ;;  %v1903_v12 = vmul.f32 %v3544_v2, %v1864_v13  ;;  %v2390_v22 = vunpack.c.l.bf16 %v2412_v10  ;;  %v2066_v36 = vmax.f32 %v2034_v19, 0.0 }
 0x1a2   : > { %2097 = vst.msk [vmem:[%s2819_s17 + $0xa8] sm:$0xff] %vm767_vm2, %v2065_v40  ;;  %v1941_v53 = vadd.f32 %v3549_v25, %v1902_v39  ;;  %v1904_v26 = vmul.f32 %v3544_v2, %v1865_v49  ;;  %v2391_v38 = vunpack.c.h.bf16 %v2412_v10  ;;  %v2036_v58 = vadd.f32 %v2386_v43, %v1940_v34 }
 0x1a3   : > { %v2067_v61 = vmax.f32 %v2035_v0, 0.0  ;;  %v1942_v11 = vadd.f32 %v3549_v25, %v1903_v12  ;;  %v1905_v48 = vmul.f32 %v3544_v2, %v1866_v16  ;;  %2098 = vst.msk [vmem:[%s2819_s17 + $0xb0] sm:$0xff] %vm767_vm2, %v2066_v36  ;;  %v2394_v55 = vunpack.c.l.bf16 %v2413_v35 }
 0x1a4   : > { %v2037_v33 = vadd.f32 %v2387_v15, %v1941_v53  ;;  %v1943_v27 = vadd.f32 %v3549_v25, %v1904_v26  ;;  %v1906_v31 = vmul.f32 %v3544_v2, %v1867_v14  ;;  %v2068_v52 = vmax.f32 %v2036_v58, 0.0 }
 0x1a5   : > { %2099 = vst.msk [vmem:[%s2819_s17 + $0xb8] sm:$0xff] %vm767_vm2, %v2067_v61  ;;  %v2038_v24 = vadd.f32 %v2390_v22, %v1942_v11  ;;  %v1944_v44 = vadd.f32 %v3549_v25, %v1905_v48  ;;  %v2395_v18 = vunpack.c.h.bf16 %v2413_v35  ;;  %v1907_v50 = vmul.f32 %v3544_v2, %v1868_v32 }
 0x1a6   : > { %v2069_v23 = vmax.f32 %v2037_v33, 0.0  ;;  %v2039_v4 = vadd.f32 %v2391_v38, %v1943_v27  ;;  %v1945_v8 = vadd.f32 %v3549_v25, %v1906_v31  ;;  %2100 = vst.msk [vmem:[%s2819_s17 + $0xc0] sm:$0xff] %vm767_vm2, %v2068_v52  ;;  %v2398_v37 = vunpack.c.l.bf16 %v2414_v9 }
 0x1a7   : > { %v2070_v1 = vmax.f32 %v2038_v24, 0.0  ;;  %v2040_v6 = vadd.f32 %v2394_v55, %v1944_v44  ;;  %v1908_v59 = vmul.f32 %v3544_v2, %v1869_v29  ;;  %v1946_v46 = vadd.f32 %v3549_v25, %v1907_v50 }
 0x1a8   : > { %2101 = vst.msk [vmem:[%s2819_s17 + $0xc8] sm:$0xff] %vm767_vm2, %v2069_v23  ;;  %v2071_v54 = vmax.f32 %v2039_v4, 0.0  ;;  %v2041_v21 = vadd.f32 %v2395_v18, %v1945_v8  ;;  %v2399_v56 = vunpack.c.h.bf16 %v2414_v9 }
 0x1a9   : > { %2102 = vst.msk [vmem:[%s2819_s17 + $0xd0] sm:$0xff] %vm767_vm2, %v2070_v1  ;;  %v2072_v51 = vmax.f32 %v2040_v6, 0.0  ;;  %v1947_v45 = vadd.f32 %v3549_v25, %v1908_v59  ;;  %v2042_v63 = vadd.f32 %v2398_v37, %v1946_v46 }
 0x1aa   : > { %2103 = vst.msk [vmem:[%s2819_s17 + $0xd8] sm:$0xff] %vm767_vm2, %v2071_v54  ;;  %v2073_v20 = vmax.f32 %v2041_v21, 0.0 }
 0x1ab   : > { %2104 = vst.msk [vmem:[%s2819_s17 + $0xe0] sm:$0xff] %vm767_vm2, %v2072_v51  ;;  %v2043_v2 = vadd.f32 %v2399_v56, %v1947_v45  ;;  %v2074_v57 = vmax.f32 %v2042_v63, 0.0 }
 0x1ac   : > { %2105 = vst.msk [vmem:[%s2819_s17 + $0xe8] sm:$0xff] %vm767_vm2, %v2073_v20 }
 0x1ad   : > { %v2075_v60 = vmax.f32 %v2043_v2, 0.0  ;;  %2106 = vst.msk [vmem:[%s2819_s17 + $0xf0] sm:$0xff] %vm767_vm2, %v2074_v57 }
 0x1af   : > { %2107 = vst.msk [vmem:[%s2819_s17 + $0xf8] sm:$0xff] %vm767_vm2, %v2075_v60 }
 0x1b0 PF: > { %s15_s22 = sadd.s32 1, %s2734_s22   ;;  %s3720_s18 = smov %s2726_s20 }
 0x1b1   : > { %p12_p10 = scmp.ge.s32.totalorder %s15_s22, 8   ;;  %s3721_s19 = smov %s2730_s21 }
 0x1b2   : > { %s3722_s20 = smov %s3725_s23  ;;  %s3723_s21 = smov %s3729_s24 }
 0x1b3   :  { %14 = sbr.rel (!%p12_p10) target bundleno = 3 (0x3), region = 91 }

// kernel: _lambda_.8
= control target key start
LH: loop header
LB: loop body
LE: loop exit
PB: predicated region body
PF: predicated region fallthrough
CT: control target
= control target key end

     0   :  { %s2717_s15 = smov 0   ;;  %s2719_s16 = smov 0   ;;  %s3640_s0 = inlined_call_operand.vmem [shape: bf16[2,18,18,8], index: 0, kind: input, shape index: {}]   ;;  %s3641_s1 = inlined_call_operand.vmem [shape: bf16[3,3,8,8], index: 1, kind: input, shape index: {}]   ;;  %s3642_s2 = inlined_call_operand.vmem [shape: f32[1,8], index: 2, kind: input, shape index: {}]   ;;  %s3643_s3 = inlined_call_operand.vmem [shape: f32[1,8], index: 3, kind: input, shape index: {}]   ;;  %s3644_s4 = inlined_call_operand.vmem [shape: bf16[2,256,8], index: 4, kind: output, shape index: {}]  }
   0x1   :  { %s2721_s17 = smov 0   ;;  %s2723_s18 = smov 0  }
   0x2   :  { %s2725_s19 = smov 0  }
   0x3 LB: > { %s23_s20 = sadd.s32 1, %s2682_s17  ;;  %s26_s21 = sadd.s32 1, %s2686_s18  ;;  %s2690_s19 = sphi %s2725_s19, %s14_s19   ;;  %s2686_s18 = sphi %s2723_s18, %s3652_s18   ;;  %s2682_s17 = sphi %s2721_s17, %s3651_s17   ;;  %s2678_s16 = sphi %s2719_s16, %s3650_s16   ;;  %s2674_s15 = sphi %s2717_s15, %s3649_s15  }
   0x4   : > { %p24_p0 = scmp.ge.s32.totalorder %s23_s20, 3  ;;  %p2178_p1 = scmp.ge.s32.totalorder %s2690_s19, 1 }
   0x5   : > { %p184_p2 = scmp.lt.s32.totalorder %s2690_s19, 7 }
   0x6   : > { %s3654_s20 = smov (%p24_p0, %s23_s20), 0  ;;  %s3656_s21 = smov (!%p24_p0, %s26_s21), %s2686_s18 }
   0x7   : > { %p185_p3 = pnand %p2178_p1, %p184_p2  ;;  %p28_p4 = scmp.ge.s32.totalorder %s3656_s21, 2 }
   0x8   : > { %p220_p5 = scmp.lt.s32.totalorder (!%p185_p3), %s2674_s15, 2  ;;  %p215_p6 = scmp.lt.s32.totalorder (!%p185_p3), %s2678_s16, 1  ;;  %vm769_vm0 = vcmask (!%p185_p3), 1043456   ;;  %vm720_vm1 = vcmask (!%p185_p3), 64512   ;;  %vm283_vm2 = vsmask.f32 (!%p185_p3), 3328 }
   0x9   : > { %s3658_s21 = smov (%p28_p4, %s3656_s21), 0  ;;  %188 = sbr.rel (%p185_p3) target bundleno = 425 (0x1a9), region = 36 }
   0xa   : > { %s2338_s22 = smul.u32 (!%p185_p3), 12, %s2674_s15  ;;  %vm284_vm3 = vsmask.f32 (!%p185_p3), 7440  ;;  %vm1242_vm5 = vcmask (!%p185_p3), 1042432   ;;  %vm1243_vm6 = vcmask (!%p185_p3), 1046532   ;;  %p2298_p7 = scmp.ne.s32.totalorder (!%p185_p3), %s2674_s15, 0 }
   0xb   : > { %vm2843_vm4 = vmor (!%p185_p3), %vm283_vm2, %vm284_vm3 }
   0xc   : > { %vm2940_vm7 = vmor (!%p185_p3), %vm1242_vm5, %vm1243_vm6 }
  0x10   : > { %s221_s23 = scalar_select %p220_p5, %s2674_s15, 2 }
  0x11   : > { %s3660_s16 = smov (!%p215_p6, %s2678_s16), 1 }
  0x12   : > { %s2595_s24 = smul.u32 12, %s221_s23  ;;  %s2337_s26 = sshll.u32 %s3660_s16, 7 }
  0x13   : > { %s2594_s25 = smul.u32 216, %s3660_s16  ;;  %s2758_s6 = scalar_lea.vmem %s3644_s4, %s2337_s26 }
  0x14   : > { %s224_s29 = scalar_lea.vmem %s3641_s1, %s2595_s24 }
  0x15   : > { %v282_v0 = vld [vmem:[%s224_s29] sm:$0xf]  ;;  %s219_s9 = scalar_lea.vmem %s3640_s0, %s2594_s25  ;;  %v2184_v1 = vld [vmem:[%s224_s29 + $0x4] sm:$0xf]  ;;  %v2265_v2 = vld [vmem:[%s224_s29 + $0x8] sm:$0xf] }
  0x16   : > { %2591 = vmatprep.subr.msk.bf16.mxu0 %vm769_vm0, %v282_v0  ;;  %v2765_v3 = vsel %vm769_vm0, %v282_v0, 0  ;;  %s2767_s10 = scalar_lea.vmem %s219_s9, %s2338_s22  ;;  %2590 = vmatprep.subr.msk.bf16.mxu1 %vm769_vm0, %v2184_v1  ;;  %v771_v4 = vsel %vm769_vm0, %v2184_v1, 0  ;;  %v1456_v5 = vsel %vm769_vm0, %v2265_v2, 0 }
  0x17   : > { %2457 = vmatpush3.bf16.msra.mxu0 %v2765_v3  ;;  %v2774_v6 = vld [vmem:[%s2767_s10] sm:$0xf]  ;;  %v2777_v7 = vld [vmem:[%s2767_s10 + $0x4] sm:$0xf]  ;;  %v2780_v8 = vld [vmem:[%s2767_s10 + $0xc] sm:$0xf]  ;;  %2423 = vmatpush3.bf16.msra.mxu1 %v771_v4 }
  0x18   : > { %v287_v9 = vshrl.u32 %v2774_v6, 16  ;;  %v290_v10 = vshll.u32 %v2774_v6, 16  ;;  %v300_v11 = vshrl.u32 %v2777_v7, 16  ;;  %v2217_v12 = vcombine.low %v2774_v6, %v2777_v7  ;;  %v2788_v13 = vld [vmem:[%s2767_s10 + $0x10] sm:$0xf]  ;;  %2592 = vmatprep.subr.msk.bf16.mxu1 %vm769_vm0, %v282_v0  ;;  %2593 = vmatprep.subr.msk.bf16.mxu0 %vm769_vm0, %v2265_v2 }
  0x19   : > { %v2249_v14 = vrot.slane %v2774_v6, 9  ;;  %v1247_v15 = vrot.slane %v2777_v7, 5  ;;  %v311_v16 = vshrl.u32 %v2780_v8, 16  ;;  %v314_v17 = vshll.u32 %v2780_v8, 16  ;;  %v2797_v18 = vld [vmem:[%s2767_s10 + $0x18] sm:$0xf] }
  0x1a   : > { %2458 = vmatprep.mubr.msk.bf16.mxu0 %vm720_vm1, %v2217_v12  ;;  %v324_v19 = vshrl.u32 %v2788_v13, 16  ;;  %v2218_v20 = vcombine.low %v2780_v8, %v2788_v13  ;;  %v2250_v21 = vrot.slane %v2780_v8, 9  ;;  %v1254_v22 = vrot.slane %v2788_v13, 5  ;;  %v2806_v23 = vld [vmem:[%s2767_s10 + $0x1c] sm:$0xf] }
  0x1b   : > { %v2810_v24 = vrot.slane %v1247_v15, 4  ;;  %v335_v25 = vshrl.u32 %v2797_v18, 16  ;;  %v338_v26 = vshll.u32 %v2797_v18, 16  ;;  %v348_v27 = vshrl.u32 %v2806_v23, 16  ;;  %v2816_v28 = vld [vmem:[%s2767_s10 + $0x8] sm:$0x1] }
  0x1c   : > { %2459 = vmatmul.mubr.msk.bf16.vlgmr.msra.gmra.mrb[0].mxu0 %vm720_vm1, %v2218_v20  ;;  %v2821_v29 = vrot.slane %v1254_v22, 4  ;;  %v2219_v30 = vcombine.low %v2797_v18, %v2806_v23  ;;  %v289_v31 = vrot.slane %v287_v9, 4  ;;  %v292_v32 = vrot.slane %v290_v10, 5  ;;  %v2826_v33 = vld [vmem:[%s2767_s10 + $0x24] sm:$0xf] }
  0x1d   : > { %v296_v34 = vshll.u32 %v2777_v7, 16  ;;  %v302_v35 = vrot.slane %v300_v11, 4  ;;  %v306_v36 = vshll.u32 %v2816_v28, 16  ;;  %v1250_v37 = vrot.slane %v2816_v28, 5  ;;  %v2832_v38 = vld [vmem:[%s2767_s10 + $0x28] sm:$0xf]  ;;  %2491 = vmatpush3.bf16.msra.mxu0 %v1456_v5 }
  0x1e   : > { %2462 = vmatprep.mubr.msk.bf16.mxu0 %vm720_vm1, %v2219_v30  ;;  %v293_v39 = vor.u32 %v292_v32, %v289_v31  ;;  %v359_v40 = vshrl.u32 %v2826_v33, 16  ;;  %v362_v41 = vshll.u32 %v2826_v33, 16  ;;  %v372_v42 = vshrl.u32 %v2832_v38, 16  ;;  %v2839_v43 = vld [vmem:[%s2767_s10 + $0x14] sm:$0x1] }
  0x1f   : > { %v298_v45 = vrot.slane %v296_v34, 5  ;;  %v308_v46 = vrot.slane %v306_v36, 5  ;;  %v2220_v47 = vcombine.low %v2826_v33, %v2832_v38  ;;  %v313_v48 = vrot.slane %v311_v16, 4  ;;  %v2850_v49 = vld [vmem:[%s2767_s10 + $0x30] sm:$0xf] }
  0x20   : > { %v294_v50 = vrot.slane %v293_v39, 4  ;;  %v316_v51 = vrot.slane %v314_v17, 5  ;;  %v320_v52 = vshll.u32 %v2788_v13, 16  ;;  %v326_v53 = vrot.slane %v324_v19, 4  ;;  %v2854_v54 = vld [vmem:[%s2767_s10 + $0x34] sm:$0xf] }
  0x21   : > { %v303_v55 = vor.u32 %v302_v35, %v298_v45  ;;  %v330_v56 = vshll.u32 %v2839_v43, 16  ;;  %v1257_v57 = vrot.slane %v2839_v43, 5  ;;  %v383_v58 = vshrl.u32 %v2850_v49, 16  ;;  %v2863_v63 = vld [vmem:[%s2767_s10 + $0x20] sm:$0x1] }
  0x22   : > { %v299_v59 = vsel %vm2843_vm4, %v294_v50, %v298_v45  ;;  %v317_v60 = vor.u32 %v316_v51, %v313_v48  ;;  %v322_v61 = vrot.slane %v320_v52, 5  ;;  %v386_v62 = vshll.u32 %v2850_v49, 16  ;;  %v2870_v12 = vld [vmem:[%s2767_s10 + $0x3c] sm:$0xf]  ;;  %v2878_v30 = vld [vmem:[%s2767_s10 + $0x40] sm:$0xf] }
  0x23   : > { %v304_v0 = vrot.slane %v303_v55, 4  ;;  %v332_v1 = vrot.slane %v330_v56, 5  ;;  %v396_v2 = vshrl.u32 %v2854_v54, 16  ;;  %v2221_v4 = vcombine.low %v2850_v49, %v2854_v54  ;;  %v2885_v39 = vld [vmem:[%s2767_s10 + $0x2c] sm:$0x1] }
  0x24   : > { %2463 = vmatmul.mubr.msk.bf16.gmra.mrb[4].mxu0 %vm720_vm1, %v2220_v47  ;;  %v318_v5 = vrot.slane %v317_v60, 4  ;;  %v327_v9 = vor.u32 %v326_v53, %v322_v61  ;;  %v337_v10 = vrot.slane %v335_v25, 4  ;;  %v340_v11 = vrot.slane %v338_v26, 5  ;;  %v2894_v50 = vld [vmem:[%s2767_s10 + $0x48] sm:$0xf] }
  0x25   : > { %v309_v16 = vsel %vm2843_vm4, %v304_v0, %v308_v46  ;;  %2466 = vmatprep.mubr.msk.bf16.mxu0 %vm720_vm1, %v2221_v4  ;;  %v344_v17 = vshll.u32 %v2806_v23, 16  ;;  %v350_v19 = vrot.slane %v348_v27, 4  ;;  %v354_v20 = vshll.u32 %v2863_v63, 16  ;;  %v2897_v56 = vld [vmem:[%s2767_s10 + $0x4c] sm:$0xf] }
  0x26   : > { %v2185_v31 = vcombine.low %v299_v59, %v309_v16  ;;  %v323_v25 = vsel %vm2843_vm4, %v318_v5, %v322_v61  ;;  %v328_v26 = vrot.slane %v327_v9, 4  ;;  %v341_v32 = vor.u32 %v340_v11, %v337_v10  ;;  %v2915_v16 = vld [vmem:[%s2767_s10 + $0x54] sm:$0xf] }
  0x27   : > { %v346_v34 = vrot.slane %v344_v17, 5  ;;  %v356_v35 = vrot.slane %v354_v20, 5  ;;  %v407_v36 = vshrl.u32 %v2870_v12, 16  ;;  %v410_v27 = vshll.u32 %v2870_v12, 16 }
  0x28   : > { %2424 = vmatprep.mubr.msk.bf16.mxu1 %vm720_vm1, %v2185_v31  ;;  %v333_v45 = vsel %vm2843_vm4, %v328_v26, %v332_v1  ;;  %v342_v46 = vrot.slane %v341_v32, 4  ;;  %v420_v47 = vshrl.u32 %v2878_v30, 16  ;;  %v2222_v48 = vcombine.low %v2870_v12, %v2878_v30 }
  0x29   : > { %v2186_v51 = vcombine.low %v323_v25, %v333_v45  ;;  %v351_v52 = vor.u32 %v350_v19, %v346_v34  ;;  %v361_v53 = vrot.slane %v359_v40, 4  ;;  %v364_v55 = vrot.slane %v362_v41, 5  ;;  %v2907_v41 = vld [vmem:[%s2767_s10 + $0x38] sm:$0x1] }
  0x2a   : > { %v347_v59 = vsel %vm2843_vm4, %v342_v46, %v346_v34  ;;  %v368_v60 = vshll.u32 %v2832_v38, 16  ;;  %v374_v61 = vrot.slane %v372_v42, 4  ;;  %v378_v0 = vshll.u32 %v2885_v39, 16 }
  0x2b   : > { %2425 = vmatmul.mubr.msk.bf16.vlgmr.msra.gmra.mrb[0].mxu1 %vm720_vm1, %v2186_v51  ;;  %v352_v1 = vrot.slane %v351_v52, 4  ;;  %v365_v4 = vor.u32 %v364_v55, %v361_v53  ;;  %v431_v5 = vshrl.u32 %v2894_v50, 16  ;;  %v434_v40 = vshll.u32 %v2894_v50, 16  ;;  %v2934_v53 = vld [vmem:[%s2767_s10 + $0x44] sm:$0x1] }
  0x2c   : > { %2525 = vmatpush3.bf16.msra.mxu1 %v2765_v3  ;;  %2467 = vmatmul.mubr.msk.bf16.gmra.mrb[8].mxu0 %vm720_vm1, %v2222_v48  ;;  %v370_v9 = vrot.slane %v368_v60, 5  ;;  %v380_v10 = vrot.slane %v378_v0, 5  ;;  %v444_v42 = vshrl.u32 %v2897_v56, 16  ;;  %v2223_v11 = vcombine.low %v2894_v50, %v2897_v56  ;;  %v2922_v3 = vld [vmem:[%s2767_s10 + $0x58] sm:$0xf] }
  0x2d   : > { %v357_v17 = vsel %vm2843_vm4, %v352_v1, %v356_v35  ;;  %v366_v19 = vrot.slane %v365_v4, 4  ;;  %v385_v20 = vrot.slane %v383_v58, 4  ;;  %v388_v31 = vrot.slane %v386_v62, 5 }
  0x2e   : > { %v2187_v25 = vcombine.low %v347_v59, %v357_v17  ;;  %v375_v26 = vor.u32 %v374_v61, %v370_v9  ;;  %2470 = vmatprep.mubr.msk.bf16.mxu0 %vm720_vm1, %v2223_v11  ;;  %v392_v32 = vshll.u32 %v2854_v54, 16  ;;  %v398_v34 = vrot.slane %v396_v2, 4 }
  0x2f   : > { %v371_v45 = vsel %vm2843_vm4, %v366_v19, %v370_v9  ;;  %v389_v46 = vor.u32 %v388_v31, %v385_v20  ;;  %v402_v35 = vshll.u32 %v2907_v41, 16  ;;  %v455_v48 = vshrl.u32 %v2915_v16, 16 }
  0x30   : > { %2428 = vmatprep.mubr.msk.bf16.mxu1 %vm720_vm1, %v2187_v25  ;;  %v376_v58 = vrot.slane %v375_v26, 4  ;;  %v394_v62 = vrot.slane %v392_v32, 5  ;;  %v458_v51 = vshll.u32 %v2915_v16, 16  ;;  %v468_v52 = vshrl.u32 %v2922_v3, 16  ;;  %v2964_v26 = vld [vmem:[%s2767_s10 + $0x50] sm:$0x1] }
  0x31   : > { %v390_v55 = vrot.slane %v389_v46, 4  ;;  %v404_v2 = vrot.slane %v402_v35, 5  ;;  %v2224_v59 = vcombine.low %v2915_v16, %v2922_v3  ;;  %v409_v60 = vrot.slane %v407_v36, 4 }
  0x32   : > { %v381_v0 = vsel %vm2843_vm4, %v376_v58, %v380_v10  ;;  %v399_v1 = vor.u32 %v398_v34, %v394_v62  ;;  %v412_v4 = vrot.slane %v410_v27, 5  ;;  %v416_v9 = vshll.u32 %v2878_v30, 16 }
  0x33   : > { %v2188_v11 = vcombine.low %v371_v45, %v381_v0  ;;  %v395_v17 = vsel %vm2843_vm4, %v390_v55, %v394_v62  ;;  %v422_v19 = vrot.slane %v420_v47, 4  ;;  %v426_v36 = vshll.u32 %v2934_v53, 16  ;;  %v2986_v55 = vld [vmem:[%s2767_s10 + $0x5c] sm:$0x1] }
  0x34   : > { %v400_v20 = vrot.slane %v399_v1, 4  ;;  %2471 = vmatmul.mubr.msk.bf16.gmra.mrb[12].mxu0 %vm720_vm1, %v2224_v59  ;;  %v413_v31 = vor.u32 %v412_v4, %v409_v60  ;;  %v418_v25 = vrot.slane %v416_v9, 5  ;;  %v1248_v27 = vsel %vm2940_vm7, %v2249_v14, %v1247_v15  ;;  %v2994_v1 = vld [vmem:[%s2767_s10 + $0x60] sm:$0xf] }
  0x35   : > { %2429 = vmatmul.mubr.msk.bf16.gmra.mrb[4].mxu1 %vm720_vm1, %v2188_v11  ;;  %v428_v10 = vrot.slane %v426_v36, 5  ;;  %v1251_v47 = vsel %vm2940_vm7, %v2810_v24, %v1250_v37  ;;  %v433_v32 = vrot.slane %v431_v5, 4  ;;  %v436_v34 = vrot.slane %v434_v40, 5 }
  0x36   : > { %v405_v7 = vsel %vm2843_vm4, %v400_v20, %v404_v2  ;;  %v414_v6 = vrot.slane %v413_v31, 4  ;;  %v423_v45 = vor.u32 %v422_v19, %v418_v25  ;;  %v2266_v14 = vcombine.low %v1248_v27, %v1251_v47  ;;  %v3003_v20 = vld [vmem:[%s2767_s10 + $0x64] sm:$0xf] }
  0x37   : > { %v2189_v15 = vcombine.low %v395_v17, %v405_v7  ;;  %v437_v46 = vor.u32 %v436_v34, %v433_v32  ;;  %v440_v35 = vshll.u32 %v2897_v56, 16  ;;  %v446_v28 = vrot.slane %v444_v42, 4 }
  0x38   : > { %v419_v58 = vsel %vm2843_vm4, %v414_v6, %v418_v25  ;;  %v424_v24 = vrot.slane %v423_v45, 4  ;;  %2492 = vmatprep.mubr.msk.bf16.mxu0 %vm720_vm1, %v2266_v14  ;;  %v450_v37 = vshll.u32 %v2964_v26, 16  ;;  %v1255_v5 = vsel %vm2940_vm7, %v2250_v21, %v1254_v22 }
  0x39   : > { %2432 = vmatprep.mubr.msk.bf16.mxu1 %vm720_vm1, %v2189_v15  ;;  %v438_v40 = vrot.slane %v437_v46, 4  ;;  %v442_v42 = vrot.slane %v440_v35, 5  ;;  %v1258_v62 = vsel %vm2940_vm7, %v2821_v29, %v1257_v57  ;;  %v457_v2 = vrot.slane %v455_v48, 4 }
  0x3a   : > { %v429_v8 = vsel %vm2843_vm4, %v424_v24, %v428_v10  ;;  %v452_v13 = vrot.slane %v450_v37, 5  ;;  %v2267_v59 = vcombine.low %v1255_v5, %v1258_v62  ;;  %v460_v60 = vrot.slane %v458_v51, 5 }
  0x3b   : > { %v2190_v21 = vcombine.low %v419_v58, %v429_v8  ;;  %v443_v22 = vsel %vm2843_vm4, %v438_v40, %v442_v42  ;;  %v447_v0 = vor.u32 %v446_v28, %v442_v42  ;;  %v464_v43 = vshll.u32 %v2922_v3, 16  ;;  %v3024_v58 = vld [vmem:[%s2767_s10 + $0x6c] sm:$0xf]  ;;  %v3030_v42 = vld [vmem:[%s2767_s10 + $0x70] sm:$0xf] }
  0x3c   : > { %2493 = vmatmul.mubr.msk.bf16.vlgmr.msra.gmra.mrb[0].mxu0 %vm720_vm1, %v2267_v59  ;;  %v461_v29 = vor.u32 %v460_v60, %v457_v2  ;;  %v470_v57 = vrot.slane %v468_v52, 4  ;;  %v474_v48 = vshll.u32 %v2986_v55, 16  ;;  %v2251_v4 = vrot.slane %v2797_v18, 9  ;;  %v3035_v59 = vld [vmem:[%s2767_s10 + $0x74] sm:$0x1] }
  0x3d   : > { %2433 = vmatmul.mubr.msk.bf16.gmra.mrb[8].mxu1 %vm720_vm1, %v2190_v21  ;;  %v448_v51 = vrot.slane %v447_v0, 4  ;;  %v466_v9 = vrot.slane %v464_v43, 5  ;;  %v1261_v11 = vrot.slane %v2806_v23, 5  ;;  %v1264_v17 = vrot.slane %v2863_v63, 5  ;;  %v3012_v23 = vld [vmem:[%s2767_s10 + $0x68] sm:$0x1] }
  0x3e   : > { %v462_v19 = vrot.slane %v461_v29, 4  ;;  %v476_v36 = vrot.slane %v474_v48, 5  ;;  %v479_v31 = vshrl.u32 %v2994_v1, 16  ;;  %v482_v52 = vshll.u32 %v2994_v1, 16 }
  0x3f   : > { %v453_v25 = vsel %vm2843_vm4, %v448_v51, %v452_v13  ;;  %v471_v18 = vor.u32 %v470_v57, %v466_v9  ;;  %v1262_v27 = vsel %vm2940_vm7, %v2251_v4, %v1261_v11  ;;  %v1263_v10 = vrot.slane %v1261_v11, 4 }
  0x40   : > { %v2191_v63 = vcombine.low %v443_v22, %v453_v25  ;;  %v467_v47 = vsel %vm2843_vm4, %v462_v19, %v466_v9  ;;  %v481_v32 = vrot.slane %v479_v31, 4  ;;  %v484_v34 = vrot.slane %v482_v52, 5  ;;  %v3050_v19 = vld [vmem:[%s2767_s10 + $0x78] sm:$0xf] }
  0x41   : > { %v472_v7 = vrot.slane %v471_v18, 4  ;;  %v1265_v6 = vsel %vm2940_vm7, %v1263_v10, %v1264_v17  ;;  %v488_v45 = vshll.u32 %v3003_v20, 16  ;;  %v492_v14 = vshrl.u32 %v3003_v20, 16  ;;  %v3057_v18 = vld [vmem:[%s2767_s10 + $0x7c] sm:$0xf] }
  0x42   : > { %2436 = vmatprep.mubr.msk.bf16.mxu1 %vm720_vm1, %v2191_v63  ;;  %v2268_v15 = vcombine.low %v1262_v27, %v1265_v6  ;;  %v485_v46 = vor.u32 %v484_v34, %v481_v32  ;;  %v498_v35 = vshll.u32 %v3012_v23, 16  ;;  %v2252_v28 = vrot.slane %v2826_v33, 9  ;;  %v3062_v32 = vld [vmem:[%s2767_s10 + $0x80] sm:$0x1] }
  0x43   : > { %v477_v24 = vsel %vm2843_vm4, %v472_v7, %v476_v36  ;;  %v490_v37 = vrot.slane %v488_v45, 5  ;;  %v494_v5 = vrot.slane %v492_v14, 4  ;;  %v1268_v40 = vrot.slane %v2832_v38, 5 }
  0x44   : > { %v2192_v62 = vcombine.low %v467_v47, %v477_v24  ;;  %2496 = vmatprep.mubr.msk.bf16.mxu0 %vm720_vm1, %v2268_v15  ;;  %v486_v2 = vrot.slane %v485_v46, 4  ;;  %v500_v8 = vrot.slane %v498_v35, 5  ;;  %v1271_v13 = vrot.slane %v2885_v39, 5  ;;  %v3075_v24 = vld [vmem:[%s2767_s10 + $0x84] sm:$0xf] }
  0x45   : > { %v495_v33 = vor.u32 %v494_v5, %v490_v37  ;;  %v1269_v60 = vsel %vm2940_vm7, %v2252_v28, %v1268_v40  ;;  %v1270_v21 = vrot.slane %v1268_v40, 4  ;;  %v503_v22 = vshrl.u32 %v3024_v58, 16 }
  0x46   : > { %2437 = vmatmul.mubr.msk.bf16.gmra.mrb[12].mxu1 %vm720_vm1, %v2192_v62  ;;  %v491_v38 = vsel %vm2843_vm4, %v486_v2, %v490_v37  ;;  %v506_v0 = vshll.u32 %v3024_v58, 16  ;;  %v512_v39 = vshll.u32 %v3030_v42, 16  ;;  %v516_v43 = vshrl.u32 %v3030_v42, 16  ;;  %v3082_v2 = vld [vmem:[%s2767_s10 + $0x88] sm:$0xf] }
  0x47   : > { %v496_v29 = vrot.slane %v495_v33, 4  ;;  %v1272_v57 = vsel %vm2940_vm7, %v1270_v21, %v1271_v13  ;;  %v505_v48 = vrot.slane %v503_v22, 4  ;;  %v522_v4 = vshll.u32 %v3035_v59, 16 }
  0x48   : > { %v2269_v51 = vcombine.low %v1269_v60, %v1272_v57  ;;  %v508_v9 = vrot.slane %v506_v0, 5  ;;  %v514_v11 = vrot.slane %v512_v39, 5  ;;  %v518_v17 = vrot.slane %v516_v43, 4 }
  0x49   : > { %v501_v36 = vsel %vm2843_vm4, %v496_v29, %v500_v8  ;;  %v524_v31 = vrot.slane %v522_v4, 5  ;;  %v2253_v52 = vrot.slane %v2850_v49, 9  ;;  %v1275_v25 = vrot.slane %v2854_v54, 5  ;;  %v3091_v29 = vld [vmem:[%s2767_s10 + $0x8c] sm:$0x1] }
  0x4a   : > { %v2193_v27 = vcombine.low %v491_v38, %v501_v36  ;;  %2497 = vmatmul.mubr.msk.bf16.gmra.mrb[4].mxu0 %vm720_vm1, %v2269_v51  ;;  %v509_v10 = vor.u32 %v508_v9, %v505_v48  ;;  %v519_v63 = vor.u32 %v518_v17, %v514_v11  ;;  %v1278_v47 = vrot.slane %v2907_v41, 5 }
  0x4b   : > { %v1276_v34 = vsel %vm2940_vm7, %v2253_v52, %v1275_v25  ;;  %v1277_v7 = vrot.slane %v1275_v25, 4  ;;  %v527_v49 = vshrl.u32 %v3050_v19, 16  ;;  %v530_v54 = vshll.u32 %v3050_v19, 16 }
  0x4c   : > { %2440 = vmatprep.mubr.msk.bf16.mxu1 %vm720_vm1, %v2193_v27  ;;  %v510_v6 = vrot.slane %v509_v10, 4  ;;  %v520_v45 = vrot.slane %v519_v63, 4  ;;  %v536_v14 = vshll.u32 %v3057_v18, 16  ;;  %v540_v15 = vshrl.u32 %v3057_v18, 16  ;;  %v3105_v27 = vld [vmem:[%s2767_s10 + $0x90] sm:$0xf] }
  0x4d   : > { %v1279_v41 = vsel %vm2940_vm7, %v1277_v7, %v1278_v47  ;;  %v529_v46 = vrot.slane %v527_v49, 4  ;;  %v532_v35 = vrot.slane %v530_v54, 5  ;;  %v546_v28 = vshll.u32 %v3062_v32, 16  ;;  %v3111_v7 = vld [vmem:[%s2767_s10 + $0x94] sm:$0xf] }
  0x4e   : > { %v515_v37 = vsel %vm2843_vm4, %v510_v6, %v514_v11  ;;  %v525_v5 = vsel %vm2843_vm4, %v520_v45, %v524_v31  ;;  %v2270_v40 = vcombine.low %v1276_v34, %v1279_v41  ;;  %v538_v62 = vrot.slane %v536_v14, 5  ;;  %v3115_v14 = vld [vmem:[%s2767_s10 + $0x98] sm:$0x1] }
  0x4f   : > { %v2194_v8 = vcombine.low %v515_v37, %v525_v5  ;;  %v533_v13 = vor.u32 %v532_v35, %v529_v46  ;;  %v542_v33 = vrot.slane %v540_v15, 4  ;;  %v548_v60 = vrot.slane %v546_v28, 5 }
  0x50   : > { %2500 = vmatprep.mubr.msk.bf16.mxu0 %vm720_vm1, %v2270_v40  ;;  %v2254_v21 = vrot.slane %v2870_v12, 9  ;;  %v1282_v22 = vrot.slane %v2878_v30, 5  ;;  %v1285_v38 = vrot.slane %v2934_v53, 5  ;;  %v551_v0 = vshrl.u32 %v3075_v24, 16 }
  0x51   : > { %2441 = vmatmul.mubr.msk.bf16.gmra.mrb[16].mxu1 %vm720_vm1, %v2194_v8  ;;  %v534_v39 = vrot.slane %v533_v13, 4  ;;  %v543_v43 = vor.u32 %v542_v33, %v538_v62  ;;  %v554_v57 = vshll.u32 %v3075_v24, 16  ;;  %v560_v48 = vshll.u32 %v3082_v2, 16  ;;  %v3131_v8 = vld [vmem:[%s2767_s10 + $0x9c] sm:$0xf] }
  0x52   : > { %v1283_v12 = vsel %vm2940_vm7, %v2254_v21, %v1282_v22  ;;  %v1284_v4 = vrot.slane %v1282_v22, 4  ;;  %v553_v30 = vrot.slane %v551_v0, 4  ;;  %v564_v53 = vshrl.u32 %v3082_v2, 16  ;;  %v3136_v22 = vld [vmem:[%s2767_s10 + $0xa0] sm:$0xf] }
  0x53   : > { %v539_v51 = vsel %vm2843_vm4, %v534_v39, %v538_v62  ;;  %v544_v9 = vrot.slane %v543_v43, 4  ;;  %v556_v11 = vrot.slane %v554_v57, 5  ;;  %v562_v17 = vrot.slane %v560_v48, 5 }
  0x54   : > { %v1286_v36 = vsel %vm2940_vm7, %v1284_v4, %v1285_v38  ;;  %v566_v31 = vrot.slane %v564_v53, 4  ;;  %v570_v52 = vshll.u32 %v3091_v29, 16  ;;  %v2255_v25 = vrot.slane %v2894_v50, 9  ;;  %v3143_v4 = vld [vmem:[%s2767_s10 + $0xa4] sm:$0x1] }
  0x55   : > { %v549_v10 = vsel %vm2843_vm4, %v544_v9, %v548_v60  ;;  %v2271_v63 = vcombine.low %v1283_v12, %v1286_v36  ;;  %v557_v47 = vor.u32 %v556_v11, %v553_v30  ;;  %v1289_v34 = vrot.slane %v2897_v56, 5  ;;  %v3151_v11 = vld [vmem:[%s2767_s10 + $0xa8] sm:$0xf] }
  0x56   : > { %v2195_v49 = vcombine.low %v539_v51, %v549_v10  ;;  %v567_v54 = vor.u32 %v566_v31, %v562_v17  ;;  %v572_v6 = vrot.slane %v570_v52, 5  ;;  %v1292_v45 = vrot.slane %v2964_v26, 5 }
  0x57   : > { %2501 = vmatmul.mubr.msk.bf16.gmra.mrb[8].mxu0 %vm720_vm1, %v2271_v63  ;;  %v558_v50 = vrot.slane %v557_v47, 4  ;;  %v1290_v15 = vsel %vm2940_vm7, %v2255_v25, %v1289_v34  ;;  %v1291_v41 = vrot.slane %v1289_v34, 4  ;;  %v575_v56 = vshrl.u32 %v3105_v27, 16 }
  0x58   : > { %2444 = vmatprep.mubr.msk.bf16.mxu1 %vm720_vm1, %v2195_v49  ;;  %v568_v46 = vrot.slane %v567_v54, 4  ;;  %v578_v35 = vshll.u32 %v3105_v27, 16  ;;  %v584_v26 = vshll.u32 %v3111_v7, 16  ;;  %v588_v28 = vshrl.u32 %v3111_v7, 16  ;;  %v3161_v49 = vld [vmem:[%s2767_s10 + $0xac] sm:$0xf] }
  0x59   : > { %v563_v37 = vsel %vm2843_vm4, %v558_v50, %v562_v17  ;;  %v1293_v5 = vsel %vm2940_vm7, %v1291_v41, %v1292_v45  ;;  %v577_v40 = vrot.slane %v575_v56, 4  ;;  %v594_v62 = vshll.u32 %v3115_v14, 16  ;;  %v3167_v41 = vld [vmem:[%s2767_s10 + $0xb0] sm:$0x1]  ;;  %v3170_v56 = vld [vmem:[%s2767_s10 + $0xb4] sm:$0xf] }
  0x5a   : > { %v573_v13 = vsel %vm2843_vm4, %v568_v46, %v572_v6  ;;  %v2272_v33 = vcombine.low %v1290_v15, %v1293_v5  ;;  %v580_v60 = vrot.slane %v578_v35, 5  ;;  %v586_v21 = vrot.slane %v584_v26, 5 }
  0x5b   : > { %v2196_v38 = vcombine.low %v563_v37, %v573_v13  ;;  %v590_v0 = vrot.slane %v588_v28, 4  ;;  %v596_v39 = vrot.slane %v594_v62, 5  ;;  %v2256_v43 = vrot.slane %v2915_v16, 9 }
  0x5c   : > { %2504 = vmatprep.mubr.msk.bf16.mxu0 %vm720_vm1, %v2272_v33  ;;  %v581_v57 = vor.u32 %v580_v60, %v577_v40  ;;  %v1296_v48 = vrot.slane %v2922_v3, 5  ;;  %v1299_v12 = vrot.slane %v2986_v55, 5  ;;  %v599_v30 = vshrl.u32 %v3131_v8, 16  ;;  %v3179_v60 = vld [vmem:[%s2767_s10 + $0xb8] sm:$0xf] }
  0x5d   : > { %2445 = vmatmul.mubr.msk.bf16.gmra.mrb[20].mxu1 %vm720_vm1, %v2196_v38  ;;  %v591_v53 = vor.u32 %v590_v0, %v586_v21  ;;  %v602_v51 = vshll.u32 %v3131_v8, 16  ;;  %v608_v9 = vshll.u32 %v3136_v22, 16  ;;  %v612_v16 = vshrl.u32 %v3136_v22, 16 }
  0x5e   : > { %v582_v17 = vrot.slane %v581_v57, 4  ;;  %v1297_v3 = vsel %vm2940_vm7, %v2256_v43, %v1296_v48  ;;  %v1298_v55 = vrot.slane %v1296_v48, 4  ;;  %v601_v36 = vrot.slane %v599_v30, 4  ;;  %v3188_v48 = vld [vmem:[%s2767_s10 + $0xbc] sm:$0x1] }
  0x5f   : > { %v592_v31 = vrot.slane %v591_v53, 4  ;;  %v604_v52 = vrot.slane %v602_v51, 5  ;;  %v610_v25 = vrot.slane %v608_v9, 5  ;;  %v614_v10 = vrot.slane %v612_v16, 4 }
  0x60   : > { %v587_v63 = vsel %vm2843_vm4, %v582_v17, %v586_v21  ;;  %v1300_v47 = vsel %vm2940_vm7, %v1298_v55, %v1299_v12  ;;  %v618_v34 = vshll.u32 %v3143_v4, 16  ;;  %v623_v54 = vshrl.u32 %v3151_v11, 16 }
  0x61   : > { %v597_v6 = vsel %vm2843_vm4, %v592_v31, %v596_v39  ;;  %v2273_v45 = vcombine.low %v1297_v3, %v1300_v47  ;;  %v605_v50 = vor.u32 %v604_v52, %v601_v36  ;;  %v615_v15 = vor.u32 %v614_v10, %v610_v25 }
  0x62   : > { %v2197_v46 = vcombine.low %v587_v63, %v597_v6  ;;  %v620_v35 = vrot.slane %v618_v34, 5  ;;  %v625_v26 = vrot.slane %v623_v54, 4  ;;  %v626_v28 = vshll.u32 %v3151_v11, 16 }
  0x63   : > { %2505 = vmatmul.mubr.msk.bf16.gmra.mrb[12].mxu0 %vm720_vm1, %v2273_v45  ;;  %v606_v37 = vrot.slane %v605_v50, 4  ;;  %v616_v5 = vrot.slane %v615_v15, 4  ;;  %v632_v40 = vshll.u32 %v3161_v49, 16  ;;  %v636_v62 = vshrl.u32 %v3161_v49, 16 }
  0x64   : > { %2448 = vmatprep.mubr.msk.bf16.mxu1 %vm720_vm1, %v2197_v46  ;;  %v628_v13 = vrot.slane %v626_v28, 5  ;;  %v642_v33 = vshll.u32 %v3167_v41, 16  ;;  %v647_v21 = vshrl.u32 %v3170_v56, 16  ;;  %v650_v38 = vshll.u32 %v3170_v56, 16 }
  0x65   : > { %v611_v0 = vsel %vm2843_vm4, %v606_v37, %v610_v25  ;;  %v621_v39 = vsel %vm2843_vm4, %v616_v5, %v620_v35  ;;  %v634_v43 = vrot.slane %v632_v40, 5  ;;  %v638_v57 = vrot.slane %v636_v62, 4 }
  0x66   : > { %v2198_v12 = vcombine.low %v611_v0, %v621_v39  ;;  %v629_v30 = vor.u32 %v628_v13, %v625_v26  ;;  %v644_v53 = vrot.slane %v642_v33, 5  ;;  %v649_v51 = vrot.slane %v647_v21, 4 }
  0x67   : > { %v639_v9 = vor.u32 %v638_v57, %v634_v43  ;;  %v652_v16 = vrot.slane %v650_v38, 5  ;;  %v656_v17 = vshll.u32 %v3179_v60, 16  ;;  %v660_v3 = vshrl.u32 %v3179_v60, 16 }
  0x68   : > { %2449 = vmatmul.mubr.msk.bf16.gmra.mrb[24].mxu1 %vm720_vm1, %v2198_v12  ;;  %v630_v55 = vrot.slane %v629_v30, 4  ;;  %v666_v36 = vshll.u32 %v3188_v48, 16  ;;  %v2257_v31 = vrot.slane %v2994_v1, 9  ;;  %v1303_v52 = vrot.slane %v3003_v20, 5 }
  0x69   : > { %v640_v25 = vrot.slane %v639_v9, 4  ;;  %v653_v10 = vor.u32 %v652_v16, %v649_v51  ;;  %v658_v63 = vrot.slane %v656_v17, 5  ;;  %v662_v47 = vrot.slane %v660_v3, 4 }
  0x6a   : > { %v635_v34 = vsel %vm2843_vm4, %v630_v55, %v634_v43  ;;  %v668_v54 = vrot.slane %v666_v36, 5  ;;  %v1304_v6 = vsel %vm2940_vm7, %v2257_v31, %v1303_v52  ;;  %v1305_v45 = vrot.slane %v1303_v52, 4 }
  0x6b   : > { %v645_v50 = vsel %vm2843_vm4, %v640_v25, %v644_v53  ;;  %v654_v15 = vrot.slane %v653_v10, 4  ;;  %v663_v46 = vor.u32 %v662_v47, %v658_v63  ;;  %v1306_v35 = vrot.slane %v3012_v23, 5 }
  0x6c   : > { %v2199_v26 = vcombine.low %v635_v34, %v645_v50  ;;  %v2258_v28 = vrot.slane %v3024_v58, 9  ;;  %v1310_v37 = vrot.slane %v3030_v42, 5  ;;  %v1313_v5 = vrot.slane %v3035_v59, 5 }
  0x6d   : > { %v659_v40 = vsel %vm2843_vm4, %v654_v15, %v658_v63  ;;  %v664_v62 = vrot.slane %v663_v46, 4  ;;  %v1307_v13 = vsel %vm2940_vm7, %v1305_v45, %v1306_v35  ;;  %v2225_v38 = vcombine.low %v2994_v1, %v3003_v20 }
  0x6e   : > { %2452 = vmatprep.mubr.msk.bf16.mxu1 %vm720_vm1, %v2199_v26  ;;  %v2274_v33 = vcombine.low %v1304_v6, %v1307_v13  ;;  %v1311_v23 = vsel %vm2940_vm7, %v2258_v28, %v1310_v37  ;;  %v1312_v21 = vrot.slane %v1310_v37, 4  ;;  %v2259_v0 = vrot.slane %v3050_v19, 9 }
  0x6f   : > { %v669_v59 = vsel %vm2843_vm4, %v664_v62, %v668_v54  ;;  %v1317_v39 = vrot.slane %v3057_v18, 5  ;;  %v1320_v43 = vrot.slane %v3062_v32, 5  ;;  %v2260_v30 = vrot.slane %v3075_v24, 9 }
  0x70   : > { %v2200_v57 = vcombine.low %v659_v40, %v669_v59  ;;  %2508 = vmatprep.mubr.msk.bf16.mxu0 %vm720_vm1, %v2274_v33  ;;  %v1314_v12 = vsel %vm2940_vm7, %v1312_v21, %v1313_v5  ;;  %v1324_v53 = vrot.slane %v3082_v2, 5  ;;  %v1327_v51 = vrot.slane %v3091_v29, 5 }
  0x71   : > { %v2275_v1 = vcombine.low %v1311_v23, %v1314_v12  ;;  %v1318_v44 = vsel %vm2940_vm7, %v2259_v0, %v1317_v39  ;;  %v1319_v20 = vrot.slane %v1317_v39, 4  ;;  %v2261_v16 = vrot.slane %v3105_v27, 9 }
  0x72   : > { %2453 = vmatmul.mubr.msk.bf16.gmra.mrb[28].mxu1 %vm720_vm1, %v2200_v57  ;;  %v1326_v32 = vrot.slane %v1324_v53, 4  ;;  %v1331_v17 = vrot.slane %v3111_v7, 5  ;;  %v1334_v3 = vrot.slane %v3115_v14, 5  ;;  %v1325_v29 = vsel %vm2940_vm7, %v2260_v30, %v1324_v53 }
  0x73   : > { %2509 = vmatmul.mubr.msk.bf16.gmra.mrb[16].mxu0 %vm720_vm1, %v2275_v1  ;;  %2474 = vmatprep.mubr.msk.bf16.mxu1 %vm720_vm1, %v2225_v38  ;;  %v1321_v9 = vsel %vm2940_vm7, %v1319_v20, %v1320_v43  ;;  %v1338_v31 = vrot.slane %v3136_v22, 5  ;;  %v2226_v10 = vcombine.low %v3024_v58, %v3030_v42  ;;  %v2227_v14 = vcombine.low %v3050_v19, %v3057_v18 }
  0x74   : > { %v2276_v55 = vcombine.low %v1318_v44, %v1321_v9  ;;  %v1328_v36 = vsel %vm2940_vm7, %v1326_v32, %v1327_v51  ;;  %v1332_v52 = vsel %vm2940_vm7, %v2261_v16, %v1331_v17  ;;  %v1333_v25 = vrot.slane %v1331_v17, 4 }
  0x75   : > { %v2277_v63 = vcombine.low %v1325_v29, %v1328_v36  ;;  %v1345_v34 = vrot.slane %v3161_v49, 5  ;;  %v2262_v6 = vrot.slane %v3131_v8, 9  ;;  %v1340_v45 = vrot.slane %v1338_v31, 4 }
  0x76   : > { %2512 = vmatprep.mubr.msk.bf16.mxu0 %vm720_vm1, %v2276_v55  ;;  %v1335_v47 = vsel %vm2940_vm7, %v1333_v25, %v1334_v3  ;;  %v1341_v50 = vrot.slane %v3143_v4, 5  ;;  %v2263_v15 = vrot.slane %v3151_v11, 9  ;;  %v1348_v42 = vrot.slane %v3167_v41, 5 }
  0x77   : > { %v2278_v54 = vcombine.low %v1332_v52, %v1335_v47  ;;  %v1347_v58 = vrot.slane %v1345_v34, 4  ;;  %v1339_v19 = vsel %vm2940_vm7, %v2262_v6, %v1338_v31  ;;  %v1352_v4 = vrot.slane %v3179_v60, 5 }
  0x78   : > { %v1342_v18 = vsel %vm2940_vm7, %v1340_v45, %v1341_v50  ;;  %v1346_v46 = vsel %vm2940_vm7, %v2263_v15, %v1345_v34  ;;  %v2228_v35 = vcombine.low %v3075_v24, %v3082_v2  ;;  %v2229_v28 = vcombine.low %v3105_v27, %v3111_v7 }
  0x79   : > { %v1349_v41 = vsel %vm2940_vm7, %v1347_v58, %v1348_v42  ;;  %v2279_v26 = vcombine.low %v1339_v19, %v1342_v18  ;;  %v2264_v5 = vrot.slane %v3170_v56, 9  ;;  %v1354_v40 = vrot.slane %v1352_v4, 4 }
  0x7a   : > { %2475 = vmatmul.mubr.msk.bf16.vlgmr.msra.gmra.mrb[16].mxu1 %vm720_vm1, %v2226_v10  ;;  %v2280_v37 = vcombine.low %v1346_v46, %v1349_v41  ;;  %v1355_v62 = vrot.slane %v3188_v48, 5  ;;  %v2230_v27 = vcombine.low %v3131_v8, %v3136_v22  ;;  %v2231_v48 = vcombine.low %v3151_v11, %v3161_v49 }
  0x7b   : > { %2513 = vmatmul.mubr.msk.bf16.gmra.mrb[20].mxu0 %vm720_vm1, %v2277_v63  ;;  %2478 = vmatprep.mubr.msk.bf16.mxu1 %vm720_vm1, %v2227_v14  ;;  %v1353_v24 = vsel %vm2940_vm7, %v2264_v5, %v1352_v4  ;;  %v2232_v13 = vcombine.low %v3170_v56, %v3179_v60 }
  0x7c   : > { %2516 = vmatprep.mubr.msk.bf16.mxu0 %vm720_vm1, %v2278_v54  ;;  %v1356_v2 = vsel %vm2940_vm7, %v1354_v40, %v1355_v62 }
  0x7d   : > { %v2281_v7 = vcombine.low %v1353_v24, %v1356_v2 }
  0x82   : > { %2479 = vmatmul.mubr.msk.bf16.gmra.mrb[20].mxu1 %vm720_vm1, %v2228_v35 }
  0x83   : > { %2517 = vmatmul.mubr.msk.bf16.gmra.mrb[24].mxu0 %vm720_vm1, %v2279_v26  ;;  %2482 = vmatprep.mubr.msk.bf16.mxu1 %vm720_vm1, %v2229_v28 }
  0x84   : > { %2520 = vmatprep.mubr.msk.bf16.mxu0 %vm720_vm1, %v2280_v37 }
  0x8a   : > { %2483 = vmatmul.mubr.msk.bf16.gmra.mrb[24].mxu1 %vm720_vm1, %v2230_v27 }
  0x8b   : > { %2521 = vmatmul.mubr.msk.bf16.gmra.mrb[28].mxu0 %vm720_vm1, %v2281_v7  ;;  %2486 = vmatprep.mubr.msk.bf16.mxu1 %vm720_vm1, %v2231_v48 }
  0x92   : > { %2487 = vmatmul.mubr.msk.bf16.gmra.mrb[28].mxu1 %vm720_vm1, %v2232_v13 }
  0xfe   : > { %v2426_v61 = vpop.f32.mrb[0].mxu1 }
  0xff   : > { %v807_v33 = vpop.f32.mrb[1].mxu1 }
 0x100   : > { %v2427_v23 = vpop.f32.mrb[2].mxu1 }
 0x101   : > { %v810_v21 = vpop.f32.mrb[3].mxu1 }
 0x108   : > { %v2430_v8 = vpop.f32.mrb[4].mxu1 }
 0x109   : > { %v823_v22 = vpop.f32.mrb[5].mxu1 }
 0x10a   : > { %v2431_v38 = vpop.f32.mrb[6].mxu1 }
 0x10b   : > { %v826_v59 = vpop.f32.mrb[7].mxu1 }
 0x10f   : > { %v2494_v11 = vpop.f32.mrb[0].mxu0 }
 0x110   : > { %v2434_v49 = vpop.f32.mrb[8].mxu1  ;;  %v3292_v0 = vadd.f32 %v2494_v11, %v2426_v61  ;;  %v1492_v39 = vpop.f32.mrb[1].mxu0 }
 0x111   : > { %v839_v43 = vpop.f32.mrb[9].mxu1  ;;  %v3294_v57 = vadd.f32 %v1492_v39, %v807_v33  ;;  %v2495_v12 = vpop.f32.mrb[2].mxu0 }
 0x112   : > { %v2435_v56 = vpop.f32.mrb[10].mxu1  ;;  %v3296_v60 = vadd.f32 %v2495_v12, %v2427_v23  ;;  %v1495_v30 = vpop.f32.mrb[3].mxu0  ;;  %1657 = vst.msk [vmem:[#allocation2 + $0x10] sm:$0xff] (!%p2298_p7), %vm720_vm1, %v3292_v0 }
 0x113   : > { %v842_v53 = vpop.f32.mrb[11].mxu1  ;;  %v3298_v1 = vadd.f32 %v1495_v30, %v810_v21  ;;  %1655 = vst.msk [vmem:[#allocation2] sm:$0xff] (!%p2298_p7), %vm720_vm1, %v3294_v57 }
 0x114   : > { %1658 = vst.msk [vmem:[#allocation2 + $0x18] sm:$0xff] (!%p2298_p7), %vm720_vm1, %v3296_v60 }
 0x115   : > { %1656 = vst.msk [vmem:[#allocation2 + $0x8] sm:$0xff] (!%p2298_p7), %vm720_vm1, %v3298_v1 }
 0x119   : > { %v2438_v44 = vpop.f32.mrb[12].mxu1 }
 0x11a   : > { %v855_v20 = vpop.f32.mrb[13].mxu1 }
 0x11b   : > { %v2439_v51 = vpop.f32.mrb[14].mxu1 }
 0x11c   : > { %v858_v32 = vpop.f32.mrb[15].mxu1 }
 0x11d   : > { %v2498_v9 = vpop.f32.mrb[4].mxu0 }
 0x11e   : > { %v3300_v16 = vadd.f32 %v2498_v9, %v2430_v8  ;;  %v1508_v17 = vpop.f32.mrb[5].mxu0 }
 0x11f   : > { %v3302_v3 = vadd.f32 %v1508_v17, %v823_v22  ;;  %v2499_v55 = vpop.f32.mrb[6].mxu0 }
 0x120   : > { %v3304_v29 = vadd.f32 %v2499_v55, %v2431_v38  ;;  %v1511_v36 = vpop.f32.mrb[7].mxu0  ;;  %1661 = vst.msk [vmem:[#allocation2 + $0x30] sm:$0xff] (!%p2298_p7), %vm720_vm1, %v3300_v16 }
 0x121   : > { %v3306_v31 = vadd.f32 %v1511_v36, %v826_v59  ;;  %1659 = vst.msk [vmem:[#allocation2 + $0x20] sm:$0xff] (!%p2298_p7), %vm720_vm1, %v3302_v3 }
 0x122   : > { %1662 = vst.msk [vmem:[#allocation2 + $0x38] sm:$0xff] (!%p2298_p7), %vm720_vm1, %v3304_v29 }
 0x123   : > { %1660 = vst.msk [vmem:[#allocation2 + $0x28] sm:$0xff] (!%p2298_p7), %vm720_vm1, %v3306_v31 }
 0x12a   : > { %v2502_v52 = vpop.f32.mrb[8].mxu0 }
 0x12b   : > { %v3308_v25 = vadd.f32 %v2502_v52, %v2434_v49  ;;  %v1524_v10 = vpop.f32.mrb[9].mxu0 }
 0x12c   : > { %v3310_v63 = vadd.f32 %v1524_v10, %v839_v43  ;;  %v2503_v14 = vpop.f32.mrb[10].mxu0 }
 0x12d   : > { %v3312_v47 = vadd.f32 %v2503_v14, %v2435_v56  ;;  %v1527_v34 = vpop.f32.mrb[11].mxu0  ;;  %1665 = vst.msk [vmem:[#allocation2 + $0x50] sm:$0xff] (!%p2298_p7), %vm720_vm1, %v3308_v25 }
 0x12e   : > { %v3314_v54 = vadd.f32 %v1527_v34, %v842_v53  ;;  %1663 = vst.msk [vmem:[#allocation2 + $0x40] sm:$0xff] (!%p2298_p7), %vm720_vm1, %v3310_v63 }
 0x12f   : > { %1666 = vst.msk [vmem:[#allocation2 + $0x58] sm:$0xff] (!%p2298_p7), %vm720_vm1, %v3312_v47 }
 0x130   : > { %1664 = vst.msk [vmem:[#allocation2 + $0x48] sm:$0xff] (!%p2298_p7), %vm720_vm1, %v3314_v54 }
 0x136   : > { %v2506_v6 = vpop.f32.mrb[12].mxu0 }
 0x137   : > { %v3316_v45 = vadd.f32 %v2506_v6, %v2438_v44  ;;  %v1540_v50 = vpop.f32.mrb[13].mxu0 }
 0x138   : > { %v3318_v15 = vadd.f32 %v1540_v50, %v855_v20  ;;  %v2507_v58 = vpop.f32.mrb[14].mxu0 }
 0x139   : > { %v3320_v42 = vadd.f32 %v2507_v58, %v2439_v51  ;;  %v1543_v19 = vpop.f32.mrb[15].mxu0  ;;  %1669 = vst.msk [vmem:[#allocation2 + $0x70] sm:$0xff] (!%p2298_p7), %vm720_vm1, %v3316_v45 }
 0x13a   : > { %v3322_v18 = vadd.f32 %v1543_v19, %v858_v32  ;;  %1667 = vst.msk [vmem:[#allocation2 + $0x60] sm:$0xff] (!%p2298_p7), %vm720_vm1, %v3318_v15 }
 0x13b   : > { %1670 = vst.msk [vmem:[#allocation2 + $0x78] sm:$0xff] (!%p2298_p7), %vm720_vm1, %v3320_v42 }
 0x13c   : > { %1668 = vst.msk [vmem:[#allocation2 + $0x68] sm:$0xff] (!%p2298_p7), %vm720_vm1, %v3322_v18 }
 0x146   : > { %v2510_v4 = vpop.f32.mrb[16].mxu0 }
 0x147   : > { %v1556_v46 = vpop.f32.mrb[17].mxu0 }
 0x148   : > { %v2511_v41 = vpop.f32.mrb[18].mxu0 }
 0x149   : > { %v1559_v35 = vpop.f32.mrb[19].mxu0 }
 0x14d   : > { %v2476_v26 = vpop.f32.mrb[16].mxu1 }
 0x14e   : > { %v3324_v28 = vadd.f32 %v2510_v4, %v2476_v26  ;;  %v1163_v37 = vpop.f32.mrb[17].mxu1  ;;  %v2514_v5 = vpop.f32.mrb[20].mxu0 }
 0x14f   : > { %v3326_v40 = vadd.f32 %v1556_v46, %v1163_v37  ;;  %v2477_v62 = vpop.f32.mrb[18].mxu1  ;;  %v1572_v24 = vpop.f32.mrb[21].mxu0 }
 0x150   : > { %v3328_v2 = vadd.f32 %v2511_v41, %v2477_v62  ;;  %v1166_v27 = vpop.f32.mrb[19].mxu1  ;;  %v2515_v7 = vpop.f32.mrb[22].mxu0  ;;  %1673 = vst.msk [vmem:[#allocation2 + $0x90] sm:$0xff] (!%p2298_p7), %vm720_vm1, %v3324_v28 }
 0x151   : > { %v3330_v48 = vadd.f32 %v1559_v35, %v1166_v27  ;;  %v1575_v13 = vpop.f32.mrb[23].mxu0  ;;  %1671 = vst.msk [vmem:[#allocation2 + $0x80] sm:$0xff] (!%p2298_p7), %vm720_vm1, %v3326_v40 }
 0x152   : > { %1674 = vst.msk [vmem:[#allocation2 + $0x98] sm:$0xff] (!%p2298_p7), %vm720_vm1, %v3328_v2 }
 0x153   : > { %1672 = vst.msk [vmem:[#allocation2 + $0x88] sm:$0xff] (!%p2298_p7), %vm720_vm1, %v3330_v48 }
 0x155   : > { %v2480_v61 = vpop.f32.mrb[20].mxu1 }
 0x156   : > { %v3332_v33 = vadd.f32 %v2514_v5, %v2480_v61  ;;  %v1179_v23 = vpop.f32.mrb[21].mxu1  ;;  %v2518_v21 = vpop.f32.mrb[24].mxu0 }
 0x157   : > { %v3334_v8 = vadd.f32 %v1572_v24, %v1179_v23  ;;  %v2481_v22 = vpop.f32.mrb[22].mxu1  ;;  %v1588_v38 = vpop.f32.mrb[25].mxu0 }
 0x158   : > { %v3336_v59 = vadd.f32 %v2515_v7, %v2481_v22  ;;  %v1182_v11 = vpop.f32.mrb[23].mxu1  ;;  %v2519_v49 = vpop.f32.mrb[26].mxu0  ;;  %1677 = vst.msk [vmem:[#allocation2 + $0xb0] sm:$0xff] (!%p2298_p7), %vm720_vm1, %v3332_v33 }
 0x159   : > { %v3338_v39 = vadd.f32 %v1575_v13, %v1182_v11  ;;  %v1591_v43 = vpop.f32.mrb[27].mxu0  ;;  %1675 = vst.msk [vmem:[#allocation2 + $0xa0] sm:$0xff] (!%p2298_p7), %vm720_vm1, %v3334_v8 }
 0x15a   : > { %1678 = vst.msk [vmem:[#allocation2 + $0xb8] sm:$0xff] (!%p2298_p7), %vm720_vm1, %v3336_v59 }
 0x15b   : > { %1676 = vst.msk [vmem:[#allocation2 + $0xa8] sm:$0xff] (!%p2298_p7), %vm720_vm1, %v3338_v39 }
 0x15d   : > { %v2484_v12 = vpop.f32.mrb[24].mxu1 }
 0x15e   : > { %v3340_v56 = vadd.f32 %v2518_v21, %v2484_v12  ;;  %v1195_v30 = vpop.f32.mrb[25].mxu1  ;;  %v2522_v53 = vpop.f32.mrb[28].mxu0 }
 0x15f   : > { %v3342_v44 = vadd.f32 %v1588_v38, %v1195_v30  ;;  %v2485_v20 = vpop.f32.mrb[26].mxu1  ;;  %v1604_v51 = vpop.f32.mrb[29].mxu0 }
 0x160   : > { %v3344_v32 = vadd.f32 %v2519_v49, %v2485_v20  ;;  %v1198_v9 = vpop.f32.mrb[27].mxu1  ;;  %v2523_v17 = vpop.f32.mrb[30].mxu0  ;;  %1681 = vst.msk [vmem:[#allocation2 + $0xd0] sm:$0xff] (!%p2298_p7), %vm720_vm1, %v3340_v56 }
 0x161   : > { %v3346_v55 = vadd.f32 %v1591_v43, %v1198_v9  ;;  %v1607_v36 = vpop.f32.mrb[31].mxu0  ;;  %1679 = vst.msk [vmem:[#allocation2 + $0xc0] sm:$0xff] (!%p2298_p7), %vm720_vm1, %v3342_v44 }
 0x162   : > { %1682 = vst.msk [vmem:[#allocation2 + $0xd8] sm:$0xff] (!%p2298_p7), %vm720_vm1, %v3344_v32 }
 0x163   : > { %1654 = sbr.rel (%p2298_p7) target bundleno = 364 (0x16c), region = 40  ;;  %1680 = vst.msk [vmem:[#allocation2 + $0xc8] sm:$0xff] (!%p2298_p7), %vm720_vm1, %v3346_v55 }
 0x165   : > { %v2488_v52 = vpop.f32.mrb[28].mxu1 }
 0x166   : > { %v3348_v10 = vadd.f32 %v2522_v53, %v2488_v52  ;;  %v1211_v14 = vpop.f32.mrb[29].mxu1 }
 0x167   : > { %v3350_v34 = vadd.f32 %v1604_v51, %v1211_v14  ;;  %v2489_v6 = vpop.f32.mrb[30].mxu1 }
 0x168   : > { %v3352_v50 = vadd.f32 %v2523_v17, %v2489_v6  ;;  %v1214_v58 = vpop.f32.mrb[31].mxu1  ;;  %1685 = vst.msk [vmem:[#allocation2 + $0xf0] sm:$0xff] (!%p2298_p7), %vm720_vm1, %v3348_v10 }
 0x169   : > { %v3354_v19 = vadd.f32 %v1607_v36, %v1214_v58  ;;  %1683 = vst.msk [vmem:[#allocation2 + $0xe0] sm:$0xff] (!%p2298_p7), %vm720_vm1, %v3350_v34 }
 0x16a   : > { %1686 = vst.msk [vmem:[#allocation2 + $0xf8] sm:$0xff] %vm720_vm1, %v3352_v50 }
 0x16b   : > { %1684 = vst.msk [vmem:[#allocation2 + $0xe8] sm:$0xff] %vm720_vm1, %v3354_v19 }
 0x16c PF: > { %p2299_p8 = scmp.le.s32.totalorder %s2674_s15, 0 }
 0x16d   : > { %v1691_v4 = vld [vmem:[#allocation2] sm:$0xff] (!%p2299_p8)  ;;  %v1692_v46 = vld [vmem:[#allocation2 + $0x8] sm:$0xff] (!%p2299_p8)  ;;  %v1693_v41 = vld [vmem:[#allocation2 + $0x10] sm:$0xff] (!%p2299_p8) }
 0x16e   : > { %1690 = sbr.rel (%p2299_p8) target bundleno = 384 (0x180), region = 44  ;;  %v1723_v35 = vadd.f32 (!%p2299_p8), %v3294_v57, %v1691_v4  ;;  %v1724_v26 = vadd.f32 (!%p2299_p8), %v3298_v1, %v1692_v46  ;;  %v1725_v37 = vadd.f32 (!%p2299_p8), %v3292_v0, %v1693_v41  ;;  %v1694_v5 = vld [vmem:[#allocation2 + $0x18] sm:$0xff] (!%p2299_p8)  ;;  %v1695_v62 = vld [vmem:[#allocation2 + $0x20] sm:$0xff] (!%p2299_p8)  ;;  %v1696_v24 = vld [vmem:[#allocation2 + $0x28] sm:$0xff] (!%p2299_p8) }
 0x16f   : > { %v1726_v27 = vadd.f32 (!%p2299_p8), %v3296_v60, %v1694_v5  ;;  %v1727_v7 = vadd.f32 (!%p2299_p8), %v3302_v3, %v1695_v62  ;;  %v1728_v13 = vadd.f32 (!%p2299_p8), %v3306_v31, %v1696_v24  ;;  %v1697_v61 = vld [vmem:[#allocation2 + $0x30] sm:$0xff] (!%p2299_p8)  ;;  %v1698_v23 = vld [vmem:[#allocation2 + $0x38] sm:$0xff] (!%p2299_p8)  ;;  %v1699_v21 = vld [vmem:[#allocation2 + $0x40] sm:$0xff] (!%p2299_p8) }
 0x170   : > { %1755 = vst.msk [vmem:[#allocation2] sm:$0xff] (!%p2299_p8), %vm720_vm1, %v1723_v35  ;;  %1756 = vst.msk [vmem:[#allocation2 + $0x8] sm:$0xff] (!%p2299_p8), %vm720_vm1, %v1724_v26  ;;  %v1729_v0 = vadd.f32 (!%p2299_p8), %v3300_v16, %v1697_v61  ;;  %v1730_v57 = vadd.f32 (!%p2299_p8), %v3304_v29, %v1698_v23  ;;  %v1731_v1 = vadd.f32 (!%p2299_p8), %v3310_v63, %v1699_v21  ;;  %v1700_v60 = vld [vmem:[#allocation2 + $0x48] sm:$0xff] (!%p2299_p8)  ;;  %v1701_v22 = vld [vmem:[#allocation2 + $0x50] sm:$0xff] (!%p2299_p8) }
 0x171   : > { %1757 = vst.msk [vmem:[#allocation2 + $0x10] sm:$0xff] (!%p2299_p8), %vm720_vm1, %v1725_v37  ;;  %v1702_v3 = vld [vmem:[#allocation2 + $0x58] sm:$0xff] (!%p2299_p8)  ;;  %1758 = vst.msk [vmem:[#allocation2 + $0x18] sm:$0xff] (!%p2299_p8), %vm720_vm1, %v1726_v27  ;;  %v1732_v31 = vadd.f32 (!%p2299_p8), %v3314_v54, %v1700_v60  ;;  %v1733_v38 = vadd.f32 (!%p2299_p8), %v3308_v25, %v1701_v22  ;;  %v1703_v16 = vld [vmem:[#allocation2 + $0x60] sm:$0xff] (!%p2299_p8) }
 0x172   : > { %1759 = vst.msk [vmem:[#allocation2 + $0x20] sm:$0xff] (!%p2299_p8), %vm720_vm1, %v1727_v7  ;;  %1760 = vst.msk [vmem:[#allocation2 + $0x28] sm:$0xff] (!%p2299_p8), %vm720_vm1, %v1728_v13  ;;  %v1734_v11 = vadd.f32 (!%p2299_p8), %v3312_v47, %v1702_v3  ;;  %v1704_v49 = vld [vmem:[#allocation2 + $0x68] sm:$0xff] (!%p2299_p8)  ;;  %v1705_v29 = vld [vmem:[#allocation2 + $0x70] sm:$0xff] (!%p2299_p8)  ;;  %v1735_v63 = vadd.f32 (!%p2299_p8), %v3318_v15, %v1703_v16 }
 0x173   : > { %1761 = vst.msk [vmem:[#allocation2 + $0x30] sm:$0xff] (!%p2299_p8), %vm720_vm1, %v1729_v0  ;;  %1762 = vst.msk [vmem:[#allocation2 + $0x38] sm:$0xff] (!%p2299_p8), %vm720_vm1, %v1730_v57  ;;  %v1736_v43 = vadd.f32 (!%p2299_p8), %v3322_v18, %v1704_v49  ;;  %v1737_v12 = vadd.f32 (!%p2299_p8), %v3316_v45, %v1705_v29  ;;  %v1706_v54 = vld [vmem:[#allocation2 + $0x78] sm:$0xff] (!%p2299_p8)  ;;  %v1707_v30 = vld [vmem:[#allocation2 + $0x80] sm:$0xff] (!%p2299_p8) }
 0x174   : > { %1763 = vst.msk [vmem:[#allocation2 + $0x40] sm:$0xff] (!%p2299_p8), %vm720_vm1, %v1731_v1  ;;  %v1708_v25 = vld [vmem:[#allocation2 + $0x88] sm:$0xff] (!%p2299_p8)  ;;  %1764 = vst.msk [vmem:[#allocation2 + $0x48] sm:$0xff] (!%p2299_p8), %vm720_vm1, %v1732_v31  ;;  %v1738_v47 = vadd.f32 (!%p2299_p8), %v3320_v42, %v1706_v54  ;;  %v1739_v53 = vadd.f32 (!%p2299_p8), %v3326_v40, %v1707_v30  ;;  %v1709_v15 = vld [vmem:[#allocation2 + $0x90] sm:$0xff] (!%p2299_p8) }
 0x175   : > { %1765 = vst.msk [vmem:[#allocation2 + $0x50] sm:$0xff] %vm720_vm1, %v1733_v38  ;;  %1766 = vst.msk [vmem:[#allocation2 + $0x58] sm:$0xff] %vm720_vm1, %v1734_v11  ;;  %v1740_v20 = vadd.f32 %v3330_v48, %v1708_v25  ;;  %v1710_v51 = vld [vmem:[#allocation2 + $0x98] sm:$0xff]  ;;  %v1711_v18 = vld [vmem:[#allocation2 + $0xa0] sm:$0xff]  ;;  %v1741_v45 = vadd.f32 %v3324_v28, %v1709_v15 }
 0x176   : > { %1767 = vst.msk [vmem:[#allocation2 + $0x60] sm:$0xff] %vm720_vm1, %v1735_v63  ;;  %1768 = vst.msk [vmem:[#allocation2 + $0x68] sm:$0xff] %vm720_vm1, %v1736_v43  ;;  %v1742_v9 = vadd.f32 %v3328_v2, %v1710_v51  ;;  %v1743_v17 = vadd.f32 %v3334_v8, %v1711_v18  ;;  %v1712_v42 = vld [vmem:[#allocation2 + $0xa8] sm:$0xff]  ;;  %v1713_v36 = vld [vmem:[#allocation2 + $0xb0] sm:$0xff] }
 0x177   : > { %1769 = vst.msk [vmem:[#allocation2 + $0x70] sm:$0xff] %vm720_vm1, %v1737_v12  ;;  %v1714_v40 = vld [vmem:[#allocation2 + $0xb8] sm:$0xff]  ;;  %1770 = vst.msk [vmem:[#allocation2 + $0x78] sm:$0xff] %vm720_vm1, %v1738_v47  ;;  %v1744_v48 = vadd.f32 %v3338_v39, %v1712_v42  ;;  %v1745_v52 = vadd.f32 %v3332_v33, %v1713_v36  ;;  %v1715_v28 = vld [vmem:[#allocation2 + $0xc0] sm:$0xff] }
 0x178   : > { %1771 = vst.msk [vmem:[#allocation2 + $0x80] sm:$0xff] %vm720_vm1, %v1739_v53  ;;  %1772 = vst.msk [vmem:[#allocation2 + $0x88] sm:$0xff] %vm720_vm1, %v1740_v20  ;;  %v1746_v14 = vadd.f32 %v3336_v59, %v1714_v40  ;;  %v1716_v6 = vld [vmem:[#allocation2 + $0xc8] sm:$0xff]  ;;  %v1717_v2 = vld [vmem:[#allocation2 + $0xd0] sm:$0xff]  ;;  %v1747_v8 = vadd.f32 %v3342_v44, %v1715_v28 }
 0x179   : > { %1773 = vst.msk [vmem:[#allocation2 + $0x90] sm:$0xff] %vm720_vm1, %v1741_v45  ;;  %1774 = vst.msk [vmem:[#allocation2 + $0x98] sm:$0xff] %vm720_vm1, %v1742_v9  ;;  %v1748_v58 = vadd.f32 %v3346_v55, %v1716_v6  ;;  %v1749_v4 = vadd.f32 %v3340_v56, %v1717_v2  ;;  %v1718_v39 = vld [vmem:[#allocation2 + $0xd8] sm:$0xff]  ;;  %v1719_v46 = vld [vmem:[#allocation2 + $0xe0] sm:$0xff] }
 0x17a   : > { %1775 = vst.msk [vmem:[#allocation2 + $0xa0] sm:$0xff] %vm720_vm1, %v1743_v17  ;;  %v1720_v33 = vld [vmem:[#allocation2 + $0xe8] sm:$0xff]  ;;  %1776 = vst.msk [vmem:[#allocation2 + $0xa8] sm:$0xff] %vm720_vm1, %v1744_v48  ;;  %v1750_v59 = vadd.f32 %v3344_v32, %v1718_v39  ;;  %v1751_v41 = vadd.f32 %v3350_v34, %v1719_v46  ;;  %v1721_v44 = vld [vmem:[#allocation2 + $0xf0] sm:$0xff] }
 0x17b   : > { %1777 = vst.msk [vmem:[#allocation2 + $0xb0] sm:$0xff] %vm720_vm1, %v1745_v52  ;;  %1778 = vst.msk [vmem:[#allocation2 + $0xb8] sm:$0xff] %vm720_vm1, %v1746_v14  ;;  %v1752_v35 = vadd.f32 %v3354_v19, %v1720_v33  ;;  %v1722_v26 = vld [vmem:[#allocation2 + $0xf8] sm:$0xff]  ;;  %v1753_v56 = vadd.f32 %v3348_v10, %v1721_v44 }
 0x17c   : > { %1779 = vst.msk [vmem:[#allocation2 + $0xc0] sm:$0xff] %vm720_vm1, %v1747_v8  ;;  %1780 = vst.msk [vmem:[#allocation2 + $0xc8] sm:$0xff] %vm720_vm1, %v1748_v58  ;;  %v1754_v55 = vadd.f32 %v3352_v50, %v1722_v26 }
 0x17d   : > { %1781 = vst.msk [vmem:[#allocation2 + $0xd0] sm:$0xff] %vm720_vm1, %v1749_v4  ;;  %1782 = vst.msk [vmem:[#allocation2 + $0xd8] sm:$0xff] %vm720_vm1, %v1750_v59 }
 0x17e   : > { %1783 = vst.msk [vmem:[#allocation2 + $0xe0] sm:$0xff] %vm720_vm1, %v1751_v41  ;;  %1784 = vst.msk [vmem:[#allocation2 + $0xe8] sm:$0xff] %vm720_vm1, %v1752_v35 }
 0x17f   : > { %1785 = vst.msk [vmem:[#allocation2 + $0xf0] sm:$0xff] %vm720_vm1, %v1753_v56  ;;  %1786 = vst.msk [vmem:[#allocation2 + $0xf8] sm:$0xff] %vm720_vm1, %v1754_v55 }
 0x180 PF: > { %p2300_p9 = scmp.ne.s32.totalorder %s2674_s15, 2 }
 0x181   : > { %v3490_v10 = vld [vmem:[%s3642_s2] ss:$0 sm:$0xff] (!%p2300_p9)  ;;  %vm2061_vm8 = vcmask (!%p2300_p9), 60416   ;;  %v1804_v36 = vld [vmem:[#allocation2 + $0x68] sm:$0xff] (!%p2300_p9)  ;;  %v1805_v40 = vld [vmem:[#allocation2 + $0x70] sm:$0xff] (!%p2300_p9) }
 0x182   : > { %1790 = sbr.rel (%p2300_p9) target bundleno = 425 (0x1a9), region = 48  ;;  %v1791_v32 = vld [vmem:[#allocation2] sm:$0xff] (!%p2300_p9)  ;;  %v1792_v19 = vld [vmem:[#allocation2 + $0x8] sm:$0xff] (!%p2300_p9)  ;;  %v1806_v6 = vld [vmem:[#allocation2 + $0x78] sm:$0xff] (!%p2300_p9)  ;;  %v1843_v33 = vmul.f32 (!%p2300_p9), %v3490_v10, %v1804_v36  ;;  %v1844_v59 = vmul.f32 (!%p2300_p9), %v3490_v10, %v1805_v40 }
 0x183   : > { %v3495_v34 = vld [vmem:[%s3643_s3] ss:$0 sm:$0xff] (!%p2300_p9)  ;;  %v1830_v50 = vmul.f32 (!%p2300_p9), %v3490_v10, %v1791_v32  ;;  %v1793_v37 = vld [vmem:[#allocation2 + $0x10] sm:$0xff] (!%p2300_p9)  ;;  %v1794_v5 = vld [vmem:[#allocation2 + $0x18] sm:$0xff] (!%p2300_p9)  ;;  %v1831_v62 = vmul.f32 (!%p2300_p9), %v3490_v10, %v1792_v19  ;;  %v1845_v26 = vmul.f32 (!%p2300_p9), %v3490_v10, %v1806_v6 }
 0x184   : > { %v1832_v24 = vmul.f32 (!%p2300_p9), %v3490_v10, %v1793_v37  ;;  %v1833_v27 = vmul.f32 (!%p2300_p9), %v3490_v10, %v1794_v5  ;;  %v1795_v7 = vld [vmem:[#allocation2 + $0x20] sm:$0xff] (!%p2300_p9)  ;;  %v1796_v13 = vld [vmem:[#allocation2 + $0x28] sm:$0xff] (!%p2300_p9)  ;;  %v1882_v32 = vadd.f32 (!%p2300_p9), %v3495_v34, %v1843_v33 }
 0x185   : > { %v1797_v61 = vld [vmem:[#allocation2 + $0x30] sm:$0xff] (!%p2300_p9)  ;;  %v1869_v23 = vadd.f32 (!%p2300_p9), %v3495_v34, %v1830_v50  ;;  %v1834_v21 = vmul.f32 (!%p2300_p9), %v3490_v10, %v1795_v7  ;;  %v1835_v0 = vmul.f32 (!%p2300_p9), %v3490_v10, %v1796_v13  ;;  %v1798_v1 = vld [vmem:[#allocation2 + $0x38] sm:$0xff] (!%p2300_p9)  ;;  %v1870_v60 = vadd.f32 (!%p2300_p9), %v3495_v34, %v1831_v62  ;;  %v1803_v42 = vld [vmem:[#allocation2 + $0x60] sm:$0xff] (!%p2300_p9) }
 0x186   : > { %v1836_v57 = vmul.f32 (!%p2300_p9), %v3490_v10, %v1797_v61  ;;  %v1871_v22 = vadd.f32 (!%p2300_p9), %v3495_v34, %v1832_v24  ;;  %v1872_v3 = vadd.f32 (!%p2300_p9), %v3495_v34, %v1833_v27  ;;  %v1837_v31 = vmul.f32 (!%p2300_p9), %v3490_v10, %v1798_v1  ;;  %v1799_v54 = vld [vmem:[#allocation2 + $0x40] sm:$0xff] (!%p2300_p9)  ;;  %v1800_v20 = vld [vmem:[#allocation2 + $0x48] sm:$0xff] (!%p2300_p9) }
 0x187   : > { %v1901_v38 = vmax.f32 (!%p2300_p9), %v1869_v23, 0.0  ;;  %v1873_v11 = vadd.f32 (!%p2300_p9), %v3495_v34, %v1834_v21  ;;  %v1874_v16 = vadd.f32 (!%p2300_p9), %v3495_v34, %v1835_v0  ;;  %v1902_v29 = vmax.f32 (!%p2300_p9), %v1870_v60, 0.0  ;;  %v1801_v15 = vld [vmem:[#allocation2 + $0x50] sm:$0xff] (!%p2300_p9)  ;;  %v1802_v51 = vld [vmem:[#allocation2 + $0x58] sm:$0xff] (!%p2300_p9)  ;;  %v1807_v24 = vld [vmem:[#allocation2 + $0x80] sm:$0xff] (!%p2300_p9) }
 0x188   : > { %v1875_v49 = vadd.f32 (!%p2300_p9), %v3495_v34, %v1836_v57  ;;  %v1903_v63 = vmax.f32 (!%p2300_p9), %v1871_v22, 0.0  ;;  %v1904_v43 = vmax.f32 (!%p2300_p9), %v1872_v3, 0.0  ;;  %v1876_v12 = vadd.f32 (!%p2300_p9), %v3495_v34, %v1837_v31  ;;  %v1808_v23 = vld [vmem:[#allocation2 + $0x88] sm:$0xff] (!%p2300_p9)  ;;  %v1809_v21 = vld [vmem:[#allocation2 + $0x90] sm:$0xff] (!%p2300_p9)  ;;  %v1810_v0 = vld [vmem:[#allocation2 + $0x98] sm:$0xff] (!%p2300_p9) }
 0x189   : > { %v2339_v30 = vpack.c.bf16 %v1901_v38, %v1901_v38  ;;  %v1905_v25 = vmax.f32 %v1873_v11, 0.0  ;;  %v1906_v47 = vmax.f32 %v1874_v16, 0.0  ;;  %v2340_v18 = vpack.c.bf16 %v1902_v29, %v1902_v29  ;;  %v1811_v3 = vld [vmem:[#allocation2 + $0xa0] sm:$0xff]  ;;  %v1812_v31 = vld [vmem:[#allocation2 + $0xa8] sm:$0xff]  ;;  %v1813_v38 = vld [vmem:[#allocation2 + $0xb0] sm:$0xff] }
 0x18a   : > { %v1907_v53 = vmax.f32 %v1875_v49, 0.0  ;;  %v2341_v45 = vpack.c.bf16 %v1903_v63, %v1903_v63  ;;  %v2342_v9 = vpack.c.bf16 %v1904_v43, %v1904_v43  ;;  %v1908_v17 = vmax.f32 %v1876_v12, 0.0  ;;  %v1814_v63 = vld [vmem:[#allocation2 + $0xb8] sm:$0xff] }
 0x18b   : > { %2062 = vst.msk [vmem:[%s2758_s6] sm:$0xf] %vm2061_vm8, %v2339_v30  ;;  %v2343_v48 = vpack.c.bf16 %v1905_v25, %v1905_v25  ;;  %v2344_v52 = vpack.c.bf16 %v1906_v47, %v1906_v47  ;;  %v1838_v28 = vmul.f32 %v3490_v10, %v1799_v54  ;;  %2063 = vst.msk [vmem:[%s2758_s6 + $0x4] sm:$0xf] %vm2061_vm8, %v2340_v18  ;;  %v1914_v13 = vmax.f32 %v1882_v32, 0.0 }
 0x18c   : > { %v2345_v14 = vpack.c.bf16 %v1907_v53, %v1907_v53  ;;  %2064 = vst.msk [vmem:[%s2758_s6 + $0x8] sm:$0xf] %vm2061_vm8, %v2341_v45  ;;  %2065 = vst.msk [vmem:[%s2758_s6 + $0xc] sm:$0xf] %vm2061_vm8, %v2342_v9  ;;  %v2346_v2 = vpack.c.bf16 %v1908_v17, %v1908_v17  ;;  %v1839_v8 = vmul.f32 %v3490_v10, %v1800_v20 }
 0x18d   : > { %v1840_v58 = vmul.f32 %v3490_v10, %v1801_v15  ;;  %v1841_v4 = vmul.f32 %v3490_v10, %v1802_v51  ;;  %2066 = vst.msk [vmem:[%s2758_s6 + $0x10] sm:$0xf] %vm2061_vm8, %v2343_v48  ;;  %2067 = vst.msk [vmem:[%s2758_s6 + $0x14] sm:$0xf] %vm2061_vm8, %v2344_v52  ;;  %v1877_v39 = vadd.f32 %v3495_v34, %v1838_v28  ;;  %v1815_v28 = vld [vmem:[#allocation2 + $0xc0] sm:$0xff] }
 0x18e   : > { %2068 = vst.msk [vmem:[%s2758_s6 + $0x18] sm:$0xf] %vm2061_vm8, %v2345_v14  ;;  %v1842_v46 = vmul.f32 %v3490_v10, %v1803_v42  ;;  %2069 = vst.msk [vmem:[%s2758_s6 + $0x1c] sm:$0xf] %vm2061_vm8, %v2346_v2  ;;  %v1878_v41 = vadd.f32 %v3495_v34, %v1839_v8  ;;  %v1883_v50 = vadd.f32 %v3495_v34, %v1844_v59 }
 0x18f   : > { %v1879_v35 = vadd.f32 %v3495_v34, %v1840_v58  ;;  %v1880_v44 = vadd.f32 %v3495_v34, %v1841_v4  ;;  %v1909_v56 = vmax.f32 %v1877_v39, 0.0  ;;  %v1884_v62 = vadd.f32 %v3495_v34, %v1845_v26  ;;  %v1816_v4 = vld [vmem:[#allocation2 + $0xc8] sm:$0xff]  ;;  %v1817_v39 = vld [vmem:[#allocation2 + $0xd0] sm:$0xff] }
 0x190   : > { %v1881_v55 = vadd.f32 %v3495_v34, %v1842_v46  ;;  %v1910_v19 = vmax.f32 %v1878_v41, 0.0  ;;  %v1915_v61 = vmax.f32 %v1883_v50, 0.0  ;;  %v2352_v16 = vpack.c.bf16 %v1914_v13, %v1914_v13  ;;  %v1818_v46 = vld [vmem:[#allocation2 + $0xd8] sm:$0xff]  ;;  %v1820_v26 = vld [vmem:[#allocation2 + $0xe8] sm:$0xff] }
 0x191   : > { %v1911_v37 = vmax.f32 %v1879_v35, 0.0  ;;  %v1912_v5 = vmax.f32 %v1880_v44, 0.0  ;;  %v2347_v27 = vpack.c.bf16 %v1909_v56, %v1909_v56  ;;  %v1916_v22 = vmax.f32 %v1884_v62, 0.0  ;;  %v1819_v44 = vld [vmem:[#allocation2 + $0xe0] sm:$0xff]  ;;  %v1821_v56 = vld [vmem:[#allocation2 + $0xf0] sm:$0xff] }
 0x192   : > { %v1913_v7 = vmax.f32 %v1881_v55, 0.0  ;;  %v2348_v57 = vpack.c.bf16 %v1910_v19, %v1910_v19  ;;  %v2353_v49 = vpack.c.bf16 %v1915_v61, %v1915_v61  ;;  %v1846_v29 = vmul.f32 %v3490_v10, %v1807_v24  ;;  %2075 = vst.msk [vmem:[%s2758_s6 + $0x34] sm:$0xf] %vm2061_vm8, %v2352_v16 }
 0x193   : > { %v2349_v1 = vpack.c.bf16 %v1911_v37, %v1911_v37  ;;  %v2350_v60 = vpack.c.bf16 %v1912_v5, %v1912_v5  ;;  %2070 = vst.msk [vmem:[%s2758_s6 + $0x20] sm:$0xf] %vm2061_vm8, %v2347_v27  ;;  %v2354_v43 = vpack.c.bf16 %v1916_v22, %v1916_v22  ;;  %v1847_v12 = vmul.f32 %v3490_v10, %v1808_v23  ;;  %v1822_v37 = vld [vmem:[#allocation2 + $0xf8] sm:$0xff] }
 0x194   : > { %v2351_v11 = vpack.c.bf16 %v1913_v7, %v1913_v7  ;;  %2071 = vst.msk [vmem:[%s2758_s6 + $0x24] sm:$0xf] %vm2061_vm8, %v2348_v57  ;;  %v1848_v54 = vmul.f32 %v3490_v10, %v1809_v21  ;;  %v1849_v30 = vmul.f32 %v3490_v10, %v1810_v0  ;;  %2076 = vst.msk [vmem:[%s2758_s6 + $0x38] sm:$0xf] %vm2061_vm8, %v2353_v49 }
 0x195   : > { %2072 = vst.msk [vmem:[%s2758_s6 + $0x28] sm:$0xf] %vm2061_vm8, %v2349_v1  ;;  %2073 = vst.msk [vmem:[%s2758_s6 + $0x2c] sm:$0xf] %vm2061_vm8, %v2350_v60  ;;  %v1885_v25 = vadd.f32 %v3495_v34, %v1846_v29  ;;  %v1850_v47 = vmul.f32 %v3490_v10, %v1811_v3  ;;  %v1851_v53 = vmul.f32 %v3490_v10, %v1812_v31 }
 0x196   : > { %2074 = vst.msk [vmem:[%s2758_s6 + $0x30] sm:$0xf] %vm2061_vm8, %v2351_v11  ;;  %v1852_v20 = vmul.f32 %v3490_v10, %v1813_v38  ;;  %2077 = vst.msk [vmem:[%s2758_s6 + $0x3c] sm:$0xf] %vm2061_vm8, %v2354_v43  ;;  %v1886_v15 = vadd.f32 %v3495_v34, %v1847_v12  ;;  %v1887_v51 = vadd.f32 %v3495_v34, %v1848_v54 }
 0x197   : > { %v1888_v18 = vadd.f32 %v3495_v34, %v1849_v30  ;;  %v1853_v45 = vmul.f32 %v3490_v10, %v1814_v63  ;;  %v1917_v9 = vmax.f32 %v1885_v25, 0.0  ;;  %v1889_v17 = vadd.f32 %v3495_v34, %v1850_v47 }
 0x198   : > { %v1890_v42 = vadd.f32 %v3495_v34, %v1851_v53  ;;  %v1891_v36 = vadd.f32 %v3495_v34, %v1852_v20  ;;  %v1918_v40 = vmax.f32 %v1886_v15, 0.0  ;;  %v1919_v48 = vmax.f32 %v1887_v51, 0.0 }
 0x199   : > { %v1920_v52 = vmax.f32 %v1888_v18, 0.0  ;;  %v1892_v14 = vadd.f32 %v3495_v34, %v1853_v45  ;;  %v2355_v6 = vpack.c.bf16 %v1917_v9, %v1917_v9  ;;  %v1921_v2 = vmax.f32 %v1889_v17, 0.0 }
 0x19a   : > { %v1922_v8 = vmax.f32 %v1890_v42, 0.0  ;;  %v1923_v58 = vmax.f32 %v1891_v36, 0.0  ;;  %v2356_v33 = vpack.c.bf16 %v1918_v40, %v1918_v40  ;;  %v2357_v59 = vpack.c.bf16 %v1919_v48, %v1919_v48 }
 0x19b   : > { %v2358_v41 = vpack.c.bf16 %v1920_v52, %v1920_v52  ;;  %v1924_v35 = vmax.f32 %v1892_v14, 0.0  ;;  %2078 = vst.msk [vmem:[%s2758_s6 + $0x40] sm:$0xf] %vm2061_vm8, %v2355_v6  ;;  %v2359_v55 = vpack.c.bf16 %v1921_v2, %v1921_v2  ;;  %v1854_v19 = vmul.f32 %v3490_v10, %v1815_v28 }
 0x19c   : > { %v2360_v32 = vpack.c.bf16 %v1922_v8, %v1922_v8  ;;  %v2361_v50 = vpack.c.bf16 %v1923_v58, %v1923_v58  ;;  %2079 = vst.msk [vmem:[%s2758_s6 + $0x44] sm:$0xf] %vm2061_vm8, %v2356_v33  ;;  %2080 = vst.msk [vmem:[%s2758_s6 + $0x48] sm:$0xf] %vm2061_vm8, %v2357_v59  ;;  %v1855_v62 = vmul.f32 %v3490_v10, %v1816_v4 }
 0x19d   : > { %2081 = vst.msk [vmem:[%s2758_s6 + $0x4c] sm:$0xf] %vm2061_vm8, %v2358_v41  ;;  %v2362_v5 = vpack.c.bf16 %v1924_v35, %v1924_v35  ;;  %v1856_v24 = vmul.f32 %v3490_v10, %v1817_v39  ;;  %v1857_v27 = vmul.f32 %v3490_v10, %v1818_v46  ;;  %2082 = vst.msk [vmem:[%s2758_s6 + $0x50] sm:$0xf] %vm2061_vm8, %v2359_v55 }
 0x19e   : > { %2083 = vst.msk [vmem:[%s2758_s6 + $0x54] sm:$0xf] %vm2061_vm8, %v2360_v32  ;;  %2084 = vst.msk [vmem:[%s2758_s6 + $0x58] sm:$0xf] %vm2061_vm8, %v2361_v50  ;;  %v1893_v7 = vadd.f32 %v3495_v34, %v1854_v19  ;;  %v1858_v13 = vmul.f32 %v3490_v10, %v1819_v44  ;;  %v1859_v61 = vmul.f32 %v3490_v10, %v1820_v26 }
 0x19f   : > { %v1860_v23 = vmul.f32 %v3490_v10, %v1821_v56  ;;  %2085 = vst.msk [vmem:[%s2758_s6 + $0x5c] sm:$0xf] %vm2061_vm8, %v2362_v5  ;;  %v1894_v21 = vadd.f32 %v3495_v34, %v1855_v62  ;;  %v1895_v0 = vadd.f32 %v3495_v34, %v1856_v24  ;;  %v1896_v57 = vadd.f32 %v3495_v34, %v1857_v27 }
 0x1a0   : > { %v1861_v1 = vmul.f32 %v3490_v10, %v1822_v37  ;;  %v1925_v60 = vmax.f32 %v1893_v7, 0.0  ;;  %v1897_v22 = vadd.f32 %v3495_v34, %v1858_v13  ;;  %v1898_v3 = vadd.f32 %v3495_v34, %v1859_v61 }
 0x1a1   : > { %v1899_v31 = vadd.f32 %v3495_v34, %v1860_v23  ;;  %v1926_v38 = vmax.f32 %v1894_v21, 0.0  ;;  %v1927_v11 = vmax.f32 %v1895_v0, 0.0  ;;  %v1928_v16 = vmax.f32 %v1896_v57, 0.0 }
 0x1a2   : > { %v1900_v49 = vadd.f32 %v3495_v34, %v1861_v1  ;;  %v2363_v29 = vpack.c.bf16 %v1925_v60, %v1925_v60  ;;  %v1929_v63 = vmax.f32 %v1897_v22, 0.0  ;;  %v1930_v10 = vmax.f32 %v1898_v3, 0.0 }
 0x1a3   : > { %v1931_v43 = vmax.f32 %v1899_v31, 0.0  ;;  %v2364_v12 = vpack.c.bf16 %v1926_v38, %v1926_v38  ;;  %v2365_v54 = vpack.c.bf16 %v1927_v11, %v1927_v11  ;;  %v2366_v30 = vpack.c.bf16 %v1928_v16, %v1928_v16 }
 0x1a4   : > { %v1932_v25 = vmax.f32 %v1900_v49, 0.0  ;;  %2086 = vst.msk [vmem:[%s2758_s6 + $0x60] sm:$0xf] %vm2061_vm8, %v2363_v29  ;;  %v2367_v47 = vpack.c.bf16 %v1929_v63, %v1929_v63  ;;  %v2368_v53 = vpack.c.bf16 %v1930_v10, %v1930_v10 }
 0x1a5   : > { %v2369_v20 = vpack.c.bf16 %v1931_v43, %v1931_v43  ;;  %2087 = vst.msk [vmem:[%s2758_s6 + $0x64] sm:$0xf] %vm2061_vm8, %v2364_v12  ;;  %2088 = vst.msk [vmem:[%s2758_s6 + $0x68] sm:$0xf] %vm2061_vm8, %v2365_v54 }
 0x1a6   : > { %2089 = vst.msk [vmem:[%s2758_s6 + $0x6c] sm:$0xf] %vm2061_vm8, %v2366_v30  ;;  %v2370_v34 = vpack.c.bf16 %v1932_v25, %v1932_v25  ;;  %2090 = vst.msk [vmem:[%s2758_s6 + $0x70] sm:$0xf] %vm2061_vm8, %v2367_v47 }
 0x1a7   : > { %2091 = vst.msk [vmem:[%s2758_s6 + $0x74] sm:$0xf] %vm2061_vm8, %v2368_v53  ;;  %2092 = vst.msk [vmem:[%s2758_s6 + $0x78] sm:$0xf] %vm2061_vm8, %v2369_v20 }
 0x1a8   : > { %2093 = vst.msk [vmem:[%s2758_s6 + $0x7c] sm:$0xf] %vm2061_vm8, %v2370_v34 }
 0x1a9 PF: > { %s14_s19 = sadd.s32 1, %s2690_s19   ;;  %s3649_s15 = smov %s2682_s17 }
 0x1aa   : > { %p11_p10 = scmp.ge.s32.totalorder %s14_s19, 8   ;;  %s3650_s16 = smov %s2686_s18 }
 0x1ab   : > { %s3651_s17 = smov %s3654_s20  ;;  %s3652_s18 = smov %s3658_s21 }
 0x1ac   :  { %13 = sbr.rel (!%p11_p10) target bundleno = 3 (0x3), region = 84 }

// kernel: _lambda_.9
= control target key start
LH: loop header
LB: loop body
LE: loop exit
PB: predicated region body
PF: predicated region fallthrough
CT: control target
= control target key end

     0   :  { %s2655_s18 = smov 0   ;;  %s2657_s19 = smov 0   ;;  %s3615_s0 = inlined_call_operand.vmem [shape: bf16[2,18,18,8], index: 0, kind: input, shape index: {}]   ;;  %s3616_s1 = inlined_call_operand.vmem [shape: bf16[3,3,8,8], index: 1, kind: input, shape index: {}]   ;;  %s3617_s2 = inlined_call_operand.vmem [shape: f32[1,8], index: 2, kind: input, shape index: {}]   ;;  %s3618_s3 = inlined_call_operand.vmem [shape: f32[1,8], index: 3, kind: input, shape index: {}]   ;;  %s3619_s4 = inlined_call_operand.vmem [shape: f32[2,256,8], index: 4, kind: input, shape index: {}]   ;;  %s3620_s5 = inlined_call_operand.vmem [shape: f32[2,256,8], index: 5, kind: output, shape index: {}]  }
   0x1   :  { %s2659_s20 = smov 0   ;;  %s2661_s21 = smov 0  }
   0x2   :  { %s2663_s22 = smov 0  }
   0x3 LB: > { %s24_s23 = sadd.s32 1, %s2615_s20  ;;  %s27_s24 = sadd.s32 1, %s2619_s21  ;;  %s2623_s22 = sphi %s2663_s22, %s15_s22   ;;  %s2619_s21 = sphi %s2661_s21, %s3628_s21   ;;  %s2615_s20 = sphi %s2659_s20, %s3627_s20   ;;  %s2611_s19 = sphi %s2657_s19, %s3626_s19   ;;  %s2607_s18 = sphi %s2655_s18, %s3625_s18  }
   0x4   : > { %p25_p0 = scmp.ge.s32.totalorder %s24_s23, 3  ;;  %p2172_p1 = scmp.ge.s32.totalorder %s2623_s22, 1 }
   0x5   : > { %p219_p2 = scmp.lt.s32.totalorder %s2623_s22, 7 }
   0x6   : > { %s3630_s23 = smov (%p25_p0, %s24_s23), 0  ;;  %s3632_s24 = smov (!%p25_p0, %s27_s24), %s2619_s21 }
   0x7   : > { %p220_p3 = pnand %p2172_p1, %p219_p2  ;;  %p29_p4 = scmp.ge.s32.totalorder %s3632_s24, 2 }
   0x8   : > { %p262_p5 = scmp.lt.s32.totalorder (!%p220_p3), %s2607_s18, 2  ;;  %p257_p6 = scmp.lt.s32.totalorder (!%p220_p3), %s2611_s19, 1  ;;  %vm816_vm0 = vcmask (!%p220_p3), 1043456   ;;  %vm767_vm1 = vcmask (!%p220_p3), 64512   ;;  %vm330_vm2 = vsmask.f32 (!%p220_p3), 3328 }
   0x9   : > { %s3634_s24 = smov (%p29_p4, %s3632_s24), 0  ;;  %223 = sbr.rel (%p220_p3) target bundleno = 425 (0x1a9), region = 40 }
   0xa   : > { %s2303_s25 = smul.u32 (!%p220_p3), 12, %s2607_s18  ;;  %vm331_vm3 = vsmask.f32 (!%p220_p3), 7440  ;;  %vm1289_vm5 = vcmask (!%p220_p3), 1042432   ;;  %vm1290_vm6 = vcmask (!%p220_p3), 1046532   ;;  %p2294_p7 = scmp.ne.s32.totalorder (!%p220_p3), %s2607_s18, 0 }
   0xb   : > { %vm2786_vm4 = vmor (!%p220_p3), %vm330_vm2, %vm331_vm3 }
   0xc   : > { %vm2883_vm7 = vmor (!%p220_p3), %vm1289_vm5, %vm1290_vm6 }
  0x10   : > { %s263_s26 = scalar_select %p262_p5, %s2607_s18, 2 }
  0x11   : > { %s3636_s19 = smov (!%p257_p6, %s2611_s19), 1 }
  0x12   : > { %s2528_s27 = smul.u32 12, %s263_s26  ;;  %s2301_s29 = sshll.u32 %s3636_s19, 8 }
  0x13   : > { %s2527_s28 = smul.u32 216, %s3636_s19  ;;  %s2696_s10 = scalar_lea.vmem %s3619_s4, %s2301_s29 }
  0x14   : > { %s266_s7 = scalar_lea.vmem %s3616_s1, %s2528_s27  ;;  %s2704_s16 = scalar_lea.vmem %s3620_s5, %s2301_s29 }
  0x15   : > { %v329_v0 = vld [vmem:[%s266_s7] sm:$0xf]  ;;  %s261_s13 = scalar_lea.vmem %s3615_s0, %s2527_s28  ;;  %v2180_v1 = vld [vmem:[%s266_s7 + $0x4] sm:$0xf]  ;;  %v2261_v2 = vld [vmem:[%s266_s7 + $0x8] sm:$0xf] }
  0x16   : > { %2524 = vmatprep.subr.msk.bf16.mxu0 %vm816_vm0, %v329_v0  ;;  %v2708_v3 = vsel %vm816_vm0, %v329_v0, 0  ;;  %s2710_s17 = scalar_lea.vmem %s261_s13, %s2303_s25  ;;  %2523 = vmatprep.subr.msk.bf16.mxu1 %vm816_vm0, %v2180_v1  ;;  %v818_v4 = vsel %vm816_vm0, %v2180_v1, 0  ;;  %v1503_v5 = vsel %vm816_vm0, %v2261_v2, 0 }
  0x17   : > { %2390 = vmatpush3.bf16.msra.mxu0 %v2708_v3  ;;  %v2717_v6 = vld [vmem:[%s2710_s17] sm:$0xf]  ;;  %v2720_v7 = vld [vmem:[%s2710_s17 + $0x4] sm:$0xf]  ;;  %v2723_v8 = vld [vmem:[%s2710_s17 + $0xc] sm:$0xf]  ;;  %2356 = vmatpush3.bf16.msra.mxu1 %v818_v4 }
  0x18   : > { %v334_v9 = vshrl.u32 %v2717_v6, 16  ;;  %v337_v10 = vshll.u32 %v2717_v6, 16  ;;  %v347_v11 = vshrl.u32 %v2720_v7, 16  ;;  %v2213_v12 = vcombine.low %v2717_v6, %v2720_v7  ;;  %v2731_v13 = vld [vmem:[%s2710_s17 + $0x10] sm:$0xf]  ;;  %2525 = vmatprep.subr.msk.bf16.mxu1 %vm816_vm0, %v329_v0  ;;  %2526 = vmatprep.subr.msk.bf16.mxu0 %vm816_vm0, %v2261_v2 }
  0x19   : > { %v2245_v14 = vrot.slane %v2717_v6, 9  ;;  %v1294_v15 = vrot.slane %v2720_v7, 5  ;;  %v358_v16 = vshrl.u32 %v2723_v8, 16  ;;  %v361_v17 = vshll.u32 %v2723_v8, 16  ;;  %v2740_v18 = vld [vmem:[%s2710_s17 + $0x18] sm:$0xf] }
  0x1a   : > { %2391 = vmatprep.mubr.msk.bf16.mxu0 %vm767_vm1, %v2213_v12  ;;  %v371_v19 = vshrl.u32 %v2731_v13, 16  ;;  %v2214_v20 = vcombine.low %v2723_v8, %v2731_v13  ;;  %v2246_v21 = vrot.slane %v2723_v8, 9  ;;  %v1301_v22 = vrot.slane %v2731_v13, 5  ;;  %v2749_v23 = vld [vmem:[%s2710_s17 + $0x1c] sm:$0xf] }
  0x1b   : > { %v2753_v24 = vrot.slane %v1294_v15, 4  ;;  %v382_v25 = vshrl.u32 %v2740_v18, 16  ;;  %v385_v26 = vshll.u32 %v2740_v18, 16  ;;  %v395_v27 = vshrl.u32 %v2749_v23, 16  ;;  %v2759_v28 = vld [vmem:[%s2710_s17 + $0x8] sm:$0x1] }
  0x1c   : > { %2392 = vmatmul.mubr.msk.bf16.vlgmr.msra.gmra.mrb[0].mxu0 %vm767_vm1, %v2214_v20  ;;  %v2764_v29 = vrot.slane %v1301_v22, 4  ;;  %v2215_v30 = vcombine.low %v2740_v18, %v2749_v23  ;;  %v336_v31 = vrot.slane %v334_v9, 4  ;;  %v339_v32 = vrot.slane %v337_v10, 5  ;;  %v2769_v33 = vld [vmem:[%s2710_s17 + $0x24] sm:$0xf] }
  0x1d   : > { %v343_v34 = vshll.u32 %v2720_v7, 16  ;;  %v349_v35 = vrot.slane %v347_v11, 4  ;;  %v353_v36 = vshll.u32 %v2759_v28, 16  ;;  %v1297_v37 = vrot.slane %v2759_v28, 5  ;;  %v2775_v38 = vld [vmem:[%s2710_s17 + $0x28] sm:$0xf]  ;;  %2424 = vmatpush3.bf16.msra.mxu0 %v1503_v5 }
  0x1e   : > { %2395 = vmatprep.mubr.msk.bf16.mxu0 %vm767_vm1, %v2215_v30  ;;  %v340_v39 = vor.u32 %v339_v32, %v336_v31  ;;  %v406_v40 = vshrl.u32 %v2769_v33, 16  ;;  %v409_v41 = vshll.u32 %v2769_v33, 16  ;;  %v419_v42 = vshrl.u32 %v2775_v38, 16  ;;  %v2782_v43 = vld [vmem:[%s2710_s17 + $0x14] sm:$0x1] }
  0x1f   : > { %v345_v45 = vrot.slane %v343_v34, 5  ;;  %v355_v46 = vrot.slane %v353_v36, 5  ;;  %v2216_v47 = vcombine.low %v2769_v33, %v2775_v38  ;;  %v360_v48 = vrot.slane %v358_v16, 4  ;;  %v2793_v49 = vld [vmem:[%s2710_s17 + $0x30] sm:$0xf] }
  0x20   : > { %v341_v50 = vrot.slane %v340_v39, 4  ;;  %v363_v51 = vrot.slane %v361_v17, 5  ;;  %v367_v52 = vshll.u32 %v2731_v13, 16  ;;  %v373_v53 = vrot.slane %v371_v19, 4  ;;  %v2797_v54 = vld [vmem:[%s2710_s17 + $0x34] sm:$0xf] }
  0x21   : > { %v350_v55 = vor.u32 %v349_v35, %v345_v45  ;;  %v377_v56 = vshll.u32 %v2782_v43, 16  ;;  %v1304_v57 = vrot.slane %v2782_v43, 5  ;;  %v430_v58 = vshrl.u32 %v2793_v49, 16  ;;  %v2806_v63 = vld [vmem:[%s2710_s17 + $0x20] sm:$0x1] }
  0x22   : > { %v346_v59 = vsel %vm2786_vm4, %v341_v50, %v345_v45  ;;  %v364_v60 = vor.u32 %v363_v51, %v360_v48  ;;  %v369_v61 = vrot.slane %v367_v52, 5  ;;  %v433_v62 = vshll.u32 %v2793_v49, 16  ;;  %v2813_v12 = vld [vmem:[%s2710_s17 + $0x3c] sm:$0xf]  ;;  %v2821_v30 = vld [vmem:[%s2710_s17 + $0x40] sm:$0xf] }
  0x23   : > { %v351_v0 = vrot.slane %v350_v55, 4  ;;  %v379_v1 = vrot.slane %v377_v56, 5  ;;  %v443_v2 = vshrl.u32 %v2797_v54, 16  ;;  %v2217_v4 = vcombine.low %v2793_v49, %v2797_v54  ;;  %v2828_v39 = vld [vmem:[%s2710_s17 + $0x2c] sm:$0x1] }
  0x24   : > { %2396 = vmatmul.mubr.msk.bf16.gmra.mrb[4].mxu0 %vm767_vm1, %v2216_v47  ;;  %v365_v5 = vrot.slane %v364_v60, 4  ;;  %v374_v9 = vor.u32 %v373_v53, %v369_v61  ;;  %v384_v10 = vrot.slane %v382_v25, 4  ;;  %v387_v11 = vrot.slane %v385_v26, 5  ;;  %v2837_v50 = vld [vmem:[%s2710_s17 + $0x48] sm:$0xf] }
  0x25   : > { %v356_v16 = vsel %vm2786_vm4, %v351_v0, %v355_v46  ;;  %2399 = vmatprep.mubr.msk.bf16.mxu0 %vm767_vm1, %v2217_v4  ;;  %v391_v17 = vshll.u32 %v2749_v23, 16  ;;  %v397_v19 = vrot.slane %v395_v27, 4  ;;  %v401_v20 = vshll.u32 %v2806_v63, 16  ;;  %v2840_v56 = vld [vmem:[%s2710_s17 + $0x4c] sm:$0xf] }
  0x26   : > { %v2181_v31 = vcombine.low %v346_v59, %v356_v16  ;;  %v370_v25 = vsel %vm2786_vm4, %v365_v5, %v369_v61  ;;  %v375_v26 = vrot.slane %v374_v9, 4  ;;  %v388_v32 = vor.u32 %v387_v11, %v384_v10  ;;  %v2858_v16 = vld [vmem:[%s2710_s17 + $0x54] sm:$0xf] }
  0x27   : > { %v393_v34 = vrot.slane %v391_v17, 5  ;;  %v403_v35 = vrot.slane %v401_v20, 5  ;;  %v454_v36 = vshrl.u32 %v2813_v12, 16  ;;  %v457_v27 = vshll.u32 %v2813_v12, 16 }
  0x28   : > { %2357 = vmatprep.mubr.msk.bf16.mxu1 %vm767_vm1, %v2181_v31  ;;  %v380_v45 = vsel %vm2786_vm4, %v375_v26, %v379_v1  ;;  %v389_v46 = vrot.slane %v388_v32, 4  ;;  %v467_v47 = vshrl.u32 %v2821_v30, 16  ;;  %v2218_v48 = vcombine.low %v2813_v12, %v2821_v30 }
  0x29   : > { %v2182_v51 = vcombine.low %v370_v25, %v380_v45  ;;  %v398_v52 = vor.u32 %v397_v19, %v393_v34  ;;  %v408_v53 = vrot.slane %v406_v40, 4  ;;  %v411_v55 = vrot.slane %v409_v41, 5  ;;  %v2850_v41 = vld [vmem:[%s2710_s17 + $0x38] sm:$0x1] }
  0x2a   : > { %v394_v59 = vsel %vm2786_vm4, %v389_v46, %v393_v34  ;;  %v415_v60 = vshll.u32 %v2775_v38, 16  ;;  %v421_v61 = vrot.slane %v419_v42, 4  ;;  %v425_v0 = vshll.u32 %v2828_v39, 16 }
  0x2b   : > { %2358 = vmatmul.mubr.msk.bf16.vlgmr.msra.gmra.mrb[0].mxu1 %vm767_vm1, %v2182_v51  ;;  %v399_v1 = vrot.slane %v398_v52, 4  ;;  %v412_v4 = vor.u32 %v411_v55, %v408_v53  ;;  %v478_v5 = vshrl.u32 %v2837_v50, 16  ;;  %v481_v40 = vshll.u32 %v2837_v50, 16  ;;  %v2877_v53 = vld [vmem:[%s2710_s17 + $0x44] sm:$0x1] }
  0x2c   : > { %2458 = vmatpush3.bf16.msra.mxu1 %v2708_v3  ;;  %2400 = vmatmul.mubr.msk.bf16.gmra.mrb[8].mxu0 %vm767_vm1, %v2218_v48  ;;  %v417_v9 = vrot.slane %v415_v60, 5  ;;  %v427_v10 = vrot.slane %v425_v0, 5  ;;  %v491_v42 = vshrl.u32 %v2840_v56, 16  ;;  %v2219_v11 = vcombine.low %v2837_v50, %v2840_v56  ;;  %v2865_v3 = vld [vmem:[%s2710_s17 + $0x58] sm:$0xf] }
  0x2d   : > { %v404_v17 = vsel %vm2786_vm4, %v399_v1, %v403_v35  ;;  %v413_v19 = vrot.slane %v412_v4, 4  ;;  %v432_v20 = vrot.slane %v430_v58, 4  ;;  %v435_v31 = vrot.slane %v433_v62, 5 }
  0x2e   : > { %v2183_v25 = vcombine.low %v394_v59, %v404_v17  ;;  %v422_v26 = vor.u32 %v421_v61, %v417_v9  ;;  %2403 = vmatprep.mubr.msk.bf16.mxu0 %vm767_vm1, %v2219_v11  ;;  %v439_v32 = vshll.u32 %v2797_v54, 16  ;;  %v445_v34 = vrot.slane %v443_v2, 4 }
  0x2f   : > { %v418_v45 = vsel %vm2786_vm4, %v413_v19, %v417_v9  ;;  %v436_v46 = vor.u32 %v435_v31, %v432_v20  ;;  %v449_v35 = vshll.u32 %v2850_v41, 16  ;;  %v502_v48 = vshrl.u32 %v2858_v16, 16 }
  0x30   : > { %2361 = vmatprep.mubr.msk.bf16.mxu1 %vm767_vm1, %v2183_v25  ;;  %v423_v58 = vrot.slane %v422_v26, 4  ;;  %v441_v62 = vrot.slane %v439_v32, 5  ;;  %v505_v51 = vshll.u32 %v2858_v16, 16  ;;  %v515_v52 = vshrl.u32 %v2865_v3, 16  ;;  %v2907_v26 = vld [vmem:[%s2710_s17 + $0x50] sm:$0x1] }
  0x31   : > { %v437_v55 = vrot.slane %v436_v46, 4  ;;  %v451_v2 = vrot.slane %v449_v35, 5  ;;  %v2220_v59 = vcombine.low %v2858_v16, %v2865_v3  ;;  %v456_v60 = vrot.slane %v454_v36, 4 }
  0x32   : > { %v428_v0 = vsel %vm2786_vm4, %v423_v58, %v427_v10  ;;  %v446_v1 = vor.u32 %v445_v34, %v441_v62  ;;  %v459_v4 = vrot.slane %v457_v27, 5  ;;  %v463_v9 = vshll.u32 %v2821_v30, 16 }
  0x33   : > { %v2184_v11 = vcombine.low %v418_v45, %v428_v0  ;;  %v442_v17 = vsel %vm2786_vm4, %v437_v55, %v441_v62  ;;  %v469_v19 = vrot.slane %v467_v47, 4  ;;  %v473_v36 = vshll.u32 %v2877_v53, 16  ;;  %v2929_v55 = vld [vmem:[%s2710_s17 + $0x5c] sm:$0x1] }
  0x34   : > { %v447_v20 = vrot.slane %v446_v1, 4  ;;  %2404 = vmatmul.mubr.msk.bf16.gmra.mrb[12].mxu0 %vm767_vm1, %v2220_v59  ;;  %v460_v31 = vor.u32 %v459_v4, %v456_v60  ;;  %v465_v25 = vrot.slane %v463_v9, 5  ;;  %v1295_v27 = vsel %vm2883_vm7, %v2245_v14, %v1294_v15  ;;  %v2937_v1 = vld [vmem:[%s2710_s17 + $0x60] sm:$0xf] }
  0x35   : > { %2362 = vmatmul.mubr.msk.bf16.gmra.mrb[4].mxu1 %vm767_vm1, %v2184_v11  ;;  %v475_v10 = vrot.slane %v473_v36, 5  ;;  %v1298_v47 = vsel %vm2883_vm7, %v2753_v24, %v1297_v37  ;;  %v480_v32 = vrot.slane %v478_v5, 4  ;;  %v483_v34 = vrot.slane %v481_v40, 5 }
  0x36   : > { %v452_v7 = vsel %vm2786_vm4, %v447_v20, %v451_v2  ;;  %v461_v6 = vrot.slane %v460_v31, 4  ;;  %v470_v45 = vor.u32 %v469_v19, %v465_v25  ;;  %v2262_v14 = vcombine.low %v1295_v27, %v1298_v47  ;;  %v2946_v20 = vld [vmem:[%s2710_s17 + $0x64] sm:$0xf] }
  0x37   : > { %v2185_v15 = vcombine.low %v442_v17, %v452_v7  ;;  %v484_v46 = vor.u32 %v483_v34, %v480_v32  ;;  %v487_v35 = vshll.u32 %v2840_v56, 16  ;;  %v493_v28 = vrot.slane %v491_v42, 4 }
  0x38   : > { %v466_v58 = vsel %vm2786_vm4, %v461_v6, %v465_v25  ;;  %v471_v24 = vrot.slane %v470_v45, 4  ;;  %2425 = vmatprep.mubr.msk.bf16.mxu0 %vm767_vm1, %v2262_v14  ;;  %v497_v37 = vshll.u32 %v2907_v26, 16  ;;  %v1302_v5 = vsel %vm2883_vm7, %v2246_v21, %v1301_v22 }
  0x39   : > { %2365 = vmatprep.mubr.msk.bf16.mxu1 %vm767_vm1, %v2185_v15  ;;  %v485_v40 = vrot.slane %v484_v46, 4  ;;  %v489_v42 = vrot.slane %v487_v35, 5  ;;  %v1305_v62 = vsel %vm2883_vm7, %v2764_v29, %v1304_v57  ;;  %v504_v2 = vrot.slane %v502_v48, 4 }
  0x3a   : > { %v476_v8 = vsel %vm2786_vm4, %v471_v24, %v475_v10  ;;  %v499_v13 = vrot.slane %v497_v37, 5  ;;  %v2263_v59 = vcombine.low %v1302_v5, %v1305_v62  ;;  %v507_v60 = vrot.slane %v505_v51, 5 }
  0x3b   : > { %v2186_v21 = vcombine.low %v466_v58, %v476_v8  ;;  %v490_v22 = vsel %vm2786_vm4, %v485_v40, %v489_v42  ;;  %v494_v0 = vor.u32 %v493_v28, %v489_v42  ;;  %v511_v43 = vshll.u32 %v2865_v3, 16  ;;  %v2967_v58 = vld [vmem:[%s2710_s17 + $0x6c] sm:$0xf]  ;;  %v2973_v42 = vld [vmem:[%s2710_s17 + $0x70] sm:$0xf] }
  0x3c   : > { %2426 = vmatmul.mubr.msk.bf16.vlgmr.msra.gmra.mrb[0].mxu0 %vm767_vm1, %v2263_v59  ;;  %v508_v29 = vor.u32 %v507_v60, %v504_v2  ;;  %v517_v57 = vrot.slane %v515_v52, 4  ;;  %v521_v48 = vshll.u32 %v2929_v55, 16  ;;  %v2247_v4 = vrot.slane %v2740_v18, 9  ;;  %v2978_v59 = vld [vmem:[%s2710_s17 + $0x74] sm:$0x1] }
  0x3d   : > { %2366 = vmatmul.mubr.msk.bf16.gmra.mrb[8].mxu1 %vm767_vm1, %v2186_v21  ;;  %v495_v51 = vrot.slane %v494_v0, 4  ;;  %v513_v9 = vrot.slane %v511_v43, 5  ;;  %v1308_v11 = vrot.slane %v2749_v23, 5  ;;  %v1311_v17 = vrot.slane %v2806_v63, 5  ;;  %v2955_v23 = vld [vmem:[%s2710_s17 + $0x68] sm:$0x1] }
  0x3e   : > { %v509_v19 = vrot.slane %v508_v29, 4  ;;  %v523_v36 = vrot.slane %v521_v48, 5  ;;  %v526_v31 = vshrl.u32 %v2937_v1, 16  ;;  %v529_v52 = vshll.u32 %v2937_v1, 16 }
  0x3f   : > { %v500_v25 = vsel %vm2786_vm4, %v495_v51, %v499_v13  ;;  %v518_v18 = vor.u32 %v517_v57, %v513_v9  ;;  %v1309_v27 = vsel %vm2883_vm7, %v2247_v4, %v1308_v11  ;;  %v1310_v10 = vrot.slane %v1308_v11, 4 }
  0x40   : > { %v2187_v63 = vcombine.low %v490_v22, %v500_v25  ;;  %v514_v47 = vsel %vm2786_vm4, %v509_v19, %v513_v9  ;;  %v528_v32 = vrot.slane %v526_v31, 4  ;;  %v531_v34 = vrot.slane %v529_v52, 5  ;;  %v2993_v19 = vld [vmem:[%s2710_s17 + $0x78] sm:$0xf] }
  0x41   : > { %v519_v7 = vrot.slane %v518_v18, 4  ;;  %v1312_v6 = vsel %vm2883_vm7, %v1310_v10, %v1311_v17  ;;  %v535_v45 = vshll.u32 %v2946_v20, 16  ;;  %v539_v14 = vshrl.u32 %v2946_v20, 16  ;;  %v3000_v18 = vld [vmem:[%s2710_s17 + $0x7c] sm:$0xf] }
  0x42   : > { %2369 = vmatprep.mubr.msk.bf16.mxu1 %vm767_vm1, %v2187_v63  ;;  %v2264_v15 = vcombine.low %v1309_v27, %v1312_v6  ;;  %v532_v46 = vor.u32 %v531_v34, %v528_v32  ;;  %v545_v35 = vshll.u32 %v2955_v23, 16  ;;  %v2248_v28 = vrot.slane %v2769_v33, 9  ;;  %v3005_v32 = vld [vmem:[%s2710_s17 + $0x80] sm:$0x1] }
  0x43   : > { %v524_v24 = vsel %vm2786_vm4, %v519_v7, %v523_v36  ;;  %v537_v37 = vrot.slane %v535_v45, 5  ;;  %v541_v5 = vrot.slane %v539_v14, 4  ;;  %v1315_v40 = vrot.slane %v2775_v38, 5 }
  0x44   : > { %v2188_v62 = vcombine.low %v514_v47, %v524_v24  ;;  %2429 = vmatprep.mubr.msk.bf16.mxu0 %vm767_vm1, %v2264_v15  ;;  %v533_v2 = vrot.slane %v532_v46, 4  ;;  %v547_v8 = vrot.slane %v545_v35, 5  ;;  %v1318_v13 = vrot.slane %v2828_v39, 5  ;;  %v3018_v24 = vld [vmem:[%s2710_s17 + $0x84] sm:$0xf] }
  0x45   : > { %v542_v33 = vor.u32 %v541_v5, %v537_v37  ;;  %v1316_v60 = vsel %vm2883_vm7, %v2248_v28, %v1315_v40  ;;  %v1317_v21 = vrot.slane %v1315_v40, 4  ;;  %v550_v22 = vshrl.u32 %v2967_v58, 16 }
  0x46   : > { %2370 = vmatmul.mubr.msk.bf16.gmra.mrb[12].mxu1 %vm767_vm1, %v2188_v62  ;;  %v538_v38 = vsel %vm2786_vm4, %v533_v2, %v537_v37  ;;  %v553_v0 = vshll.u32 %v2967_v58, 16  ;;  %v559_v39 = vshll.u32 %v2973_v42, 16  ;;  %v563_v43 = vshrl.u32 %v2973_v42, 16  ;;  %v3025_v2 = vld [vmem:[%s2710_s17 + $0x88] sm:$0xf] }
  0x47   : > { %v543_v29 = vrot.slane %v542_v33, 4  ;;  %v1319_v57 = vsel %vm2883_vm7, %v1317_v21, %v1318_v13  ;;  %v552_v48 = vrot.slane %v550_v22, 4  ;;  %v569_v4 = vshll.u32 %v2978_v59, 16 }
  0x48   : > { %v2265_v51 = vcombine.low %v1316_v60, %v1319_v57  ;;  %v555_v9 = vrot.slane %v553_v0, 5  ;;  %v561_v11 = vrot.slane %v559_v39, 5  ;;  %v565_v17 = vrot.slane %v563_v43, 4 }
  0x49   : > { %v548_v36 = vsel %vm2786_vm4, %v543_v29, %v547_v8  ;;  %v571_v31 = vrot.slane %v569_v4, 5  ;;  %v2249_v52 = vrot.slane %v2793_v49, 9  ;;  %v1322_v25 = vrot.slane %v2797_v54, 5  ;;  %v3034_v29 = vld [vmem:[%s2710_s17 + $0x8c] sm:$0x1] }
  0x4a   : > { %v2189_v27 = vcombine.low %v538_v38, %v548_v36  ;;  %2430 = vmatmul.mubr.msk.bf16.gmra.mrb[4].mxu0 %vm767_vm1, %v2265_v51  ;;  %v556_v10 = vor.u32 %v555_v9, %v552_v48  ;;  %v566_v63 = vor.u32 %v565_v17, %v561_v11  ;;  %v1325_v47 = vrot.slane %v2850_v41, 5 }
  0x4b   : > { %v1323_v34 = vsel %vm2883_vm7, %v2249_v52, %v1322_v25  ;;  %v1324_v7 = vrot.slane %v1322_v25, 4  ;;  %v574_v49 = vshrl.u32 %v2993_v19, 16  ;;  %v577_v54 = vshll.u32 %v2993_v19, 16 }
  0x4c   : > { %2373 = vmatprep.mubr.msk.bf16.mxu1 %vm767_vm1, %v2189_v27  ;;  %v557_v6 = vrot.slane %v556_v10, 4  ;;  %v567_v45 = vrot.slane %v566_v63, 4  ;;  %v583_v14 = vshll.u32 %v3000_v18, 16  ;;  %v587_v15 = vshrl.u32 %v3000_v18, 16  ;;  %v3048_v27 = vld [vmem:[%s2710_s17 + $0x90] sm:$0xf] }
  0x4d   : > { %v1326_v41 = vsel %vm2883_vm7, %v1324_v7, %v1325_v47  ;;  %v576_v46 = vrot.slane %v574_v49, 4  ;;  %v579_v35 = vrot.slane %v577_v54, 5  ;;  %v593_v28 = vshll.u32 %v3005_v32, 16  ;;  %v3054_v7 = vld [vmem:[%s2710_s17 + $0x94] sm:$0xf] }
  0x4e   : > { %v562_v37 = vsel %vm2786_vm4, %v557_v6, %v561_v11  ;;  %v572_v5 = vsel %vm2786_vm4, %v567_v45, %v571_v31  ;;  %v2266_v40 = vcombine.low %v1323_v34, %v1326_v41  ;;  %v585_v62 = vrot.slane %v583_v14, 5  ;;  %v3058_v14 = vld [vmem:[%s2710_s17 + $0x98] sm:$0x1] }
  0x4f   : > { %v2190_v8 = vcombine.low %v562_v37, %v572_v5  ;;  %v580_v13 = vor.u32 %v579_v35, %v576_v46  ;;  %v589_v33 = vrot.slane %v587_v15, 4  ;;  %v595_v60 = vrot.slane %v593_v28, 5 }
  0x50   : > { %2433 = vmatprep.mubr.msk.bf16.mxu0 %vm767_vm1, %v2266_v40  ;;  %v2250_v21 = vrot.slane %v2813_v12, 9  ;;  %v1329_v22 = vrot.slane %v2821_v30, 5  ;;  %v1332_v38 = vrot.slane %v2877_v53, 5  ;;  %v598_v0 = vshrl.u32 %v3018_v24, 16 }
  0x51   : > { %2374 = vmatmul.mubr.msk.bf16.gmra.mrb[16].mxu1 %vm767_vm1, %v2190_v8  ;;  %v581_v39 = vrot.slane %v580_v13, 4  ;;  %v590_v43 = vor.u32 %v589_v33, %v585_v62  ;;  %v601_v57 = vshll.u32 %v3018_v24, 16  ;;  %v607_v48 = vshll.u32 %v3025_v2, 16  ;;  %v3074_v8 = vld [vmem:[%s2710_s17 + $0x9c] sm:$0xf] }
  0x52   : > { %v1330_v12 = vsel %vm2883_vm7, %v2250_v21, %v1329_v22  ;;  %v1331_v4 = vrot.slane %v1329_v22, 4  ;;  %v600_v30 = vrot.slane %v598_v0, 4  ;;  %v611_v53 = vshrl.u32 %v3025_v2, 16  ;;  %v3079_v22 = vld [vmem:[%s2710_s17 + $0xa0] sm:$0xf] }
  0x53   : > { %v586_v51 = vsel %vm2786_vm4, %v581_v39, %v585_v62  ;;  %v591_v9 = vrot.slane %v590_v43, 4  ;;  %v603_v11 = vrot.slane %v601_v57, 5  ;;  %v609_v17 = vrot.slane %v607_v48, 5 }
  0x54   : > { %v1333_v36 = vsel %vm2883_vm7, %v1331_v4, %v1332_v38  ;;  %v613_v31 = vrot.slane %v611_v53, 4  ;;  %v617_v52 = vshll.u32 %v3034_v29, 16  ;;  %v2251_v25 = vrot.slane %v2837_v50, 9  ;;  %v3086_v4 = vld [vmem:[%s2710_s17 + $0xa4] sm:$0x1] }
  0x55   : > { %v596_v10 = vsel %vm2786_vm4, %v591_v9, %v595_v60  ;;  %v2267_v63 = vcombine.low %v1330_v12, %v1333_v36  ;;  %v604_v47 = vor.u32 %v603_v11, %v600_v30  ;;  %v1336_v34 = vrot.slane %v2840_v56, 5  ;;  %v3094_v11 = vld [vmem:[%s2710_s17 + $0xa8] sm:$0xf] }
  0x56   : > { %v2191_v49 = vcombine.low %v586_v51, %v596_v10  ;;  %v614_v54 = vor.u32 %v613_v31, %v609_v17  ;;  %v619_v6 = vrot.slane %v617_v52, 5  ;;  %v1339_v45 = vrot.slane %v2907_v26, 5 }
  0x57   : > { %2434 = vmatmul.mubr.msk.bf16.gmra.mrb[8].mxu0 %vm767_vm1, %v2267_v63  ;;  %v605_v50 = vrot.slane %v604_v47, 4  ;;  %v1337_v15 = vsel %vm2883_vm7, %v2251_v25, %v1336_v34  ;;  %v1338_v41 = vrot.slane %v1336_v34, 4  ;;  %v622_v56 = vshrl.u32 %v3048_v27, 16 }
  0x58   : > { %2377 = vmatprep.mubr.msk.bf16.mxu1 %vm767_vm1, %v2191_v49  ;;  %v615_v46 = vrot.slane %v614_v54, 4  ;;  %v625_v35 = vshll.u32 %v3048_v27, 16  ;;  %v631_v26 = vshll.u32 %v3054_v7, 16  ;;  %v635_v28 = vshrl.u32 %v3054_v7, 16  ;;  %v3104_v49 = vld [vmem:[%s2710_s17 + $0xac] sm:$0xf] }
  0x59   : > { %v610_v37 = vsel %vm2786_vm4, %v605_v50, %v609_v17  ;;  %v1340_v5 = vsel %vm2883_vm7, %v1338_v41, %v1339_v45  ;;  %v624_v40 = vrot.slane %v622_v56, 4  ;;  %v641_v62 = vshll.u32 %v3058_v14, 16  ;;  %v3110_v41 = vld [vmem:[%s2710_s17 + $0xb0] sm:$0x1]  ;;  %v3113_v56 = vld [vmem:[%s2710_s17 + $0xb4] sm:$0xf] }
  0x5a   : > { %v620_v13 = vsel %vm2786_vm4, %v615_v46, %v619_v6  ;;  %v2268_v33 = vcombine.low %v1337_v15, %v1340_v5  ;;  %v627_v60 = vrot.slane %v625_v35, 5  ;;  %v633_v21 = vrot.slane %v631_v26, 5 }
  0x5b   : > { %v2192_v38 = vcombine.low %v610_v37, %v620_v13  ;;  %v637_v0 = vrot.slane %v635_v28, 4  ;;  %v643_v39 = vrot.slane %v641_v62, 5  ;;  %v2252_v43 = vrot.slane %v2858_v16, 9 }
  0x5c   : > { %2437 = vmatprep.mubr.msk.bf16.mxu0 %vm767_vm1, %v2268_v33  ;;  %v628_v57 = vor.u32 %v627_v60, %v624_v40  ;;  %v1343_v48 = vrot.slane %v2865_v3, 5  ;;  %v1346_v12 = vrot.slane %v2929_v55, 5  ;;  %v646_v30 = vshrl.u32 %v3074_v8, 16  ;;  %v3122_v60 = vld [vmem:[%s2710_s17 + $0xb8] sm:$0xf] }
  0x5d   : > { %2378 = vmatmul.mubr.msk.bf16.gmra.mrb[20].mxu1 %vm767_vm1, %v2192_v38  ;;  %v638_v53 = vor.u32 %v637_v0, %v633_v21  ;;  %v649_v51 = vshll.u32 %v3074_v8, 16  ;;  %v655_v9 = vshll.u32 %v3079_v22, 16  ;;  %v659_v16 = vshrl.u32 %v3079_v22, 16 }
  0x5e   : > { %v629_v17 = vrot.slane %v628_v57, 4  ;;  %v1344_v3 = vsel %vm2883_vm7, %v2252_v43, %v1343_v48  ;;  %v1345_v55 = vrot.slane %v1343_v48, 4  ;;  %v648_v36 = vrot.slane %v646_v30, 4  ;;  %v3131_v48 = vld [vmem:[%s2710_s17 + $0xbc] sm:$0x1] }
  0x5f   : > { %v639_v31 = vrot.slane %v638_v53, 4  ;;  %v651_v52 = vrot.slane %v649_v51, 5  ;;  %v657_v25 = vrot.slane %v655_v9, 5  ;;  %v661_v10 = vrot.slane %v659_v16, 4 }
  0x60   : > { %v634_v63 = vsel %vm2786_vm4, %v629_v17, %v633_v21  ;;  %v1347_v47 = vsel %vm2883_vm7, %v1345_v55, %v1346_v12  ;;  %v665_v34 = vshll.u32 %v3086_v4, 16  ;;  %v670_v54 = vshrl.u32 %v3094_v11, 16 }
  0x61   : > { %v644_v6 = vsel %vm2786_vm4, %v639_v31, %v643_v39  ;;  %v2269_v45 = vcombine.low %v1344_v3, %v1347_v47  ;;  %v652_v50 = vor.u32 %v651_v52, %v648_v36  ;;  %v662_v15 = vor.u32 %v661_v10, %v657_v25 }
  0x62   : > { %v2193_v46 = vcombine.low %v634_v63, %v644_v6  ;;  %v667_v35 = vrot.slane %v665_v34, 5  ;;  %v672_v26 = vrot.slane %v670_v54, 4  ;;  %v673_v28 = vshll.u32 %v3094_v11, 16 }
  0x63   : > { %2438 = vmatmul.mubr.msk.bf16.gmra.mrb[12].mxu0 %vm767_vm1, %v2269_v45  ;;  %v653_v37 = vrot.slane %v652_v50, 4  ;;  %v663_v5 = vrot.slane %v662_v15, 4  ;;  %v679_v40 = vshll.u32 %v3104_v49, 16  ;;  %v683_v62 = vshrl.u32 %v3104_v49, 16 }
  0x64   : > { %2381 = vmatprep.mubr.msk.bf16.mxu1 %vm767_vm1, %v2193_v46  ;;  %v675_v13 = vrot.slane %v673_v28, 5  ;;  %v689_v33 = vshll.u32 %v3110_v41, 16  ;;  %v694_v21 = vshrl.u32 %v3113_v56, 16  ;;  %v697_v38 = vshll.u32 %v3113_v56, 16 }
  0x65   : > { %v658_v0 = vsel %vm2786_vm4, %v653_v37, %v657_v25  ;;  %v668_v39 = vsel %vm2786_vm4, %v663_v5, %v667_v35  ;;  %v681_v43 = vrot.slane %v679_v40, 5  ;;  %v685_v57 = vrot.slane %v683_v62, 4 }
  0x66   : > { %v2194_v12 = vcombine.low %v658_v0, %v668_v39  ;;  %v676_v30 = vor.u32 %v675_v13, %v672_v26  ;;  %v691_v53 = vrot.slane %v689_v33, 5  ;;  %v696_v51 = vrot.slane %v694_v21, 4 }
  0x67   : > { %v686_v9 = vor.u32 %v685_v57, %v681_v43  ;;  %v699_v16 = vrot.slane %v697_v38, 5  ;;  %v703_v17 = vshll.u32 %v3122_v60, 16  ;;  %v707_v3 = vshrl.u32 %v3122_v60, 16 }
  0x68   : > { %2382 = vmatmul.mubr.msk.bf16.gmra.mrb[24].mxu1 %vm767_vm1, %v2194_v12  ;;  %v677_v55 = vrot.slane %v676_v30, 4  ;;  %v713_v36 = vshll.u32 %v3131_v48, 16  ;;  %v2253_v31 = vrot.slane %v2937_v1, 9  ;;  %v1350_v52 = vrot.slane %v2946_v20, 5 }
  0x69   : > { %v687_v25 = vrot.slane %v686_v9, 4  ;;  %v700_v10 = vor.u32 %v699_v16, %v696_v51  ;;  %v705_v63 = vrot.slane %v703_v17, 5  ;;  %v709_v47 = vrot.slane %v707_v3, 4 }
  0x6a   : > { %v682_v34 = vsel %vm2786_vm4, %v677_v55, %v681_v43  ;;  %v715_v54 = vrot.slane %v713_v36, 5  ;;  %v1351_v6 = vsel %vm2883_vm7, %v2253_v31, %v1350_v52  ;;  %v1352_v45 = vrot.slane %v1350_v52, 4 }
  0x6b   : > { %v692_v50 = vsel %vm2786_vm4, %v687_v25, %v691_v53  ;;  %v701_v15 = vrot.slane %v700_v10, 4  ;;  %v710_v46 = vor.u32 %v709_v47, %v705_v63  ;;  %v1353_v35 = vrot.slane %v2955_v23, 5 }
  0x6c   : > { %v2195_v26 = vcombine.low %v682_v34, %v692_v50  ;;  %v2254_v28 = vrot.slane %v2967_v58, 9  ;;  %v1357_v37 = vrot.slane %v2973_v42, 5  ;;  %v1360_v5 = vrot.slane %v2978_v59, 5 }
  0x6d   : > { %v706_v40 = vsel %vm2786_vm4, %v701_v15, %v705_v63  ;;  %v711_v62 = vrot.slane %v710_v46, 4  ;;  %v1354_v13 = vsel %vm2883_vm7, %v1352_v45, %v1353_v35  ;;  %v2221_v38 = vcombine.low %v2937_v1, %v2946_v20 }
  0x6e   : > { %2385 = vmatprep.mubr.msk.bf16.mxu1 %vm767_vm1, %v2195_v26  ;;  %v2270_v33 = vcombine.low %v1351_v6, %v1354_v13  ;;  %v1358_v23 = vsel %vm2883_vm7, %v2254_v28, %v1357_v37  ;;  %v1359_v21 = vrot.slane %v1357_v37, 4  ;;  %v2255_v0 = vrot.slane %v2993_v19, 9 }
  0x6f   : > { %v716_v59 = vsel %vm2786_vm4, %v711_v62, %v715_v54  ;;  %v1364_v39 = vrot.slane %v3000_v18, 5  ;;  %v1367_v43 = vrot.slane %v3005_v32, 5  ;;  %v2256_v30 = vrot.slane %v3018_v24, 9 }
  0x70   : > { %v2196_v57 = vcombine.low %v706_v40, %v716_v59  ;;  %2441 = vmatprep.mubr.msk.bf16.mxu0 %vm767_vm1, %v2270_v33  ;;  %v1361_v12 = vsel %vm2883_vm7, %v1359_v21, %v1360_v5  ;;  %v1371_v53 = vrot.slane %v3025_v2, 5  ;;  %v1374_v51 = vrot.slane %v3034_v29, 5 }
  0x71   : > { %v2271_v1 = vcombine.low %v1358_v23, %v1361_v12  ;;  %v1365_v44 = vsel %vm2883_vm7, %v2255_v0, %v1364_v39  ;;  %v1366_v20 = vrot.slane %v1364_v39, 4  ;;  %v2257_v16 = vrot.slane %v3048_v27, 9 }
  0x72   : > { %2386 = vmatmul.mubr.msk.bf16.gmra.mrb[28].mxu1 %vm767_vm1, %v2196_v57  ;;  %v1373_v32 = vrot.slane %v1371_v53, 4  ;;  %v1378_v17 = vrot.slane %v3054_v7, 5  ;;  %v1381_v3 = vrot.slane %v3058_v14, 5  ;;  %v1372_v29 = vsel %vm2883_vm7, %v2256_v30, %v1371_v53 }
  0x73   : > { %2442 = vmatmul.mubr.msk.bf16.gmra.mrb[16].mxu0 %vm767_vm1, %v2271_v1  ;;  %2407 = vmatprep.mubr.msk.bf16.mxu1 %vm767_vm1, %v2221_v38  ;;  %v1368_v9 = vsel %vm2883_vm7, %v1366_v20, %v1367_v43  ;;  %v1385_v31 = vrot.slane %v3079_v22, 5  ;;  %v2222_v10 = vcombine.low %v2967_v58, %v2973_v42  ;;  %v2223_v14 = vcombine.low %v2993_v19, %v3000_v18 }
  0x74   : > { %v2272_v55 = vcombine.low %v1365_v44, %v1368_v9  ;;  %v1375_v36 = vsel %vm2883_vm7, %v1373_v32, %v1374_v51  ;;  %v1379_v52 = vsel %vm2883_vm7, %v2257_v16, %v1378_v17  ;;  %v1380_v25 = vrot.slane %v1378_v17, 4 }
  0x75   : > { %v2273_v63 = vcombine.low %v1372_v29, %v1375_v36  ;;  %v1392_v34 = vrot.slane %v3104_v49, 5  ;;  %v2258_v6 = vrot.slane %v3074_v8, 9  ;;  %v1387_v45 = vrot.slane %v1385_v31, 4 }
  0x76   : > { %2445 = vmatprep.mubr.msk.bf16.mxu0 %vm767_vm1, %v2272_v55  ;;  %v1382_v47 = vsel %vm2883_vm7, %v1380_v25, %v1381_v3  ;;  %v1388_v50 = vrot.slane %v3086_v4, 5  ;;  %v2259_v15 = vrot.slane %v3094_v11, 9  ;;  %v1395_v42 = vrot.slane %v3110_v41, 5 }
  0x77   : > { %v2274_v54 = vcombine.low %v1379_v52, %v1382_v47  ;;  %v1394_v58 = vrot.slane %v1392_v34, 4  ;;  %v1386_v19 = vsel %vm2883_vm7, %v2258_v6, %v1385_v31  ;;  %v1399_v4 = vrot.slane %v3122_v60, 5 }
  0x78   : > { %v1389_v18 = vsel %vm2883_vm7, %v1387_v45, %v1388_v50  ;;  %v1393_v46 = vsel %vm2883_vm7, %v2259_v15, %v1392_v34  ;;  %v2224_v35 = vcombine.low %v3018_v24, %v3025_v2  ;;  %v2225_v28 = vcombine.low %v3048_v27, %v3054_v7 }
  0x79   : > { %v1396_v41 = vsel %vm2883_vm7, %v1394_v58, %v1395_v42  ;;  %v2275_v26 = vcombine.low %v1386_v19, %v1389_v18  ;;  %v2260_v5 = vrot.slane %v3113_v56, 9  ;;  %v1401_v40 = vrot.slane %v1399_v4, 4 }
  0x7a   : > { %2408 = vmatmul.mubr.msk.bf16.vlgmr.msra.gmra.mrb[16].mxu1 %vm767_vm1, %v2222_v10  ;;  %v2276_v37 = vcombine.low %v1393_v46, %v1396_v41  ;;  %v1402_v62 = vrot.slane %v3131_v48, 5  ;;  %v2226_v27 = vcombine.low %v3074_v8, %v3079_v22  ;;  %v2227_v48 = vcombine.low %v3094_v11, %v3104_v49 }
  0x7b   : > { %2446 = vmatmul.mubr.msk.bf16.gmra.mrb[20].mxu0 %vm767_vm1, %v2273_v63  ;;  %2411 = vmatprep.mubr.msk.bf16.mxu1 %vm767_vm1, %v2223_v14  ;;  %v1400_v24 = vsel %vm2883_vm7, %v2260_v5, %v1399_v4  ;;  %v2228_v13 = vcombine.low %v3113_v56, %v3122_v60 }
  0x7c   : > { %2449 = vmatprep.mubr.msk.bf16.mxu0 %vm767_vm1, %v2274_v54  ;;  %v1403_v2 = vsel %vm2883_vm7, %v1401_v40, %v1402_v62 }
  0x7d   : > { %v2277_v7 = vcombine.low %v1400_v24, %v1403_v2 }
  0x82   : > { %2412 = vmatmul.mubr.msk.bf16.gmra.mrb[20].mxu1 %vm767_vm1, %v2224_v35 }
  0x83   : > { %2450 = vmatmul.mubr.msk.bf16.gmra.mrb[24].mxu0 %vm767_vm1, %v2275_v26  ;;  %2415 = vmatprep.mubr.msk.bf16.mxu1 %vm767_vm1, %v2225_v28 }
  0x84   : > { %2453 = vmatprep.mubr.msk.bf16.mxu0 %vm767_vm1, %v2276_v37 }
  0x8a   : > { %2416 = vmatmul.mubr.msk.bf16.gmra.mrb[24].mxu1 %vm767_vm1, %v2226_v27 }
  0x8b   : > { %2454 = vmatmul.mubr.msk.bf16.gmra.mrb[28].mxu0 %vm767_vm1, %v2277_v7  ;;  %2419 = vmatprep.mubr.msk.bf16.mxu1 %vm767_vm1, %v2227_v48 }
  0x92   : > { %2420 = vmatmul.mubr.msk.bf16.gmra.mrb[28].mxu1 %vm767_vm1, %v2228_v13 }
  0xfe   : > { %v2359_v61 = vpop.f32.mrb[0].mxu1 }
  0xff   : > { %v854_v33 = vpop.f32.mrb[1].mxu1 }
 0x100   : > { %v2360_v23 = vpop.f32.mrb[2].mxu1 }
 0x101   : > { %v857_v21 = vpop.f32.mrb[3].mxu1 }
 0x108   : > { %v2363_v8 = vpop.f32.mrb[4].mxu1 }
 0x109   : > { %v870_v22 = vpop.f32.mrb[5].mxu1 }
 0x10a   : > { %v2364_v38 = vpop.f32.mrb[6].mxu1 }
 0x10b   : > { %v873_v59 = vpop.f32.mrb[7].mxu1 }
 0x10f   : > { %v2427_v11 = vpop.f32.mrb[0].mxu0 }
 0x110   : > { %v2367_v49 = vpop.f32.mrb[8].mxu1  ;;  %v3235_v0 = vadd.f32 %v2427_v11, %v2359_v61  ;;  %v1539_v39 = vpop.f32.mrb[1].mxu0 }
 0x111   : > { %v886_v43 = vpop.f32.mrb[9].mxu1  ;;  %v3237_v57 = vadd.f32 %v1539_v39, %v854_v33  ;;  %v2428_v12 = vpop.f32.mrb[2].mxu0 }
 0x112   : > { %v2368_v56 = vpop.f32.mrb[10].mxu1  ;;  %v3239_v60 = vadd.f32 %v2428_v12, %v2360_v23  ;;  %v1542_v30 = vpop.f32.mrb[3].mxu0  ;;  %1704 = vst.msk [vmem:[#allocation2 + $0x10] sm:$0xff] (!%p2294_p7), %vm767_vm1, %v3235_v0 }
 0x113   : > { %v889_v53 = vpop.f32.mrb[11].mxu1  ;;  %v3241_v1 = vadd.f32 %v1542_v30, %v857_v21  ;;  %1702 = vst.msk [vmem:[#allocation2] sm:$0xff] (!%p2294_p7), %vm767_vm1, %v3237_v57 }
 0x114   : > { %1705 = vst.msk [vmem:[#allocation2 + $0x18] sm:$0xff] (!%p2294_p7), %vm767_vm1, %v3239_v60 }
 0x115   : > { %1703 = vst.msk [vmem:[#allocation2 + $0x8] sm:$0xff] (!%p2294_p7), %vm767_vm1, %v3241_v1 }
 0x119   : > { %v2371_v44 = vpop.f32.mrb[12].mxu1 }
 0x11a   : > { %v902_v20 = vpop.f32.mrb[13].mxu1 }
 0x11b   : > { %v2372_v51 = vpop.f32.mrb[14].mxu1 }
 0x11c   : > { %v905_v32 = vpop.f32.mrb[15].mxu1 }
 0x11d   : > { %v2431_v9 = vpop.f32.mrb[4].mxu0 }
 0x11e   : > { %v3243_v16 = vadd.f32 %v2431_v9, %v2363_v8  ;;  %v1555_v17 = vpop.f32.mrb[5].mxu0 }
 0x11f   : > { %v3245_v3 = vadd.f32 %v1555_v17, %v870_v22  ;;  %v2432_v55 = vpop.f32.mrb[6].mxu0 }
 0x120   : > { %v3247_v29 = vadd.f32 %v2432_v55, %v2364_v38  ;;  %v1558_v36 = vpop.f32.mrb[7].mxu0  ;;  %1708 = vst.msk [vmem:[#allocation2 + $0x30] sm:$0xff] (!%p2294_p7), %vm767_vm1, %v3243_v16 }
 0x121   : > { %v3249_v31 = vadd.f32 %v1558_v36, %v873_v59  ;;  %1706 = vst.msk [vmem:[#allocation2 + $0x20] sm:$0xff] (!%p2294_p7), %vm767_vm1, %v3245_v3 }
 0x122   : > { %1709 = vst.msk [vmem:[#allocation2 + $0x38] sm:$0xff] (!%p2294_p7), %vm767_vm1, %v3247_v29 }
 0x123   : > { %1707 = vst.msk [vmem:[#allocation2 + $0x28] sm:$0xff] (!%p2294_p7), %vm767_vm1, %v3249_v31 }
 0x12a   : > { %v2435_v52 = vpop.f32.mrb[8].mxu0 }
 0x12b   : > { %v3251_v25 = vadd.f32 %v2435_v52, %v2367_v49  ;;  %v1571_v10 = vpop.f32.mrb[9].mxu0 }
 0x12c   : > { %v3253_v63 = vadd.f32 %v1571_v10, %v886_v43  ;;  %v2436_v14 = vpop.f32.mrb[10].mxu0 }
 0x12d   : > { %v3255_v47 = vadd.f32 %v2436_v14, %v2368_v56  ;;  %v1574_v34 = vpop.f32.mrb[11].mxu0  ;;  %1712 = vst.msk [vmem:[#allocation2 + $0x50] sm:$0xff] (!%p2294_p7), %vm767_vm1, %v3251_v25 }
 0x12e   : > { %v3257_v54 = vadd.f32 %v1574_v34, %v889_v53  ;;  %1710 = vst.msk [vmem:[#allocation2 + $0x40] sm:$0xff] (!%p2294_p7), %vm767_vm1, %v3253_v63 }
 0x12f   : > { %1713 = vst.msk [vmem:[#allocation2 + $0x58] sm:$0xff] (!%p2294_p7), %vm767_vm1, %v3255_v47 }
 0x130   : > { %1711 = vst.msk [vmem:[#allocation2 + $0x48] sm:$0xff] (!%p2294_p7), %vm767_vm1, %v3257_v54 }
 0x136   : > { %v2439_v6 = vpop.f32.mrb[12].mxu0 }
 0x137   : > { %v3259_v45 = vadd.f32 %v2439_v6, %v2371_v44  ;;  %v1587_v50 = vpop.f32.mrb[13].mxu0 }
 0x138   : > { %v3261_v15 = vadd.f32 %v1587_v50, %v902_v20  ;;  %v2440_v58 = vpop.f32.mrb[14].mxu0 }
 0x139   : > { %v3263_v42 = vadd.f32 %v2440_v58, %v2372_v51  ;;  %v1590_v19 = vpop.f32.mrb[15].mxu0  ;;  %1716 = vst.msk [vmem:[#allocation2 + $0x70] sm:$0xff] (!%p2294_p7), %vm767_vm1, %v3259_v45 }
 0x13a   : > { %v3265_v18 = vadd.f32 %v1590_v19, %v905_v32  ;;  %1714 = vst.msk [vmem:[#allocation2 + $0x60] sm:$0xff] (!%p2294_p7), %vm767_vm1, %v3261_v15 }
 0x13b   : > { %1717 = vst.msk [vmem:[#allocation2 + $0x78] sm:$0xff] (!%p2294_p7), %vm767_vm1, %v3263_v42 }
 0x13c   : > { %1715 = vst.msk [vmem:[#allocation2 + $0x68] sm:$0xff] (!%p2294_p7), %vm767_vm1, %v3265_v18 }
 0x146   : > { %v2443_v4 = vpop.f32.mrb[16].mxu0 }
 0x147   : > { %v1603_v46 = vpop.f32.mrb[17].mxu0 }
 0x148   : > { %v2444_v41 = vpop.f32.mrb[18].mxu0 }
 0x149   : > { %v1606_v35 = vpop.f32.mrb[19].mxu0 }
 0x14d   : > { %v2409_v26 = vpop.f32.mrb[16].mxu1 }
 0x14e   : > { %v3267_v28 = vadd.f32 %v2443_v4, %v2409_v26  ;;  %v1210_v37 = vpop.f32.mrb[17].mxu1  ;;  %v2447_v5 = vpop.f32.mrb[20].mxu0 }
 0x14f   : > { %v3269_v40 = vadd.f32 %v1603_v46, %v1210_v37  ;;  %v2410_v62 = vpop.f32.mrb[18].mxu1  ;;  %v1619_v24 = vpop.f32.mrb[21].mxu0 }
 0x150   : > { %v3271_v2 = vadd.f32 %v2444_v41, %v2410_v62  ;;  %v1213_v27 = vpop.f32.mrb[19].mxu1  ;;  %v2448_v7 = vpop.f32.mrb[22].mxu0  ;;  %1720 = vst.msk [vmem:[#allocation2 + $0x90] sm:$0xff] (!%p2294_p7), %vm767_vm1, %v3267_v28 }
 0x151   : > { %v3273_v48 = vadd.f32 %v1606_v35, %v1213_v27  ;;  %v1622_v13 = vpop.f32.mrb[23].mxu0  ;;  %1718 = vst.msk [vmem:[#allocation2 + $0x80] sm:$0xff] (!%p2294_p7), %vm767_vm1, %v3269_v40 }
 0x152   : > { %1721 = vst.msk [vmem:[#allocation2 + $0x98] sm:$0xff] (!%p2294_p7), %vm767_vm1, %v3271_v2 }
 0x153   : > { %1719 = vst.msk [vmem:[#allocation2 + $0x88] sm:$0xff] (!%p2294_p7), %vm767_vm1, %v3273_v48 }
 0x155   : > { %v2413_v61 = vpop.f32.mrb[20].mxu1 }
 0x156   : > { %v3275_v33 = vadd.f32 %v2447_v5, %v2413_v61  ;;  %v1226_v23 = vpop.f32.mrb[21].mxu1  ;;  %v2451_v21 = vpop.f32.mrb[24].mxu0 }
 0x157   : > { %v3277_v8 = vadd.f32 %v1619_v24, %v1226_v23  ;;  %v2414_v22 = vpop.f32.mrb[22].mxu1  ;;  %v1635_v38 = vpop.f32.mrb[25].mxu0 }
 0x158   : > { %v3279_v59 = vadd.f32 %v2448_v7, %v2414_v22  ;;  %v1229_v11 = vpop.f32.mrb[23].mxu1  ;;  %v2452_v49 = vpop.f32.mrb[26].mxu0  ;;  %1724 = vst.msk [vmem:[#allocation2 + $0xb0] sm:$0xff] (!%p2294_p7), %vm767_vm1, %v3275_v33 }
 0x159   : > { %v3281_v39 = vadd.f32 %v1622_v13, %v1229_v11  ;;  %v1638_v43 = vpop.f32.mrb[27].mxu0  ;;  %1722 = vst.msk [vmem:[#allocation2 + $0xa0] sm:$0xff] (!%p2294_p7), %vm767_vm1, %v3277_v8 }
 0x15a   : > { %1725 = vst.msk [vmem:[#allocation2 + $0xb8] sm:$0xff] (!%p2294_p7), %vm767_vm1, %v3279_v59 }
 0x15b   : > { %1723 = vst.msk [vmem:[#allocation2 + $0xa8] sm:$0xff] (!%p2294_p7), %vm767_vm1, %v3281_v39 }
 0x15d   : > { %v2417_v12 = vpop.f32.mrb[24].mxu1 }
 0x15e   : > { %v3283_v56 = vadd.f32 %v2451_v21, %v2417_v12  ;;  %v1242_v30 = vpop.f32.mrb[25].mxu1  ;;  %v2455_v53 = vpop.f32.mrb[28].mxu0 }
 0x15f   : > { %v3285_v44 = vadd.f32 %v1635_v38, %v1242_v30  ;;  %v2418_v20 = vpop.f32.mrb[26].mxu1  ;;  %v1651_v51 = vpop.f32.mrb[29].mxu0 }
 0x160   : > { %v3287_v32 = vadd.f32 %v2452_v49, %v2418_v20  ;;  %v1245_v9 = vpop.f32.mrb[27].mxu1  ;;  %v2456_v17 = vpop.f32.mrb[30].mxu0  ;;  %1728 = vst.msk [vmem:[#allocation2 + $0xd0] sm:$0xff] (!%p2294_p7), %vm767_vm1, %v3283_v56 }
 0x161   : > { %v3289_v55 = vadd.f32 %v1638_v43, %v1245_v9  ;;  %v1654_v36 = vpop.f32.mrb[31].mxu0  ;;  %1726 = vst.msk [vmem:[#allocation2 + $0xc0] sm:$0xff] (!%p2294_p7), %vm767_vm1, %v3285_v44 }
 0x162   : > { %1729 = vst.msk [vmem:[#allocation2 + $0xd8] sm:$0xff] (!%p2294_p7), %vm767_vm1, %v3287_v32 }
 0x163   : > { %1701 = sbr.rel (%p2294_p7) target bundleno = 364 (0x16c), region = 44  ;;  %1727 = vst.msk [vmem:[#allocation2 + $0xc8] sm:$0xff] (!%p2294_p7), %vm767_vm1, %v3289_v55 }
 0x165   : > { %v2421_v52 = vpop.f32.mrb[28].mxu1 }
 0x166   : > { %v3291_v10 = vadd.f32 %v2455_v53, %v2421_v52  ;;  %v1258_v14 = vpop.f32.mrb[29].mxu1 }
 0x167   : > { %v3293_v34 = vadd.f32 %v1651_v51, %v1258_v14  ;;  %v2422_v6 = vpop.f32.mrb[30].mxu1 }
 0x168   : > { %v3295_v50 = vadd.f32 %v2456_v17, %v2422_v6  ;;  %v1261_v58 = vpop.f32.mrb[31].mxu1  ;;  %1732 = vst.msk [vmem:[#allocation2 + $0xf0] sm:$0xff] (!%p2294_p7), %vm767_vm1, %v3291_v10 }
 0x169   : > { %v3297_v19 = vadd.f32 %v1654_v36, %v1261_v58  ;;  %1730 = vst.msk [vmem:[#allocation2 + $0xe0] sm:$0xff] (!%p2294_p7), %vm767_vm1, %v3293_v34 }
 0x16a   : > { %1733 = vst.msk [vmem:[#allocation2 + $0xf8] sm:$0xff] %vm767_vm1, %v3295_v50 }
 0x16b   : > { %1731 = vst.msk [vmem:[#allocation2 + $0xe8] sm:$0xff] %vm767_vm1, %v3297_v19 }
 0x16c PF: > { %p2295_p8 = scmp.le.s32.totalorder %s2607_s18, 0 }
 0x16d   : > { %v1738_v4 = vld [vmem:[#allocation2] sm:$0xff] (!%p2295_p8)  ;;  %v1739_v46 = vld [vmem:[#allocation2 + $0x8] sm:$0xff] (!%p2295_p8)  ;;  %v1740_v41 = vld [vmem:[#allocation2 + $0x10] sm:$0xff] (!%p2295_p8) }
 0x16e   : > { %1737 = sbr.rel (%p2295_p8) target bundleno = 384 (0x180), region = 48  ;;  %v1770_v35 = vadd.f32 (!%p2295_p8), %v3237_v57, %v1738_v4  ;;  %v1771_v26 = vadd.f32 (!%p2295_p8), %v3241_v1, %v1739_v46  ;;  %v1772_v37 = vadd.f32 (!%p2295_p8), %v3235_v0, %v1740_v41  ;;  %v1741_v5 = vld [vmem:[#allocation2 + $0x18] sm:$0xff] (!%p2295_p8)  ;;  %v1742_v62 = vld [vmem:[#allocation2 + $0x20] sm:$0xff] (!%p2295_p8)  ;;  %v1743_v24 = vld [vmem:[#allocation2 + $0x28] sm:$0xff] (!%p2295_p8) }
 0x16f   : > { %v1773_v27 = vadd.f32 (!%p2295_p8), %v3239_v60, %v1741_v5  ;;  %v1774_v7 = vadd.f32 (!%p2295_p8), %v3245_v3, %v1742_v62  ;;  %v1775_v13 = vadd.f32 (!%p2295_p8), %v3249_v31, %v1743_v24  ;;  %v1744_v61 = vld [vmem:[#allocation2 + $0x30] sm:$0xff] (!%p2295_p8)  ;;  %v1745_v23 = vld [vmem:[#allocation2 + $0x38] sm:$0xff] (!%p2295_p8)  ;;  %v1746_v21 = vld [vmem:[#allocation2 + $0x40] sm:$0xff] (!%p2295_p8) }
 0x170   : > { %1802 = vst.msk [vmem:[#allocation2] sm:$0xff] (!%p2295_p8), %vm767_vm1, %v1770_v35  ;;  %1803 = vst.msk [vmem:[#allocation2 + $0x8] sm:$0xff] (!%p2295_p8), %vm767_vm1, %v1771_v26  ;;  %v1776_v0 = vadd.f32 (!%p2295_p8), %v3243_v16, %v1744_v61  ;;  %v1777_v57 = vadd.f32 (!%p2295_p8), %v3247_v29, %v1745_v23  ;;  %v1778_v1 = vadd.f32 (!%p2295_p8), %v3253_v63, %v1746_v21  ;;  %v1747_v60 = vld [vmem:[#allocation2 + $0x48] sm:$0xff] (!%p2295_p8)  ;;  %v1748_v22 = vld [vmem:[#allocation2 + $0x50] sm:$0xff] (!%p2295_p8) }
 0x171   : > { %1804 = vst.msk [vmem:[#allocation2 + $0x10] sm:$0xff] (!%p2295_p8), %vm767_vm1, %v1772_v37  ;;  %v1749_v3 = vld [vmem:[#allocation2 + $0x58] sm:$0xff] (!%p2295_p8)  ;;  %1805 = vst.msk [vmem:[#allocation2 + $0x18] sm:$0xff] (!%p2295_p8), %vm767_vm1, %v1773_v27  ;;  %v1779_v31 = vadd.f32 (!%p2295_p8), %v3257_v54, %v1747_v60  ;;  %v1780_v38 = vadd.f32 (!%p2295_p8), %v3251_v25, %v1748_v22  ;;  %v1750_v16 = vld [vmem:[#allocation2 + $0x60] sm:$0xff] (!%p2295_p8) }
 0x172   : > { %1806 = vst.msk [vmem:[#allocation2 + $0x20] sm:$0xff] (!%p2295_p8), %vm767_vm1, %v1774_v7  ;;  %1807 = vst.msk [vmem:[#allocation2 + $0x28] sm:$0xff] (!%p2295_p8), %vm767_vm1, %v1775_v13  ;;  %v1781_v11 = vadd.f32 (!%p2295_p8), %v3255_v47, %v1749_v3  ;;  %v1751_v49 = vld [vmem:[#allocation2 + $0x68] sm:$0xff] (!%p2295_p8)  ;;  %v1752_v29 = vld [vmem:[#allocation2 + $0x70] sm:$0xff] (!%p2295_p8)  ;;  %v1782_v63 = vadd.f32 (!%p2295_p8), %v3261_v15, %v1750_v16 }
 0x173   : > { %1808 = vst.msk [vmem:[#allocation2 + $0x30] sm:$0xff] (!%p2295_p8), %vm767_vm1, %v1776_v0  ;;  %1809 = vst.msk [vmem:[#allocation2 + $0x38] sm:$0xff] (!%p2295_p8), %vm767_vm1, %v1777_v57  ;;  %v1783_v43 = vadd.f32 (!%p2295_p8), %v3265_v18, %v1751_v49  ;;  %v1784_v12 = vadd.f32 (!%p2295_p8), %v3259_v45, %v1752_v29  ;;  %v1753_v54 = vld [vmem:[#allocation2 + $0x78] sm:$0xff] (!%p2295_p8)  ;;  %v1754_v30 = vld [vmem:[#allocation2 + $0x80] sm:$0xff] (!%p2295_p8) }
 0x174   : > { %1810 = vst.msk [vmem:[#allocation2 + $0x40] sm:$0xff] (!%p2295_p8), %vm767_vm1, %v1778_v1  ;;  %v1755_v25 = vld [vmem:[#allocation2 + $0x88] sm:$0xff] (!%p2295_p8)  ;;  %1811 = vst.msk [vmem:[#allocation2 + $0x48] sm:$0xff] (!%p2295_p8), %vm767_vm1, %v1779_v31  ;;  %v1785_v47 = vadd.f32 (!%p2295_p8), %v3263_v42, %v1753_v54  ;;  %v1786_v53 = vadd.f32 (!%p2295_p8), %v3269_v40, %v1754_v30  ;;  %v1756_v15 = vld [vmem:[#allocation2 + $0x90] sm:$0xff] (!%p2295_p8) }
 0x175   : > { %1812 = vst.msk [vmem:[#allocation2 + $0x50] sm:$0xff] %vm767_vm1, %v1780_v38  ;;  %1813 = vst.msk [vmem:[#allocation2 + $0x58] sm:$0xff] %vm767_vm1, %v1781_v11  ;;  %v1787_v20 = vadd.f32 %v3273_v48, %v1755_v25  ;;  %v1757_v51 = vld [vmem:[#allocation2 + $0x98] sm:$0xff]  ;;  %v1758_v18 = vld [vmem:[#allocation2 + $0xa0] sm:$0xff]  ;;  %v1788_v45 = vadd.f32 %v3267_v28, %v1756_v15 }
 0x176   : > { %1814 = vst.msk [vmem:[#allocation2 + $0x60] sm:$0xff] %vm767_vm1, %v1782_v63  ;;  %1815 = vst.msk [vmem:[#allocation2 + $0x68] sm:$0xff] %vm767_vm1, %v1783_v43  ;;  %v1789_v9 = vadd.f32 %v3271_v2, %v1757_v51  ;;  %v1790_v17 = vadd.f32 %v3277_v8, %v1758_v18  ;;  %v1759_v42 = vld [vmem:[#allocation2 + $0xa8] sm:$0xff]  ;;  %v1760_v36 = vld [vmem:[#allocation2 + $0xb0] sm:$0xff] }
 0x177   : > { %1816 = vst.msk [vmem:[#allocation2 + $0x70] sm:$0xff] %vm767_vm1, %v1784_v12  ;;  %v1761_v40 = vld [vmem:[#allocation2 + $0xb8] sm:$0xff]  ;;  %1817 = vst.msk [vmem:[#allocation2 + $0x78] sm:$0xff] %vm767_vm1, %v1785_v47  ;;  %v1791_v48 = vadd.f32 %v3281_v39, %v1759_v42  ;;  %v1792_v52 = vadd.f32 %v3275_v33, %v1760_v36  ;;  %v1762_v28 = vld [vmem:[#allocation2 + $0xc0] sm:$0xff] }
 0x178   : > { %1818 = vst.msk [vmem:[#allocation2 + $0x80] sm:$0xff] %vm767_vm1, %v1786_v53  ;;  %1819 = vst.msk [vmem:[#allocation2 + $0x88] sm:$0xff] %vm767_vm1, %v1787_v20  ;;  %v1793_v14 = vadd.f32 %v3279_v59, %v1761_v40  ;;  %v1763_v6 = vld [vmem:[#allocation2 + $0xc8] sm:$0xff]  ;;  %v1764_v2 = vld [vmem:[#allocation2 + $0xd0] sm:$0xff]  ;;  %v1794_v8 = vadd.f32 %v3285_v44, %v1762_v28 }
 0x179   : > { %1820 = vst.msk [vmem:[#allocation2 + $0x90] sm:$0xff] %vm767_vm1, %v1788_v45  ;;  %1821 = vst.msk [vmem:[#allocation2 + $0x98] sm:$0xff] %vm767_vm1, %v1789_v9  ;;  %v1795_v58 = vadd.f32 %v3289_v55, %v1763_v6  ;;  %v1796_v4 = vadd.f32 %v3283_v56, %v1764_v2  ;;  %v1765_v39 = vld [vmem:[#allocation2 + $0xd8] sm:$0xff]  ;;  %v1766_v46 = vld [vmem:[#allocation2 + $0xe0] sm:$0xff] }
 0x17a   : > { %1822 = vst.msk [vmem:[#allocation2 + $0xa0] sm:$0xff] %vm767_vm1, %v1790_v17  ;;  %v1767_v33 = vld [vmem:[#allocation2 + $0xe8] sm:$0xff]  ;;  %1823 = vst.msk [vmem:[#allocation2 + $0xa8] sm:$0xff] %vm767_vm1, %v1791_v48  ;;  %v1797_v59 = vadd.f32 %v3287_v32, %v1765_v39  ;;  %v1798_v41 = vadd.f32 %v3293_v34, %v1766_v46  ;;  %v1768_v44 = vld [vmem:[#allocation2 + $0xf0] sm:$0xff] }
 0x17b   : > { %1824 = vst.msk [vmem:[#allocation2 + $0xb0] sm:$0xff] %vm767_vm1, %v1792_v52  ;;  %1825 = vst.msk [vmem:[#allocation2 + $0xb8] sm:$0xff] %vm767_vm1, %v1793_v14  ;;  %v1799_v35 = vadd.f32 %v3297_v19, %v1767_v33  ;;  %v1769_v26 = vld [vmem:[#allocation2 + $0xf8] sm:$0xff]  ;;  %v1800_v56 = vadd.f32 %v3291_v10, %v1768_v44 }
 0x17c   : > { %1826 = vst.msk [vmem:[#allocation2 + $0xc0] sm:$0xff] %vm767_vm1, %v1794_v8  ;;  %1827 = vst.msk [vmem:[#allocation2 + $0xc8] sm:$0xff] %vm767_vm1, %v1795_v58  ;;  %v1801_v55 = vadd.f32 %v3295_v50, %v1769_v26 }
 0x17d   : > { %1828 = vst.msk [vmem:[#allocation2 + $0xd0] sm:$0xff] %vm767_vm1, %v1796_v4  ;;  %1829 = vst.msk [vmem:[#allocation2 + $0xd8] sm:$0xff] %vm767_vm1, %v1797_v59 }
 0x17e   : > { %1830 = vst.msk [vmem:[#allocation2 + $0xe0] sm:$0xff] %vm767_vm1, %v1798_v41  ;;  %1831 = vst.msk [vmem:[#allocation2 + $0xe8] sm:$0xff] %vm767_vm1, %v1799_v35 }
 0x17f   : > { %1832 = vst.msk [vmem:[#allocation2 + $0xf0] sm:$0xff] %vm767_vm1, %v1800_v56  ;;  %1833 = vst.msk [vmem:[#allocation2 + $0xf8] sm:$0xff] %vm767_vm1, %v1801_v55 }
 0x180 PF: > { %p2296_p9 = scmp.ne.s32.totalorder %s2607_s18, 2 }
 0x181   : > { %v3433_v10 = vld [vmem:[%s3617_s2] ss:$0 sm:$0xff] (!%p2296_p9)  ;;  %v1949_v7 = vld [vmem:[%s2696_s10 + $0x8] sm:$0xff] (!%p2296_p9)  ;;  %v1950_v61 = vld [vmem:[%s2696_s10 + $0x10] sm:$0xff] (!%p2296_p9) }
 0x182   : > { %1837 = sbr.rel (%p2296_p9) target bundleno = 425 (0x1a9), region = 52  ;;  %v1838_v32 = vld [vmem:[#allocation2] sm:$0xff] (!%p2296_p9)  ;;  %v1839_v19 = vld [vmem:[#allocation2 + $0x8] sm:$0xff] (!%p2296_p9)  ;;  %v1951_v57 = vld [vmem:[%s2696_s10 + $0x18] sm:$0xff] (!%p2296_p9) }
 0x183   : > { %v3438_v34 = vld [vmem:[%s3618_s3] ss:$0 sm:$0xff] (!%p2296_p9)  ;;  %v1877_v50 = vmul.f32 (!%p2296_p9), %v3433_v10, %v1838_v32  ;;  %v1878_v5 = vmul.f32 (!%p2296_p9), %v3433_v10, %v1839_v19  ;;  %v1840_v62 = vld [vmem:[#allocation2 + $0x10] sm:$0xff] (!%p2296_p9)  ;;  %v1841_v24 = vld [vmem:[#allocation2 + $0x18] sm:$0xff] (!%p2296_p9) }
 0x184   : > { %v1948_v37 = vld [vmem:[%s2696_s10] sm:$0xff] (!%p2296_p9)  ;;  %v1879_v13 = vmul.f32 (!%p2296_p9), %v3433_v10, %v1840_v62  ;;  %v1880_v23 = vmul.f32 (!%p2296_p9), %v3433_v10, %v1841_v24  ;;  %v1843_v60 = vld [vmem:[#allocation2 + $0x28] sm:$0xff] (!%p2296_p9)  ;;  %v1954_v15 = vld [vmem:[%s2696_s10 + $0x30] sm:$0xff] (!%p2296_p9) }
 0x185   : > { %v1916_v27 = vadd.f32 (!%p2296_p9), %v3438_v34, %v1877_v50  ;;  %v1842_v21 = vld [vmem:[#allocation2 + $0x20] sm:$0xff] (!%p2296_p9)  ;;  %v1917_v0 = vadd.f32 (!%p2296_p9), %v3438_v34, %v1878_v5  ;;  %v1844_v22 = vld [vmem:[#allocation2 + $0x30] sm:$0xff] (!%p2296_p9)  ;;  %v1882_v16 = vmul.f32 (!%p2296_p9), %v3433_v10, %v1843_v60  ;;  %v1845_v49 = vld [vmem:[#allocation2 + $0x38] sm:$0xff] (!%p2296_p9) }
 0x186   : > { %v1881_v1 = vmul.f32 (!%p2296_p9), %v3433_v10, %v1842_v21  ;;  %v1918_v31 = vadd.f32 (!%p2296_p9), %v3438_v34, %v1879_v13  ;;  %v1919_v38 = vadd.f32 (!%p2296_p9), %v3438_v34, %v1880_v23  ;;  %v1952_v11 = vld [vmem:[%s2696_s10 + $0x20] sm:$0xff] (!%p2296_p9)  ;;  %v1953_v43 = vld [vmem:[%s2696_s10 + $0x28] sm:$0xff] (!%p2296_p9)  ;;  %v1883_v12 = vmul.f32 (!%p2296_p9), %v3433_v10, %v1844_v22  ;;  %v1955_v51 = vld [vmem:[%s2696_s10 + $0x38] sm:$0xff] (!%p2296_p9) }
 0x187   : > { %v1980_v3 = vadd.f32 (!%p2296_p9), %v1948_v37, %v1916_v27  ;;  %v1981_v29 = vadd.f32 (!%p2296_p9), %v1949_v7, %v1917_v0  ;;  %v1884_v54 = vmul.f32 (!%p2296_p9), %v3433_v10, %v1845_v49  ;;  %v1846_v30 = vld [vmem:[#allocation2 + $0x40] sm:$0xff] (!%p2296_p9)  ;;  %v1921_v20 = vadd.f32 (!%p2296_p9), %v3438_v34, %v1882_v16  ;;  %v1847_v18 = vld [vmem:[#allocation2 + $0x48] sm:$0xff] (!%p2296_p9)  ;;  %v1848_v36 = vld [vmem:[#allocation2 + $0x50] sm:$0xff] (!%p2296_p9) }
 0x188   : > { %v1920_v63 = vadd.f32 (!%p2296_p9), %v3438_v34, %v1881_v1  ;;  %v1982_v47 = vadd.f32 (!%p2296_p9), %v1950_v61, %v1918_v31  ;;  %v1983_v53 = vadd.f32 (!%p2296_p9), %v1951_v57, %v1919_v38  ;;  %v1922_v17 = vadd.f32 (!%p2296_p9), %v3438_v34, %v1883_v12  ;;  %v1849_v40 = vld [vmem:[#allocation2 + $0x58] sm:$0xff] (!%p2296_p9)  ;;  %v1850_v6 = vld [vmem:[#allocation2 + $0x60] sm:$0xff] (!%p2296_p9)  ;;  %v1851_v46 = vld [vmem:[#allocation2 + $0x68] sm:$0xff] (!%p2296_p9) }
 0x189   : > { %v2012_v25 = vmax.f32 %v1980_v3, 0.0  ;;  %v2013_v45 = vmax.f32 %v1981_v29, 0.0  ;;  %v1923_v42 = vadd.f32 %v3438_v34, %v1884_v54  ;;  %v1985_v14 = vadd.f32 %v1953_v43, %v1921_v20  ;;  %v1956_v4 = vld [vmem:[%s2696_s10 + $0x40] sm:$0xff]  ;;  %v1957_v41 = vld [vmem:[%s2696_s10 + $0x48] sm:$0xff]  ;;  %v1852_v26 = vld [vmem:[#allocation2 + $0x70] sm:$0xff] }
 0x18a   : > { %v1984_v9 = vadd.f32 %v1952_v11, %v1920_v63  ;;  %v2014_v48 = vmax.f32 %v1982_v47, 0.0  ;;  %v2015_v52 = vmax.f32 %v1983_v53, 0.0  ;;  %v1885_v28 = vmul.f32 %v3433_v10, %v1846_v30  ;;  %v1853_v56 = vld [vmem:[#allocation2 + $0x78] sm:$0xff]  ;;  %v1958_v19 = vld [vmem:[%s2696_s10 + $0x50] sm:$0xff]  ;;  %v1960_v7 = vld [vmem:[%s2696_s10 + $0x60] sm:$0xff] }
 0x18b   : > { %2044 = vst.msk [vmem:[%s2704_s16] sm:$0xff] %vm767_vm1, %v2012_v25  ;;  %2045 = vst.msk [vmem:[%s2704_s16 + $0x8] sm:$0xff] %vm767_vm1, %v2013_v45  ;;  %v1986_v8 = vadd.f32 %v1954_v15, %v1922_v17  ;;  %v1987_v58 = vadd.f32 %v1955_v51, %v1923_v42  ;;  %v1886_v39 = vmul.f32 %v3433_v10, %v1847_v18  ;;  %v2017_v33 = vmax.f32 %v1985_v14, 0.0  ;;  %v1959_v37 = vld [vmem:[%s2696_s10 + $0x58] sm:$0xff]  ;;  %v1961_v21 = vld [vmem:[%s2696_s10 + $0x68] sm:$0xff] }
 0x18c   : > { %v2016_v2 = vmax.f32 %v1984_v9, 0.0  ;;  %2046 = vst.msk [vmem:[%s2704_s16 + $0x10] sm:$0xff] %vm767_vm1, %v2014_v48  ;;  %2047 = vst.msk [vmem:[%s2704_s16 + $0x18] sm:$0xff] %vm767_vm1, %v2015_v52  ;;  %v1924_v59 = vadd.f32 %v3438_v34, %v1885_v28  ;;  %v1887_v35 = vmul.f32 %v3433_v10, %v1848_v36  ;;  %v1888_v44 = vmul.f32 %v3433_v10, %v1849_v40  ;;  %v1854_v1 = vld [vmem:[#allocation2 + $0x80] sm:$0xff]  ;;  %v1962_v38 = vld [vmem:[%s2696_s10 + $0x70] sm:$0xff] }
 0x18d   : > { %v2018_v55 = vmax.f32 %v1986_v8, 0.0  ;;  %v2019_v32 = vmax.f32 %v1987_v58, 0.0  ;;  %v1925_v50 = vadd.f32 %v3438_v34, %v1886_v39  ;;  %v1889_v5 = vmul.f32 %v3433_v10, %v1850_v6  ;;  %2049 = vst.msk [vmem:[%s2704_s16 + $0x28] sm:$0xff] %vm767_vm1, %v2017_v33  ;;  %v1963_v11 = vld [vmem:[%s2696_s10 + $0x78] sm:$0xff]  ;;  %v1855_v16 = vld [vmem:[#allocation2 + $0x88] sm:$0xff]  ;;  %v1856_v12 = vld [vmem:[#allocation2 + $0x90] sm:$0xff] }
 0x18e   : > { %2048 = vst.msk [vmem:[%s2704_s16 + $0x20] sm:$0xff] %vm767_vm1, %v2016_v2  ;;  %v1988_v62 = vadd.f32 %v1956_v4, %v1924_v59  ;;  %v1926_v24 = vadd.f32 %v3438_v34, %v1887_v35  ;;  %v1927_v27 = vadd.f32 %v3438_v34, %v1888_v44  ;;  %v1890_v13 = vmul.f32 %v3433_v10, %v1851_v46  ;;  %v1857_v54 = vld [vmem:[#allocation2 + $0x98] sm:$0xff]  ;;  %v1858_v20 = vld [vmem:[#allocation2 + $0xa0] sm:$0xff]  ;;  %v1859_v17 = vld [vmem:[#allocation2 + $0xa8] sm:$0xff] }
 0x18f   : > { %2050 = vst.msk [vmem:[%s2704_s16 + $0x30] sm:$0xff] %vm767_vm1, %v2018_v55  ;;  %2051 = vst.msk [vmem:[%s2704_s16 + $0x38] sm:$0xff] %vm767_vm1, %v2019_v32  ;;  %v1989_v61 = vadd.f32 %v1957_v41, %v1925_v50  ;;  %v1928_v23 = vadd.f32 %v3438_v34, %v1889_v5  ;;  %v1891_v0 = vmul.f32 %v3433_v10, %v1852_v26  ;;  %v1964_v45 = vld [vmem:[%s2696_s10 + $0x80] sm:$0xff]  ;;  %v1965_v40 = vld [vmem:[%s2696_s10 + $0x88] sm:$0xff] }
 0x190   : > { %v1892_v57 = vmul.f32 %v3433_v10, %v1853_v56  ;;  %v2020_v60 = vmax.f32 %v1988_v62, 0.0  ;;  %v1990_v22 = vadd.f32 %v1958_v19, %v1926_v24  ;;  %v1991_v3 = vadd.f32 %v1959_v37, %v1927_v27  ;;  %v1860_v14 = vld [vmem:[#allocation2 + $0xb0] sm:$0xff]  ;;  %v1861_v28 = vld [vmem:[#allocation2 + $0xb8] sm:$0xff]  ;;  %v1968_v41 = vld [vmem:[%s2696_s10 + $0xa0] sm:$0xff] }
 0x191   : > { %v1929_v31 = vadd.f32 %v3438_v34, %v1890_v13  ;;  %v2021_v49 = vmax.f32 %v1989_v61, 0.0  ;;  %v1992_v29 = vadd.f32 %v1960_v7, %v1928_v23  ;;  %v1930_v63 = vadd.f32 %v3438_v34, %v1891_v0  ;;  %v1966_v58 = vld [vmem:[%s2696_s10 + $0x90] sm:$0xff]  ;;  %v1967_v4 = vld [vmem:[%s2696_s10 + $0x98] sm:$0xff]  ;;  %v1969_v56 = vld [vmem:[%s2696_s10 + $0xa8] sm:$0xff] }
 0x192   : > { %v1931_v43 = vadd.f32 %v3438_v34, %v1892_v57  ;;  %2052 = vst.msk [vmem:[%s2704_s16 + $0x40] sm:$0xff] %vm767_vm1, %v2020_v60  ;;  %v2022_v30 = vmax.f32 %v1990_v22, 0.0  ;;  %v2023_v25 = vmax.f32 %v1991_v3, 0.0  ;;  %v1893_v53 = vmul.f32 %v3433_v10, %v1854_v1  ;;  %v1862_v50 = vld [vmem:[#allocation2 + $0xc0] sm:$0xff]  ;;  %v1970_v24 = vld [vmem:[%s2696_s10 + $0xb0] sm:$0xff]  ;;  %v1971_v27 = vld [vmem:[%s2696_s10 + $0xb8] sm:$0xff] }
 0x193   : > { %v1993_v47 = vadd.f32 %v1961_v21, %v1929_v31  ;;  %2053 = vst.msk [vmem:[%s2704_s16 + $0x48] sm:$0xff] %vm767_vm1, %v2021_v49  ;;  %v2024_v15 = vmax.f32 %v1992_v29, 0.0  ;;  %v1994_v51 = vadd.f32 %v1962_v38, %v1930_v63  ;;  %v1894_v9 = vmul.f32 %v3433_v10, %v1855_v16  ;;  %v1863_v7 = vld [vmem:[#allocation2 + $0xc8] sm:$0xff]  ;;  %v1864_v0 = vld [vmem:[#allocation2 + $0xd0] sm:$0xff]  ;;  %v1865_v57 = vld [vmem:[#allocation2 + $0xd8] sm:$0xff] }
 0x194   : > { %v1995_v18 = vadd.f32 %v1963_v11, %v1931_v43  ;;  %2054 = vst.msk [vmem:[%s2704_s16 + $0x50] sm:$0xff] %vm767_vm1, %v2022_v30  ;;  %2055 = vst.msk [vmem:[%s2704_s16 + $0x58] sm:$0xff] %vm767_vm1, %v2023_v25  ;;  %v1932_v36 = vadd.f32 %v3438_v34, %v1893_v53  ;;  %v1895_v48 = vmul.f32 %v3433_v10, %v1856_v12  ;;  %v1866_v31 = vld [vmem:[#allocation2 + $0xe0] sm:$0xff]  ;;  %v1867_v63 = vld [vmem:[#allocation2 + $0xe8] sm:$0xff] }
 0x195   : > { %v2025_v42 = vmax.f32 %v1993_v47, 0.0  ;;  %v1896_v52 = vmul.f32 %v3433_v10, %v1857_v54  ;;  %2056 = vst.msk [vmem:[%s2704_s16 + $0x60] sm:$0xff] %vm767_vm1, %v2024_v15  ;;  %v2026_v6 = vmax.f32 %v1994_v51, 0.0  ;;  %v1933_v8 = vadd.f32 %v3438_v34, %v1894_v9  ;;  %v1972_v49 = vld [vmem:[%s2696_s10 + $0xc0] sm:$0xff]  ;;  %v1973_v54 = vld [vmem:[%s2696_s10 + $0xc8] sm:$0xff]  ;;  %v1868_v47 = vld [vmem:[#allocation2 + $0xf0] sm:$0xff] }
 0x196   : > { %v2027_v2 = vmax.f32 %v1995_v18, 0.0  ;;  %v1897_v39 = vmul.f32 %v3433_v10, %v1858_v20  ;;  %v1996_v46 = vadd.f32 %v1964_v45, %v1932_v36  ;;  %v1934_v33 = vadd.f32 %v3438_v34, %v1895_v48  ;;  %v1869_v53 = vld [vmem:[#allocation2 + $0xf8] sm:$0xff]  ;;  %v1974_v18 = vld [vmem:[%s2696_s10 + $0xd0] sm:$0xff] }
 0x197   : > { %2057 = vst.msk [vmem:[%s2704_s16 + $0x68] sm:$0xff] %vm767_vm1, %v2025_v42  ;;  %v1935_v59 = vadd.f32 %v3438_v34, %v1896_v52  ;;  %v1898_v35 = vmul.f32 %v3433_v10, %v1859_v17  ;;  %2058 = vst.msk [vmem:[%s2704_s16 + $0x70] sm:$0xff] %vm767_vm1, %v2026_v6  ;;  %v1997_v44 = vadd.f32 %v1965_v40, %v1933_v8  ;;  %v1975_v45 = vld [vmem:[%s2696_s10 + $0xd8] sm:$0xff]  ;;  %v1976_v40 = vld [vmem:[%s2696_s10 + $0xe0] sm:$0xff] }
 0x198   : > { %2059 = vst.msk [vmem:[%s2704_s16 + $0x78] sm:$0xff] %vm767_vm1, %v2027_v2  ;;  %v1936_v26 = vadd.f32 %v3438_v34, %v1897_v39  ;;  %v1899_v55 = vmul.f32 %v3433_v10, %v1860_v14  ;;  %v1900_v32 = vmul.f32 %v3433_v10, %v1861_v28  ;;  %v2028_v19 = vmax.f32 %v1996_v46, 0.0  ;;  %v1977_v28 = vld [vmem:[%s2696_s10 + $0xe8] sm:$0xff]  ;;  %v1978_v46 = vld [vmem:[%s2696_s10 + $0xf0] sm:$0xff] }
 0x199   : > { %v1998_v37 = vadd.f32 %v1966_v58, %v1934_v33  ;;  %v1999_v5 = vadd.f32 %v1967_v4, %v1935_v59  ;;  %v1937_v62 = vadd.f32 %v3438_v34, %v1898_v35  ;;  %v2029_v13 = vmax.f32 %v1997_v44, 0.0  ;;  %v1979_v33 = vld [vmem:[%s2696_s10 + $0xf8] sm:$0xff] }
 0x19a   : > { %v2000_v61 = vadd.f32 %v1968_v41, %v1936_v26  ;;  %v1938_v23 = vadd.f32 %v3438_v34, %v1899_v55  ;;  %v1939_v21 = vadd.f32 %v3438_v34, %v1900_v32  ;;  %2060 = vst.msk [vmem:[%s2704_s16 + $0x80] sm:$0xff] %vm767_vm1, %v2028_v19  ;;  %v1901_v3 = vmul.f32 %v3433_v10, %v1862_v50 }
 0x19b   : > { %v2030_v1 = vmax.f32 %v1998_v37, 0.0  ;;  %v2031_v60 = vmax.f32 %v1999_v5, 0.0  ;;  %v2001_v22 = vadd.f32 %v1969_v56, %v1937_v62  ;;  %2061 = vst.msk [vmem:[%s2704_s16 + $0x88] sm:$0xff] %vm767_vm1, %v2029_v13  ;;  %v1902_v29 = vmul.f32 %v3433_v10, %v1863_v7 }
 0x19c   : > { %v2032_v38 = vmax.f32 %v2000_v61, 0.0  ;;  %v2002_v11 = vadd.f32 %v1970_v24, %v1938_v23  ;;  %v2003_v16 = vadd.f32 %v1971_v27, %v1939_v21  ;;  %v1940_v12 = vadd.f32 %v3438_v34, %v1901_v3 }
 0x19d   : > { %2062 = vst.msk [vmem:[%s2704_s16 + $0x90] sm:$0xff] %vm767_vm1, %v2030_v1  ;;  %2063 = vst.msk [vmem:[%s2704_s16 + $0x98] sm:$0xff] %vm767_vm1, %v2031_v60  ;;  %v2033_v43 = vmax.f32 %v2001_v22, 0.0  ;;  %v1903_v30 = vmul.f32 %v3433_v10, %v1864_v0  ;;  %v1904_v25 = vmul.f32 %v3433_v10, %v1865_v57  ;;  %v1941_v51 = vadd.f32 %v3438_v34, %v1902_v29 }
 0x19e   : > { %2064 = vst.msk [vmem:[%s2704_s16 + $0xa0] sm:$0xff] %vm767_vm1, %v2032_v38  ;;  %v2034_v20 = vmax.f32 %v2002_v11, 0.0  ;;  %v2035_v15 = vmax.f32 %v2003_v16, 0.0  ;;  %v1905_v9 = vmul.f32 %v3433_v10, %v1866_v31  ;;  %v2004_v17 = vadd.f32 %v1972_v49, %v1940_v12 }
 0x19f   : > { %2065 = vst.msk [vmem:[%s2704_s16 + $0xa8] sm:$0xff] %vm767_vm1, %v2033_v43  ;;  %v1942_v42 = vadd.f32 %v3438_v34, %v1903_v30  ;;  %v1943_v36 = vadd.f32 %v3438_v34, %v1904_v25  ;;  %v1906_v48 = vmul.f32 %v3433_v10, %v1867_v63  ;;  %v2005_v52 = vadd.f32 %v1973_v54, %v1941_v51 }
 0x1a0   : > { %2066 = vst.msk [vmem:[%s2704_s16 + $0xb0] sm:$0xff] %vm767_vm1, %v2034_v20  ;;  %2067 = vst.msk [vmem:[%s2704_s16 + $0xb8] sm:$0xff] %vm767_vm1, %v2035_v15  ;;  %v1944_v14 = vadd.f32 %v3438_v34, %v1905_v9  ;;  %v1907_v6 = vmul.f32 %v3433_v10, %v1868_v47  ;;  %v1908_v2 = vmul.f32 %v3433_v10, %v1869_v53  ;;  %v2036_v8 = vmax.f32 %v2004_v17, 0.0 }
 0x1a1   : > { %v2006_v58 = vadd.f32 %v1974_v18, %v1942_v42  ;;  %v2007_v4 = vadd.f32 %v1975_v45, %v1943_v36  ;;  %v1945_v39 = vadd.f32 %v3438_v34, %v1906_v48  ;;  %v2037_v59 = vmax.f32 %v2005_v52, 0.0 }
 0x1a2   : > { %v2008_v41 = vadd.f32 %v1976_v40, %v1944_v14  ;;  %v1946_v35 = vadd.f32 %v3438_v34, %v1907_v6  ;;  %v1947_v44 = vadd.f32 %v3438_v34, %v1908_v2  ;;  %2068 = vst.msk [vmem:[%s2704_s16 + $0xc0] sm:$0xff] %vm767_vm1, %v2036_v8 }
 0x1a3   : > { %v2038_v10 = vmax.f32 %v2006_v58, 0.0  ;;  %v2039_v26 = vmax.f32 %v2007_v4, 0.0  ;;  %v2009_v56 = vadd.f32 %v1977_v28, %v1945_v39  ;;  %2069 = vst.msk [vmem:[%s2704_s16 + $0xc8] sm:$0xff] %vm767_vm1, %v2037_v59 }
 0x1a4   : > { %v2040_v55 = vmax.f32 %v2008_v41, 0.0  ;;  %v2010_v32 = vadd.f32 %v1978_v46, %v1946_v35  ;;  %v2011_v50 = vadd.f32 %v1979_v33, %v1947_v44 }
 0x1a5   : > { %2070 = vst.msk [vmem:[%s2704_s16 + $0xd0] sm:$0xff] %vm767_vm1, %v2038_v10  ;;  %2071 = vst.msk [vmem:[%s2704_s16 + $0xd8] sm:$0xff] %vm767_vm1, %v2039_v26  ;;  %v2041_v19 = vmax.f32 %v2009_v56, 0.0 }
 0x1a6   : > { %2072 = vst.msk [vmem:[%s2704_s16 + $0xe0] sm:$0xff] %vm767_vm1, %v2040_v55  ;;  %v2042_v34 = vmax.f32 %v2010_v32, 0.0  ;;  %v2043_v37 = vmax.f32 %v2011_v50, 0.0 }
 0x1a7   : > { %2073 = vst.msk [vmem:[%s2704_s16 + $0xe8] sm:$0xff] %vm767_vm1, %v2041_v19 }
 0x1a8   : > { %2074 = vst.msk [vmem:[%s2704_s16 + $0xf0] sm:$0xff] %vm767_vm1, %v2042_v34  ;;  %2075 = vst.msk [vmem:[%s2704_s16 + $0xf8] sm:$0xff] %vm767_vm1, %v2043_v37 }
 0x1a9 PF: > { %s15_s22 = sadd.s32 1, %s2623_s22   ;;  %s3625_s18 = smov %s2615_s20 }
 0x1aa   : > { %p12_p10 = scmp.ge.s32.totalorder %s15_s22, 8   ;;  %s3626_s19 = smov %s2619_s21 }
 0x1ab   : > { %s3627_s20 = smov %s3630_s23  ;;  %s3628_s21 = smov %s3634_s24 }
 0x1ac   :  { %14 = sbr.rel (!%p12_p10) target bundleno = 3 (0x3), region = 91 }

</bundles_post_ra>
